<compile_context>
chip_gen: v7x
topology: tpu7x:2x2x1
jax: 0.10.0
libtpu: 0.0.40
codegen_flags: <defaults>
</compile_context>

<pallas_src>
import functools
import math

import jax
import jax.numpy as jnp
from jax.experimental import pallas as pl
from jax.experimental.pallas import tpu as pltpu


# ----------------------------------------------------------------------------
# Cout-tile width: 256 matches the 256-wide MXU on v6e / v7x; 128 elsewhere.
# (The workload is weight-DMA-bound either way; wider tiles mainly cut the
#  per-grid-step overhead on the tiny deep layers.)
# ----------------------------------------------------------------------------
def _mxu_tile_n():
    try:
        kind = jax.devices()[0].device_kind.lower()
    except Exception:
        kind = ""
    return 256 if ("v6" in kind or "v7" in kind) else 128


# ----------------------------------------------------------------------------
# Pallas kernel: one Cout tile of a 3x3 conv (as im2col matmul) + fused loss
# ----------------------------------------------------------------------------
def _conv_loss_kernel(x_ref, w_ref, b_ref, o_ref, ls_ref, *, half_rows):
    """x_ref : (M, K)   bf16  im2col activations (resident across the grid)
       w_ref : (K, TN)  bf16  contiguous weight slab for this grid step
       b_ref : (1, TN)  f32   bias tile
       o_ref : (M, TN)  bf16  relu(conv + bias) tile  (next layer's input)
       ls_ref: (1, TN)  f32   per-lane partial of sum((y_tgt - y_src)^2)."""
    acc = jnp.dot(x_ref[...], w_ref[...],
                  preferred_element_type=jnp.float32)          # MXU, f32 acc
    # ReLU fused into the epilogue (every conv output is ReLU'd exactly once
    # before its next consumer in the reference forward).
    o_ref[...] = jnp.maximum(acc + b_ref[...], 0.0).astype(o_ref.dtype)
    # Feature loss is on the raw (pre-ReLU) conv output; the bias cancels in
    # the target/source difference, so reduce the pre-bias accumulator.
    # NOTE: assumes the target batch occupies the first half of the im2col
    # rows (true for the N-leading reshape with N=2).
    d = acc[:half_rows, :] - acc[half_rows:, :]
    ls_ref[...] = jnp.sum(d * d, axis=0, keepdims=True)


def conv3x3_relu_with_loss(x, w_blocks, b):
    """x: (N, H, W, Cin); w_blocks: (Cout//TN, 9*Cin, TN) bf16; b: (1, Cout) f32.
    Returns (relu(conv3x3(x, w) + b),  mean((conv[:N/2] - conv[N/2:])**2)),
    mirroring Conv2d(k=3, s=1, p=1) -> feature_loss -> ReLU in the reference."""
    N, H, W, Cin = x.shape
    n_tiles, K, TN = w_blocks.shape
    Cout = n_tiles * TN

    # im2col: tap order (dh, dw, cin) matches the (3,3,Cin,Cout)->(9*Cin,Cout)
    # weight flattening done in init_params.
    xp = jnp.pad(x.astype(jnp.bfloat16), ((0, 0), (1, 1), (1, 1), (0, 0)))
    patches = [xp[:, dh:dh + H, dw:dw + W, :]
               for dh in range(3) for dw in range(3)]
    col = jnp.concatenate(patches, axis=-1).reshape(N * H * W, 9 * Cin)

    M = N * H * W
    half_rows = M // 2

    kernel = functools.partial(_conv_loss_kernel, half_rows=half_rows)
    y, loss_vec = pl.pallas_call(
        kernel,
        out_shape=(
            jax.ShapeDtypeStruct((M, Cout), jnp.bfloat16),
            jax.ShapeDtypeStruct((1, Cout), jnp.float32),
        ),
        grid=(n_tiles,),
        in_specs=[
            pl.BlockSpec((M, K), lambda j: (0, 0)),           # activations: resident
            pl.BlockSpec((None, K, TN), lambda j: (j, 0, 0)),  # contiguous weight slab
            pl.BlockSpec((1, TN), lambda j: (0, j)),           # bias tile
        ],
        out_specs=(
            pl.BlockSpec((M, TN), lambda j: (0, j)),           # relu(conv) tile
            pl.BlockSpec((1, TN), lambda j: (0, j)),           # partial loss lanes
        ),
        compiler_params=pltpu.CompilerParams(
            dimension_semantics=("parallel",),                 # disjoint writes per tile
            vmem_limit_bytes=32 * 1024 * 1024,
        ),
    )(col, w_blocks, b)

    y = y.reshape(N, H, W, Cout)
    layer_loss = jnp.sum(loss_vec) * (1.0 / float(half_rows * Cout))
    return y, layer_loss


# ----------------------------------------------------------------------------
# Plain-JAX glue
# ----------------------------------------------------------------------------
def maxpool2x2(x):
    # MaxPool2d(kernel=2, stride=2). The preceding ReLU is already fused into
    # the conv epilogue.
    N, H, W, C = x.shape
    return jnp.max(x.reshape(N, H // 2, 2, W // 2, 2, C), axis=(2, 4))


def init_params(key, channel_in=3, width=64, tile_n=128):
    """Deterministic synthetic weights (the original loads a .pt checkpoint).
    Weights are flattened to (9*Cin, Cout) with (dh, dw, cin) K-order, then
    pre-blocked to (Cout//TN, 9*Cin, TN) bf16 so every weight tile is one
    contiguous HBM slab. Biases stay f32."""
    chans = [
        (channel_in, width), (width, width),
        (width, 2 * width), (2 * width, 2 * width),
        (2 * width, 4 * width), (4 * width, 4 * width),
        (4 * width, 4 * width), (4 * width, 4 * width),
        (4 * width, 8 * width), (8 * width, 8 * width),
        (8 * width, 8 * width), (8 * width, 8 * width),
        (8 * width, 8 * width), (8 * width, 8 * width),
        (8 * width, 8 * width), (8 * width, 8 * width),
    ]
    params = []
    for i, (cin, cout) in enumerate(chans):
        kw, kb = jax.random.split(jax.random.fold_in(key, i))
        scale = 1.0 / math.sqrt(9.0 * cin)
        w = jax.random.uniform(kw, (3, 3, cin, cout), jnp.float32, -scale, scale)
        b = jax.random.uniform(kb, (1, cout), jnp.float32, -scale, scale)
        k = 9 * cin
        tn = min(cout, tile_n)
        w2 = w.reshape(k, cout)                                # (K, Cout)
        wb = (w2.reshape(k, cout // tn, tn)                    # (K, nt, TN)
                .transpose(1, 0, 2)                            # (nt, K, TN) contiguous tiles
                .astype(jnp.bfloat16))
        params.append((wb, b))
    return params
    # TODO(synk): checkpoint loading and the unused classifier head
    # (Flatten + Linear(8192, 10)) are not part of forward(); omitted.


def vgg19_feature_loss(x_nchw, params):
    """Mirror of VGG19.forward: x is target/source concatenated on dim 0 (NCHW)."""
    x = jnp.transpose(x_nchw, (0, 2, 3, 1)).astype(jnp.float32)  # -> NHWC

    loss = jnp.float32(0.0)
    layer = 0
    # VGG19 feature block structure: [conv x2, mp] x2, [conv x4, mp] x2, conv x4.
    for n_convs in (2, 2, 4, 4, 4):
        for _ in range(n_convs):
            wb, b = params[layer]
            layer += 1
            x, l = conv3x3_relu_with_loss(x, wb, b)
            loss = loss + l
        if layer < len(params):            # maxpool after the first four blocks
            x = maxpool2x2(x)

    return loss / 16.0


# ----------------------------------------------------------------------------
# Main
# ----------------------------------------------------------------------------
if __name__ == "__main__":
    key = jax.random.PRNGKey(0)
    k_params, k_x = jax.random.split(key)

    channel_in, width = 3, 64
    tile_n = _mxu_tile_n()
    params = init_params(k_params, channel_in=channel_in, width=width,
                         tile_n=tile_n)

    # batch=2 (first half = target, second half = source), 3 channels, 16x16.
    x = jax.random.normal(k_x, (2, channel_in, 16, 16), jnp.float32)

    loss_fn = jax.jit(vgg19_feature_loss)
    loss = loss_fn(x, params)
    jax.block_until_ready(loss)

    assert loss.shape == () and bool(jnp.isfinite(loss))
    print("KERNEL_OK")
</pallas_src>

<mosaic_0001>
module attributes {stable_mosaic.version = 11 : i64} {
  func.func @_conv_loss_kernel(%arg0: i32, %arg1: memref<512x27xbf16, #tpu.memory_space<vmem>>, %arg2: memref<1x27x64xbf16, #tpu.memory_space<vmem>>, %arg3: memref<1x64xf32, #tpu.memory_space<vmem>>, %arg4: memref<512x64xbf16, #tpu.memory_space<vmem>>, %arg5: memref<1x64xf32, #tpu.memory_space<vmem>>) attributes {dimension_semantics = [#tpu.dimension_semantics<parallel>], iteration_bounds = array<i64: 1>, scalar_prefetch = 0 : i64, scratch_operands = 0 : i64, tpu.core_type = #tpu.core_type<tc>, window_params = [{pipeline_mode = #tpu.pipeline_mode<synchronous>, transform_indices = @transform_0, window_bounds = array<i64: 512, 27>}, {transform_indices = @transform_1, window_bounds = array<i64: 1, 27, 64>}, {transform_indices = @transform_2, window_bounds = array<i64: 1, 64>}, {transform_indices = @transform_3, window_bounds = array<i64: 512, 64>}, {transform_indices = @transform_4, window_bounds = array<i64: 1, 64>}]} {
    %c0 = arith.constant 0 : index
    %c0_0 = arith.constant 0 : index
    %0 = vector.load %arg1[%c0, %c0_0] : memref<512x27xbf16, #tpu.memory_space<vmem>>, vector<512x27xbf16>
    %c0_1 = arith.constant 0 : index
    %c0_2 = arith.constant 0 : index
    %c0_3 = arith.constant 0 : index
    %1 = vector.load %arg2[%c0_1, %c0_2, %c0_3] : memref<1x27x64xbf16, #tpu.memory_space<vmem>>, vector<1x27x64xbf16>
    %2 = vector.shape_cast %1 : vector<1x27x64xbf16> to vector<27x64xbf16>
    %cst = arith.constant dense<0.000000e+00> : vector<512x64xf32>
    %3 = tpu.matmul %0, %2, %cst {dimension_numbers = #tpu.dot_dimension_numbers<[1], [0], [0], [1], [0, 0, 1, 1], [], []>} : vector<512x27xbf16>, vector<27x64xbf16>, vector<512x64xf32> -> vector<512x64xf32>
    %c0_4 = arith.constant 0 : index
    %c0_5 = arith.constant 0 : index
    %4 = vector.load %arg3[%c0_4, %c0_5] : memref<1x64xf32, #tpu.memory_space<vmem>>, vector<1x64xf32>
    %5 = vector.broadcast %4 : vector<1x64xf32> to vector<512x64xf32>
    %6 = arith.addf %3, %5 : vector<512x64xf32>
    %cst_6 = arith.constant 0.000000e+00 : f32
    %7 = vector.broadcast %cst_6 : f32 to vector<512x64xf32>
    %8 = arith.maximumf %6, %7 : vector<512x64xf32>
    %9 = arith.truncf %8 : vector<512x64xf32> to vector<512x64xbf16>
    %c0_7 = arith.constant 0 : index
    %c0_8 = arith.constant 0 : index
    %10 = vector.load %arg4[%c0_7, %c0_8] : memref<512x64xbf16, #tpu.memory_space<vmem>>, vector<512x64xbf16>
    tpu.vector_store %arg4[%c0_7, %c0_8], %9 {strides = array<i32>} : memref<512x64xbf16, #tpu.memory_space<vmem>>, vector<512x64xbf16>,
    %11 = vector.extract_strided_slice %3 {offsets = [0, 0], sizes = [256, 64], strides = [1, 1]} : vector<512x64xf32> to vector<256x64xf32>
    %12 = vector.extract_strided_slice %3 {offsets = [256, 0], sizes = [256, 64], strides = [1, 1]} : vector<512x64xf32> to vector<256x64xf32>
    %13 = arith.subf %11, %12 : vector<256x64xf32>
    %14 = arith.mulf %13, %13 : vector<256x64xf32>
    %cst_9 = arith.constant dense<0.000000e+00> : vector<64xf32>
    %15 = vector.multi_reduction <add>, %14, %cst_9 [0] : vector<256x64xf32> to vector<64xf32>
    %16 = vector.shape_cast %15 : vector<64xf32> to vector<1x64xf32>
    %c0_10 = arith.constant 0 : index
    %c0_11 = arith.constant 0 : index
    %17 = vector.load %arg5[%c0_10, %c0_11] : memref<1x64xf32, #tpu.memory_space<vmem>>, vector<1x64xf32>
    tpu.vector_store %arg5[%c0_10, %c0_11], %16 {strides = array<i32>} : memref<1x64xf32, #tpu.memory_space<vmem>>, vector<1x64xf32>,
    return
  }
  func.func @transform_0(%arg0: i32) -> (i32, i32) {
    %c0_i32 = arith.constant 0 : i32
    %c0_i32_0 = arith.constant 0 : i32
    %c0_i32_1 = arith.constant 0 : i32
    return %c0_i32, %c0_i32_0 : i32, i32
  }
  func.func @transform_1(%arg0: i32) -> (i32, i32, i32) {
    %c0_i32 = arith.constant 0 : i32
    %c0_i32_0 = arith.constant 0 : i32
    %c0_i32_1 = arith.constant 0 : i32
    return %arg0, %c0_i32, %c0_i32_0 : i32, i32, i32
  }
  func.func @transform_2(%arg0: i32) -> (i32, i32) {
    %c0_i32 = arith.constant 0 : i32
    %c0_i32_0 = arith.constant 0 : i32
    return %c0_i32, %arg0 : i32, i32
  }
  func.func @transform_3(%arg0: i32) -> (i32, i32) {
    %c0_i32 = arith.constant 0 : i32
    %c0_i32_0 = arith.constant 0 : i32
    return %c0_i32, %arg0 : i32, i32
  }
  func.func @transform_4(%arg0: i32) -> (i32, i32) {
    %c0_i32 = arith.constant 0 : i32
    %c0_i32_0 = arith.constant 0 : i32
    return %c0_i32, %arg0 : i32, i32
  }
}

module attributes {stable_mosaic.version = 11 : i64} {
  func.func @_conv_loss_kernel(%arg0: i32, %arg1: memref<512x576xbf16, #tpu.memory_space<vmem>>, %arg2: memref<1x576x64xbf16, #tpu.memory_space<vmem>>, %arg3: memref<1x64xf32, #tpu.memory_space<vmem>>, %arg4: memref<512x64xbf16, #tpu.memory_space<vmem>>, %arg5: memref<1x64xf32, #tpu.memory_space<vmem>>) attributes {dimension_semantics = [#tpu.dimension_semantics<parallel>], iteration_bounds = array<i64: 1>, scalar_prefetch = 0 : i64, scratch_operands = 0 : i64, tpu.core_type = #tpu.core_type<tc>, window_params = [{pipeline_mode = #tpu.pipeline_mode<synchronous>, transform_indices = @transform_0, window_bounds = array<i64: 512, 576>}, {transform_indices = @transform_1, window_bounds = array<i64: 1, 576, 64>}, {transform_indices = @transform_2, window_bounds = array<i64: 1, 64>}, {transform_indices = @transform_3, window_bounds = array<i64: 512, 64>}, {transform_indices = @transform_4, window_bounds = array<i64: 1, 64>}]} {
    %c0 = arith.constant 0 : index
    %c0_0 = arith.constant 0 : index
    %0 = vector.load %arg1[%c0, %c0_0] : memref<512x576xbf16, #tpu.memory_space<vmem>>, vector<512x576xbf16>
    %c0_1 = arith.constant 0 : index
    %c0_2 = arith.constant 0 : index
    %c0_3 = arith.constant 0 : index
    %1 = vector.load %arg2[%c0_1, %c0_2, %c0_3] : memref<1x576x64xbf16, #tpu.memory_space<vmem>>, vector<1x576x64xbf16>
    %2 = vector.shape_cast %1 : vector<1x576x64xbf16> to vector<576x64xbf16>
    %cst = arith.constant dense<0.000000e+00> : vector<512x64xf32>
    %3 = tpu.matmul %0, %2, %cst {dimension_numbers = #tpu.dot_dimension_numbers<[1], [0], [0], [1], [0, 0, 1, 1], [], []>} : vector<512x576xbf16>, vector<576x64xbf16>, vector<512x64xf32> -> vector<512x64xf32>
    %c0_4 = arith.constant 0 : index
    %c0_5 = arith.constant 0 : index
    %4 = vector.load %arg3[%c0_4, %c0_5] : memref<1x64xf32, #tpu.memory_space<vmem>>, vector<1x64xf32>
    %5 = vector.broadcast %4 : vector<1x64xf32> to vector<512x64xf32>
    %6 = arith.addf %3, %5 : vector<512x64xf32>
    %cst_6 = arith.constant 0.000000e+00 : f32
    %7 = vector.broadcast %cst_6 : f32 to vector<512x64xf32>
    %8 = arith.maximumf %6, %7 : vector<512x64xf32>
    %9 = arith.truncf %8 : vector<512x64xf32> to vector<512x64xbf16>
    %c0_7 = arith.constant 0 : index
    %c0_8 = arith.constant 0 : index
    %10 = vector.load %arg4[%c0_7, %c0_8] : memref<512x64xbf16, #tpu.memory_space<vmem>>, vector<512x64xbf16>
    tpu.vector_store %arg4[%c0_7, %c0_8], %9 {strides = array<i32>} : memref<512x64xbf16, #tpu.memory_space<vmem>>, vector<512x64xbf16>,
    %11 = vector.extract_strided_slice %3 {offsets = [0, 0], sizes = [256, 64], strides = [1, 1]} : vector<512x64xf32> to vector<256x64xf32>
    %12 = vector.extract_strided_slice %3 {offsets = [256, 0], sizes = [256, 64], strides = [1, 1]} : vector<512x64xf32> to vector<256x64xf32>
    %13 = arith.subf %11, %12 : vector<256x64xf32>
    %14 = arith.mulf %13, %13 : vector<256x64xf32>
    %cst_9 = arith.constant dense<0.000000e+00> : vector<64xf32>
    %15 = vector.multi_reduction <add>, %14, %cst_9 [0] : vector<256x64xf32> to vector<64xf32>
    %16 = vector.shape_cast %15 : vector<64xf32> to vector<1x64xf32>
    %c0_10 = arith.constant 0 : index
    %c0_11 = arith.constant 0 : index
    %17 = vector.load %arg5[%c0_10, %c0_11] : memref<1x64xf32, #tpu.memory_space<vmem>>, vector<1x64xf32>
    tpu.vector_store %arg5[%c0_10, %c0_11], %16 {strides = array<i32>} : memref<1x64xf32, #tpu.memory_space<vmem>>, vector<1x64xf32>,
    return
  }
  func.func @transform_0(%arg0: i32) -> (i32, i32) {
    %c0_i32 = arith.constant 0 : i32
    %c0_i32_0 = arith.constant 0 : i32
    %c0_i32_1 = arith.constant 0 : i32
    return %c0_i32, %c0_i32_0 : i32, i32
  }
  func.func @transform_1(%arg0: i32) -> (i32, i32, i32) {
    %c0_i32 = arith.constant 0 : i32
    %c0_i32_0 = arith.constant 0 : i32
    %c0_i32_1 = arith.constant 0 : i32
    return %arg0, %c0_i32, %c0_i32_0 : i32, i32, i32
  }
  func.func @transform_2(%arg0: i32) -> (i32, i32) {
    %c0_i32 = arith.constant 0 : i32
    %c0_i32_0 = arith.constant 0 : i32
    return %c0_i32, %arg0 : i32, i32
  }
  func.func @transform_3(%arg0: i32) -> (i32, i32) {
    %c0_i32 = arith.constant 0 : i32
    %c0_i32_0 = arith.constant 0 : i32
    return %c0_i32, %arg0 : i32, i32
  }
  func.func @transform_4(%arg0: i32) -> (i32, i32) {
    %c0_i32 = arith.constant 0 : i32
    %c0_i32_0 = arith.constant 0 : i32
    return %c0_i32, %arg0 : i32, i32
  }
}

module attributes {stable_mosaic.version = 11 : i64} {
  func.func @_conv_loss_kernel(%arg0: i32, %arg1: memref<128x576xbf16, #tpu.memory_space<vmem>>, %arg2: memref<1x576x128xbf16, #tpu.memory_space<vmem>>, %arg3: memref<1x128xf32, #tpu.memory_space<vmem>>, %arg4: memref<128x128xbf16, #tpu.memory_space<vmem>>, %arg5: memref<1x128xf32, #tpu.memory_space<vmem>>) attributes {dimension_semantics = [#tpu.dimension_semantics<parallel>], iteration_bounds = array<i64: 1>, scalar_prefetch = 0 : i64, scratch_operands = 0 : i64, tpu.core_type = #tpu.core_type<tc>, window_params = [{pipeline_mode = #tpu.pipeline_mode<synchronous>, transform_indices = @transform_0, window_bounds = array<i64: 128, 576>}, {transform_indices = @transform_1, window_bounds = array<i64: 1, 576, 128>}, {transform_indices = @transform_2, window_bounds = array<i64: 1, 128>}, {transform_indices = @transform_3, window_bounds = array<i64: 128, 128>}, {transform_indices = @transform_4, window_bounds = array<i64: 1, 128>}]} {
    %c0 = arith.constant 0 : index
    %c0_0 = arith.constant 0 : index
    %0 = vector.load %arg1[%c0, %c0_0] : memref<128x576xbf16, #tpu.memory_space<vmem>>, vector<128x576xbf16>
    %c0_1 = arith.constant 0 : index
    %c0_2 = arith.constant 0 : index
    %c0_3 = arith.constant 0 : index
    %1 = vector.load %arg2[%c0_1, %c0_2, %c0_3] : memref<1x576x128xbf16, #tpu.memory_space<vmem>>, vector<1x576x128xbf16>
    %2 = vector.shape_cast %1 : vector<1x576x128xbf16> to vector<576x128xbf16>
    %cst = arith.constant dense<0.000000e+00> : vector<128x128xf32>
    %3 = tpu.matmul %0, %2, %cst {dimension_numbers = #tpu.dot_dimension_numbers<[1], [0], [0], [1], [0, 0, 1, 1], [], []>} : vector<128x576xbf16>, vector<576x128xbf16>, vector<128x128xf32> -> vector<128x128xf32>
    %c0_4 = arith.constant 0 : index
    %c0_5 = arith.constant 0 : index
    %4 = vector.load %arg3[%c0_4, %c0_5] : memref<1x128xf32, #tpu.memory_space<vmem>>, vector<1x128xf32>
    %5 = vector.broadcast %4 : vector<1x128xf32> to vector<128x128xf32>
    %6 = arith.addf %3, %5 : vector<128x128xf32>
    %cst_6 = arith.constant 0.000000e+00 : f32
    %7 = vector.broadcast %cst_6 : f32 to vector<128x128xf32>
    %8 = arith.maximumf %6, %7 : vector<128x128xf32>
    %9 = arith.truncf %8 : vector<128x128xf32> to vector<128x128xbf16>
    %c0_7 = arith.constant 0 : index
    %c0_8 = arith.constant 0 : index
    %10 = vector.load %arg4[%c0_7, %c0_8] : memref<128x128xbf16, #tpu.memory_space<vmem>>, vector<128x128xbf16>
    tpu.vector_store %arg4[%c0_7, %c0_8], %9 {strides = array<i32>} : memref<128x128xbf16, #tpu.memory_space<vmem>>, vector<128x128xbf16>,
    %11 = vector.extract_strided_slice %3 {offsets = [0, 0], sizes = [64, 128], strides = [1, 1]} : vector<128x128xf32> to vector<64x128xf32>
    %12 = vector.extract_strided_slice %3 {offsets = [64, 0], sizes = [64, 128], strides = [1, 1]} : vector<128x128xf32> to vector<64x128xf32>
    %13 = arith.subf %11, %12 : vector<64x128xf32>
    %14 = arith.mulf %13, %13 : vector<64x128xf32>
    %cst_9 = arith.constant dense<0.000000e+00> : vector<128xf32>
    %15 = vector.multi_reduction <add>, %14, %cst_9 [0] : vector<64x128xf32> to vector<128xf32>
    %16 = vector.shape_cast %15 : vector<128xf32> to vector<1x128xf32>
    %c0_10 = arith.constant 0 : index
    %c0_11 = arith.constant 0 : index
    %17 = vector.load %arg5[%c0_10, %c0_11] : memref<1x128xf32, #tpu.memory_space<vmem>>, vector<1x128xf32>
    tpu.vector_store %arg5[%c0_10, %c0_11], %16 {strides = array<i32>} : memref<1x128xf32, #tpu.memory_space<vmem>>, vector<1x128xf32>,
    return
  }
  func.func @transform_0(%arg0: i32) -> (i32, i32) {
    %c0_i32 = arith.constant 0 : i32
    %c0_i32_0 = arith.constant 0 : i32
    %c0_i32_1 = arith.constant 0 : i32
    return %c0_i32, %c0_i32_0 : i32, i32
  }
  func.func @transform_1(%arg0: i32) -> (i32, i32, i32) {
    %c0_i32 = arith.constant 0 : i32
    %c0_i32_0 = arith.constant 0 : i32
    %c0_i32_1 = arith.constant 0 : i32
    return %arg0, %c0_i32, %c0_i32_0 : i32, i32, i32
  }
  func.func @transform_2(%arg0: i32) -> (i32, i32) {
    %c0_i32 = arith.constant 0 : i32
    %c0_i32_0 = arith.constant 0 : i32
    return %c0_i32, %arg0 : i32, i32
  }
  func.func @transform_3(%arg0: i32) -> (i32, i32) {
    %c0_i32 = arith.constant 0 : i32
    %c0_i32_0 = arith.constant 0 : i32
    return %c0_i32, %arg0 : i32, i32
  }
  func.func @transform_4(%arg0: i32) -> (i32, i32) {
    %c0_i32 = arith.constant 0 : i32
    %c0_i32_0 = arith.constant 0 : i32
    return %c0_i32, %arg0 : i32, i32
  }
}

module attributes {stable_mosaic.version = 11 : i64} {
  func.func @_conv_loss_kernel(%arg0: i32, %arg1: memref<128x1152xbf16, #tpu.memory_space<vmem>>, %arg2: memref<1x1152x128xbf16, #tpu.memory_space<vmem>>, %arg3: memref<1x128xf32, #tpu.memory_space<vmem>>, %arg4: memref<128x128xbf16, #tpu.memory_space<vmem>>, %arg5: memref<1x128xf32, #tpu.memory_space<vmem>>) attributes {dimension_semantics = [#tpu.dimension_semantics<parallel>], iteration_bounds = array<i64: 1>, scalar_prefetch = 0 : i64, scratch_operands = 0 : i64, tpu.core_type = #tpu.core_type<tc>, window_params = [{pipeline_mode = #tpu.pipeline_mode<synchronous>, transform_indices = @transform_0, window_bounds = array<i64: 128, 1152>}, {transform_indices = @transform_1, window_bounds = array<i64: 1, 1152, 128>}, {transform_indices = @transform_2, window_bounds = array<i64: 1, 128>}, {transform_indices = @transform_3, window_bounds = array<i64: 128, 128>}, {transform_indices = @transform_4, window_bounds = array<i64: 1, 128>}]} {
    %c0 = arith.constant 0 : index
    %c0_0 = arith.constant 0 : index
    %0 = vector.load %arg1[%c0, %c0_0] : memref<128x1152xbf16, #tpu.memory_space<vmem>>, vector<128x1152xbf16>
    %c0_1 = arith.constant 0 : index
    %c0_2 = arith.constant 0 : index
    %c0_3 = arith.constant 0 : index
    %1 = vector.load %arg2[%c0_1, %c0_2, %c0_3] : memref<1x1152x128xbf16, #tpu.memory_space<vmem>>, vector<1x1152x128xbf16>
    %2 = vector.shape_cast %1 : vector<1x1152x128xbf16> to vector<1152x128xbf16>
    %cst = arith.constant dense<0.000000e+00> : vector<128x128xf32>
    %3 = tpu.matmul %0, %2, %cst {dimension_numbers = #tpu.dot_dimension_numbers<[1], [0], [0], [1], [0, 0, 1, 1], [], []>} : vector<128x1152xbf16>, vector<1152x128xbf16>, vector<128x128xf32> -> vector<128x128xf32>
    %c0_4 = arith.constant 0 : index
    %c0_5 = arith.constant 0 : index
    %4 = vector.load %arg3[%c0_4, %c0_5] : memref<1x128xf32, #tpu.memory_space<vmem>>, vector<1x128xf32>
    %5 = vector.broadcast %4 : vector<1x128xf32> to vector<128x128xf32>
    %6 = arith.addf %3, %5 : vector<128x128xf32>
    %cst_6 = arith.constant 0.000000e+00 : f32
    %7 = vector.broadcast %cst_6 : f32 to vector<128x128xf32>
    %8 = arith.maximumf %6, %7 : vector<128x128xf32>
    %9 = arith.truncf %8 : vector<128x128xf32> to vector<128x128xbf16>
    %c0_7 = arith.constant 0 : index
    %c0_8 = arith.constant 0 : index
    %10 = vector.load %arg4[%c0_7, %c0_8] : memref<128x128xbf16, #tpu.memory_space<vmem>>, vector<128x128xbf16>
    tpu.vector_store %arg4[%c0_7, %c0_8], %9 {strides = array<i32>} : memref<128x128xbf16, #tpu.memory_space<vmem>>, vector<128x128xbf16>,
    %11 = vector.extract_strided_slice %3 {offsets = [0, 0], sizes = [64, 128], strides = [1, 1]} : vector<128x128xf32> to vector<64x128xf32>
    %12 = vector.extract_strided_slice %3 {offsets = [64, 0], sizes = [64, 128], strides = [1, 1]} : vector<128x128xf32> to vector<64x128xf32>
    %13 = arith.subf %11, %12 : vector<64x128xf32>
    %14 = arith.mulf %13, %13 : vector<64x128xf32>
    %cst_9 = arith.constant dense<0.000000e+00> : vector<128xf32>
    %15 = vector.multi_reduction <add>, %14, %cst_9 [0] : vector<64x128xf32> to vector<128xf32>
    %16 = vector.shape_cast %15 : vector<128xf32> to vector<1x128xf32>
    %c0_10 = arith.constant 0 : index
    %c0_11 = arith.constant 0 : index
    %17 = vector.load %arg5[%c0_10, %c0_11] : memref<1x128xf32, #tpu.memory_space<vmem>>, vector<1x128xf32>
    tpu.vector_store %arg5[%c0_10, %c0_11], %16 {strides = array<i32>} : memref<1x128xf32, #tpu.memory_space<vmem>>, vector<1x128xf32>,
    return
  }
  func.func @transform_0(%arg0: i32) -> (i32, i32) {
    %c0_i32 = arith.constant 0 : i32
    %c0_i32_0 = arith.constant 0 : i32
    %c0_i32_1 = arith.constant 0 : i32
    return %c0_i32, %c0_i32_0 : i32, i32
  }
  func.func @transform_1(%arg0: i32) -> (i32, i32, i32) {
    %c0_i32 = arith.constant 0 : i32
    %c0_i32_0 = arith.constant 0 : i32
    %c0_i32_1 = arith.constant 0 : i32
    return %arg0, %c0_i32, %c0_i32_0 : i32, i32, i32
  }
  func.func @transform_2(%arg0: i32) -> (i32, i32) {
    %c0_i32 = arith.constant 0 : i32
    %c0_i32_0 = arith.constant 0 : i32
    return %c0_i32, %arg0 : i32, i32
  }
  func.func @transform_3(%arg0: i32) -> (i32, i32) {
    %c0_i32 = arith.constant 0 : i32
    %c0_i32_0 = arith.constant 0 : i32
    return %c0_i32, %arg0 : i32, i32
  }
  func.func @transform_4(%arg0: i32) -> (i32, i32) {
    %c0_i32 = arith.constant 0 : i32
    %c0_i32_0 = arith.constant 0 : i32
    return %c0_i32, %arg0 : i32, i32
  }
}

module attributes {stable_mosaic.version = 11 : i64} {
  func.func @_conv_loss_kernel(%arg0: i32, %arg1: memref<32x1152xbf16, #tpu.memory_space<vmem>>, %arg2: memref<1x1152x128xbf16, #tpu.memory_space<vmem>>, %arg3: memref<1x128xf32, #tpu.memory_space<vmem>>, %arg4: memref<32x128xbf16, #tpu.memory_space<vmem>>, %arg5: memref<1x128xf32, #tpu.memory_space<vmem>>) attributes {dimension_semantics = [#tpu.dimension_semantics<parallel>], iteration_bounds = array<i64: 2>, scalar_prefetch = 0 : i64, scratch_operands = 0 : i64, tpu.core_type = #tpu.core_type<tc>, window_params = [{pipeline_mode = #tpu.pipeline_mode<synchronous>, transform_indices = @transform_0, window_bounds = array<i64: 32, 1152>}, {transform_indices = @transform_1, window_bounds = array<i64: 1, 1152, 128>}, {transform_indices = @transform_2, window_bounds = array<i64: 1, 128>}, {transform_indices = @transform_3, window_bounds = array<i64: 32, 128>}, {transform_indices = @transform_4, window_bounds = array<i64: 1, 128>}]} {
    %c0 = arith.constant 0 : index
    %c0_0 = arith.constant 0 : index
    %0 = vector.load %arg1[%c0, %c0_0] : memref<32x1152xbf16, #tpu.memory_space<vmem>>, vector<32x1152xbf16>
    %c0_1 = arith.constant 0 : index
    %c0_2 = arith.constant 0 : index
    %c0_3 = arith.constant 0 : index
    %1 = vector.load %arg2[%c0_1, %c0_2, %c0_3] : memref<1x1152x128xbf16, #tpu.memory_space<vmem>>, vector<1x1152x128xbf16>
    %2 = vector.shape_cast %1 : vector<1x1152x128xbf16> to vector<1152x128xbf16>
    %cst = arith.constant dense<0.000000e+00> : vector<32x128xf32>
    %3 = tpu.matmul %0, %2, %cst {dimension_numbers = #tpu.dot_dimension_numbers<[1], [0], [0], [1], [0, 0, 1, 1], [], []>} : vector<32x1152xbf16>, vector<1152x128xbf16>, vector<32x128xf32> -> vector<32x128xf32>
    %c0_4 = arith.constant 0 : index
    %c0_5 = arith.constant 0 : index
    %4 = vector.load %arg3[%c0_4, %c0_5] : memref<1x128xf32, #tpu.memory_space<vmem>>, vector<1x128xf32>
    %5 = vector.broadcast %4 : vector<1x128xf32> to vector<32x128xf32>
    %6 = arith.addf %3, %5 : vector<32x128xf32>
    %cst_6 = arith.constant 0.000000e+00 : f32
    %7 = vector.broadcast %cst_6 : f32 to vector<32x128xf32>
    %8 = arith.maximumf %6, %7 : vector<32x128xf32>
    %9 = arith.truncf %8 : vector<32x128xf32> to vector<32x128xbf16>
    %c0_7 = arith.constant 0 : index
    %c0_8 = arith.constant 0 : index
    %10 = vector.load %arg4[%c0_7, %c0_8] : memref<32x128xbf16, #tpu.memory_space<vmem>>, vector<32x128xbf16>
    tpu.vector_store %arg4[%c0_7, %c0_8], %9 {strides = array<i32>} : memref<32x128xbf16, #tpu.memory_space<vmem>>, vector<32x128xbf16>,
    %11 = vector.extract_strided_slice %3 {offsets = [0, 0], sizes = [16, 128], strides = [1, 1]} : vector<32x128xf32> to vector<16x128xf32>
    %12 = vector.extract_strided_slice %3 {offsets = [16, 0], sizes = [16, 128], strides = [1, 1]} : vector<32x128xf32> to vector<16x128xf32>
    %13 = arith.subf %11, %12 : vector<16x128xf32>
    %14 = arith.mulf %13, %13 : vector<16x128xf32>
    %cst_9 = arith.constant dense<0.000000e+00> : vector<128xf32>
    %15 = vector.multi_reduction <add>, %14, %cst_9 [0] : vector<16x128xf32> to vector<128xf32>
    %16 = vector.shape_cast %15 : vector<128xf32> to vector<1x128xf32>
    %c0_10 = arith.constant 0 : index
    %c0_11 = arith.constant 0 : index
    %17 = vector.load %arg5[%c0_10, %c0_11] : memref<1x128xf32, #tpu.memory_space<vmem>>, vector<1x128xf32>
    tpu.vector_store %arg5[%c0_10, %c0_11], %16 {strides = array<i32>} : memref<1x128xf32, #tpu.memory_space<vmem>>, vector<1x128xf32>,
    return
  }
  func.func @transform_0(%arg0: i32) -> (i32, i32) {
    %c0_i32 = arith.constant 0 : i32
    %c0_i32_0 = arith.constant 0 : i32
    %c0_i32_1 = arith.constant 0 : i32
    return %c0_i32, %c0_i32_0 : i32, i32
  }
  func.func @transform_1(%arg0: i32) -> (i32, i32, i32) {
    %c0_i32 = arith.constant 0 : i32
    %c0_i32_0 = arith.constant 0 : i32
    %c0_i32_1 = arith.constant 0 : i32
    return %arg0, %c0_i32, %c0_i32_0 : i32, i32, i32
  }
  func.func @transform_2(%arg0: i32) -> (i32, i32) {
    %c0_i32 = arith.constant 0 : i32
    %c0_i32_0 = arith.constant 0 : i32
    return %c0_i32, %arg0 : i32, i32
  }
  func.func @transform_3(%arg0: i32) -> (i32, i32) {
    %c0_i32 = arith.constant 0 : i32
    %c0_i32_0 = arith.constant 0 : i32
    return %c0_i32, %arg0 : i32, i32
  }
  func.func @transform_4(%arg0: i32) -> (i32, i32) {
    %c0_i32 = arith.constant 0 : i32
    %c0_i32_0 = arith.constant 0 : i32
    return %c0_i32, %arg0 : i32, i32
  }
}

module attributes {stable_mosaic.version = 11 : i64} {
  func.func @_conv_loss_kernel(%arg0: i32, %arg1: memref<32x2304xbf16, #tpu.memory_space<vmem>>, %arg2: memref<1x2304x128xbf16, #tpu.memory_space<vmem>>, %arg3: memref<1x128xf32, #tpu.memory_space<vmem>>, %arg4: memref<32x128xbf16, #tpu.memory_space<vmem>>, %arg5: memref<1x128xf32, #tpu.memory_space<vmem>>) attributes {dimension_semantics = [#tpu.dimension_semantics<parallel>], iteration_bounds = array<i64: 2>, scalar_prefetch = 0 : i64, scratch_operands = 0 : i64, tpu.core_type = #tpu.core_type<tc>, window_params = [{pipeline_mode = #tpu.pipeline_mode<synchronous>, transform_indices = @transform_0, window_bounds = array<i64: 32, 2304>}, {transform_indices = @transform_1, window_bounds = array<i64: 1, 2304, 128>}, {transform_indices = @transform_2, window_bounds = array<i64: 1, 128>}, {transform_indices = @transform_3, window_bounds = array<i64: 32, 128>}, {transform_indices = @transform_4, window_bounds = array<i64: 1, 128>}]} {
    %c0 = arith.constant 0 : index
    %c0_0 = arith.constant 0 : index
    %0 = vector.load %arg1[%c0, %c0_0] : memref<32x2304xbf16, #tpu.memory_space<vmem>>, vector<32x2304xbf16>
    %c0_1 = arith.constant 0 : index
    %c0_2 = arith.constant 0 : index
    %c0_3 = arith.constant 0 : index
    %1 = vector.load %arg2[%c0_1, %c0_2, %c0_3] : memref<1x2304x128xbf16, #tpu.memory_space<vmem>>, vector<1x2304x128xbf16>
    %2 = vector.shape_cast %1 : vector<1x2304x128xbf16> to vector<2304x128xbf16>
    %cst = arith.constant dense<0.000000e+00> : vector<32x128xf32>
    %3 = tpu.matmul %0, %2, %cst {dimension_numbers = #tpu.dot_dimension_numbers<[1], [0], [0], [1], [0, 0, 1, 1], [], []>} : vector<32x2304xbf16>, vector<2304x128xbf16>, vector<32x128xf32> -> vector<32x128xf32>
    %c0_4 = arith.constant 0 : index
    %c0_5 = arith.constant 0 : index
    %4 = vector.load %arg3[%c0_4, %c0_5] : memref<1x128xf32, #tpu.memory_space<vmem>>, vector<1x128xf32>
    %5 = vector.broadcast %4 : vector<1x128xf32> to vector<32x128xf32>
    %6 = arith.addf %3, %5 : vector<32x128xf32>
    %cst_6 = arith.constant 0.000000e+00 : f32
    %7 = vector.broadcast %cst_6 : f32 to vector<32x128xf32>
    %8 = arith.maximumf %6, %7 : vector<32x128xf32>
    %9 = arith.truncf %8 : vector<32x128xf32> to vector<32x128xbf16>
    %c0_7 = arith.constant 0 : index
    %c0_8 = arith.constant 0 : index
    %10 = vector.load %arg4[%c0_7, %c0_8] : memref<32x128xbf16, #tpu.memory_space<vmem>>, vector<32x128xbf16>
    tpu.vector_store %arg4[%c0_7, %c0_8], %9 {strides = array<i32>} : memref<32x128xbf16, #tpu.memory_space<vmem>>, vector<32x128xbf16>,
    %11 = vector.extract_strided_slice %3 {offsets = [0, 0], sizes = [16, 128], strides = [1, 1]} : vector<32x128xf32> to vector<16x128xf32>
    %12 = vector.extract_strided_slice %3 {offsets = [16, 0], sizes = [16, 128], strides = [1, 1]} : vector<32x128xf32> to vector<16x128xf32>
    %13 = arith.subf %11, %12 : vector<16x128xf32>
    %14 = arith.mulf %13, %13 : vector<16x128xf32>
    %cst_9 = arith.constant dense<0.000000e+00> : vector<128xf32>
    %15 = vector.multi_reduction <add>, %14, %cst_9 [0] : vector<16x128xf32> to vector<128xf32>
    %16 = vector.shape_cast %15 : vector<128xf32> to vector<1x128xf32>
    %c0_10 = arith.constant 0 : index
    %c0_11 = arith.constant 0 : index
    %17 = vector.load %arg5[%c0_10, %c0_11] : memref<1x128xf32, #tpu.memory_space<vmem>>, vector<1x128xf32>
    tpu.vector_store %arg5[%c0_10, %c0_11], %16 {strides = array<i32>} : memref<1x128xf32, #tpu.memory_space<vmem>>, vector<1x128xf32>,
    return
  }
  func.func @transform_0(%arg0: i32) -> (i32, i32) {
    %c0_i32 = arith.constant 0 : i32
    %c0_i32_0 = arith.constant 0 : i32
    %c0_i32_1 = arith.constant 0 : i32
    return %c0_i32, %c0_i32_0 : i32, i32
  }
  func.func @transform_1(%arg0: i32) -> (i32, i32, i32) {
    %c0_i32 = arith.constant 0 : i32
    %c0_i32_0 = arith.constant 0 : i32
    %c0_i32_1 = arith.constant 0 : i32
    return %arg0, %c0_i32, %c0_i32_0 : i32, i32, i32
  }
  func.func @transform_2(%arg0: i32) -> (i32, i32) {
    %c0_i32 = arith.constant 0 : i32
    %c0_i32_0 = arith.constant 0 : i32
    return %c0_i32, %arg0 : i32, i32
  }
  func.func @transform_3(%arg0: i32) -> (i32, i32) {
    %c0_i32 = arith.constant 0 : i32
    %c0_i32_0 = arith.constant 0 : i32
    return %c0_i32, %arg0 : i32, i32
  }
  func.func @transform_4(%arg0: i32) -> (i32, i32) {
    %c0_i32 = arith.constant 0 : i32
    %c0_i32_0 = arith.constant 0 : i32
    return %c0_i32, %arg0 : i32, i32
  }
}

module attributes {stable_mosaic.version = 11 : i64} {
  func.func @_conv_loss_kernel(%arg0: i32, %arg1: memref<8x2304xbf16, #tpu.memory_space<vmem>>, %arg2: memref<1x2304x128xbf16, #tpu.memory_space<vmem>>, %arg3: memref<1x128xf32, #tpu.memory_space<vmem>>, %arg4: memref<8x128xbf16, #tpu.memory_space<vmem>>, %arg5: memref<1x128xf32, #tpu.memory_space<vmem>>) attributes {dimension_semantics = [#tpu.dimension_semantics<parallel>], iteration_bounds = array<i64: 4>, scalar_prefetch = 0 : i64, scratch_operands = 0 : i64, tpu.core_type = #tpu.core_type<tc>, window_params = [{pipeline_mode = #tpu.pipeline_mode<synchronous>, transform_indices = @transform_0, window_bounds = array<i64: 8, 2304>}, {transform_indices = @transform_1, window_bounds = array<i64: 1, 2304, 128>}, {transform_indices = @transform_2, window_bounds = array<i64: 1, 128>}, {transform_indices = @transform_3, window_bounds = array<i64: 8, 128>}, {transform_indices = @transform_4, window_bounds = array<i64: 1, 128>}]} {
    %c0 = arith.constant 0 : index
    %c0_0 = arith.constant 0 : index
    %0 = vector.load %arg1[%c0, %c0_0] : memref<8x2304xbf16, #tpu.memory_space<vmem>>, vector<8x2304xbf16>
    %c0_1 = arith.constant 0 : index
    %c0_2 = arith.constant 0 : index
    %c0_3 = arith.constant 0 : index
    %1 = vector.load %arg2[%c0_1, %c0_2, %c0_3] : memref<1x2304x128xbf16, #tpu.memory_space<vmem>>, vector<1x2304x128xbf16>
    %2 = vector.shape_cast %1 : vector<1x2304x128xbf16> to vector<2304x128xbf16>
    %cst = arith.constant dense<0.000000e+00> : vector<8x128xf32>
    %3 = tpu.matmul %0, %2, %cst {dimension_numbers = #tpu.dot_dimension_numbers<[1], [0], [0], [1], [0, 0, 1, 1], [], []>} : vector<8x2304xbf16>, vector<2304x128xbf16>, vector<8x128xf32> -> vector<8x128xf32>
    %c0_4 = arith.constant 0 : index
    %c0_5 = arith.constant 0 : index
    %4 = vector.load %arg3[%c0_4, %c0_5] : memref<1x128xf32, #tpu.memory_space<vmem>>, vector<1x128xf32>
    %5 = vector.broadcast %4 : vector<1x128xf32> to vector<8x128xf32>
    %6 = arith.addf %3, %5 : vector<8x128xf32>
    %cst_6 = arith.constant 0.000000e+00 : f32
    %7 = vector.broadcast %cst_6 : f32 to vector<8x128xf32>
    %8 = arith.maximumf %6, %7 : vector<8x128xf32>
    %9 = arith.truncf %8 : vector<8x128xf32> to vector<8x128xbf16>
    %c0_7 = arith.constant 0 : index
    %c0_8 = arith.constant 0 : index
    %10 = vector.load %arg4[%c0_7, %c0_8] : memref<8x128xbf16, #tpu.memory_space<vmem>>, vector<8x128xbf16>
    tpu.vector_store %arg4[%c0_7, %c0_8], %9 {strides = array<i32>} : memref<8x128xbf16, #tpu.memory_space<vmem>>, vector<8x128xbf16>,
    %11 = vector.extract_strided_slice %3 {offsets = [0, 0], sizes = [4, 128], strides = [1, 1]} : vector<8x128xf32> to vector<4x128xf32>
    %12 = vector.extract_strided_slice %3 {offsets = [4, 0], sizes = [4, 128], strides = [1, 1]} : vector<8x128xf32> to vector<4x128xf32>
    %13 = arith.subf %11, %12 : vector<4x128xf32>
    %14 = arith.mulf %13, %13 : vector<4x128xf32>
    %cst_9 = arith.constant dense<0.000000e+00> : vector<128xf32>
    %15 = vector.multi_reduction <add>, %14, %cst_9 [0] : vector<4x128xf32> to vector<128xf32>
    %16 = vector.shape_cast %15 : vector<128xf32> to vector<1x128xf32>
    %c0_10 = arith.constant 0 : index
    %c0_11 = arith.constant 0 : index
    %17 = vector.load %arg5[%c0_10, %c0_11] : memref<1x128xf32, #tpu.memory_space<vmem>>, vector<1x128xf32>
    tpu.vector_store %arg5[%c0_10, %c0_11], %16 {strides = array<i32>} : memref<1x128xf32, #tpu.memory_space<vmem>>, vector<1x128xf32>,
    return
  }
  func.func @transform_0(%arg0: i32) -> (i32, i32) {
    %c0_i32 = arith.constant 0 : i32
    %c0_i32_0 = arith.constant 0 : i32
    %c0_i32_1 = arith.constant 0 : i32
    return %c0_i32, %c0_i32_0 : i32, i32
  }
  func.func @transform_1(%arg0: i32) -> (i32, i32, i32) {
    %c0_i32 = arith.constant 0 : i32
    %c0_i32_0 = arith.constant 0 : i32
    %c0_i32_1 = arith.constant 0 : i32
    return %arg0, %c0_i32, %c0_i32_0 : i32, i32, i32
  }
  func.func @transform_2(%arg0: i32) -> (i32, i32) {
    %c0_i32 = arith.constant 0 : i32
    %c0_i32_0 = arith.constant 0 : i32
    return %c0_i32, %arg0 : i32, i32
  }
  func.func @transform_3(%arg0: i32) -> (i32, i32) {
    %c0_i32 = arith.constant 0 : i32
    %c0_i32_0 = arith.constant 0 : i32
    return %c0_i32, %arg0 : i32, i32
  }
  func.func @transform_4(%arg0: i32) -> (i32, i32) {
    %c0_i32 = arith.constant 0 : i32
    %c0_i32_0 = arith.constant 0 : i32
    return %c0_i32, %arg0 : i32, i32
  }
}

module attributes {stable_mosaic.version = 11 : i64} {
  func.func @_conv_loss_kernel(%arg0: i32, %arg1: memref<8x4608xbf16, #tpu.memory_space<vmem>>, %arg2: memref<1x4608x128xbf16, #tpu.memory_space<vmem>>, %arg3: memref<1x128xf32, #tpu.memory_space<vmem>>, %arg4: memref<8x128xbf16, #tpu.memory_space<vmem>>, %arg5: memref<1x128xf32, #tpu.memory_space<vmem>>) attributes {dimension_semantics = [#tpu.dimension_semantics<parallel>], iteration_bounds = array<i64: 4>, scalar_prefetch = 0 : i64, scratch_operands = 0 : i64, tpu.core_type = #tpu.core_type<tc>, window_params = [{pipeline_mode = #tpu.pipeline_mode<synchronous>, transform_indices = @transform_0, window_bounds = array<i64: 8, 4608>}, {transform_indices = @transform_1, window_bounds = array<i64: 1, 4608, 128>}, {transform_indices = @transform_2, window_bounds = array<i64: 1, 128>}, {transform_indices = @transform_3, window_bounds = array<i64: 8, 128>}, {transform_indices = @transform_4, window_bounds = array<i64: 1, 128>}]} {
    %c0 = arith.constant 0 : index
    %c0_0 = arith.constant 0 : index
    %0 = vector.load %arg1[%c0, %c0_0] : memref<8x4608xbf16, #tpu.memory_space<vmem>>, vector<8x4608xbf16>
    %c0_1 = arith.constant 0 : index
    %c0_2 = arith.constant 0 : index
    %c0_3 = arith.constant 0 : index
    %1 = vector.load %arg2[%c0_1, %c0_2, %c0_3] : memref<1x4608x128xbf16, #tpu.memory_space<vmem>>, vector<1x4608x128xbf16>
    %2 = vector.shape_cast %1 : vector<1x4608x128xbf16> to vector<4608x128xbf16>
    %cst = arith.constant dense<0.000000e+00> : vector<8x128xf32>
    %3 = tpu.matmul %0, %2, %cst {dimension_numbers = #tpu.dot_dimension_numbers<[1], [0], [0], [1], [0, 0, 1, 1], [], []>} : vector<8x4608xbf16>, vector<4608x128xbf16>, vector<8x128xf32> -> vector<8x128xf32>
    %c0_4 = arith.constant 0 : index
    %c0_5 = arith.constant 0 : index
    %4 = vector.load %arg3[%c0_4, %c0_5] : memref<1x128xf32, #tpu.memory_space<vmem>>, vector<1x128xf32>
    %5 = vector.broadcast %4 : vector<1x128xf32> to vector<8x128xf32>
    %6 = arith.addf %3, %5 : vector<8x128xf32>
    %cst_6 = arith.constant 0.000000e+00 : f32
    %7 = vector.broadcast %cst_6 : f32 to vector<8x128xf32>
    %8 = arith.maximumf %6, %7 : vector<8x128xf32>
    %9 = arith.truncf %8 : vector<8x128xf32> to vector<8x128xbf16>
    %c0_7 = arith.constant 0 : index
    %c0_8 = arith.constant 0 : index
    %10 = vector.load %arg4[%c0_7, %c0_8] : memref<8x128xbf16, #tpu.memory_space<vmem>>, vector<8x128xbf16>
    tpu.vector_store %arg4[%c0_7, %c0_8], %9 {strides = array<i32>} : memref<8x128xbf16, #tpu.memory_space<vmem>>, vector<8x128xbf16>,
    %11 = vector.extract_strided_slice %3 {offsets = [0, 0], sizes = [4, 128], strides = [1, 1]} : vector<8x128xf32> to vector<4x128xf32>
    %12 = vector.extract_strided_slice %3 {offsets = [4, 0], sizes = [4, 128], strides = [1, 1]} : vector<8x128xf32> to vector<4x128xf32>
    %13 = arith.subf %11, %12 : vector<4x128xf32>
    %14 = arith.mulf %13, %13 : vector<4x128xf32>
    %cst_9 = arith.constant dense<0.000000e+00> : vector<128xf32>
    %15 = vector.multi_reduction <add>, %14, %cst_9 [0] : vector<4x128xf32> to vector<128xf32>
    %16 = vector.shape_cast %15 : vector<128xf32> to vector<1x128xf32>
    %c0_10 = arith.constant 0 : index
    %c0_11 = arith.constant 0 : index
    %17 = vector.load %arg5[%c0_10, %c0_11] : memref<1x128xf32, #tpu.memory_space<vmem>>, vector<1x128xf32>
    tpu.vector_store %arg5[%c0_10, %c0_11], %16 {strides = array<i32>} : memref<1x128xf32, #tpu.memory_space<vmem>>, vector<1x128xf32>,
    return
  }
  func.func @transform_0(%arg0: i32) -> (i32, i32) {
    %c0_i32 = arith.constant 0 : i32
    %c0_i32_0 = arith.constant 0 : i32
    %c0_i32_1 = arith.constant 0 : i32
    return %c0_i32, %c0_i32_0 : i32, i32
  }
  func.func @transform_1(%arg0: i32) -> (i32, i32, i32) {
    %c0_i32 = arith.constant 0 : i32
    %c0_i32_0 = arith.constant 0 : i32
    %c0_i32_1 = arith.constant 0 : i32
    return %arg0, %c0_i32, %c0_i32_0 : i32, i32, i32
  }
  func.func @transform_2(%arg0: i32) -> (i32, i32) {
    %c0_i32 = arith.constant 0 : i32
    %c0_i32_0 = arith.constant 0 : i32
    return %c0_i32, %arg0 : i32, i32
  }
  func.func @transform_3(%arg0: i32) -> (i32, i32) {
    %c0_i32 = arith.constant 0 : i32
    %c0_i32_0 = arith.constant 0 : i32
    return %c0_i32, %arg0 : i32, i32
  }
  func.func @transform_4(%arg0: i32) -> (i32, i32) {
    %c0_i32 = arith.constant 0 : i32
    %c0_i32_0 = arith.constant 0 : i32
    return %c0_i32, %arg0 : i32, i32
  }
}

module attributes {stable_mosaic.version = 11 : i64} {
  func.func @_conv_loss_kernel(%arg0: i32, %arg1: memref<2x4608xbf16, #tpu.memory_space<vmem>>, %arg2: memref<1x4608x128xbf16, #tpu.memory_space<vmem>>, %arg3: memref<1x128xf32, #tpu.memory_space<vmem>>, %arg4: memref<2x128xbf16, #tpu.memory_space<vmem>>, %arg5: memref<1x128xf32, #tpu.memory_space<vmem>>) attributes {dimension_semantics = [#tpu.dimension_semantics<parallel>], iteration_bounds = array<i64: 4>, scalar_prefetch = 0 : i64, scratch_operands = 0 : i64, tpu.core_type = #tpu.core_type<tc>, window_params = [{pipeline_mode = #tpu.pipeline_mode<synchronous>, transform_indices = @transform_0, window_bounds = array<i64: 2, 4608>}, {transform_indices = @transform_1, window_bounds = array<i64: 1, 4608, 128>}, {transform_indices = @transform_2, window_bounds = array<i64: 1, 128>}, {transform_indices = @transform_3, window_bounds = array<i64: 2, 128>}, {transform_indices = @transform_4, window_bounds = array<i64: 1, 128>}]} {
    %c0 = arith.constant 0 : index
    %c0_0 = arith.constant 0 : index
    %0 = vector.load %arg1[%c0, %c0_0] : memref<2x4608xbf16, #tpu.memory_space<vmem>>, vector<2x4608xbf16>
    %c0_1 = arith.constant 0 : index
    %c0_2 = arith.constant 0 : index
    %c0_3 = arith.constant 0 : index
    %1 = vector.load %arg2[%c0_1, %c0_2, %c0_3] : memref<1x4608x128xbf16, #tpu.memory_space<vmem>>, vector<1x4608x128xbf16>
    %2 = vector.shape_cast %1 : vector<1x4608x128xbf16> to vector<4608x128xbf16>
    %cst = arith.constant dense<0.000000e+00> : vector<2x128xf32>
    %3 = tpu.matmul %0, %2, %cst {dimension_numbers = #tpu.dot_dimension_numbers<[1], [0], [0], [1], [0, 0, 1, 1], [], []>} : vector<2x4608xbf16>, vector<4608x128xbf16>, vector<2x128xf32> -> vector<2x128xf32>
    %c0_4 = arith.constant 0 : index
    %c0_5 = arith.constant 0 : index
    %4 = vector.load %arg3[%c0_4, %c0_5] : memref<1x128xf32, #tpu.memory_space<vmem>>, vector<1x128xf32>
    %5 = vector.broadcast %4 : vector<1x128xf32> to vector<2x128xf32>
    %6 = arith.addf %3, %5 : vector<2x128xf32>
    %cst_6 = arith.constant 0.000000e+00 : f32
    %7 = vector.broadcast %cst_6 : f32 to vector<2x128xf32>
    %8 = arith.maximumf %6, %7 : vector<2x128xf32>
    %9 = arith.truncf %8 : vector<2x128xf32> to vector<2x128xbf16>
    %c0_7 = arith.constant 0 : index
    %c0_8 = arith.constant 0 : index
    %10 = vector.load %arg4[%c0_7, %c0_8] : memref<2x128xbf16, #tpu.memory_space<vmem>>, vector<2x128xbf16>
    tpu.vector_store %arg4[%c0_7, %c0_8], %9 {strides = array<i32>} : memref<2x128xbf16, #tpu.memory_space<vmem>>, vector<2x128xbf16>,
    %11 = vector.extract_strided_slice %3 {offsets = [0, 0], sizes = [1, 128], strides = [1, 1]} : vector<2x128xf32> to vector<1x128xf32>
    %12 = vector.extract_strided_slice %3 {offsets = [1, 0], sizes = [1, 128], strides = [1, 1]} : vector<2x128xf32> to vector<1x128xf32>
    %13 = arith.subf %11, %12 : vector<1x128xf32>
    %14 = arith.mulf %13, %13 : vector<1x128xf32>
    %cst_9 = arith.constant dense<0.000000e+00> : vector<128xf32>
    %15 = vector.multi_reduction <add>, %14, %cst_9 [0] : vector<1x128xf32> to vector<128xf32>
    %16 = vector.shape_cast %15 : vector<128xf32> to vector<1x128xf32>
    %c0_10 = arith.constant 0 : index
    %c0_11 = arith.constant 0 : index
    %17 = vector.load %arg5[%c0_10, %c0_11] : memref<1x128xf32, #tpu.memory_space<vmem>>, vector<1x128xf32>
    tpu.vector_store %arg5[%c0_10, %c0_11], %16 {strides = array<i32>} : memref<1x128xf32, #tpu.memory_space<vmem>>, vector<1x128xf32>,
    return
  }
  func.func @transform_0(%arg0: i32) -> (i32, i32) {
    %c0_i32 = arith.constant 0 : i32
    %c0_i32_0 = arith.constant 0 : i32
    %c0_i32_1 = arith.constant 0 : i32
    return %c0_i32, %c0_i32_0 : i32, i32
  }
  func.func @transform_1(%arg0: i32) -> (i32, i32, i32) {
    %c0_i32 = arith.constant 0 : i32
    %c0_i32_0 = arith.constant 0 : i32
    %c0_i32_1 = arith.constant 0 : i32
    return %arg0, %c0_i32, %c0_i32_0 : i32, i32, i32
  }
  func.func @transform_2(%arg0: i32) -> (i32, i32) {
    %c0_i32 = arith.constant 0 : i32
    %c0_i32_0 = arith.constant 0 : i32
    return %c0_i32, %arg0 : i32, i32
  }
  func.func @transform_3(%arg0: i32) -> (i32, i32) {
    %c0_i32 = arith.constant 0 : i32
    %c0_i32_0 = arith.constant 0 : i32
    return %c0_i32, %arg0 : i32, i32
  }
  func.func @transform_4(%arg0: i32) -> (i32, i32) {
    %c0_i32 = arith.constant 0 : i32
    %c0_i32_0 = arith.constant 0 : i32
    return %c0_i32, %arg0 : i32, i32
  }
}

module attributes {stable_mosaic.version = 11 : i64} {
  func.func @_conv_loss_kernel(%arg0: i32, %arg1: memref<2x4608xbf16, #tpu.memory_space<vmem>>, %arg2: memref<1x4608x128xbf16, #tpu.memory_space<vmem>>, %arg3: memref<1x128xf32, #tpu.memory_space<vmem>>, %arg4: memref<2x128xbf16, #tpu.memory_space<vmem>>, %arg5: memref<1x128xf32, #tpu.memory_space<vmem>>) attributes {dimension_semantics = [#tpu.dimension_semantics<parallel>], iteration_bounds = array<i64: 4>, scalar_prefetch = 0 : i64, scratch_operands = 0 : i64, tpu.core_type = #tpu.core_type<tc>, window_params = [{pipeline_mode = #tpu.pipeline_mode<synchronous>, transform_indices = @transform_0, window_bounds = array<i64: 2, 4608>}, {transform_indices = @transform_1, window_bounds = array<i64: 1, 4608, 128>}, {transform_indices = @transform_2, window_bounds = array<i64: 1, 128>}, {transform_indices = @transform_3, window_bounds = array<i64: 2, 128>}, {transform_indices = @transform_4, window_bounds = array<i64: 1, 128>}]} {
    %c0 = arith.constant 0 : index
    %c0_0 = arith.constant 0 : index
    %0 = vector.load %arg1[%c0, %c0_0] : memref<2x4608xbf16, #tpu.memory_space<vmem>>, vector<2x4608xbf16>
    %c0_1 = arith.constant 0 : index
    %c0_2 = arith.constant 0 : index
    %c0_3 = arith.constant 0 : index
    %1 = vector.load %arg2[%c0_1, %c0_2, %c0_3] : memref<1x4608x128xbf16, #tpu.memory_space<vmem>>, vector<1x4608x128xbf16>
    %2 = vector.shape_cast %1 : vector<1x4608x128xbf16> to vector<4608x128xbf16>
    %cst = arith.constant dense<0.000000e+00> : vector<2x128xf32>
    %3 = tpu.matmul %0, %2, %cst {dimension_numbers = #tpu.dot_dimension_numbers<[1], [0], [0], [1], [0, 0, 1, 1], [], []>} : vector<2x4608xbf16>, vector<4608x128xbf16>, vector<2x128xf32> -> vector<2x128xf32>
    %c0_4 = arith.constant 0 : index
    %c0_5 = arith.constant 0 : index
    %4 = vector.load %arg3[%c0_4, %c0_5] : memref<1x128xf32, #tpu.memory_space<vmem>>, vector<1x128xf32>
    %5 = vector.broadcast %4 : vector<1x128xf32> to vector<2x128xf32>
    %6 = arith.addf %3, %5 : vector<2x128xf32>
    %cst_6 = arith.constant 0.000000e+00 : f32
    %7 = vector.broadcast %cst_6 : f32 to vector<2x128xf32>
    %8 = arith.maximumf %6, %7 : vector<2x128xf32>
    %9 = arith.truncf %8 : vector<2x128xf32> to vector<2x128xbf16>
    %c0_7 = arith.constant 0 : index
    %c0_8 = arith.constant 0 : index
    %10 = vector.load %arg4[%c0_7, %c0_8] : memref<2x128xbf16, #tpu.memory_space<vmem>>, vector<2x128xbf16>
    tpu.vector_store %arg4[%c0_7, %c0_8], %9 {strides = array<i32>} : memref<2x128xbf16, #tpu.memory_space<vmem>>, vector<2x128xbf16>,
    %11 = vector.extract_strided_slice %3 {offsets = [0, 0], sizes = [1, 128], strides = [1, 1]} : vector<2x128xf32> to vector<1x128xf32>
    %12 = vector.extract_strided_slice %3 {offsets = [1, 0], sizes = [1, 128], strides = [1, 1]} : vector<2x128xf32> to vector<1x128xf32>
    %13 = arith.subf %11, %12 : vector<1x128xf32>
    %14 = arith.mulf %13, %13 : vector<1x128xf32>
    %cst_9 = arith.constant dense<0.000000e+00> : vector<128xf32>
    %15 = vector.multi_reduction <add>, %14, %cst_9 [0] : vector<1x128xf32> to vector<128xf32>
    %16 = vector.shape_cast %15 : vector<128xf32> to vector<1x128xf32>
    %c0_10 = arith.constant 0 : index
    %c0_11 = arith.constant 0 : index
    %17 = vector.load %arg5[%c0_10, %c0_11] : memref<1x128xf32, #tpu.memory_space<vmem>>, vector<1x128xf32>
    tpu.vector_store %arg5[%c0_10, %c0_11], %16 {strides = array<i32>} : memref<1x128xf32, #tpu.memory_space<vmem>>, vector<1x128xf32>,
    return
  }
  func.func @transform_0(%arg0: i32) -> (i32, i32) {
    %c0_i32 = arith.constant 0 : i32
    %c0_i32_0 = arith.constant 0 : i32
    %c0_i32_1 = arith.constant 0 : i32
    return %c0_i32, %c0_i32_0 : i32, i32
  }
  func.func @transform_1(%arg0: i32) -> (i32, i32, i32) {
    %c0_i32 = arith.constant 0 : i32
    %c0_i32_0 = arith.constant 0 : i32
    %c0_i32_1 = arith.constant 0 : i32
    return %arg0, %c0_i32, %c0_i32_0 : i32, i32, i32
  }
  func.func @transform_2(%arg0: i32) -> (i32, i32) {
    %c0_i32 = arith.constant 0 : i32
    %c0_i32_0 = arith.constant 0 : i32
    return %c0_i32, %arg0 : i32, i32
  }
  func.func @transform_3(%arg0: i32) -> (i32, i32) {
    %c0_i32 = arith.constant 0 : i32
    %c0_i32_0 = arith.constant 0 : i32
    return %c0_i32, %arg0 : i32, i32
  }
  func.func @transform_4(%arg0: i32) -> (i32, i32) {
    %c0_i32 = arith.constant 0 : i32
    %c0_i32_0 = arith.constant 0 : i32
    return %c0_i32, %arg0 : i32, i32
  }
}

</mosaic_0001>

<bundles_post_ra>
// kernel: vgg19_feature_loss.16
= control target key start
LH: loop header
LB: loop body
LE: loop exit
PB: predicated region body
PF: predicated region fallthrough
CT: control target
= control target key end

     0   :  { %10 = vsyncpa [#allocation3], 0  ;;  %s2324_s0 = inlined_call_operand.vmem [shape: bf16[512,27], index: 0, kind: input, shape index: {}]   ;;  %s2325_s1 = inlined_call_operand.hbm [shape: bf16[1,27,64], index: 1, kind: input, shape index: {}]   ;;  %s2326_s2 = inlined_call_operand.hbm [shape: f32[1,64], index: 2, kind: input, shape index: {}]   ;;  %s2327_s3 = inlined_call_operand.vmem [shape: bf16[512,64], index: 3, kind: output, shape index: {0}]   ;;  %s2328_s4 = inlined_call_operand.vmem [shape: f32[1,64], index: 4, kind: output, shape index: {1}]  }
   0x1   :  { %11 = vsyncpa [#allocation5], 0  ;;  %s1665_s15 = smov [#allocation2]   ;;  %s1617_s19 = scalar_lea.hbm %s2325_s1, 256 }
   0x2   :  { %s19_s16 = sshll.u32 %s1665_s15, 4  ;;  %p1618_p0 = scmp.ne.s32.totalorder %s2325_s1, %s1617_s19  ;;  %s20_s16 = int_to_ptr.vmem [resolvable:$true] %s19_s16 }
   0x3   :  { %p1621_p1 = scmp.lt.u32.totalorder %s1617_s19, %s2325_s1 }
   0x5   :  { %p1623_p2 = pnand %p1621_p1, %p1618_p0 }
   0x7   :  { %1626 = shalt.err (!%p1623_p2)
}
   0x8   :  { %s1627_s24 = scalar_lea.vmem %s20_s16, 256  ;;  %p1632_p4 = scmp.lt.s32.totalorder %s20_s16, %s20_s16 }
   0x9   :  { %p1628_p3 = scmp.ne.s32.totalorder %s20_s16, %s1627_s24  ;;  %p1633_p5 = scmp.lt.s32.totalorder %s1627_s24, %s1627_s24 }
   0xb   :  { %p1634_p6 = por %p1633_p5, %p1632_p4 }
   0xd   :  { %p1635_p7 = pnand %p1634_p6, %p1628_p3 }
   0xf   :  { %1638 = shalt.err (!%p1635_p7)
}
  0x10   :  { %s1666_s25 = smov 64   ;;  %s1667_s26 = smov 4  }
  0x11   :  { %25 = dma.hbm_to_vmem [thread:$0]  %s2325_s1, 256, %s20_s16, [#allocation3], %s1666_s25, %s1666_s25, %s1667_s26  }
  0x12   :  { %s1668_s29 = smov [#allocation4]   ;;  %s1639_s7 = scalar_lea.hbm %s2326_s2, 16 }
  0x13   :  { %s32_s30 = sshll.u32 %s1668_s29, 4  ;;  %p1640_p8 = scmp.ne.s32.totalorder %s2326_s2, %s1639_s7  ;;  %s33_s30 = int_to_ptr.vmem [resolvable:$true] %s32_s30 }
  0x14   :  { %p1643_p9 = scmp.lt.u32.totalorder %s1639_s7, %s2326_s2 }
  0x16   :  { %p1645_p10 = pnand %p1643_p9, %p1640_p8 }
  0x18   :  { %1648 = shalt.err (!%p1645_p10)
}
  0x19   :  { %s1649_s12 = scalar_lea.vmem %s33_s30, 16  ;;  %s1653_s1 = scalar_lea.vmem %s33_s30, 32 }
  0x1a   :  { %p1650_p11 = scmp.ne.s32.totalorder %s33_s30, %s1649_s12  ;;  %p1654_p12 = scmp.lt.s32.totalorder %s33_s30, %s33_s30 }
  0x1b   :  { %p1655_p13 = scmp.lt.s32.totalorder %s1653_s1, %s1649_s12 }
  0x1d   :  { %p1656_p0 = por %p1655_p13, %p1654_p12 }
  0x1f   :  { %p1657_p1 = pnand %p1656_p0, %p1650_p11 }
  0x21   :  { %1660 = shalt.err (!%p1657_p1)
}
  0x22   :  { %35 = dma.hbm_to_vmem [thread:$0]  %s2326_s2, 16, %s33_s30, [#allocation5]  }
  0x23   :  { %1661 = dma.done.wait [#allocation3], 256  }
  0x24   :  { %1662 = vsyncadd [#allocation3], 4294967040 }
  0x25   :  { %1663 = dma.done.wait [#allocation5], 16  }
  0x26   :  { %1664 = vsyncadd [#allocation5], 4294967280  ;;  %vm379_vm0 = vcmask 1044480   ;;  %vm380_vm1 = vcmask 1045504   ;;  %v1669_v0 = vmov 65535   ;;  %vm282_vm2 = vcmask 220160  }
  0x27   :  { %v381_v1 = vsel %vm379_vm0, 4294967295, %v1669_v0  ;;  %v1583_v2 = vld [vmem:[#allocation2] sm:$0xff]   ;;  %v1584_v4 = vld [vmem:[#allocation2 + $0x8] sm:$0x3f]   ;;  %v1589_v10 = vld [vmem:[%s2324_s0 + $0x10] sm:$0xff]   ;;  %vm1066_vm3 = vcmask 519168  }
  0x28   :  { %v382_v3 = vsel %vm380_vm1, %v381_v1, 0  ;;  %1506 = vmatprep.subr.bf16.mxu0 %v1583_v2  ;;  %1574 = vmatprep.subr.bf16.mxu1 %v1583_v2  ;;  %v1585_v5 = vld [vmem:[%s2324_s0] sm:$0xff]   ;;  %v1587_v8 = vld [vmem:[%s2324_s0 + $0x8] sm:$0xff]   ;;  %v1590_v11 = vld [vmem:[%s2324_s0 + $0x90] sm:$0xff]   ;;  %vm1195_vm4 = vcmask 523264   ;;  %vm1265_vm5 = vcmask 516096  }
  0x29   :  { %1507 = vmatpush3.bf16.msra.mxu0 %v1583_v2  ;;  %1576 = vmatpush3.bf16.msra.mxu1 %v1583_v2  ;;  %v384_v6 = vand.u32 %v1584_v4, %v382_v3  ;;  %v1586_v7 = vld [vmem:[%s2324_s0 + $0x80] sm:$0xff]   ;;  %v1588_v9 = vld [vmem:[%s2324_s0 + $0x88] sm:$0xff]   ;;  %v1591_v12 = vld [vmem:[%s2324_s0 + $0x18] sm:$0xff]  }
  0x2a   :  { %1510 = vmatprep.mubr.msk.bf16.mxu0 %vm282_vm2, %v1585_v5  ;;  %1542 = vmatprep.mubr.msk.bf16.mxu1 %vm282_vm2, %v1586_v7  ;;  %v1592_v13 = vld [vmem:[%s2324_s0 + $0x98] sm:$0xff]   ;;  %v1593_v14 = vld [vmem:[%s2324_s0 + $0x20] sm:$0xff]   ;;  %v1595_v16 = vld [vmem:[%s2324_s0 + $0x28] sm:$0xff]  }
  0x2b   :  { %1508 = vmatprep.subr.bf16.mxu0 %v384_v6  ;;  %1575 = vmatprep.subr.bf16.mxu1 %v384_v6  ;;  %v1594_v15 = vld [vmem:[%s2324_s0 + $0xa0] sm:$0xff]   ;;  %v1596_v17 = vld [vmem:[%s2324_s0 + $0xa8] sm:$0xff]   ;;  %v1597_v18 = vld [vmem:[%s2324_s0 + $0x30] sm:$0xff]  }
  0x2c   :  { %v1598_v19 = vld [vmem:[%s2324_s0 + $0xb0] sm:$0xff]   ;;  %v1599_v20 = vld [vmem:[%s2324_s0 + $0x38] sm:$0xff]   ;;  %v1601_v22 = vld [vmem:[%s2324_s0 + $0x40] sm:$0xff]  }
  0x2d   :  { %1509 = vmatpush3.bf16.msra.mxu0 %v384_v6  ;;  %1577 = vmatpush3.bf16.msra.mxu1 %v384_v6  ;;  %v1600_v21 = vld [vmem:[%s2324_s0 + $0xb8] sm:$0xff]   ;;  %v1602_v23 = vld [vmem:[%s2324_s0 + $0xc0] sm:$0xff]   ;;  %v1603_v24 = vld [vmem:[%s2324_s0 + $0x48] sm:$0xff]  }
  0x2e   :  { %v1604_v25 = vld [vmem:[%s2324_s0 + $0xc8] sm:$0xff]   ;;  %v1605_v26 = vld [vmem:[%s2324_s0 + $0x50] sm:$0xff]   ;;  %v1607_v28 = vld [vmem:[%s2324_s0 + $0x58] sm:$0xff]  }
  0x2f   :  { %v1606_v27 = vld [vmem:[%s2324_s0 + $0xd0] sm:$0xff]   ;;  %v1608_v29 = vld [vmem:[%s2324_s0 + $0xd8] sm:$0xff]   ;;  %v1609_v30 = vld [vmem:[%s2324_s0 + $0x60] sm:$0xff]  }
  0x30   :  { %1511 = vmatmul.mubr.msk.bf16.vlgmr.msra.gmra.mrb[0].mxu0 %vm282_vm2, %v1587_v8  ;;  %1543 = vmatmul.mubr.msk.bf16.vlgmr.msra.gmra.mrb[0].mxu1 %vm282_vm2, %v1588_v9  ;;  %v1610_v31 = vld [vmem:[%s2324_s0 + $0xe0] sm:$0xff]   ;;  %v1611_v32 = vld [vmem:[%s2324_s0 + $0x68] sm:$0xff]   ;;  %v1613_v34 = vld [vmem:[%s2324_s0 + $0x70] sm:$0xff]  }
  0x31   :  { %1514 = vmatprep.mubr.msk.bf16.mxu0 %vm282_vm2, %v1589_v10  ;;  %1546 = vmatprep.mubr.msk.bf16.mxu1 %vm282_vm2, %v1590_v11  ;;  %v1612_v33 = vld [vmem:[%s2324_s0 + $0xe8] sm:$0xff]   ;;  %v1614_v35 = vld [vmem:[%s2324_s0 + $0xf0] sm:$0xff]   ;;  %v1615_v36 = vld [vmem:[%s2324_s0 + $0x78] sm:$0xff]  }
  0x32   :  { %v1616_v37 = vld [vmem:[%s2324_s0 + $0xf8] sm:$0xff]   ;;  %v1847_v38 = vld [vmem:[#allocation4] ss:$0 sm:$0xff] }
  0x38   :  { %1515 = vmatmul.mubr.msk.bf16.gmra.mrb[4].mxu0 %vm282_vm2, %v1591_v12  ;;  %1547 = vmatmul.mubr.msk.bf16.gmra.mrb[4].mxu1 %vm282_vm2, %v1592_v13 }
  0x39   :  { %1518 = vmatprep.mubr.msk.bf16.mxu0 %vm282_vm2, %v1593_v14  ;;  %1550 = vmatprep.mubr.msk.bf16.mxu1 %vm282_vm2, %v1594_v15 }
  0x40   :  { %1519 = vmatmul.mubr.msk.bf16.gmra.mrb[8].mxu0 %vm282_vm2, %v1595_v16  ;;  %1551 = vmatmul.mubr.msk.bf16.gmra.mrb[8].mxu1 %vm282_vm2, %v1596_v17 }
  0x41   :  { %1522 = vmatprep.mubr.msk.bf16.mxu0 %vm282_vm2, %v1597_v18  ;;  %1554 = vmatprep.mubr.msk.bf16.mxu1 %vm282_vm2, %v1598_v19 }
  0x48   :  { %1523 = vmatmul.mubr.msk.bf16.gmra.mrb[12].mxu0 %vm282_vm2, %v1599_v20  ;;  %1555 = vmatmul.mubr.msk.bf16.gmra.mrb[12].mxu1 %vm282_vm2, %v1600_v21 }
  0x49   :  { %1526 = vmatprep.mubr.msk.bf16.mxu0 %vm282_vm2, %v1601_v22  ;;  %1558 = vmatprep.mubr.msk.bf16.mxu1 %vm282_vm2, %v1602_v23 }
  0x50   :  { %1527 = vmatmul.mubr.msk.bf16.gmra.mrb[16].mxu0 %vm282_vm2, %v1603_v24  ;;  %1559 = vmatmul.mubr.msk.bf16.gmra.mrb[16].mxu1 %vm282_vm2, %v1604_v25 }
  0x51   :  { %1530 = vmatprep.mubr.msk.bf16.mxu0 %vm282_vm2, %v1605_v26  ;;  %1562 = vmatprep.mubr.msk.bf16.mxu1 %vm282_vm2, %v1606_v27 }
  0x58   :  { %1531 = vmatmul.mubr.msk.bf16.gmra.mrb[20].mxu0 %vm282_vm2, %v1607_v28  ;;  %1563 = vmatmul.mubr.msk.bf16.gmra.mrb[20].mxu1 %vm282_vm2, %v1608_v29 }
  0x59   :  { %1534 = vmatprep.mubr.msk.bf16.mxu0 %vm282_vm2, %v1609_v30  ;;  %1566 = vmatprep.mubr.msk.bf16.mxu1 %vm282_vm2, %v1610_v31 }
  0x60   :  { %1535 = vmatmul.mubr.msk.bf16.gmra.mrb[24].mxu0 %vm282_vm2, %v1611_v32  ;;  %1567 = vmatmul.mubr.msk.bf16.gmra.mrb[24].mxu1 %vm282_vm2, %v1612_v33 }
  0x61   :  { %1538 = vmatprep.mubr.msk.bf16.mxu0 %vm282_vm2, %v1613_v34  ;;  %1570 = vmatprep.mubr.msk.bf16.mxu1 %vm282_vm2, %v1614_v35 }
  0x68   :  { %1539 = vmatmul.mubr.msk.bf16.gmra.mrb[28].mxu0 %vm282_vm2, %v1615_v36  ;;  %1571 = vmatmul.mubr.msk.bf16.gmra.mrb[28].mxu1 %vm282_vm2, %v1616_v37 }
 0x103   :  { %v1512_v39 = vpop.f32.mrb[0].mxu0  ;;  %v1544_v40 = vpop.f32.mrb[0].mxu1 }
 0x104   :  { %v684_v41 = vadd.f32 %v1512_v39, %v1847_v38  ;;  %v716_v42 = vadd.f32 %v1544_v40, %v1847_v38  ;;  %v1133_v43 = vsub.f32 %v1512_v39, %v1544_v40  ;;  %v420_v44 = vpop.f32.mrb[1].mxu0  ;;  %v548_v45 = vpop.f32.mrb[1].mxu1 }
 0x105   :  { %v682_v46 = vadd.f32 %v1847_v38, %v420_v44  ;;  %v714_v47 = vadd.f32 %v1847_v38, %v548_v45  ;;  %v1131_v48 = vsub.f32 %v420_v44, %v548_v45  ;;  %v1513_v49 = vpop.f32.mrb[2].mxu0  ;;  %v1545_v50 = vpop.f32.mrb[2].mxu1 }
 0x106   :  { %v748_v51 = vmax.f32 %v684_v41, 0.0  ;;  %v780_v52 = vmax.f32 %v716_v42, 0.0  ;;  %v685_v53 = vadd.f32 %v1513_v49, %v1847_v38  ;;  %v423_v54 = vpop.f32.mrb[3].mxu0  ;;  %v551_v55 = vpop.f32.mrb[3].mxu1  ;;  %v717_v58 = vadd.f32 %v1545_v50, %v1847_v38 }
 0x107   :  { %v746_v56 = vmax.f32 %v682_v46, 0.0  ;;  %v778_v57 = vmax.f32 %v714_v47, 0.0  ;;  %v1165_v62 = vmul.f32 %v1133_v43, %v1133_v43  ;;  %v1134_v3 = vsub.f32 %v1513_v49, %v1545_v50 }
 0x108   :  { %v1410_v59 = vpack.c.bf16 %v748_v51, %v748_v51  ;;  %v1442_v60 = vpack.c.bf16 %v780_v52, %v780_v52  ;;  %v749_v61 = vmax.f32 %v685_v53, 0.0  ;;  %v781_v1 = vmax.f32 %v717_v58, 0.0 }
 0x109   :  { %v1408_v63 = vpack.c.bf16 %v746_v56, %v746_v56  ;;  %v1440_v0 = vpack.c.bf16 %v778_v57, %v778_v57  ;;  %v683_v4 = vadd.f32 %v1847_v38, %v423_v54  ;;  %v715_v5 = vadd.f32 %v1847_v38, %v551_v55 }
 0x10a   :  { %1069 = vst.msk [vmem:[%s2327_s3 + $0x8] sm:$0xf] %vm1066_vm3, %v1410_v59  ;;  %1101 = vst.msk [vmem:[%s2327_s3 + $0x88] sm:$0xf] %vm1066_vm3, %v1442_v60  ;;  %v1411_v2 = vpack.c.bf16 %v749_v61, %v749_v61  ;;  %v1163_v6 = vmul.f32 %v1131_v48, %v1131_v48  ;;  %v1443_v7 = vpack.c.bf16 %v781_v1, %v781_v1  ;;  %v1199_v23 = vsel %vm1195_vm4, %v1165_v62, 0.0 }
 0x10b   :  { %1067 = vst.msk [vmem:[%s2327_s3] sm:$0xf] %vm1066_vm3, %v1408_v63  ;;  %1099 = vst.msk [vmem:[%s2327_s3 + $0x80] sm:$0xf] %vm1066_vm3, %v1440_v0  ;;  %v1132_v8 = vsub.f32 %v423_v54, %v551_v55  ;;  %v1516_v9 = vpop.f32.mrb[4].mxu0  ;;  %v1548_v10 = vpop.f32.mrb[4].mxu1  ;;  %v1166_v11 = vmul.f32 %v1134_v3, %v1134_v3 }
 0x10c   :  { %1070 = vst.msk [vmem:[%s2327_s3 + $0xc] sm:$0xf] %vm1066_vm3, %v1411_v2  ;;  %v747_v12 = vmax.f32 %v683_v4, 0.0  ;;  %v779_v13 = vmax.f32 %v715_v5, 0.0  ;;  %v688_v14 = vadd.f32 %v1516_v9, %v1847_v38  ;;  %v436_v15 = vpop.f32.mrb[5].mxu0  ;;  %v564_v16 = vpop.f32.mrb[5].mxu1  ;;  %v720_v18 = vadd.f32 %v1548_v10, %v1847_v38 }
 0x10d   :  { %1102 = vst.msk [vmem:[%s2327_s3 + $0x8c] sm:$0xf] %vm1066_vm3, %v1443_v7  ;;  %v1164_v17 = vmul.f32 %v1132_v8, %v1132_v8  ;;  %v1137_v19 = vsub.f32 %v1516_v9, %v1548_v10  ;;  %v686_v20 = vadd.f32 %v1847_v38, %v436_v15  ;;  %v1517_v21 = vpop.f32.mrb[6].mxu0  ;;  %v1549_v22 = vpop.f32.mrb[6].mxu1  ;;  %v1196_v29 = vsel %vm1195_vm4, %v1163_v6, 0.0 }
 0x10e   :  { %v1409_v24 = vpack.c.bf16 %v747_v12, %v747_v12  ;;  %v1441_v25 = vpack.c.bf16 %v779_v13, %v779_v13  ;;  %v752_v26 = vmax.f32 %v688_v14, 0.0  ;;  %v439_v27 = vpop.f32.mrb[7].mxu0  ;;  %v567_v28 = vpop.f32.mrb[7].mxu1  ;;  %v784_v31 = vmax.f32 %v720_v18, 0.0 }
 0x10f   :  { %v1197_v30 = vsel %vm1195_vm4, %v1164_v17, 0.0  ;;  %v750_v32 = vmax.f32 %v686_v20, 0.0  ;;  %v718_v35 = vadd.f32 %v1847_v38, %v564_v16  ;;  %v1135_v36 = vsub.f32 %v436_v15, %v564_v16 }
 0x110   :  { %1068 = vst.msk [vmem:[%s2327_s3 + $0x4] sm:$0xf] %vm1066_vm3, %v1409_v24  ;;  %1100 = vst.msk [vmem:[%s2327_s3 + $0x84] sm:$0xf] %vm1066_vm3, %v1441_v25  ;;  %v1198_v33 = vadd.f32 %v1197_v30, %v1196_v29  ;;  %v1414_v34 = vpack.c.bf16 %v752_v26, %v752_v26  ;;  %v1201_v37 = vsel %vm1195_vm4, %v1166_v11, 0.0  ;;  %v1446_v39 = vpack.c.bf16 %v784_v31, %v784_v31 }
 0x111   :  { %v1412_v40 = vpack.c.bf16 %v750_v32, %v750_v32  ;;  %v689_v41 = vadd.f32 %v1517_v21, %v1847_v38  ;;  %v782_v43 = vmax.f32 %v718_v35, 0.0  ;;  %v1167_v44 = vmul.f32 %v1135_v36, %v1135_v36 }
 0x112   :  { %v1200_v42 = vadd.f32 %v1199_v23, %v1198_v33  ;;  %1073 = vst.msk [vmem:[%s2327_s3 + $0x18] sm:$0xf] %vm1066_vm3, %v1414_v34  ;;  %v721_v45 = vadd.f32 %v1549_v22, %v1847_v38  ;;  %1105 = vst.msk [vmem:[%s2327_s3 + $0x98] sm:$0xf] %vm1066_vm3, %v1446_v39  ;;  %v1138_v47 = vsub.f32 %v1517_v21, %v1549_v22 }
 0x113   :  { %1071 = vst.msk [vmem:[%s2327_s3 + $0x10] sm:$0xf] %vm1066_vm3, %v1412_v40  ;;  %v753_v46 = vmax.f32 %v689_v41, 0.0  ;;  %v687_v48 = vadd.f32 %v1847_v38, %v439_v27  ;;  %v719_v49 = vadd.f32 %v1847_v38, %v567_v28  ;;  %v1520_v50 = vpop.f32.mrb[8].mxu0  ;;  %v1552_v51 = vpop.f32.mrb[8].mxu1  ;;  %v1444_v52 = vpack.c.bf16 %v782_v43, %v782_v43 }
 0x114   :  { %v1202_v53 = vadd.f32 %v1201_v37, %v1200_v42  ;;  %v1203_v54 = vsel %vm1195_vm4, %v1167_v44, 0.0  ;;  %v785_v55 = vmax.f32 %v721_v45, 0.0  ;;  %v452_v56 = vpop.f32.mrb[9].mxu0  ;;  %v580_v57 = vpop.f32.mrb[9].mxu1  ;;  %v1169_v58 = vmul.f32 %v1137_v19, %v1137_v19 }
 0x115   :  { %v1415_v59 = vpack.c.bf16 %v753_v46, %v753_v46  ;;  %v751_v60 = vmax.f32 %v687_v48, 0.0  ;;  %v783_v61 = vmax.f32 %v719_v49, 0.0  ;;  %v1521_v62 = vpop.f32.mrb[10].mxu0  ;;  %v1553_v63 = vpop.f32.mrb[10].mxu1  ;;  %1103 = vst.msk [vmem:[%s2327_s3 + $0x90] sm:$0xf] %vm1066_vm3, %v1444_v52  ;;  %v1136_v2 = vsub.f32 %v439_v27, %v567_v28 }
 0x116   :  { %v1204_v0 = vadd.f32 %v1203_v54, %v1202_v53  ;;  %v1447_v1 = vpack.c.bf16 %v785_v55, %v785_v55  ;;  %v692_v3 = vadd.f32 %v1520_v50, %v1847_v38  ;;  %v455_v4 = vpop.f32.mrb[11].mxu0  ;;  %v583_v5 = vpop.f32.mrb[11].mxu1  ;;  %v1170_v6 = vmul.f32 %v1138_v47, %v1138_v47 }
 0x117   :  { %1074 = vst.msk [vmem:[%s2327_s3 + $0x1c] sm:$0xf] %vm1066_vm3, %v1415_v59  ;;  %v1413_v7 = vpack.c.bf16 %v751_v60, %v751_v60  ;;  %v1445_v8 = vpack.c.bf16 %v783_v61, %v783_v61  ;;  %v724_v9 = vadd.f32 %v1552_v51, %v1847_v38  ;;  %v1168_v10 = vmul.f32 %v1136_v2, %v1136_v2 }
 0x118   :  { %1106 = vst.msk [vmem:[%s2327_s3 + $0x9c] sm:$0xf] %vm1066_vm3, %v1447_v1  ;;  %v756_v11 = vmax.f32 %v692_v3, 0.0  ;;  %v1141_v12 = vsub.f32 %v1520_v50, %v1552_v51  ;;  %v690_v13 = vadd.f32 %v1847_v38, %v452_v56  ;;  %v722_v15 = vadd.f32 %v1847_v38, %v580_v57 }
 0x119   :  { %1072 = vst.msk [vmem:[%s2327_s3 + $0x14] sm:$0xf] %vm1066_vm3, %v1413_v7  ;;  %1104 = vst.msk [vmem:[%s2327_s3 + $0x94] sm:$0xf] %vm1066_vm3, %v1445_v8  ;;  %v788_v14 = vmax.f32 %v724_v9, 0.0  ;;  %v1139_v16 = vsub.f32 %v452_v56, %v580_v57  ;;  %v693_v17 = vadd.f32 %v1521_v62, %v1847_v38  ;;  %v1207_v18 = vsel %vm1195_vm4, %v1169_v58, 0.0 }
 0x11a   :  { %v1205_v19 = vsel %vm1195_vm4, %v1168_v10, 0.0  ;;  %v1418_v20 = vpack.c.bf16 %v756_v11, %v756_v11  ;;  %v754_v21 = vmax.f32 %v690_v13, 0.0  ;;  %v786_v24 = vmax.f32 %v722_v15, 0.0 }
 0x11b   :  { %v1206_v22 = vadd.f32 %v1205_v19, %v1204_v0  ;;  %v1450_v23 = vpack.c.bf16 %v788_v14, %v788_v14  ;;  %v1171_v25 = vmul.f32 %v1139_v16, %v1139_v16  ;;  %v1524_v26 = vpop.f32.mrb[12].mxu0  ;;  %v1556_v27 = vpop.f32.mrb[12].mxu1  ;;  %v1209_v28 = vsel %vm1195_vm4, %v1170_v6, 0.0 }
 0x11c   :  { %1077 = vst.msk [vmem:[%s2327_s3 + $0x28] sm:$0xf] %vm1066_vm3, %v1418_v20  ;;  %v1416_v29 = vpack.c.bf16 %v754_v21, %v754_v21  ;;  %v757_v30 = vmax.f32 %v693_v17, 0.0  ;;  %v725_v31 = vadd.f32 %v1553_v63, %v1847_v38  ;;  %v468_v32 = vpop.f32.mrb[13].mxu0  ;;  %v596_v33 = vpop.f32.mrb[13].mxu1  ;;  %v1448_v35 = vpack.c.bf16 %v786_v24, %v786_v24 }
 0x11d   :  { %v1208_v34 = vadd.f32 %v1207_v18, %v1206_v22  ;;  %1109 = vst.msk [vmem:[%s2327_s3 + $0xa8] sm:$0xf] %vm1066_vm3, %v1450_v23  ;;  %v1211_v36 = vsel %vm1195_vm4, %v1171_v25, 0.0  ;;  %v1142_v37 = vsub.f32 %v1521_v62, %v1553_v63  ;;  %v1525_v39 = vpop.f32.mrb[14].mxu0  ;;  %v1557_v40 = vpop.f32.mrb[14].mxu1  ;;  %v691_v43 = vadd.f32 %v1847_v38, %v455_v4 }
 0x11e   :  { %1075 = vst.msk [vmem:[%s2327_s3 + $0x20] sm:$0xf] %vm1066_vm3, %v1416_v29  ;;  %v1419_v41 = vpack.c.bf16 %v757_v30, %v757_v30  ;;  %v789_v42 = vmax.f32 %v725_v31, 0.0  ;;  %v723_v44 = vadd.f32 %v1847_v38, %v583_v5  ;;  %v471_v45 = vpop.f32.mrb[15].mxu0  ;;  %v599_v46 = vpop.f32.mrb[15].mxu1  ;;  %v1173_v47 = vmul.f32 %v1141_v12, %v1141_v12 }
 0x11f   :  { %1107 = vst.msk [vmem:[%s2327_s3 + $0xa0] sm:$0xf] %vm1066_vm3, %v1448_v35  ;;  %v1210_v48 = vadd.f32 %v1209_v28, %v1208_v34  ;;  %v1140_v49 = vsub.f32 %v455_v4, %v583_v5  ;;  %v696_v50 = vadd.f32 %v1524_v26, %v1847_v38  ;;  %v755_v52 = vmax.f32 %v691_v43, 0.0 }
 0x120   :  { %1078 = vst.msk [vmem:[%s2327_s3 + $0x2c] sm:$0xf] %vm1066_vm3, %v1419_v41  ;;  %v1451_v51 = vpack.c.bf16 %v789_v42, %v789_v42  ;;  %v787_v53 = vmax.f32 %v723_v44, 0.0  ;;  %v728_v54 = vadd.f32 %v1556_v27, %v1847_v38  ;;  %v1174_v56 = vmul.f32 %v1142_v37, %v1142_v37 }
 0x121   :  { %v1212_v55 = vadd.f32 %v1211_v36, %v1210_v48  ;;  %v1172_v57 = vmul.f32 %v1140_v49, %v1140_v49  ;;  %v760_v58 = vmax.f32 %v696_v50, 0.0  ;;  %v1417_v59 = vpack.c.bf16 %v755_v52, %v755_v52 }
 0x122   :  { %1110 = vst.msk [vmem:[%s2327_s3 + $0xac] sm:$0xf] %vm1066_vm3, %v1451_v51  ;;  %v1449_v60 = vpack.c.bf16 %v787_v53, %v787_v53  ;;  %v792_v61 = vmax.f32 %v728_v54, 0.0  ;;  %v1145_v62 = vsub.f32 %v1524_v26, %v1556_v27  ;;  %v694_v1 = vadd.f32 %v1847_v38, %v468_v32 }
 0x123   :  { %v1213_v63 = vsel %vm1195_vm4, %v1172_v57, 0.0  ;;  %v1422_v0 = vpack.c.bf16 %v760_v58, %v760_v58  ;;  %v726_v2 = vadd.f32 %v1847_v38, %v596_v33  ;;  %v1528_v3 = vpop.f32.mrb[16].mxu0  ;;  %v1560_v4 = vpop.f32.mrb[16].mxu1  ;;  %v1215_v5 = vsel %vm1195_vm4, %v1173_v47, 0.0  ;;  %1076 = vst.msk [vmem:[%s2327_s3 + $0x24] sm:$0xf] %vm1066_vm3, %v1417_v59 }
 0x124   :  { %1108 = vst.msk [vmem:[%s2327_s3 + $0xa4] sm:$0xf] %vm1066_vm3, %v1449_v60  ;;  %v1214_v6 = vadd.f32 %v1213_v63, %v1212_v55  ;;  %v1454_v7 = vpack.c.bf16 %v792_v61, %v792_v61  ;;  %v1143_v8 = vsub.f32 %v468_v32, %v596_v33  ;;  %v1984_v9 = vpop.f32.mrb[17].mxu0  ;;  %v1986_v10 = vpop.f32.mrb[17].mxu1  ;;  %v758_v11 = vmax.f32 %v694_v1, 0.0 }
 0x125   :  { %1081 = vst.msk [vmem:[%s2327_s3 + $0x38] sm:$0xf] %vm1066_vm3, %v1422_v0  ;;  %v790_v12 = vmax.f32 %v726_v2, 0.0  ;;  %v697_v13 = vadd.f32 %v1525_v39, %v1847_v38  ;;  %v729_v14 = vadd.f32 %v1557_v40, %v1847_v38  ;;  %v1994_v15 = vpop.f32.mrb[18].mxu0  ;;  %v1996_v16 = vpop.f32.mrb[18].mxu1  ;;  %v1217_v17 = vsel %vm1195_vm4, %v1174_v56, 0.0 }
 0x126   :  { %v1216_v18 = vadd.f32 %v1215_v5, %v1214_v6  ;;  %1113 = vst.msk [vmem:[%s2327_s3 + $0xb8] sm:$0xf] %vm1066_vm3, %v1454_v7  ;;  %v1175_v19 = vmul.f32 %v1143_v8, %v1143_v8  ;;  %v1146_v20 = vsub.f32 %v1525_v39, %v1557_v40  ;;  %v2003_v21 = vpop.f32.mrb[19].mxu0  ;;  %v2005_v22 = vpop.f32.mrb[19].mxu1  ;;  %v1420_v23 = vpack.c.bf16 %v758_v11, %v758_v11 }
 0x127   :  { %v1452_v24 = vpack.c.bf16 %v790_v12, %v790_v12  ;;  %v761_v25 = vmax.f32 %v697_v13, 0.0  ;;  %v793_v26 = vmax.f32 %v729_v14, 0.0  ;;  %v1177_v27 = vmul.f32 %v1145_v62, %v1145_v62 }
 0x128   :  { %v1218_v28 = vadd.f32 %v1217_v17, %v1216_v18  ;;  %v1219_v29 = vsel %vm1195_vm4, %v1175_v19, 0.0  ;;  %v695_v30 = vadd.f32 %v1847_v38, %v471_v45  ;;  %1079 = vst.msk [vmem:[%s2327_s3 + $0x30] sm:$0xf] %vm1066_vm3, %v1420_v23  ;;  %v727_v33 = vadd.f32 %v1847_v38, %v599_v46 }
 0x129   :  { %1111 = vst.msk [vmem:[%s2327_s3 + $0xb0] sm:$0xf] %vm1066_vm3, %v1452_v24  ;;  %v1423_v31 = vpack.c.bf16 %v761_v25, %v761_v25  ;;  %v1455_v32 = vpack.c.bf16 %v793_v26, %v793_v26  ;;  %v1144_v34 = vsub.f32 %v471_v45, %v599_v46  ;;  %v1178_v36 = vmul.f32 %v1146_v20, %v1146_v20 }
 0x12a   :  { %v1220_v35 = vadd.f32 %v1219_v29, %v1218_v28  ;;  %v759_v37 = vmax.f32 %v695_v30, 0.0  ;;  %v700_v39 = vadd.f32 %v1528_v3, %v1847_v38  ;;  %v791_v40 = vmax.f32 %v727_v33, 0.0 }
 0x12b   :  { %1082 = vst.msk [vmem:[%s2327_s3 + $0x3c] sm:$0xf] %vm1066_vm3, %v1423_v31  ;;  %1114 = vst.msk [vmem:[%s2327_s3 + $0xbc] sm:$0xf] %vm1066_vm3, %v1455_v32  ;;  %v1176_v41 = vmul.f32 %v1144_v34, %v1144_v34  ;;  %v732_v42 = vadd.f32 %v1560_v4, %v1847_v38  ;;  %v1149_v43 = vsub.f32 %v1528_v3, %v1560_v4  ;;  %v2028_v44 = vpop.f32.mrb[20].mxu0  ;;  %v2030_v45 = vpop.f32.mrb[20].mxu1 }
 0x12c   :  { %v1421_v46 = vpack.c.bf16 %v759_v37, %v759_v37  ;;  %v764_v47 = vmax.f32 %v700_v39, 0.0  ;;  %v698_v48 = vadd.f32 %v1847_v38, %v1984_v9  ;;  %v730_v49 = vadd.f32 %v1847_v38, %v1986_v10  ;;  %v2036_v50 = vpop.f32.mrb[21].mxu0  ;;  %v2038_v51 = vpop.f32.mrb[21].mxu1 }
 0x12d   :  { %v1223_v52 = vsel %vm1195_vm4, %v1177_v27, 0.0  ;;  %v1453_v53 = vpack.c.bf16 %v791_v40, %v791_v40  ;;  %v1221_v54 = vsel %vm1195_vm4, %v1176_v41, 0.0  ;;  %v796_v55 = vmax.f32 %v732_v42, 0.0  ;;  %v2042_v56 = vpop.f32.mrb[22].mxu0  ;;  %v2044_v57 = vpop.f32.mrb[22].mxu1 }
 0x12e   :  { %1080 = vst.msk [vmem:[%s2327_s3 + $0x34] sm:$0xf] %vm1066_vm3, %v1421_v46  ;;  %v1222_v58 = vadd.f32 %v1221_v54, %v1220_v35  ;;  %v1426_v59 = vpack.c.bf16 %v764_v47, %v764_v47  ;;  %v762_v60 = vmax.f32 %v698_v48, 0.0  ;;  %v794_v61 = vmax.f32 %v730_v49, 0.0  ;;  %v2050_v62 = vpop.f32.mrb[23].mxu0  ;;  %v2052_v63 = vpop.f32.mrb[23].mxu1 }
 0x12f   :  { %v1225_v0 = vsel %vm1195_vm4, %v1178_v36, 0.0  ;;  %1112 = vst.msk [vmem:[%s2327_s3 + $0xb4] sm:$0xf] %vm1066_vm3, %v1453_v53  ;;  %v1458_v1 = vpack.c.bf16 %v796_v55, %v796_v55  ;;  %v1147_v2 = vsub.f32 %v1984_v9, %v1986_v10  ;;  %v701_v3 = vadd.f32 %v1994_v15, %v1847_v38 }
 0x130   :  { %v1224_v4 = vadd.f32 %v1223_v52, %v1222_v58  ;;  %1085 = vst.msk [vmem:[%s2327_s3 + $0x48] sm:$0xf] %vm1066_vm3, %v1426_v59  ;;  %v1424_v5 = vpack.c.bf16 %v762_v60, %v762_v60  ;;  %v1456_v6 = vpack.c.bf16 %v794_v61, %v794_v61  ;;  %v733_v7 = vadd.f32 %v1996_v16, %v1847_v38 }
 0x131   :  { %1117 = vst.msk [vmem:[%s2327_s3 + $0xc8] sm:$0xf] %vm1066_vm3, %v1458_v1  ;;  %v1179_v8 = vmul.f32 %v1147_v2, %v1147_v2  ;;  %v765_v9 = vmax.f32 %v701_v3, 0.0  ;;  %v1150_v10 = vsub.f32 %v1994_v15, %v1996_v16  ;;  %v699_v11 = vadd.f32 %v1847_v38, %v2003_v21 }
 0x132   :  { %1083 = vst.msk [vmem:[%s2327_s3 + $0x40] sm:$0xf] %vm1066_vm3, %v1424_v5  ;;  %1115 = vst.msk [vmem:[%s2327_s3 + $0xc0] sm:$0xf] %vm1066_vm3, %v1456_v6  ;;  %v1226_v12 = vadd.f32 %v1225_v0, %v1224_v4  ;;  %v797_v13 = vmax.f32 %v733_v7, 0.0  ;;  %v731_v14 = vadd.f32 %v1847_v38, %v2005_v22  ;;  %v1148_v15 = vsub.f32 %v2003_v21, %v2005_v22 }
 0x133   :  { %v1181_v16 = vmul.f32 %v1149_v43, %v1149_v43  ;;  %v1227_v17 = vsel %vm1195_vm4, %v1179_v8, 0.0  ;;  %v1427_v18 = vpack.c.bf16 %v765_v9, %v765_v9  ;;  %v763_v19 = vmax.f32 %v699_v11, 0.0  ;;  %v2090_v20 = vpop.f32.mrb[24].mxu0  ;;  %v2092_v23 = vpop.f32.mrb[24].mxu1 }
 0x134   :  { %v1228_v24 = vadd.f32 %v1227_v17, %v1226_v12  ;;  %v1459_v25 = vpack.c.bf16 %v797_v13, %v797_v13  ;;  %v795_v26 = vmax.f32 %v731_v14, 0.0  ;;  %v1180_v27 = vmul.f32 %v1148_v15, %v1148_v15  ;;  %v2094_v28 = vpop.f32.mrb[25].mxu0  ;;  %v2096_v29 = vpop.f32.mrb[25].mxu1 }
 0x135   :  { %1086 = vst.msk [vmem:[%s2327_s3 + $0x4c] sm:$0xf] %vm1066_vm3, %v1427_v18  ;;  %v1182_v21 = vmul.f32 %v1150_v10, %v1150_v10  ;;  %v1425_v22 = vpack.c.bf16 %v763_v19, %v763_v19  ;;  %v704_v30 = vadd.f32 %v2028_v44, %v1847_v38  ;;  %v736_v31 = vadd.f32 %v2030_v45, %v1847_v38  ;;  %v2106_v32 = vpop.f32.mrb[26].mxu0  ;;  %v2108_v33 = vpop.f32.mrb[26].mxu1 }
 0x136   :  { %1118 = vst.msk [vmem:[%s2327_s3 + $0xcc] sm:$0xf] %vm1066_vm3, %v1459_v25  ;;  %v1457_v34 = vpack.c.bf16 %v795_v26, %v795_v26  ;;  %v1229_v35 = vsel %vm1195_vm4, %v1180_v27, 0.0  ;;  %v1153_v36 = vsub.f32 %v2028_v44, %v2030_v45  ;;  %v702_v37 = vadd.f32 %v1847_v38, %v2036_v50  ;;  %v2119_v39 = vpop.f32.mrb[27].mxu0  ;;  %v2121_v40 = vpop.f32.mrb[27].mxu1 }
 0x137   :  { %1084 = vst.msk [vmem:[%s2327_s3 + $0x44] sm:$0xf] %vm1066_vm3, %v1425_v22  ;;  %v1230_v41 = vadd.f32 %v1229_v35, %v1228_v24  ;;  %v768_v42 = vmax.f32 %v704_v30, 0.0  ;;  %v800_v43 = vmax.f32 %v736_v31, 0.0  ;;  %v734_v46 = vadd.f32 %v1847_v38, %v2038_v51 }
 0x138   :  { %v1231_v44 = vsel %vm1195_vm4, %v1181_v16, 0.0  ;;  %1116 = vst.msk [vmem:[%s2327_s3 + $0xc4] sm:$0xf] %vm1066_vm3, %v1457_v34  ;;  %v766_v45 = vmax.f32 %v702_v37, 0.0  ;;  %v1151_v47 = vsub.f32 %v2036_v50, %v2038_v51  ;;  %v705_v48 = vadd.f32 %v2042_v56, %v1847_v38 }
 0x139   :  { %v1232_v49 = vadd.f32 %v1231_v44, %v1230_v41  ;;  %v1430_v52 = vpack.c.bf16 %v768_v42, %v768_v42  ;;  %v1462_v53 = vpack.c.bf16 %v800_v43, %v800_v43  ;;  %v798_v54 = vmax.f32 %v734_v46, 0.0 }
 0x13a   :  { %v1233_v55 = vsel %vm1195_vm4, %v1182_v21, 0.0  ;;  %v1428_v58 = vpack.c.bf16 %v766_v45, %v766_v45  ;;  %v1183_v59 = vmul.f32 %v1151_v47, %v1151_v47  ;;  %v769_v60 = vmax.f32 %v705_v48, 0.0 }
 0x13b   :  { %1089 = vst.msk [vmem:[%s2327_s3 + $0x58] sm:$0xf] %vm1066_vm3, %v1430_v52  ;;  %1121 = vst.msk [vmem:[%s2327_s3 + $0xd8] sm:$0xf] %vm1066_vm3, %v1462_v53  ;;  %v1460_v50 = vpack.c.bf16 %v798_v54, %v798_v54  ;;  %v1234_v51 = vadd.f32 %v1233_v55, %v1232_v49  ;;  %v737_v61 = vadd.f32 %v2044_v57, %v1847_v38  ;;  %v2151_v1 = vpop.f32.mrb[28].mxu0  ;;  %v2153_v2 = vpop.f32.mrb[28].mxu1 }
 0x13c   :  { %v1154_v0 = vsub.f32 %v2042_v56, %v2044_v57  ;;  %1087 = vst.msk [vmem:[%s2327_s3 + $0x50] sm:$0xf] %vm1066_vm3, %v1428_v58  ;;  %v1235_v3 = vsel %vm1195_vm4, %v1183_v59, 0.0  ;;  %v1431_v4 = vpack.c.bf16 %v769_v60, %v769_v60  ;;  %v703_v5 = vadd.f32 %v1847_v38, %v2050_v62  ;;  %v2164_v7 = vpop.f32.mrb[29].mxu0  ;;  %v2166_v56 = vpop.f32.mrb[29].mxu1 }
 0x13d   :  { %v735_v6 = vadd.f32 %v1847_v38, %v2052_v63  ;;  %v1185_v57 = vmul.f32 %v1153_v36, %v1153_v36  ;;  %1119 = vst.msk [vmem:[%s2327_s3 + $0xd0] sm:$0xf] %vm1066_vm3, %v1460_v50  ;;  %v1236_v8 = vadd.f32 %v1235_v3, %v1234_v51  ;;  %v801_v9 = vmax.f32 %v737_v61, 0.0  ;;  %v2174_v11 = vpop.f32.mrb[30].mxu0  ;;  %v2176_v12 = vpop.f32.mrb[30].mxu1 }
 0x13e   :  { %v1152_v10 = vsub.f32 %v2050_v62, %v2052_v63  ;;  %1090 = vst.msk [vmem:[%s2327_s3 + $0x5c] sm:$0xf] %vm1066_vm3, %v1431_v4  ;;  %v767_v13 = vmax.f32 %v703_v5, 0.0  ;;  %v708_v15 = vadd.f32 %v2090_v20, %v1847_v38  ;;  %v740_v16 = vadd.f32 %v2092_v23, %v1847_v38  ;;  %v2186_v17 = vpop.f32.mrb[31].mxu0  ;;  %v2188_v62 = vpop.f32.mrb[31].mxu1 }
 0x13f   :  { %v799_v14 = vmax.f32 %v735_v6, 0.0  ;;  %v1463_v63 = vpack.c.bf16 %v801_v9, %v801_v9  ;;  %v1186_v18 = vmul.f32 %v1154_v0, %v1154_v0  ;;  %v1157_v24 = vsub.f32 %v2090_v20, %v2092_v23 }
 0x140   :  { %v1184_v19 = vmul.f32 %v1152_v10, %v1152_v10  ;;  %v1429_v25 = vpack.c.bf16 %v767_v13, %v767_v13  ;;  %v772_v27 = vmax.f32 %v708_v15, 0.0  ;;  %v804_v21 = vmax.f32 %v740_v16, 0.0 }
 0x141   :  { %v1461_v26 = vpack.c.bf16 %v799_v14, %v799_v14  ;;  %v1239_v22 = vsel %vm1195_vm4, %v1185_v57, 0.0  ;;  %1122 = vst.msk [vmem:[%s2327_s3 + $0xdc] sm:$0xf] %vm1066_vm3, %v1463_v63  ;;  %v706_v31 = vadd.f32 %v1847_v38, %v2094_v28  ;;  %v738_v34 = vadd.f32 %v1847_v38, %v2096_v29 }
 0x142   :  { %v1237_v30 = vsel %vm1195_vm4, %v1184_v19, 0.0  ;;  %1088 = vst.msk [vmem:[%s2327_s3 + $0x54] sm:$0xf] %vm1066_vm3, %v1429_v25  ;;  %v1434_v23 = vpack.c.bf16 %v772_v27, %v772_v27  ;;  %v1466_v35 = vpack.c.bf16 %v804_v21, %v804_v21  ;;  %v1155_v36 = vsub.f32 %v2094_v28, %v2096_v29 }
 0x143   :  { %1120 = vst.msk [vmem:[%s2327_s3 + $0xd4] sm:$0xf] %vm1066_vm3, %v1461_v26  ;;  %v1238_v20 = vadd.f32 %v1237_v30, %v1236_v8  ;;  %v1241_v37 = vsel %vm1195_vm4, %v1186_v18, 0.0  ;;  %v770_v41 = vmax.f32 %v706_v31, 0.0  ;;  %v802_v42 = vmax.f32 %v738_v34, 0.0 }
 0x144   :  { %v709_v43 = vadd.f32 %v2106_v32, %v1847_v38  ;;  %1093 = vst.msk [vmem:[%s2327_s3 + $0x68] sm:$0xf] %vm1066_vm3, %v1434_v23  ;;  %1125 = vst.msk [vmem:[%s2327_s3 + $0xe8] sm:$0xf] %vm1066_vm3, %v1466_v35  ;;  %v1187_v44 = vmul.f32 %v1155_v36, %v1155_v36  ;;  %v741_v28 = vadd.f32 %v2108_v33, %v1847_v38 }
 0x145   :  { %v1240_v46 = vadd.f32 %v1239_v22, %v1238_v20  ;;  %v1158_v29 = vsub.f32 %v2106_v32, %v2108_v33  ;;  %v1432_v45 = vpack.c.bf16 %v770_v41, %v770_v41  ;;  %v1464_v47 = vpack.c.bf16 %v802_v42, %v802_v42 }
 0x146   :  { %v773_v48 = vmax.f32 %v709_v43, 0.0  ;;  %v707_v49 = vadd.f32 %v1847_v38, %v2119_v39  ;;  %v1189_v52 = vmul.f32 %v1157_v24, %v1157_v24  ;;  %v1243_v54 = vsel %vm1195_vm4, %v1187_v44, 0.0 }
 0x147   :  { %v1242_v53 = vadd.f32 %v1241_v37, %v1240_v46  ;;  %v805_v55 = vmax.f32 %v741_v28, 0.0  ;;  %1091 = vst.msk [vmem:[%s2327_s3 + $0x60] sm:$0xf] %vm1066_vm3, %v1432_v45  ;;  %1123 = vst.msk [vmem:[%s2327_s3 + $0xe0] sm:$0xf] %vm1066_vm3, %v1464_v47  ;;  %v739_v58 = vadd.f32 %v1847_v38, %v2121_v40  ;;  %v1156_v59 = vsub.f32 %v2119_v39, %v2121_v40 }
 0x148   :  { %v1435_v32 = vpack.c.bf16 %v773_v48, %v773_v48  ;;  %v771_v33 = vmax.f32 %v707_v49, 0.0  ;;  %v1190_v51 = vmul.f32 %v1158_v29, %v1158_v29  ;;  %v712_v61 = vadd.f32 %v2151_v1, %v1847_v38 }
 0x149   :  { %v1244_v60 = vadd.f32 %v1243_v54, %v1242_v53  ;;  %v1467_v50 = vpack.c.bf16 %v805_v55, %v805_v55  ;;  %v803_v3 = vmax.f32 %v739_v58, 0.0  ;;  %v1188_v4 = vmul.f32 %v1156_v59, %v1156_v59 }
 0x14a   :  { %1094 = vst.msk [vmem:[%s2327_s3 + $0x6c] sm:$0xf] %vm1066_vm3, %v1435_v32  ;;  %v1433_v0 = vpack.c.bf16 %v771_v33, %v771_v33  ;;  %v744_v5 = vadd.f32 %v2153_v2, %v1847_v38  ;;  %v776_v39 = vmax.f32 %v712_v61, 0.0  ;;  %v1161_v40 = vsub.f32 %v2151_v1, %v2153_v2 }
 0x14b   :  { %1126 = vst.msk [vmem:[%s2327_s3 + $0xec] sm:$0xf] %vm1066_vm3, %v1467_v50  ;;  %v710_v6 = vadd.f32 %v1847_v38, %v2164_v7  ;;  %v742_v57 = vadd.f32 %v1847_v38, %v2166_v56  ;;  %v1465_v8 = vpack.c.bf16 %v803_v3, %v803_v3  ;;  %v1245_v9 = vsel %vm1195_vm4, %v1188_v4, 0.0 }
 0x14c   :  { %1092 = vst.msk [vmem:[%s2327_s3 + $0x64] sm:$0xf] %vm1066_vm3, %v1433_v0  ;;  %v808_v10 = vmax.f32 %v744_v5, 0.0  ;;  %v1159_v13 = vsub.f32 %v2164_v7, %v2166_v56  ;;  %v1247_v1 = vsel %vm1195_vm4, %v1189_v52, 0.0  ;;  %v1246_v2 = vadd.f32 %v1245_v9, %v1244_v60 }
 0x14d   :  { %v1438_v14 = vpack.c.bf16 %v776_v39, %v776_v39  ;;  %v774_v15 = vmax.f32 %v710_v6, 0.0  ;;  %1124 = vst.msk [vmem:[%s2327_s3 + $0xe4] sm:$0xf] %vm1066_vm3, %v1465_v8  ;;  %v806_v63 = vmax.f32 %v742_v57, 0.0  ;;  %v713_v19 = vadd.f32 %v2174_v11, %v1847_v38 }
 0x14e   :  { %v1470_v16 = vpack.c.bf16 %v808_v10, %v808_v10  ;;  %v1191_v18 = vmul.f32 %v1159_v13, %v1159_v13  ;;  %v1249_v24 = vsel %vm1195_vm4, %v1190_v51, 0.0  ;;  %v1248_v25 = vadd.f32 %v1247_v1, %v1246_v2 }
 0x14f   :  { %1097 = vst.msk [vmem:[%s2327_s3 + $0x78] sm:$0xf] %vm1066_vm3, %v1438_v14  ;;  %v1436_v7 = vpack.c.bf16 %v774_v15, %v774_v15  ;;  %v745_v56 = vadd.f32 %v2176_v12, %v1847_v38  ;;  %v1468_v26 = vpack.c.bf16 %v806_v63, %v806_v63  ;;  %v777_v21 = vmax.f32 %v713_v19, 0.0 }
 0x150   :  { %1129 = vst.msk [vmem:[%s2327_s3 + $0xf8] sm:$0xf] %vm1066_vm3, %v1470_v16  ;;  %v1251_v27 = vsel %vm1195_vm4, %v1191_v18, 0.0  ;;  %v1162_v22 = vsub.f32 %v2174_v11, %v2176_v12  ;;  %v1250_v30 = vadd.f32 %v1249_v24, %v1248_v25  ;;  %v711_v34 = vadd.f32 %v1847_v38, %v2186_v17 }
 0x151   :  { %1095 = vst.msk [vmem:[%s2327_s3 + $0x70] sm:$0xf] %vm1066_vm3, %v1436_v7  ;;  %v809_v31 = vmax.f32 %v745_v56, 0.0  ;;  %v743_v20 = vadd.f32 %v1847_v38, %v2188_v62  ;;  %1127 = vst.msk [vmem:[%s2327_s3 + $0xf0] sm:$0xf] %vm1066_vm3, %v1468_v26  ;;  %v1439_v23 = vpack.c.bf16 %v777_v21, %v777_v21  ;;  %v1160_v11 = vsub.f32 %v2186_v17, %v2188_v62 }
 0x152   :  { %v1252_v12 = vadd.f32 %v1251_v27, %v1250_v30  ;;  %v775_v36 = vmax.f32 %v711_v34, 0.0  ;;  %v1193_v41 = vmul.f32 %v1161_v40, %v1161_v40  ;;  %v1194_v46 = vmul.f32 %v1162_v22, %v1162_v22 }
 0x153   :  { %v1471_v35 = vpack.c.bf16 %v809_v31, %v809_v31  ;;  %v807_v37 = vmax.f32 %v743_v20, 0.0  ;;  %1098 = vst.msk [vmem:[%s2327_s3 + $0x7c] sm:$0xf] %vm1066_vm3, %v1439_v23  ;;  %v1192_v38 = vmul.f32 %v1160_v11, %v1160_v11 }
 0x154   :  { %v1437_v42 = vpack.c.bf16 %v775_v36, %v775_v36  ;;  %v1255_v44 = vsel %vm1195_vm4, %v1193_v41, 0.0  ;;  %v1257_v29 = vsel %vm1195_vm4, %v1194_v46, 0.0 }
 0x155   :  { %1130 = vst.msk [vmem:[%s2327_s3 + $0xfc] sm:$0xf] %vm1066_vm3, %v1471_v35  ;;  %v1469_v43 = vpack.c.bf16 %v807_v37, %v807_v37  ;;  %v1253_v17 = vsel %vm1195_vm4, %v1192_v38, 0.0 }
 0x156   :  { %1096 = vst.msk [vmem:[%s2327_s3 + $0x74] sm:$0xf] %vm1066_vm3, %v1437_v42  ;;  %v1254_v62 = vadd.f32 %v1253_v17, %v1252_v12 }
 0x157   :  { %1128 = vst.msk [vmem:[%s2327_s3 + $0xf4] sm:$0xf] %vm1066_vm3, %v1469_v43 }
 0x158   :  { %v1256_v28 = vadd.f32 %v1255_v44, %v1254_v62 }
 0x15a   :  { %v1258_v45 = vadd.f32 %v1257_v29, %v1256_v28 }
 0x15c   :  { %v1259_v47 = vrot.slane %v1258_v45, 4 }
 0x15e   :  { %v1260_v48 = vadd.f32 %v1259_v47, %v1258_v45 }
 0x160   :  { %v1261_v49 = vrot.slane %v1260_v48, 2 }
 0x162   :  { %v1262_v52 = vadd.f32 %v1261_v49, %v1260_v48 }
 0x164   :  { %v1263_v53 = vrot.slane %v1262_v52, 1 }
 0x166   :  { %v1264_v54 = vadd.f32 %v1263_v53, %v1262_v52 }
 0x168   :  { %1266 = vst.msk [vmem:[%s2328_s4] sm:$0x1] %vm1265_vm5, %v1264_v54 }
 0x169   :  { %1275 = vsyncpa [#allocation3], 1 }
 0x16a   :  { %1276 = vsyncpa [#allocation5], 1 }

// kernel: vgg19_feature_loss.17
= control target key start
LH: loop header
LB: loop body
LE: loop exit
PB: predicated region body
PF: predicated region fallthrough
CT: control target
= control target key end

     0   :  { %10 = vsyncpa [#allocation3], 0  ;;  %s3737_s15 = smov [#allocation2]   ;;  %s5239_s0 = inlined_call_operand.vmem [shape: bf16[512,576], index: 0, kind: input, shape index: {}]   ;;  %s5240_s1 = inlined_call_operand.vmem [shape: bf16[1,576,64], index: 1, kind: input, shape index: {}]   ;;  %s5241_s2 = inlined_call_operand.hbm [shape: f32[1,64], index: 2, kind: input, shape index: {}]   ;;  %s5242_s3 = inlined_call_operand.vmem [shape: bf16[512,64], index: 3, kind: output, shape index: {0}]   ;;  %s5243_s4 = inlined_call_operand.vmem [shape: f32[1,64], index: 4, kind: output, shape index: {1}]  }
   0x1   :  { %s21_s16 = sshll.u32 %s3737_s15, 4  ;;  %s3713_s19 = scalar_lea.hbm %s5241_s2, 16  ;;  %s22_s16 = int_to_ptr.vmem [resolvable:$true] %s21_s16 }
   0x2   :  { %p3714_p0 = scmp.ne.s32.totalorder %s5241_s2, %s3713_s19  ;;  %p3717_p1 = scmp.lt.u32.totalorder %s3713_s19, %s5241_s2 }
   0x4   :  { %p3719_p2 = pnand %p3717_p1, %p3714_p0 }
   0x6   :  { %3722 = shalt.err (!%p3719_p2)
}
   0x7   :  { %s3723_s24 = scalar_lea.vmem %s22_s16, 16  ;;  %s3727_s25 = scalar_lea.vmem %s22_s16, 32 }
   0x8   :  { %p3724_p3 = scmp.ne.s32.totalorder %s22_s16, %s3723_s24  ;;  %p3728_p4 = scmp.lt.s32.totalorder %s22_s16, %s22_s16 }
   0x9   :  { %p3729_p5 = scmp.lt.s32.totalorder %s3727_s25, %s3723_s24 }
   0xb   :  { %p3730_p6 = por %p3729_p5, %p3728_p4 }
   0xd   :  { %p3731_p7 = pnand %p3730_p6, %p3724_p3 }
   0xf   :  { %3734 = shalt.err (!%p3731_p7)
}
  0x10   :  { %24 = dma.hbm_to_vmem [thread:$0]  %s5241_s2, 16, %s22_s16, [#allocation3]  }
  0x11   :  { %3735 = dma.done.wait [#allocation3], 16  }
  0x12   :  { %3736 = vsyncadd [#allocation3], 4294967280  ;;  %v3738_v0 = vmov 0   ;;  %v3452_v1 = vld [vmem:[%s5240_s1] sm:$0xff]   ;;  %v3453_v2 = vld [vmem:[%s5240_s1 + $0x8] sm:$0xff]   ;;  %vm1309_vm0 = vcmask 523264  }
  0x13   :  { %1406 = vmatprep.subr.bf16.mxu0 %v3738_v0  ;;  %3338 = vmatprep.subr.bf16.mxu1 %v3738_v0  ;;  %v3454_v3 = vld [vmem:[%s5240_s1 + $0x10] sm:$0xff]   ;;  %v3455_v4 = vld [vmem:[%s5240_s1 + $0x18] sm:$0xff]   ;;  %v3456_v5 = vld [vmem:[%s5240_s1 + $0x20] sm:$0xff]   ;;  %vm2664_vm1 = vcmask 519168   ;;  %vm2862_vm2 = vcmask 516096  }
  0x14   :  { %1407 = vmatpush1.bf16.msra.mxu0 %v3452_v1  ;;  %3354 = vmatpush1.bf16.msra.mxu1 %v3452_v1  ;;  %v3470_v6 = vld [vmem:[%s5239_s0 + $0x4] ss:$20 sps:$4 sm:$0xff]   ;;  %v3457_v7 = vld [vmem:[%s5240_s1 + $0x28] sm:$0xff]   ;;  %v3458_v9 = vld [vmem:[%s5240_s1 + $0x30] sm:$0xff]  }
  0x15   :  { %1408 = vmatprep.subr.bf16.mxu0 %v3738_v0  ;;  %3339 = vmatprep.subr.bf16.mxu1 %v3738_v0  ;;  %v3473_v8 = vld [vmem:[%s5239_s0 + $0x144] ss:$20 sps:$4 sm:$0xff]   ;;  %v3461_v12 = vld [vmem:[%s5240_s1 + $0x48] sm:$0xff]   ;;  %v3462_v13 = vld [vmem:[%s5240_s1 + $0x50] sm:$0xff]  }
  0x16   :  { %1438 = vmatprep.mubr.bf16.mxu0 %v3470_v6  ;;  %1502 = vmatprep.mubr.bf16.mxu1 %v3473_v8  ;;  %v3459_v10 = vld [vmem:[%s5240_s1 + $0x38] sm:$0xff]   ;;  %v3460_v11 = vld [vmem:[%s5240_s1 + $0x40] sm:$0xff]   ;;  %v3465_v16 = vld [vmem:[%s5240_s1 + $0x68] sm:$0xff]  }
  0x17   :  { %v3463_v14 = vld [vmem:[%s5240_s1 + $0x58] sm:$0xff]   ;;  %v3464_v15 = vld [vmem:[%s5240_s1 + $0x60] sm:$0xff]   ;;  %v3466_v17 = vld [vmem:[%s5240_s1 + $0x70] sm:$0xff]  }
  0x18   :  { %1409 = vmatpush1.bf16.msra.mxu0 %v3453_v2  ;;  %3355 = vmatpush1.bf16.msra.mxu1 %v3453_v2  ;;  %v3467_v18 = vld [vmem:[%s5240_s1 + $0x78] sm:$0xff]   ;;  %v3474_v19 = vld [vmem:[%s5240_s1 + $0x100] sm:$0xff]   ;;  %v3523_v25 = vld [vmem:[%s5240_s1 + $0x108] sm:$0xff]  }
  0x19   :  { %1410 = vmatprep.subr.bf16.mxu0 %v3738_v0  ;;  %3340 = vmatprep.subr.bf16.mxu1 %v3738_v0  ;;  %v3468_v20 = vld [vmem:[%s5239_s0] ss:$20 sps:$4 sm:$0xff]   ;;  %v3476_v26 = vld [vmem:[%s5240_s1 + $0x88] sm:$0xff]   ;;  %v3484_v33 = vld [vmem:[%s5240_s1 + $0x98] sm:$0xff]  }
  0x1a   :  { %v3471_v21 = vld [vmem:[%s5239_s0 + $0x140] ss:$20 sps:$4 sm:$0xff]   ;;  %v3481_v27 = vld [vmem:[%s5239_s0 + $0x28] ss:$20 sps:$4 sm:$0xff]   ;;  %v3489_v34 = vld [vmem:[%s5239_s0 + $0x50] ss:$20 sps:$4 sm:$0xff]  }
  0x1b   :  { %v3475_v22 = vld [vmem:[%s5240_s1 + $0x80] sm:$0xff]   ;;  %v3482_v28 = vld [vmem:[%s5239_s0 + $0x168] ss:$20 sps:$4 sm:$0xff]   ;;  %v3483_v29 = vld [vmem:[%s5240_s1 + $0x90] sm:$0xff]  }
  0x1c   :  { %1411 = vmatpush1.bf16.msra.mxu0 %v3454_v3  ;;  %3356 = vmatpush1.bf16.msra.mxu1 %v3454_v3  ;;  %v3477_v23 = vld [vmem:[%s5239_s0 + $0x2c] ss:$20 sps:$4 sm:$0xff]   ;;  %v3564_v30 = vld [vmem:[%s5240_s1 + $0x110] sm:$0xff]   ;;  %v3501_v43 = vld [vmem:[%s5239_s0 + $0xa4] ss:$20 sps:$4 sm:$0xff]  }
  0x1d   :  { %1412 = vmatprep.subr.bf16.mxu0 %v3738_v0  ;;  %3341 = vmatprep.subr.bf16.mxu1 %v3738_v0  ;;  %v3479_v24 = vld [vmem:[%s5239_s0 + $0x16c] ss:$20 sps:$4 sm:$0xff]   ;;  %v3485_v31 = vld [vmem:[%s5239_s0 + $0x54] ss:$20 sps:$4 sm:$0xff]   ;;  %v3490_v35 = vld [vmem:[%s5239_s0 + $0x190] ss:$20 sps:$4 sm:$0xff]  }
  0x1e   :  { %v3487_v32 = vld [vmem:[%s5239_s0 + $0x194] ss:$20 sps:$4 sm:$0xff]   ;;  %v3491_v36 = vld [vmem:[%s5240_s1 + $0xa0] sm:$0xff]   ;;  %v3493_v37 = vld [vmem:[%s5239_s0 + $0x7c] ss:$20 sps:$4 sm:$0xff]  }
  0x1f   :  { %v3495_v38 = vld [vmem:[%s5239_s0 + $0x1bc] ss:$20 sps:$4 sm:$0xff]   ;;  %v3492_v39 = vld [vmem:[%s5240_s1 + $0xa8] sm:$0xff]   ;;  %v3503_v45 = vld [vmem:[%s5239_s0 + $0x1e4] ss:$20 sps:$4 sm:$0xff]  }
  0x20   :  { %1413 = vmatpush1.bf16.msra.mxu0 %v3455_v4  ;;  %3357 = vmatpush1.bf16.msra.mxu1 %v3455_v4  ;;  %v3497_v40 = vld [vmem:[%s5239_s0 + $0x78] ss:$20 sps:$4 sm:$0xff]   ;;  %v3499_v42 = vld [vmem:[%s5240_s1 + $0xb0] sm:$0xff]   ;;  %v3507_v49 = vld [vmem:[%s5240_s1 + $0xc0] sm:$0xff]  }
  0x21   :  { %1414 = vmatprep.subr.bf16.mxu0 %v3738_v0  ;;  %3342 = vmatprep.subr.bf16.mxu1 %v3738_v0  ;;  %v3498_v41 = vld [vmem:[%s5239_s0 + $0x1b8] ss:$20 sps:$4 sm:$0xff]   ;;  %v3505_v47 = vld [vmem:[%s5239_s0 + $0xa0] ss:$20 sps:$4 sm:$0xff]   ;;  %v3513_v53 = vld [vmem:[%s5239_s0 + $0xc8] ss:$20 sps:$4 sm:$0xff]  }
  0x22   :  { %v3601_v44 = vld [vmem:[%s5240_s1 + $0x118] sm:$0xff]   ;;  %v3506_v48 = vld [vmem:[%s5239_s0 + $0x1e0] ss:$20 sps:$4 sm:$0xff]   ;;  %v3508_v52 = vld [vmem:[%s5240_s1 + $0xc8] sm:$0xff]  }
  0x23   :  { %v3500_v46 = vld [vmem:[%s5240_s1 + $0xb8] sm:$0xff]   ;;  %v3509_v50 = vld [vmem:[%s5239_s0 + $0xcc] ss:$20 sps:$4 sm:$0xff]   ;;  %v3515_v55 = vld [vmem:[%s5240_s1 + $0xd0] sm:$0xff]  }
  0x24   :  { %1415 = vmatpush1.bf16.msra.mxu0 %v3456_v5  ;;  %3358 = vmatpush1.bf16.msra.mxu1 %v3456_v5  ;;  %v3511_v51 = vld [vmem:[%s5239_s0 + $0x20c] ss:$20 sps:$4 sm:$0xff]   ;;  %v3514_v54 = vld [vmem:[%s5239_s0 + $0x208] ss:$20 sps:$4 sm:$0xff]   ;;  %v3521_v59 = vld [vmem:[%s5239_s0 + $0xf0] ss:$20 sps:$4 sm:$0xff]  }
  0x25   :  { %1416 = vmatprep.subr.bf16.mxu0 %v3738_v0  ;;  %3343 = vmatprep.subr.bf16.mxu1 %v3738_v0  ;;  %v3517_v56 = vld [vmem:[%s5239_s0 + $0xf4] ss:$20 sps:$4 sm:$0xff]   ;;  %v3516_v58 = vld [vmem:[%s5240_s1 + $0xd8] sm:$0xff]   ;;  %v3522_v60 = vld [vmem:[%s5239_s0 + $0x230] ss:$20 sps:$4 sm:$0xff]  }
  0x26   :  { %v3519_v57 = vld [vmem:[%s5239_s0 + $0x234] ss:$20 sps:$4 sm:$0xff]   ;;  %v3524_v61 = vld [vmem:[%s5240_s1 + $0xe0] sm:$0xff]   ;;  %v3526_v62 = vld [vmem:[%s5239_s0 + $0x11c] ss:$20 sps:$4 sm:$0xff]  }
  0x27   :  { %v3528_v63 = vld [vmem:[%s5239_s0 + $0x25c] ss:$20 sps:$4 sm:$0xff]   ;;  %v3525_v1 = vld [vmem:[%s5240_s1 + $0xe8] sm:$0xff]   ;;  %v3534_v5 = vld [vmem:[%s5239_s0 + $0x284] ss:$20 sps:$4 sm:$0xff]  }
  0x28   :  { %1417 = vmatpush1.bf16.msra.mxu0 %v3457_v7  ;;  %3359 = vmatpush1.bf16.msra.mxu1 %v3457_v7  ;;  %v3530_v2 = vld [vmem:[%s5239_s0 + $0x118] ss:$20 sps:$4 sm:$0xff]   ;;  %v3532_v4 = vld [vmem:[%s5240_s1 + $0xf0] sm:$0xff]   ;;  %v3536_v8 = vld [vmem:[%s5239_s0 + $0x8] ss:$20 sps:$4 sm:$0xff]  }
  0x29   :  { %1418 = vmatprep.subr.bf16.mxu0 %v3738_v0  ;;  %3344 = vmatprep.subr.bf16.mxu1 %v3738_v0  ;;  %v3531_v3 = vld [vmem:[%s5239_s0 + $0x258] ss:$20 sps:$4 sm:$0xff]  }
  0x2a   :  { %v3538_v6 = vld [vmem:[%s5239_s0 + $0xc] ss:$20 sps:$4 sm:$0xff]   ;;  %v3533_v7 = vld [vmem:[%s5240_s1 + $0xf8] sm:$0xff]  }
  0x2c   :  { %1419 = vmatpush1.bf16.msra.mxu0 %v3458_v9  ;;  %3360 = vmatpush1.bf16.msra.mxu1 %v3458_v9  ;;  %v3539_v9 = vld [vmem:[%s5239_s0 + $0x280] ss:$20 sps:$4 sm:$0xff]  }
  0x2d   :  { %1420 = vmatprep.subr.bf16.mxu0 %v3738_v0  ;;  %3345 = vmatprep.subr.bf16.mxu1 %v3738_v0 }
  0x30   :  { %1421 = vmatpush1.bf16.msra.mxu0 %v3459_v10  ;;  %3361 = vmatpush1.bf16.msra.mxu1 %v3459_v10  ;;  %v3540_v10 = vld [vmem:[%s5239_s0 + $0x2ac] ss:$20 sps:$4 sm:$0xff]  }
  0x31   :  { %1422 = vmatprep.subr.bf16.mxu0 %v3738_v0  ;;  %3346 = vmatprep.subr.bf16.mxu1 %v3738_v0 }
  0x34   :  { %1423 = vmatpush1.bf16.msra.mxu0 %v3460_v11  ;;  %3362 = vmatpush1.bf16.msra.mxu1 %v3460_v11  ;;  %v3542_v11 = vld [vmem:[%s5239_s0 + $0x34] ss:$20 sps:$4 sm:$0xff]  }
  0x35   :  { %1424 = vmatprep.subr.bf16.mxu0 %v3738_v0  ;;  %3347 = vmatprep.subr.bf16.mxu1 %v3738_v0 }
  0x38   :  { %1425 = vmatpush1.bf16.msra.mxu0 %v3461_v12  ;;  %3363 = vmatpush1.bf16.msra.mxu1 %v3461_v12  ;;  %v3545_v12 = vld [vmem:[%s5239_s0 + $0x30] ss:$20 sps:$4 sm:$0xff]  }
  0x39   :  { %1426 = vmatprep.subr.bf16.mxu0 %v3738_v0  ;;  %3348 = vmatprep.subr.bf16.mxu1 %v3738_v0 }
  0x3c   :  { %1427 = vmatpush1.bf16.msra.mxu0 %v3462_v13  ;;  %3364 = vmatpush1.bf16.msra.mxu1 %v3462_v13  ;;  %v3546_v13 = vld [vmem:[%s5239_s0 + $0x2d4] ss:$20 sps:$4 sm:$0xff]  }
  0x3d   :  { %1428 = vmatprep.subr.bf16.mxu0 %v3738_v0  ;;  %3349 = vmatprep.subr.bf16.mxu1 %v3738_v0 }
  0x40   :  { %1429 = vmatpush1.bf16.msra.mxu0 %v3463_v14  ;;  %3365 = vmatpush1.bf16.msra.mxu1 %v3463_v14  ;;  %v3548_v14 = vld [vmem:[%s5239_s0 + $0x5c] ss:$20 sps:$4 sm:$0xff]  }
  0x41   :  { %1430 = vmatprep.subr.bf16.mxu0 %v3738_v0  ;;  %3350 = vmatprep.subr.bf16.mxu1 %v3738_v0 }
  0x44   :  { %1431 = vmatpush1.bf16.msra.mxu0 %v3464_v15  ;;  %3366 = vmatpush1.bf16.msra.mxu1 %v3464_v15  ;;  %v3550_v15 = vld [vmem:[%s5239_s0 + $0x2d0] ss:$20 sps:$4 sm:$0xff]  }
  0x45   :  { %1432 = vmatprep.subr.bf16.mxu0 %v3738_v0  ;;  %3351 = vmatprep.subr.bf16.mxu1 %v3738_v0 }
  0x48   :  { %1433 = vmatpush1.bf16.msra.mxu0 %v3465_v16  ;;  %3367 = vmatpush1.bf16.msra.mxu1 %v3465_v16  ;;  %v3551_v16 = vld [vmem:[%s5239_s0 + $0x58] ss:$20 sps:$4 sm:$0xff]  }
  0x49   :  { %1434 = vmatprep.subr.bf16.mxu0 %v3738_v0  ;;  %3352 = vmatprep.subr.bf16.mxu1 %v3738_v0 }
  0x4c   :  { %1435 = vmatpush1.bf16.msra.mxu0 %v3466_v17  ;;  %3368 = vmatpush1.bf16.msra.mxu1 %v3466_v17  ;;  %v3552_v17 = vld [vmem:[%s5239_s0 + $0x2fc] ss:$20 sps:$4 sm:$0xff]  }
  0x4d   :  { %1436 = vmatprep.subr.bf16.mxu0 %v3738_v0  ;;  %3353 = vmatprep.subr.bf16.mxu1 %v3738_v0 }
  0x50   :  { %1437 = vmatpush1.bf16.msra.mxu0 %v3467_v18  ;;  %3369 = vmatpush1.bf16.msra.mxu1 %v3467_v18  ;;  %v3554_v18 = vld [vmem:[%s5239_s0 + $0x84] ss:$20 sps:$4 sm:$0xff]  }
  0x51   :  { %1695 = vmatprep.subr.bf16.mxu0 %v3738_v0  ;;  %3266 = vmatprep.subr.bf16.mxu1 %v3474_v19 }
  0x53   :  { %1439 = vmatmul.mubr.bf16.vlgmr.msra.gmra.mrb[0].mxu0 %v3468_v20  ;;  %1503 = vmatmul.mubr.bf16.vlgmr.msra.gmra.mrb[0].mxu1 %v3471_v21  ;;  %v3557_v20 = vld [vmem:[%s5239_s0 + $0x80] ss:$20 sps:$4 sm:$0xff]   ;;  %v3558_v21 = vld [vmem:[%s5239_s0 + $0x324] ss:$20 sps:$4 sm:$0xff]  }
  0x54   :  { %1696 = vmatpush1.bf16.msra.mxu0 %v3475_v22  ;;  %3267 = vmatpush3.bf16.msra.mxu1 %v3474_v19  ;;  %v3556_v19 = vld [vmem:[%s5239_s0 + $0x2f8] ss:$20 sps:$4 sm:$0xff]  }
  0x55   :  { %1697 = vmatprep.subr.bf16.mxu0 %v3738_v0  ;;  %1446 = vmatprep.mubr.bf16.mxu0 %v3477_v23  ;;  %v3560_v22 = vld [vmem:[%s5239_s0 + $0xac] ss:$20 sps:$4 sm:$0xff]  }
  0x56   :  { %1510 = vmatprep.mubr.bf16.mxu1 %v3479_v24  ;;  %3268 = vmatprep.subr.bf16.mxu1 %v3523_v25  ;;  %v3562_v23 = vld [vmem:[%s5239_s0 + $0x320] ss:$20 sps:$4 sm:$0xff]   ;;  %v3563_v24 = vld [vmem:[%s5239_s0 + $0xa8] ss:$20 sps:$4 sm:$0xff]  }
  0x58   :  { %1698 = vmatpush1.bf16.msra.mxu0 %v3476_v26  ;;  %3269 = vmatpush3.bf16.msra.mxu1 %v3523_v25  ;;  %v3565_v25 = vld [vmem:[%s5239_s0 + $0x34c] ss:$20 sps:$4 sm:$0xff]   ;;  %v3567_v26 = vld [vmem:[%s5239_s0 + $0xd4] ss:$20 sps:$4 sm:$0xff]  }
  0x59   :  { %1699 = vmatprep.subr.bf16.mxu0 %v3738_v0  ;;  %3270 = vmatprep.subr.bf16.mxu1 %v3564_v30 }
  0x5b   :  { %1447 = vmatmul.mubr.bf16.gmra.mrb[4].mxu0 %v3481_v27  ;;  %1511 = vmatmul.mubr.bf16.gmra.mrb[4].mxu1 %v3482_v28  ;;  %v3569_v27 = vld [vmem:[%s5239_s0 + $0x348] ss:$20 sps:$4 sm:$0xff]   ;;  %v3570_v28 = vld [vmem:[%s5239_s0 + $0xd0] ss:$20 sps:$4 sm:$0xff]  }
  0x5c   :  { %1700 = vmatpush1.bf16.msra.mxu0 %v3483_v29  ;;  %1454 = vmatprep.mubr.bf16.mxu0 %v3485_v31  ;;  %v3571_v29 = vld [vmem:[%s5239_s0 + $0x374] ss:$20 sps:$4 sm:$0xff]   ;;  %v3575_v31 = vld [vmem:[%s5239_s0 + $0x370] ss:$20 sps:$4 sm:$0xff]  }
  0x5d   :  { %1701 = vmatprep.subr.bf16.mxu0 %v3738_v0  ;;  %1518 = vmatprep.mubr.bf16.mxu1 %v3487_v32  ;;  %v3576_v32 = vld [vmem:[%s5239_s0 + $0xf8] ss:$20 sps:$4 sm:$0xff]  }
  0x5e   :  { %3271 = vmatpush3.bf16.msra.mxu1 %v3564_v30  ;;  %v3573_v30 = vld [vmem:[%s5239_s0 + $0xfc] ss:$20 sps:$4 sm:$0xff]  }
  0x5f   :  { %3272 = vmatprep.subr.bf16.mxu1 %v3601_v44 }
  0x60   :  { %1702 = vmatpush1.bf16.msra.mxu0 %v3484_v33  ;;  %v3577_v33 = vld [vmem:[%s5239_s0 + $0x39c] ss:$20 sps:$4 sm:$0xff]  }
  0x61   :  { %1703 = vmatprep.subr.bf16.mxu0 %v3738_v0 }
  0x62   :  { %3273 = vmatpush3.bf16.msra.mxu1 %v3601_v44  ;;  %v3594_v44 = vld [vmem:[%s5239_s0 + $0x170] ss:$20 sps:$4 sm:$0xff]  }
  0x63   :  { %1455 = vmatmul.mubr.bf16.gmra.mrb[8].mxu0 %v3489_v34  ;;  %1519 = vmatmul.mubr.bf16.gmra.mrb[8].mxu1 %v3490_v35  ;;  %v3579_v34 = vld [vmem:[%s5239_s0 + $0x124] ss:$20 sps:$4 sm:$0xff]  }
  0x64   :  { %1704 = vmatpush1.bf16.msra.mxu0 %v3491_v36  ;;  %1462 = vmatprep.mubr.bf16.mxu0 %v3493_v37  ;;  %v3581_v35 = vld [vmem:[%s5239_s0 + $0x398] ss:$20 sps:$4 sm:$0xff]   ;;  %v3582_v36 = vld [vmem:[%s5239_s0 + $0x120] ss:$20 sps:$4 sm:$0xff]  }
  0x65   :  { %1705 = vmatprep.subr.bf16.mxu0 %v3738_v0  ;;  %1526 = vmatprep.mubr.bf16.mxu1 %v3495_v38  ;;  %v3583_v37 = vld [vmem:[%s5239_s0 + $0x3c4] ss:$20 sps:$4 sm:$0xff]   ;;  %v3585_v38 = vld [vmem:[%s5239_s0 + $0x14c] ss:$20 sps:$4 sm:$0xff]  }
  0x68   :  { %1706 = vmatpush1.bf16.msra.mxu0 %v3492_v39  ;;  %v3587_v39 = vld [vmem:[%s5239_s0 + $0x3c0] ss:$20 sps:$4 sm:$0xff]  }
  0x69   :  { %1707 = vmatprep.subr.bf16.mxu0 %v3738_v0 }
  0x6b   :  { %1463 = vmatmul.mubr.bf16.gmra.mrb[12].mxu0 %v3497_v40  ;;  %1527 = vmatmul.mubr.bf16.gmra.mrb[12].mxu1 %v3498_v41  ;;  %v3588_v40 = vld [vmem:[%s5239_s0 + $0x148] ss:$20 sps:$4 sm:$0xff]   ;;  %v3589_v41 = vld [vmem:[%s5239_s0 + $0x3ec] ss:$20 sps:$4 sm:$0xff]  }
  0x6c   :  { %1708 = vmatpush1.bf16.msra.mxu0 %v3499_v42  ;;  %1470 = vmatprep.mubr.bf16.mxu0 %v3501_v43  ;;  %v3591_v42 = vld [vmem:[%s5239_s0 + $0x174] ss:$20 sps:$4 sm:$0xff]  }
  0x6d   :  { %1709 = vmatprep.subr.bf16.mxu0 %v3738_v0  ;;  %1534 = vmatprep.mubr.bf16.mxu1 %v3503_v45  ;;  %v3593_v43 = vld [vmem:[%s5239_s0 + $0x3e8] ss:$20 sps:$4 sm:$0xff]  }
  0x6e   :  { %v3595_v45 = vld [vmem:[%s5239_s0 + $0x414] ss:$20 sps:$4 sm:$0xff]  }
  0x70   :  { %1710 = vmatpush1.bf16.msra.mxu0 %v3500_v46  ;;  %v3597_v46 = vld [vmem:[%s5239_s0 + $0x19c] ss:$20 sps:$4 sm:$0xff]  }
  0x71   :  { %1711 = vmatprep.subr.bf16.mxu0 %v3738_v0 }
  0x73   :  { %1471 = vmatmul.mubr.bf16.gmra.mrb[16].mxu0 %v3505_v47  ;;  %1535 = vmatmul.mubr.bf16.gmra.mrb[16].mxu1 %v3506_v48  ;;  %v3599_v47 = vld [vmem:[%s5239_s0 + $0x410] ss:$20 sps:$4 sm:$0xff]   ;;  %v3600_v48 = vld [vmem:[%s5239_s0 + $0x198] ss:$20 sps:$4 sm:$0xff]  }
  0x74   :  { %1712 = vmatpush1.bf16.msra.mxu0 %v3507_v49  ;;  %1478 = vmatprep.mubr.bf16.mxu0 %v3509_v50  ;;  %v3602_v49 = vld [vmem:[%s5239_s0 + $0x43c] ss:$20 sps:$4 sm:$0xff]   ;;  %v3604_v50 = vld [vmem:[%s5239_s0 + $0x1c4] ss:$20 sps:$4 sm:$0xff]  }
  0x75   :  { %1713 = vmatprep.subr.bf16.mxu0 %v3738_v0  ;;  %1542 = vmatprep.mubr.bf16.mxu1 %v3511_v51  ;;  %v3606_v51 = vld [vmem:[%s5239_s0 + $0x438] ss:$20 sps:$4 sm:$0xff]  }
  0x78   :  { %1714 = vmatpush1.bf16.msra.mxu0 %v3508_v52  ;;  %v3607_v52 = vld [vmem:[%s5239_s0 + $0x1c0] ss:$20 sps:$4 sm:$0xff]  }
  0x79   :  { %1715 = vmatprep.subr.bf16.mxu0 %v3738_v0 }
  0x7b   :  { %1479 = vmatmul.mubr.bf16.gmra.mrb[20].mxu0 %v3513_v53  ;;  %1543 = vmatmul.mubr.bf16.gmra.mrb[20].mxu1 %v3514_v54  ;;  %v3608_v53 = vld [vmem:[%s5239_s0 + $0x464] ss:$20 sps:$4 sm:$0xff]   ;;  %v3610_v54 = vld [vmem:[%s5239_s0 + $0x1ec] ss:$20 sps:$4 sm:$0xff]  }
  0x7c   :  { %1716 = vmatpush1.bf16.msra.mxu0 %v3515_v55  ;;  %1486 = vmatprep.mubr.bf16.mxu0 %v3517_v56  ;;  %v3612_v55 = vld [vmem:[%s5239_s0 + $0x460] ss:$20 sps:$4 sm:$0xff]   ;;  %v3613_v56 = vld [vmem:[%s5239_s0 + $0x1e8] ss:$20 sps:$4 sm:$0xff]  }
  0x7d   :  { %1717 = vmatprep.subr.bf16.mxu0 %v3738_v0  ;;  %1550 = vmatprep.mubr.bf16.mxu1 %v3519_v57  ;;  %v3614_v57 = vld [vmem:[%s5239_s0 + $0x48c] ss:$20 sps:$4 sm:$0xff]  }
  0x80   :  { %1718 = vmatpush1.bf16.msra.mxu0 %v3516_v58  ;;  %v3616_v58 = vld [vmem:[%s5239_s0 + $0x214] ss:$20 sps:$4 sm:$0xff]  }
  0x81   :  { %1719 = vmatprep.subr.bf16.mxu0 %v3738_v0 }
  0x83   :  { %1487 = vmatmul.mubr.bf16.gmra.mrb[24].mxu0 %v3521_v59  ;;  %1551 = vmatmul.mubr.bf16.gmra.mrb[24].mxu1 %v3522_v60  ;;  %v3618_v59 = vld [vmem:[%s5239_s0 + $0x488] ss:$20 sps:$4 sm:$0xff]   ;;  %v3619_v60 = vld [vmem:[%s5239_s0 + $0x210] ss:$20 sps:$4 sm:$0xff]  }
  0x84   :  { %1720 = vmatpush1.bf16.msra.mxu0 %v3524_v61  ;;  %1494 = vmatprep.mubr.bf16.mxu0 %v3526_v62  ;;  %v3620_v61 = vld [vmem:[%s5239_s0 + $0x4b4] ss:$20 sps:$4 sm:$0xff]   ;;  %v3622_v62 = vld [vmem:[%s5239_s0 + $0x23c] ss:$20 sps:$4 sm:$0xff]  }
  0x85   :  { %1721 = vmatprep.subr.bf16.mxu0 %v3738_v0  ;;  %1558 = vmatprep.mubr.bf16.mxu1 %v3528_v63  ;;  %v3624_v63 = vld [vmem:[%s5239_s0 + $0x4b0] ss:$20 sps:$4 sm:$0xff]  }
  0x88   :  { %1722 = vmatpush1.bf16.msra.mxu0 %v3525_v1  ;;  %v3625_v1 = vld [vmem:[%s5239_s0 + $0x238] ss:$20 sps:$4 sm:$0xff]  }
  0x89   :  { %1723 = vmatprep.subr.bf16.mxu0 %v3738_v0 }
  0x8b   :  { %1495 = vmatmul.mubr.bf16.gmra.mrb[28].mxu0 %v3530_v2  ;;  %1559 = vmatmul.mubr.bf16.gmra.mrb[28].mxu1 %v3531_v3  ;;  %v3626_v2 = vld [vmem:[%s5239_s0 + $0x4dc] ss:$20 sps:$4 sm:$0xff]   ;;  %v3628_v3 = vld [vmem:[%s5239_s0 + $0x264] ss:$20 sps:$4 sm:$0xff]  }
  0x8c   :  { %1724 = vmatpush1.bf16.msra.mxu0 %v3532_v4  ;;  %1566 = vmatprep.mubr.bf16.mxu1 %v3534_v5  ;;  %v3630_v4 = vld [vmem:[%s5239_s0 + $0x4d8] ss:$20 sps:$4 sm:$0xff]   ;;  %v3631_v5 = vld [vmem:[%s5239_s0 + $0x260] ss:$20 sps:$4 sm:$0xff]  }
  0x8d   :  { %1725 = vmatprep.subr.bf16.mxu0 %v3738_v0  ;;  %1727 = vmatprep.mubr.bf16.mxu0 %v3538_v6  ;;  %v3544_v0 = vld [vmem:[%s5239_s0 + $0x2a8] ss:$20 sps:$4 sm:$0xff]   ;;  %v3632_v6 = vld [vmem:[%s5239_s0 + $0x28c] ss:$20 sps:$4 sm:$0xff]  }
  0x90   :  { %1726 = vmatpush1.bf16.msra.mxu0 %v3533_v7  ;;  %v3634_v7 = vld [vmem:[%s5239_s0 + $0x10] ss:$20 sps:$4 sm:$0xff]  }
  0x93   :  { %1567 = vmatmul.mubr.bf16.gmra.mrb[32].mxu1 %v3539_v9  ;;  %1728 = vmatmul.mubr.bf16.vlgmr.msra.gmra.mrb[0].mxu0 %v3536_v8  ;;  %v3635_v8 = vld [vmem:[%s5239_s0 + $0x288] ss:$20 sps:$4 sm:$0xff]   ;;  %v3636_v9 = vld [vmem:[%s5239_s0 + $0x38] ss:$20 sps:$4 sm:$0xff]  }
  0x94   :  { %1574 = vmatprep.mubr.bf16.mxu1 %v3540_v10  ;;  %1735 = vmatprep.mubr.bf16.mxu0 %v3542_v11  ;;  %v3637_v10 = vld [vmem:[%s5239_s0 + $0x2b4] ss:$20 sps:$4 sm:$0xff]  }
  0x95   :  { %v3639_v11 = vld [vmem:[%s5239_s0 + $0x60] ss:$20 sps:$4 sm:$0xff]  }
  0x9b   :  { %1575 = vmatmul.mubr.bf16.gmra.mrb[36].mxu1 %v3544_v0  ;;  %1736 = vmatmul.mubr.bf16.gmra.mrb[4].mxu0 %v3545_v12  ;;  %v3640_v0 = vld [vmem:[%s5239_s0 + $0x2b0] ss:$20 sps:$4 sm:$0xff]   ;;  %v3641_v12 = vld [vmem:[%s5239_s0 + $0x88] ss:$20 sps:$4 sm:$0xff]  }
  0x9c   :  { %1582 = vmatprep.mubr.bf16.mxu1 %v3546_v13  ;;  %1743 = vmatprep.mubr.bf16.mxu0 %v3548_v14  ;;  %v3642_v13 = vld [vmem:[%s5239_s0 + $0x2dc] ss:$20 sps:$4 sm:$0xff]  }
  0x9d   :  { %v3644_v14 = vld [vmem:[%s5239_s0 + $0xb0] ss:$20 sps:$4 sm:$0xff]  }
  0xa3   :  { %1583 = vmatmul.mubr.bf16.gmra.mrb[40].mxu1 %v3550_v15  ;;  %1744 = vmatmul.mubr.bf16.gmra.mrb[8].mxu0 %v3551_v16  ;;  %v3645_v15 = vld [vmem:[%s5239_s0 + $0x2d8] ss:$20 sps:$4 sm:$0xff]  }
  0xa4   :  { %1590 = vmatprep.mubr.bf16.mxu1 %v3552_v17  ;;  %1751 = vmatprep.mubr.bf16.mxu0 %v3554_v18  ;;  %v3646_v16 = vld [vmem:[%s5239_s0 + $0xd8] ss:$20 sps:$4 sm:$0xff]   ;;  %v3649_v18 = vld [vmem:[%s5239_s0 + $0x100] ss:$20 sps:$4 sm:$0xff]  }
  0xa5   :  { %v3647_v17 = vld [vmem:[%s5239_s0 + $0x304] ss:$20 sps:$4 sm:$0xff]  }
  0xab   :  { %1591 = vmatmul.mubr.bf16.gmra.mrb[44].mxu1 %v3556_v19  ;;  %1752 = vmatmul.mubr.bf16.gmra.mrb[12].mxu0 %v3557_v20 }
  0xac   :  { %1598 = vmatprep.mubr.bf16.mxu1 %v3558_v21  ;;  %1759 = vmatprep.mubr.bf16.mxu0 %v3560_v22  ;;  %v3650_v21 = vld [vmem:[%s5239_s0 + $0x300] ss:$20 sps:$4 sm:$0xff]   ;;  %v3651_v22 = vld [vmem:[%s5239_s0 + $0x128] ss:$20 sps:$4 sm:$0xff]  }
  0xb3   :  { %1599 = vmatmul.mubr.bf16.gmra.mrb[48].mxu1 %v3562_v23  ;;  %1760 = vmatmul.mubr.bf16.gmra.mrb[16].mxu0 %v3563_v24  ;;  %v3652_v24 = vld [vmem:[%s5239_s0 + $0x32c] ss:$20 sps:$4 sm:$0xff]  }
  0xb4   :  { %1606 = vmatprep.mubr.bf16.mxu1 %v3565_v25  ;;  %1767 = vmatprep.mubr.bf16.mxu0 %v3567_v26  ;;  %v3654_v25 = vld [vmem:[%s5239_s0 + $0x150] ss:$20 sps:$4 sm:$0xff]  }
  0xbb   :  { %1607 = vmatmul.mubr.bf16.gmra.mrb[52].mxu1 %v3569_v27  ;;  %1768 = vmatmul.mubr.bf16.gmra.mrb[20].mxu0 %v3570_v28 }
  0xbc   :  { %1614 = vmatprep.mubr.bf16.mxu1 %v3571_v29  ;;  %1775 = vmatprep.mubr.bf16.mxu0 %v3573_v30  ;;  %v3655_v29 = vld [vmem:[%s5239_s0 + $0x328] ss:$20 sps:$4 sm:$0xff]   ;;  %v3656_v30 = vld [vmem:[%s5239_s0 + $0x178] ss:$20 sps:$4 sm:$0xff]  }
  0xc3   :  { %1615 = vmatmul.mubr.bf16.gmra.mrb[56].mxu1 %v3575_v31  ;;  %1776 = vmatmul.mubr.bf16.gmra.mrb[24].mxu0 %v3576_v32  ;;  %v3657_v32 = vld [vmem:[%s5239_s0 + $0x354] ss:$20 sps:$4 sm:$0xff]  }
  0xc4   :  { %1622 = vmatprep.mubr.bf16.mxu1 %v3577_v33  ;;  %1783 = vmatprep.mubr.bf16.mxu0 %v3579_v34  ;;  %v3659_v33 = vld [vmem:[%s5239_s0 + $0x1a0] ss:$20 sps:$4 sm:$0xff]  }
  0xcb   :  { %1623 = vmatmul.mubr.bf16.gmra.mrb[60].mxu1 %v3581_v35  ;;  %1784 = vmatmul.mubr.bf16.gmra.mrb[28].mxu0 %v3582_v36 }
  0xcc   :  { %1630 = vmatprep.mubr.bf16.mxu1 %v3583_v37  ;;  %1791 = vmatprep.mubr.bf16.mxu0 %v3585_v38  ;;  %v3660_v37 = vld [vmem:[%s5239_s0 + $0x350] ss:$20 sps:$4 sm:$0xff]   ;;  %v3661_v38 = vld [vmem:[%s5239_s0 + $0x1c8] ss:$20 sps:$4 sm:$0xff]  }
  0xd3   :  { %1631 = vmatmul.mubr.bf16.gmra.mrb[64].mxu1 %v3587_v39  ;;  %1792 = vmatmul.mubr.bf16.gmra.mrb[32].mxu0 %v3588_v40  ;;  %v3662_v40 = vld [vmem:[%s5239_s0 + $0x37c] ss:$20 sps:$4 sm:$0xff]  }
  0xd4   :  { %1638 = vmatprep.mubr.bf16.mxu1 %v3589_v41  ;;  %1799 = vmatprep.mubr.bf16.mxu0 %v3591_v42  ;;  %v3664_v41 = vld [vmem:[%s5239_s0 + $0x1f0] ss:$20 sps:$4 sm:$0xff]  }
  0xdb   :  { %1639 = vmatmul.mubr.bf16.gmra.mrb[68].mxu1 %v3593_v43  ;;  %1800 = vmatmul.mubr.bf16.gmra.mrb[36].mxu0 %v3594_v44 }
  0xdc   :  { %1646 = vmatprep.mubr.bf16.mxu1 %v3595_v45  ;;  %1807 = vmatprep.mubr.bf16.mxu0 %v3597_v46  ;;  %v3665_v45 = vld [vmem:[%s5239_s0 + $0x378] ss:$20 sps:$4 sm:$0xff]  }
  0xdd   :  { %v3666_v46 = vld [vmem:[%s5239_s0 + $0x218] ss:$20 sps:$4 sm:$0xff]  }
  0xe3   :  { %1647 = vmatmul.mubr.bf16.gmra.mrb[72].mxu1 %v3599_v47  ;;  %1808 = vmatmul.mubr.bf16.gmra.mrb[40].mxu0 %v3600_v48  ;;  %v3667_v48 = vld [vmem:[%s5239_s0 + $0x3a4] ss:$20 sps:$4 sm:$0xff]  }
  0xe4   :  { %1654 = vmatprep.mubr.bf16.mxu1 %v3602_v49  ;;  %1815 = vmatprep.mubr.bf16.mxu0 %v3604_v50  ;;  %v3669_v49 = vld [vmem:[%s5239_s0 + $0x240] ss:$20 sps:$4 sm:$0xff]  }
  0xeb   :  { %1655 = vmatmul.mubr.bf16.gmra.mrb[76].mxu1 %v3606_v51  ;;  %1816 = vmatmul.mubr.bf16.gmra.mrb[44].mxu0 %v3607_v52 }
  0xec   :  { %1662 = vmatprep.mubr.bf16.mxu1 %v3608_v53  ;;  %1823 = vmatprep.mubr.bf16.mxu0 %v3610_v54  ;;  %v3670_v53 = vld [vmem:[%s5239_s0 + $0x3a0] ss:$20 sps:$4 sm:$0xff]   ;;  %v3671_v54 = vld [vmem:[%s5239_s0 + $0x268] ss:$20 sps:$4 sm:$0xff]  }
  0xf3   :  { %1663 = vmatmul.mubr.bf16.gmra.mrb[80].mxu1 %v3612_v55  ;;  %1824 = vmatmul.mubr.bf16.gmra.mrb[48].mxu0 %v3613_v56  ;;  %v3672_v56 = vld [vmem:[%s5239_s0 + $0x3cc] ss:$20 sps:$4 sm:$0xff]  }
  0xf4   :  { %1670 = vmatprep.mubr.bf16.mxu1 %v3614_v57  ;;  %1831 = vmatprep.mubr.bf16.mxu0 %v3616_v58  ;;  %v3674_v57 = vld [vmem:[%s5239_s0 + $0x290] ss:$20 sps:$4 sm:$0xff]  }
  0xfb   :  { %1671 = vmatmul.mubr.bf16.gmra.mrb[84].mxu1 %v3618_v59  ;;  %1832 = vmatmul.mubr.bf16.gmra.mrb[52].mxu0 %v3619_v60 }
  0xfc   :  { %1678 = vmatprep.mubr.bf16.mxu1 %v3620_v61  ;;  %1839 = vmatprep.mubr.bf16.mxu0 %v3622_v62  ;;  %v3675_v61 = vld [vmem:[%s5239_s0 + $0x3c8] ss:$20 sps:$4 sm:$0xff]   ;;  %v3676_v62 = vld [vmem:[%s5239_s0 + $0x2b8] ss:$20 sps:$4 sm:$0xff]  }
 0x103   :  { %1679 = vmatmul.mubr.bf16.gmra.mrb[88].mxu1 %v3624_v63  ;;  %1840 = vmatmul.mubr.bf16.gmra.mrb[56].mxu0 %v3625_v1  ;;  %v3677_v1 = vld [vmem:[%s5239_s0 + $0x3f4] ss:$20 sps:$4 sm:$0xff]  }
 0x104   :  { %1686 = vmatprep.mubr.bf16.mxu1 %v3626_v2  ;;  %1847 = vmatprep.mubr.bf16.mxu0 %v3628_v3  ;;  %v3679_v2 = vld [vmem:[%s5239_s0 + $0x2e0] ss:$20 sps:$4 sm:$0xff]  }
 0x10b   :  { %1687 = vmatmul.mubr.bf16.gmra.mrb[92].mxu1 %v3630_v4  ;;  %1848 = vmatmul.mubr.bf16.gmra.mrb[60].mxu0 %v3631_v5 }
 0x10c   :  { %1855 = vmatprep.mubr.bf16.mxu0 %v3632_v6  ;;  %3274 = vmatprep.mubr.msk.bf16.mxu1 %vm1309_vm0, %v3634_v7  ;;  %v3680_v6 = vld [vmem:[%s5239_s0 + $0x3f0] ss:$20 sps:$4 sm:$0xff]   ;;  %v3681_v7 = vld [vmem:[%s5239_s0 + $0x308] ss:$20 sps:$4 sm:$0xff]  }
 0x113   :  { %1856 = vmatmul.mubr.bf16.gmra.mrb[64].mxu0 %v3635_v8  ;;  %3275 = vmatmul.mubr.msk.bf16.vlgmr.msra.gmra.mrb[96].mxu1 %vm1309_vm0, %v3636_v9  ;;  %v3682_v9 = vld [vmem:[%s5239_s0 + $0x41c] ss:$20 sps:$4 sm:$0xff]  }
 0x114   :  { %1863 = vmatprep.mubr.bf16.mxu0 %v3637_v10  ;;  %3278 = vmatprep.mubr.msk.bf16.mxu1 %vm1309_vm0, %v3639_v11  ;;  %v3684_v10 = vld [vmem:[%s5239_s0 + $0x330] ss:$20 sps:$4 sm:$0xff]  }
 0x11b   :  { %1864 = vmatmul.mubr.bf16.gmra.mrb[68].mxu0 %v3640_v0  ;;  %3279 = vmatmul.mubr.msk.bf16.gmra.mrb[100].mxu1 %vm1309_vm0, %v3641_v12 }
 0x11c   :  { %1871 = vmatprep.mubr.bf16.mxu0 %v3642_v13  ;;  %3282 = vmatprep.mubr.msk.bf16.mxu1 %vm1309_vm0, %v3644_v14  ;;  %v3685_v13 = vld [vmem:[%s5239_s0 + $0x418] ss:$20 sps:$4 sm:$0xff]  }
 0x11d   :  { %v3686_v14 = vld [vmem:[%s5239_s0 + $0x358] ss:$20 sps:$4 sm:$0xff]  }
 0x123   :  { %1872 = vmatmul.mubr.bf16.gmra.mrb[72].mxu0 %v3645_v15  ;;  %3283 = vmatmul.mubr.msk.bf16.gmra.mrb[104].mxu1 %vm1309_vm0, %v3646_v16  ;;  %v3687_v16 = vld [vmem:[%s5239_s0 + $0x444] ss:$20 sps:$4 sm:$0xff]  }
 0x124   :  { %1879 = vmatprep.mubr.bf16.mxu0 %v3647_v17  ;;  %3286 = vmatprep.mubr.msk.bf16.mxu1 %vm1309_vm0, %v3649_v18  ;;  %v3689_v17 = vld [vmem:[%s5239_s0 + $0x380] ss:$20 sps:$4 sm:$0xff]  }
 0x126   :  { %v4269_v19 = vpop.f32.mrb[0].mxu1 }
 0x127   :  { %v1506_v20 = vpop.f32.mrb[1].mxu1 }
 0x128   :  { %v4277_v23 = vpop.f32.mrb[2].mxu1 }
 0x129   :  { %v1509_v26 = vpop.f32.mrb[3].mxu1 }
 0x12a   :  { %v3691_v26 = vld [vmem:[%s5239_s0 + $0x3a8] ss:$20 sps:$4 sm:$0xff]  }
 0x12b   :  { %1880 = vmatmul.mubr.bf16.gmra.mrb[76].mxu0 %v3650_v21  ;;  %3287 = vmatmul.mubr.msk.bf16.gmra.mrb[108].mxu1 %vm1309_vm0, %v3651_v22 }
 0x12c   :  { %1887 = vmatprep.mubr.bf16.mxu0 %v3652_v24  ;;  %3290 = vmatprep.mubr.msk.bf16.mxu1 %vm1309_vm0, %v3654_v25  ;;  %v3690_v25 = vld [vmem:[%s5239_s0 + $0x440] ss:$20 sps:$4 sm:$0xff]  }
 0x12e   :  { %v4287_v27 = vpop.f32.mrb[4].mxu1 }
 0x12f   :  { %v1514_v28 = vpop.f32.mrb[5].mxu1 }
 0x130   :  { %v4295_v31 = vpop.f32.mrb[6].mxu1 }
 0x131   :  { %v1517_v34 = vpop.f32.mrb[7].mxu1 }
 0x133   :  { %1888 = vmatmul.mubr.bf16.gmra.mrb[80].mxu0 %v3655_v29  ;;  %3291 = vmatmul.mubr.msk.bf16.gmra.mrb[112].mxu1 %vm1309_vm0, %v3656_v30  ;;  %v3692_v30 = vld [vmem:[%s5239_s0 + $0x46c] ss:$20 sps:$4 sm:$0xff]  }
 0x134   :  { %1895 = vmatprep.mubr.bf16.mxu0 %v3657_v32  ;;  %3294 = vmatprep.mubr.msk.bf16.mxu1 %vm1309_vm0, %v3659_v33  ;;  %v3694_v32 = vld [vmem:[%s5239_s0 + $0x3d0] ss:$20 sps:$4 sm:$0xff]  }
 0x136   :  { %v4305_v35 = vpop.f32.mrb[8].mxu1 }
 0x137   :  { %v1522_v36 = vpop.f32.mrb[9].mxu1 }
 0x138   :  { %v4313_v39 = vpop.f32.mrb[10].mxu1 }
 0x139   :  { %v1525_v42 = vpop.f32.mrb[11].mxu1 }
 0x13a   :  { %v3696_v42 = vld [vmem:[%s5239_s0 + $0x3f8] ss:$20 sps:$4 sm:$0xff]  }
 0x13b   :  { %1896 = vmatmul.mubr.bf16.gmra.mrb[84].mxu0 %v3660_v37  ;;  %3295 = vmatmul.mubr.msk.bf16.gmra.mrb[116].mxu1 %vm1309_vm0, %v3661_v38 }
 0x13c   :  { %1903 = vmatprep.mubr.bf16.mxu0 %v3662_v40  ;;  %3298 = vmatprep.mubr.msk.bf16.mxu1 %vm1309_vm0, %v3664_v41  ;;  %v3695_v41 = vld [vmem:[%s5239_s0 + $0x468] ss:$20 sps:$4 sm:$0xff]  }
 0x13e   :  { %v4323_v43 = vpop.f32.mrb[12].mxu1 }
 0x13f   :  { %v1530_v44 = vpop.f32.mrb[13].mxu1 }
 0x140   :  { %v4331_v47 = vpop.f32.mrb[14].mxu1 }
 0x141   :  { %v1533_v50 = vpop.f32.mrb[15].mxu1 }
 0x143   :  { %1904 = vmatmul.mubr.bf16.gmra.mrb[88].mxu0 %v3665_v45  ;;  %3299 = vmatmul.mubr.msk.bf16.gmra.mrb[120].mxu1 %vm1309_vm0, %v3666_v46  ;;  %v3697_v46 = vld [vmem:[%s5239_s0 + $0x494] ss:$20 sps:$4 sm:$0xff]  }
 0x144   :  { %1911 = vmatprep.mubr.bf16.mxu0 %v3667_v48  ;;  %3302 = vmatprep.mubr.msk.bf16.mxu1 %vm1309_vm0, %v3669_v49  ;;  %v3699_v48 = vld [vmem:[%s5239_s0 + $0x420] ss:$20 sps:$4 sm:$0xff]  }
 0x146   :  { %v4341_v51 = vpop.f32.mrb[16].mxu1 }
 0x147   :  { %v1538_v52 = vpop.f32.mrb[17].mxu1 }
 0x148   :  { %v4349_v55 = vpop.f32.mrb[18].mxu1 }
 0x149   :  { %v1541_v58 = vpop.f32.mrb[19].mxu1 }
 0x14a   :  { %v3701_v58 = vld [vmem:[%s5239_s0 + $0x448] ss:$20 sps:$4 sm:$0xff]  }
 0x14b   :  { %1912 = vmatmul.mubr.bf16.gmra.mrb[92].mxu0 %v3670_v53  ;;  %3303 = vmatmul.mubr.msk.bf16.gmra.mrb[124].mxu1 %vm1309_vm0, %v3671_v54 }
 0x14c   :  { %1919 = vmatprep.mubr.bf16.mxu0 %v3672_v56  ;;  %3306 = vmatprep.mubr.msk.bf16.mxu1 %vm1309_vm0, %v3674_v57  ;;  %v3700_v57 = vld [vmem:[%s5239_s0 + $0x490] ss:$20 sps:$4 sm:$0xff]  }
 0x14e   :  { %v4359_v59 = vpop.f32.mrb[20].mxu1 }
 0x14f   :  { %v1546_v60 = vpop.f32.mrb[21].mxu1 }
 0x150   :  { %v4367_v63 = vpop.f32.mrb[22].mxu1 }
 0x151   :  { %v1549_v3 = vpop.f32.mrb[23].mxu1 }
 0x153   :  { %1920 = vmatmul.mubr.bf16.gmra.mrb[96].mxu0 %v3675_v61  ;;  %3307 = vmatmul.mubr.msk.bf16.gmra.mrb[128].mxu1 %vm1309_vm0, %v3676_v62  ;;  %v3702_v62 = vld [vmem:[%s5239_s0 + $0x4bc] ss:$20 sps:$4 sm:$0xff]  }
 0x154   :  { %1927 = vmatprep.mubr.bf16.mxu0 %v3677_v1  ;;  %3310 = vmatprep.mubr.msk.bf16.mxu1 %vm1309_vm0, %v3679_v2  ;;  %v3704_v1 = vld [vmem:[%s5239_s0 + $0x470] ss:$20 sps:$4 sm:$0xff]  }
 0x156   :  { %v4377_v4 = vpop.f32.mrb[24].mxu1 }
 0x157   :  { %v1554_v5 = vpop.f32.mrb[25].mxu1 }
 0x158   :  { %v4385_v8 = vpop.f32.mrb[26].mxu1 }
 0x159   :  { %v1557_v11 = vpop.f32.mrb[27].mxu1 }
 0x15a   :  { %v3706_v11 = vld [vmem:[%s5239_s0 + $0x498] ss:$20 sps:$4 sm:$0xff]  }
 0x15b   :  { %1928 = vmatmul.mubr.bf16.gmra.mrb[100].mxu0 %v3680_v6  ;;  %3311 = vmatmul.mubr.msk.bf16.gmra.mrb[132].mxu1 %vm1309_vm0, %v3681_v7 }
 0x15c   :  { %1935 = vmatprep.mubr.bf16.mxu0 %v3682_v9  ;;  %3314 = vmatprep.mubr.msk.bf16.mxu1 %vm1309_vm0, %v3684_v10  ;;  %v3705_v10 = vld [vmem:[%s5239_s0 + $0x4b8] ss:$20 sps:$4 sm:$0xff]  }
 0x15e   :  { %v4395_v0 = vpop.f32.mrb[28].mxu1 }
 0x15f   :  { %v1562_v12 = vpop.f32.mrb[29].mxu1 }
 0x160   :  { %v4403_v15 = vpop.f32.mrb[30].mxu1 }
 0x161   :  { %v1565_v18 = vpop.f32.mrb[31].mxu1 }
 0x163   :  { %1936 = vmatmul.mubr.bf16.gmra.mrb[104].mxu0 %v3685_v13  ;;  %3315 = vmatmul.mubr.msk.bf16.gmra.mrb[136].mxu1 %vm1309_vm0, %v3686_v14  ;;  %v3707_v14 = vld [vmem:[%s5239_s0 + $0x4e4] ss:$20 sps:$4 sm:$0xff]  }
 0x164   :  { %1943 = vmatprep.mubr.bf16.mxu0 %v3687_v16  ;;  %3318 = vmatprep.mubr.msk.bf16.mxu1 %vm1309_vm0, %v3689_v17  ;;  %v3709_v16 = vld [vmem:[%s5239_s0 + $0x4c0] ss:$20 sps:$4 sm:$0xff]  }
 0x166   :  { %v4413_v20 = vpop.f32.mrb[32].mxu1  ;;  %v4415_v21 = vpop.f32.mrb[0].mxu0 }
 0x167   :  { %v1570_v22 = vpop.f32.mrb[33].mxu1  ;;  %v1731_v24 = vpop.f32.mrb[1].mxu0 }
 0x168   :  { %v4423_v28 = vpop.f32.mrb[34].mxu1  ;;  %v4425_v29 = vpop.f32.mrb[2].mxu0 }
 0x169   :  { %v1573_v33 = vpop.f32.mrb[35].mxu1  ;;  %v1734_v34 = vpop.f32.mrb[3].mxu0 }
 0x16b   :  { %1944 = vmatmul.mubr.bf16.gmra.mrb[108].mxu0 %v3690_v25  ;;  %3319 = vmatmul.mubr.msk.bf16.gmra.mrb[140].mxu1 %vm1309_vm0, %v3691_v26 }
 0x16c   :  { %1951 = vmatprep.mubr.bf16.mxu0 %v3692_v30  ;;  %3322 = vmatprep.mubr.msk.bf16.mxu1 %vm1309_vm0, %v3694_v32  ;;  %v3710_v30 = vld [vmem:[%s5239_s0 + $0x4e0] ss:$20 sps:$4 sm:$0xff]   ;;  %v3711_v32 = vld [vmem:[%s5239_s0 + $0x4e8] ss:$20 sps:$4 sm:$0xff]  }
 0x16e   :  { %v4435_v36 = vpop.f32.mrb[36].mxu1  ;;  %v4437_v37 = vpop.f32.mrb[4].mxu0 }
 0x16f   :  { %v1578_v38 = vpop.f32.mrb[37].mxu1  ;;  %v1739_v40 = vpop.f32.mrb[5].mxu0 }
 0x170   :  { %v4445_v44 = vpop.f32.mrb[38].mxu1  ;;  %v4447_v45 = vpop.f32.mrb[6].mxu0 }
 0x171   :  { %v1581_v49 = vpop.f32.mrb[39].mxu1  ;;  %v1742_v50 = vpop.f32.mrb[7].mxu0 }
 0x173   :  { %1952 = vmatmul.mubr.bf16.gmra.mrb[112].mxu0 %v3695_v41  ;;  %3323 = vmatmul.mubr.msk.bf16.gmra.mrb[144].mxu1 %vm1309_vm0, %v3696_v42 }
 0x174   :  { %1959 = vmatprep.mubr.bf16.mxu0 %v3697_v46  ;;  %3326 = vmatprep.mubr.msk.bf16.mxu1 %vm1309_vm0, %v3699_v48 }
 0x176   :  { %v4457_v52 = vpop.f32.mrb[40].mxu1  ;;  %v4459_v53 = vpop.f32.mrb[8].mxu0 }
 0x177   :  { %v1586_v54 = vpop.f32.mrb[41].mxu1  ;;  %v1747_v56 = vpop.f32.mrb[9].mxu0 }
 0x178   :  { %v4467_v60 = vpop.f32.mrb[42].mxu1  ;;  %v4469_v61 = vpop.f32.mrb[10].mxu0 }
 0x179   :  { %v1589_v2 = vpop.f32.mrb[43].mxu1  ;;  %v1750_v3 = vpop.f32.mrb[11].mxu0 }
 0x17b   :  { %1960 = vmatmul.mubr.bf16.gmra.mrb[116].mxu0 %v3700_v57  ;;  %3327 = vmatmul.mubr.msk.bf16.gmra.mrb[148].mxu1 %vm1309_vm0, %v3701_v58 }
 0x17c   :  { %1967 = vmatprep.mubr.bf16.mxu0 %v3702_v62  ;;  %3330 = vmatprep.mubr.msk.bf16.mxu1 %vm1309_vm0, %v3704_v1 }
 0x17e   :  { %v4479_v5 = vpop.f32.mrb[44].mxu1  ;;  %v4481_v6 = vpop.f32.mrb[12].mxu0 }
 0x17f   :  { %v1594_v7 = vpop.f32.mrb[45].mxu1  ;;  %v1755_v9 = vpop.f32.mrb[13].mxu0 }
 0x180   :  { %v4489_v12 = vpop.f32.mrb[46].mxu1  ;;  %v4491_v13 = vpop.f32.mrb[14].mxu0 }
 0x181   :  { %v1597_v17 = vpop.f32.mrb[47].mxu1  ;;  %v1758_v18 = vpop.f32.mrb[15].mxu0 }
 0x183   :  { %1968 = vmatmul.mubr.bf16.gmra.mrb[120].mxu0 %v3705_v10  ;;  %3331 = vmatmul.mubr.msk.bf16.gmra.mrb[152].mxu1 %vm1309_vm0, %v3706_v11 }
 0x184   :  { %1975 = vmatprep.mubr.bf16.mxu0 %v3707_v14  ;;  %3334 = vmatprep.mubr.msk.bf16.mxu1 %vm1309_vm0, %v3709_v16 }
 0x186   :  { %v4501_v22 = vpop.f32.mrb[48].mxu1  ;;  %v4503_v24 = vpop.f32.mrb[16].mxu0 }
 0x187   :  { %v1602_v25 = vpop.f32.mrb[49].mxu1  ;;  %v1763_v26 = vpop.f32.mrb[17].mxu0 }
 0x188   :  { %v4511_v33 = vpop.f32.mrb[50].mxu1  ;;  %v4513_v34 = vpop.f32.mrb[18].mxu0 }
 0x189   :  { %v1605_v38 = vpop.f32.mrb[51].mxu1  ;;  %v1766_v40 = vpop.f32.mrb[19].mxu0 }
 0x18b   :  { %1976 = vmatmul.mubr.bf16.gmra.mrb[124].mxu0 %v3710_v30  ;;  %3335 = vmatmul.mubr.msk.bf16.gmra.mrb[156].mxu1 %vm1309_vm0, %v3711_v32 }
 0x18e   :  { %v4516_v41 = vpop.f32.mrb[52].mxu1  ;;  %v4518_v42 = vpop.f32.mrb[20].mxu0 }
 0x18f   :  { %v1610_v46 = vpop.f32.mrb[53].mxu1  ;;  %v1771_v48 = vpop.f32.mrb[21].mxu0 }
 0x190   :  { %v4520_v49 = vpop.f32.mrb[54].mxu1  ;;  %v4522_v50 = vpop.f32.mrb[22].mxu0 }
 0x191   :  { %v1613_v54 = vpop.f32.mrb[55].mxu1  ;;  %v1774_v56 = vpop.f32.mrb[23].mxu0 }
 0x196   :  { %v4524_v57 = vpop.f32.mrb[56].mxu1  ;;  %v4526_v58 = vpop.f32.mrb[24].mxu0 }
 0x197   :  { %v1618_v62 = vpop.f32.mrb[57].mxu1  ;;  %v1779_v1 = vpop.f32.mrb[25].mxu0 }
 0x198   :  { %v4528_v2 = vpop.f32.mrb[58].mxu1  ;;  %v4530_v3 = vpop.f32.mrb[26].mxu0 }
 0x199   :  { %v1621_v7 = vpop.f32.mrb[59].mxu1  ;;  %v1782_v9 = vpop.f32.mrb[27].mxu0 }
 0x19e   :  { %v4532_v10 = vpop.f32.mrb[60].mxu1  ;;  %v4534_v11 = vpop.f32.mrb[28].mxu0 }
 0x19f   :  { %v1626_v14 = vpop.f32.mrb[61].mxu1  ;;  %v1787_v16 = vpop.f32.mrb[29].mxu0 }
 0x1a0   :  { %v4536_v17 = vpop.f32.mrb[62].mxu1  ;;  %v4538_v18 = vpop.f32.mrb[30].mxu0 }
 0x1a1   :  { %v1629_v25 = vpop.f32.mrb[63].mxu1  ;;  %v1790_v26 = vpop.f32.mrb[31].mxu0 }
 0x1a6   :  { %v4540_v30 = vpop.f32.mrb[64].mxu1  ;;  %v1793_v32 = vpop.f32.mrb[32].mxu0 }
 0x1a7   :  { %v4543_v38 = vadd.f32 %v1793_v32, %v4269_v19  ;;  %v1634_v40 = vpop.f32.mrb[65].mxu1  ;;  %v1795_v46 = vpop.f32.mrb[33].mxu0 }
 0x1a8   :  { %v4545_v48 = vpop.f32.mrb[66].mxu1  ;;  %v1796_v54 = vpop.f32.mrb[34].mxu0 }
 0x1a9   :  { %v4548_v56 = vadd.f32 %v1796_v54, %v4277_v23  ;;  %v1637_v62 = vpop.f32.mrb[67].mxu1  ;;  %v1798_v1 = vpop.f32.mrb[35].mxu0 }
 0x1ae   :  { %v4550_v7 = vpop.f32.mrb[68].mxu1  ;;  %v1801_v9 = vpop.f32.mrb[36].mxu0 }
 0x1af   :  { %5248 = vst [vmem:[#allocation5_spill] sm:$0xff] %v4550_v7  ;;  %v4553_v14 = vadd.f32 %v1801_v9, %v4287_v27  ;;  %v1642_v16 = vpop.f32.mrb[69].mxu1  ;;  %v1803_v25 = vpop.f32.mrb[37].mxu0 }
 0x1b0   :  { %v4555_v19 = vpop.f32.mrb[70].mxu1  ;;  %v1804_v26 = vpop.f32.mrb[38].mxu0 }
 0x1b1   :  { %5249 = vst [vmem:[#allocation6_spill] sm:$0xff] %v4555_v19  ;;  %v4558_v32 = vadd.f32 %v1804_v26, %v4295_v31  ;;  %v1645_v40 = vpop.f32.mrb[71].mxu1  ;;  %v1806_v46 = vpop.f32.mrb[39].mxu0 }
 0x1b6   :  { %v4560_v23 = vpop.f32.mrb[72].mxu1  ;;  %v1809_v54 = vpop.f32.mrb[40].mxu0 }
 0x1b7   :  { %5250 = vst [vmem:[#allocation7_spill] sm:$0xff] %v4560_v23  ;;  %v4563_v62 = vadd.f32 %v1809_v54, %v4305_v35  ;;  %v1650_v1 = vpop.f32.mrb[73].mxu1  ;;  %v1811_v7 = vpop.f32.mrb[41].mxu0 }
 0x1b8   :  { %v4565_v27 = vpop.f32.mrb[74].mxu1  ;;  %v1812_v9 = vpop.f32.mrb[42].mxu0 }
 0x1b9   :  { %5251 = vst [vmem:[#allocation8_spill] sm:$0xff] %v4565_v27  ;;  %v4568_v16 = vadd.f32 %v1812_v9, %v4313_v39  ;;  %v1653_v25 = vpop.f32.mrb[75].mxu1  ;;  %v1814_v19 = vpop.f32.mrb[43].mxu0 }
 0x1be   :  { %v4570_v31 = vpop.f32.mrb[76].mxu1  ;;  %v1817_v26 = vpop.f32.mrb[44].mxu0 }
 0x1bf   :  { %5252 = vst [vmem:[#allocation9_spill] sm:$0xff] %v4570_v31  ;;  %v4573_v40 = vadd.f32 %v1817_v26, %v4323_v43  ;;  %v1658_v46 = vpop.f32.mrb[77].mxu1  ;;  %v1819_v23 = vpop.f32.mrb[45].mxu0 }
 0x1c0   :  { %v4575_v35 = vpop.f32.mrb[78].mxu1  ;;  %v1820_v54 = vpop.f32.mrb[46].mxu0 }
 0x1c1   :  { %5253 = vst [vmem:[#allocation10_spill] sm:$0xff] %v4575_v35  ;;  %v4578_v7 = vadd.f32 %v1820_v54, %v4331_v47  ;;  %v1661_v1 = vpop.f32.mrb[79].mxu1  ;;  %v1822_v27 = vpop.f32.mrb[47].mxu0 }
 0x1c6   :  { %v4580_v39 = vpop.f32.mrb[80].mxu1  ;;  %v1825_v9 = vpop.f32.mrb[48].mxu0 }
 0x1c7   :  { %5254 = vst [vmem:[#allocation11_spill] sm:$0xff] %v4580_v39  ;;  %v4583_v19 = vadd.f32 %v1825_v9, %v4341_v51  ;;  %v1666_v25 = vpop.f32.mrb[81].mxu1  ;;  %v1827_v31 = vpop.f32.mrb[49].mxu0 }
 0x1c8   :  { %v4585_v43 = vpop.f32.mrb[82].mxu1  ;;  %v1828_v26 = vpop.f32.mrb[50].mxu0 }
 0x1c9   :  { %5255 = vst [vmem:[#allocation12_spill] sm:$0xff] %v4585_v43  ;;  %v4588_v23 = vadd.f32 %v1828_v26, %v4349_v55  ;;  %v1669_v46 = vpop.f32.mrb[83].mxu1  ;;  %v1830_v35 = vpop.f32.mrb[51].mxu0 }
 0x1ce   :  { %v4590_v47 = vpop.f32.mrb[84].mxu1  ;;  %v1833_v54 = vpop.f32.mrb[52].mxu0 }
 0x1cf   :  { %5256 = vst [vmem:[#allocation13_spill] sm:$0xff] %v4590_v47  ;;  %v4593_v27 = vadd.f32 %v1833_v54, %v4359_v59  ;;  %v1674_v1 = vpop.f32.mrb[85].mxu1  ;;  %v1835_v39 = vpop.f32.mrb[53].mxu0 }
 0x1d0   :  { %v4595_v51 = vpop.f32.mrb[86].mxu1  ;;  %v1836_v9 = vpop.f32.mrb[54].mxu0 }
 0x1d1   :  { %5257 = vst [vmem:[#allocation14_spill] sm:$0xff] %v4595_v51  ;;  %v4598_v31 = vadd.f32 %v1836_v9, %v4367_v63  ;;  %v1677_v25 = vpop.f32.mrb[87].mxu1  ;;  %v1838_v43 = vpop.f32.mrb[55].mxu0 }
 0x1d6   :  { %v4600_v55 = vpop.f32.mrb[88].mxu1  ;;  %v1841_v26 = vpop.f32.mrb[56].mxu0 }
 0x1d7   :  { %5258 = vst [vmem:[#allocation15_spill] sm:$0xff] %v4600_v55  ;;  %v4603_v35 = vadd.f32 %v1841_v26, %v4377_v4  ;;  %v1682_v46 = vpop.f32.mrb[89].mxu1  ;;  %v1843_v47 = vpop.f32.mrb[57].mxu0 }
 0x1d8   :  { %v4605_v59 = vpop.f32.mrb[90].mxu1  ;;  %v1844_v54 = vpop.f32.mrb[58].mxu0 }
 0x1d9   :  { %5259 = vst [vmem:[#allocation16_spill] sm:$0xff] %v4605_v59  ;;  %v4608_v39 = vadd.f32 %v1844_v54, %v4385_v8  ;;  %v1685_v1 = vpop.f32.mrb[91].mxu1  ;;  %v1846_v51 = vpop.f32.mrb[59].mxu0 }
 0x1da   :  { %v4620_v1 = vld [vmem:[#allocation2] ss:$0 sm:$0xff] }
 0x1de   :  { %v4610_v63 = vpop.f32.mrb[92].mxu1  ;;  %v1849_v9 = vpop.f32.mrb[60].mxu0 }
 0x1df   :  { %5260 = vst [vmem:[#allocation17_spill] sm:$0xff] %v4610_v63  ;;  %v4613_v43 = vadd.f32 %v1849_v9, %v4395_v0  ;;  %v1690_v25 = vpop.f32.mrb[93].mxu1  ;;  %v1851_v55 = vpop.f32.mrb[61].mxu0 }
 0x1e0   :  { %v4615_v4 = vpop.f32.mrb[94].mxu1  ;;  %v1852_v26 = vpop.f32.mrb[62].mxu0 }
 0x1e1   :  { %5261 = vst [vmem:[#allocation18_spill] sm:$0xff] %v4615_v4  ;;  %v4618_v47 = vadd.f32 %v1852_v26, %v4403_v15  ;;  %v1693_v46 = vpop.f32.mrb[95].mxu1  ;;  %v1854_v59 = vpop.f32.mrb[63].mxu0 }
 0x1e6   :  { %v1857_v8 = vpop.f32.mrb[64].mxu0  ;;  %v3276_v54 = vpop.f32.mrb[96].mxu1 }
 0x1e7   :  { %v4623_v51 = vadd.f32 %v1857_v8, %v4413_v20  ;;  %v4626_v0 = vadd.f32 %v3276_v54, %v4437_v37  ;;  %v1859_v9 = vpop.f32.mrb[65].mxu0  ;;  %v2018_v55 = vpop.f32.mrb[97].mxu1 }
 0x1e8   :  { %v4629_v25 = vadd.f32 %v2018_v55, %v4415_v21  ;;  %v1860_v4 = vpop.f32.mrb[66].mxu0  ;;  %v3277_v15 = vpop.f32.mrb[98].mxu1 }
 0x1e9   :  { %v2282_v59 = vadd.f32 %v4620_v1, %v4626_v0  ;;  %v4634_v26 = vadd.f32 %v1860_v4, %v4423_v28  ;;  %v4637_v46 = vadd.f32 %v3277_v15, %v4447_v45  ;;  %v2021_v20 = vpop.f32.mrb[99].mxu1  ;;  %v1862_v8 = vpop.f32.mrb[67].mxu0 }
 0x1ea   :  { %v2280_v37 = vadd.f32 %v4620_v1, %v4629_v25  ;;  %v4642_v54 = vadd.f32 %v2021_v20, %v4425_v29 }
 0x1eb   :  { %5262 = vst [vmem:[#allocation19_spill] sm:$0xff] %v4634_v26  ;;  %v2346_v21 = vmax.f32 %v2282_v59, 0.0  ;;  %v2283_v9 = vadd.f32 %v4620_v1, %v4637_v46 }
 0x1ec   :  { %5263 = vst [vmem:[#allocation20_spill] sm:$0xff] %v4642_v54  ;;  %v2344_v55 = vmax.f32 %v2280_v37, 0.0  ;;  %v2281_v28 = vadd.f32 %v4620_v1, %v4642_v54 }
 0x1ed   :  { %v3168_v4 = vpack.c.bf16 %v2346_v21, %v2346_v21  ;;  %v2347_v45 = vmax.f32 %v2283_v9, 0.0 }
 0x1ee   :  { %v3166_v15 = vpack.c.bf16 %v2344_v55, %v2344_v55  ;;  %v2345_v63 = vmax.f32 %v2281_v28, 0.0  ;;  %v1865_v8 = vpop.f32.mrb[68].mxu0  ;;  %v3280_v26 = vpop.f32.mrb[100].mxu1 }
 0x1ef   :  { %2667 = vst.msk [vmem:[%s5242_s3 + $0x8] sm:$0xf] %vm2664_vm1, %v3168_v4  ;;  %v3169_v29 = vpack.c.bf16 %v2347_v45, %v2347_v45  ;;  %v4653_v59 = vadd.f32 %v1865_v8, %v4435_v36  ;;  %v4656_v20 = vadd.f32 %v3280_v26, %v4481_v6  ;;  %v1867_v37 = vpop.f32.mrb[69].mxu0  ;;  %v2034_v54 = vpop.f32.mrb[101].mxu1 }
 0x1f0   :  { %2665 = vst.msk [vmem:[%s5242_s3] sm:$0xf] %vm2664_vm1, %v3166_v15  ;;  %v3167_v21 = vpack.c.bf16 %v2345_v63, %v2345_v63  ;;  %v4663_v9 = vadd.f32 %v2034_v54, %v4459_v53  ;;  %v1868_v55 = vpop.f32.mrb[70].mxu0  ;;  %v3281_v28 = vpop.f32.mrb[102].mxu1 }
 0x1f1   :  { %2668 = vst.msk [vmem:[%s5242_s3 + $0xc] sm:$0xf] %vm2664_vm1, %v3169_v29  ;;  %v2286_v36 = vadd.f32 %v4620_v1, %v4656_v20  ;;  %v4672_v6 = vadd.f32 %v1868_v55, %v4445_v44  ;;  %v4675_v26 = vadd.f32 %v3281_v28, %v4491_v13  ;;  %v2037_v63 = vpop.f32.mrb[103].mxu1  ;;  %v1870_v4 = vpop.f32.mrb[71].mxu0 }
 0x1f2   :  { %2666 = vst.msk [vmem:[%s5242_s3 + $0x4] sm:$0xf] %vm2664_vm1, %v3167_v21  ;;  %v2284_v53 = vadd.f32 %v4620_v1, %v4663_v9  ;;  %v4684_v54 = vadd.f32 %v2037_v63, %v4469_v61 }
 0x1f3   :  { %v2350_v45 = vmax.f32 %v2286_v36, 0.0  ;;  %v2287_v44 = vadd.f32 %v4620_v1, %v4675_v26 }
 0x1f4   :  { %v2348_v15 = vmax.f32 %v2284_v53, 0.0  ;;  %v2285_v13 = vadd.f32 %v4620_v1, %v4684_v54 }
 0x1f5   :  { %v3172_v8 = vpack.c.bf16 %v2350_v45, %v2350_v45  ;;  %v2351_v29 = vmax.f32 %v2287_v44, 0.0 }
 0x1f6   :  { %v3170_v37 = vpack.c.bf16 %v2348_v15, %v2348_v15  ;;  %v2349_v55 = vmax.f32 %v2285_v13, 0.0  ;;  %v1873_v28 = vpop.f32.mrb[72].mxu0  ;;  %v3284_v21 = vpop.f32.mrb[104].mxu1 }
 0x1f7   :  { %2671 = vst.msk [vmem:[%s5242_s3 + $0x18] sm:$0xf] %vm2664_vm1, %v3172_v8  ;;  %v3173_v61 = vpack.c.bf16 %v2351_v29, %v2351_v29  ;;  %v4695_v36 = vadd.f32 %v1873_v28, %v4457_v52  ;;  %v4698_v63 = vadd.f32 %v3284_v21, %v4518_v42  ;;  %v1875_v4 = vpop.f32.mrb[73].mxu0  ;;  %v2050_v53 = vpop.f32.mrb[105].mxu1 }
 0x1f8   :  { %2669 = vst.msk [vmem:[%s5242_s3 + $0x10] sm:$0xf] %vm2664_vm1, %v3170_v37  ;;  %v3171_v45 = vpack.c.bf16 %v2349_v55, %v2349_v55  ;;  %v4705_v44 = vadd.f32 %v2050_v53, %v4503_v24  ;;  %v1876_v15 = vpop.f32.mrb[74].mxu0  ;;  %v3285_v13 = vpop.f32.mrb[106].mxu1 }
 0x1f9   :  { %2672 = vst.msk [vmem:[%s5242_s3 + $0x1c] sm:$0xf] %vm2664_vm1, %v3173_v61  ;;  %v2290_v52 = vadd.f32 %v4620_v1, %v4698_v63  ;;  %v4714_v42 = vadd.f32 %v1876_v15, %v4467_v60  ;;  %v4717_v8 = vadd.f32 %v3285_v13, %v4522_v50  ;;  %v2053_v29 = vpop.f32.mrb[107].mxu1  ;;  %v1878_v37 = vpop.f32.mrb[75].mxu0 }
 0x1fa   :  { %2670 = vst.msk [vmem:[%s5242_s3 + $0x14] sm:$0xf] %vm2664_vm1, %v3171_v45  ;;  %v2288_v24 = vadd.f32 %v4620_v1, %v4705_v44  ;;  %v4726_v55 = vadd.f32 %v2053_v29, %v4513_v34 }
 0x1fb   :  { %v2354_v28 = vmax.f32 %v2290_v52, 0.0  ;;  %v2291_v60 = vadd.f32 %v4620_v1, %v4717_v8 }
 0x1fc   :  { %v2352_v21 = vmax.f32 %v2288_v24, 0.0  ;;  %v2289_v50 = vadd.f32 %v4620_v1, %v4726_v55 }
 0x1fd   :  { %v3176_v61 = vpack.c.bf16 %v2354_v28, %v2354_v28  ;;  %v2355_v4 = vmax.f32 %v2291_v60, 0.0 }
 0x1fe   :  { %v3174_v53 = vpack.c.bf16 %v2352_v21, %v2352_v21  ;;  %v2353_v15 = vmax.f32 %v2289_v50, 0.0  ;;  %v1881_v13 = vpop.f32.mrb[76].mxu0  ;;  %v3288_v45 = vpop.f32.mrb[108].mxu1 }
 0x1ff   :  { %2675 = vst.msk [vmem:[%s5242_s3 + $0x28] sm:$0xf] %vm2664_vm1, %v3176_v61  ;;  %v3177_v34 = vpack.c.bf16 %v2355_v4, %v2355_v4  ;;  %v4737_v52 = vadd.f32 %v1881_v13, %v4479_v5  ;;  %v4740_v29 = vadd.f32 %v3288_v45, %v4534_v11  ;;  %v1883_v37 = vpop.f32.mrb[77].mxu0  ;;  %v2066_v24 = vpop.f32.mrb[109].mxu1 }
 0x200   :  { %2673 = vst.msk [vmem:[%s5242_s3 + $0x20] sm:$0xf] %vm2664_vm1, %v3174_v53  ;;  %v3175_v28 = vpack.c.bf16 %v2353_v15, %v2353_v15  ;;  %v4747_v60 = vadd.f32 %v2066_v24, %v4526_v58  ;;  %v1884_v21 = vpop.f32.mrb[78].mxu0  ;;  %v3289_v50 = vpop.f32.mrb[110].mxu1 }
 0x201   :  { %2676 = vst.msk [vmem:[%s5242_s3 + $0x2c] sm:$0xf] %vm2664_vm1, %v3177_v34  ;;  %v2294_v5 = vadd.f32 %v4620_v1, %v4740_v29  ;;  %v4756_v11 = vadd.f32 %v1884_v21, %v4489_v12  ;;  %v4759_v61 = vadd.f32 %v3289_v50, %v4538_v18  ;;  %v2069_v4 = vpop.f32.mrb[111].mxu1  ;;  %v1886_v53 = vpop.f32.mrb[79].mxu0 }
 0x202   :  { %2674 = vst.msk [vmem:[%s5242_s3 + $0x24] sm:$0xf] %vm2664_vm1, %v3175_v28  ;;  %v2292_v58 = vadd.f32 %v4620_v1, %v4747_v60  ;;  %v4768_v15 = vadd.f32 %v2069_v4, %v4530_v3 }
 0x203   :  { %v2358_v13 = vmax.f32 %v2294_v5, 0.0  ;;  %v2295_v12 = vadd.f32 %v4620_v1, %v4759_v61 }
 0x204   :  { %v2356_v45 = vmax.f32 %v2292_v58, 0.0  ;;  %v2293_v18 = vadd.f32 %v4620_v1, %v4768_v15 }
 0x205   :  { %v3180_v34 = vpack.c.bf16 %v2358_v13, %v2358_v13  ;;  %v2359_v37 = vmax.f32 %v2295_v12, 0.0 }
 0x206   :  { %v3178_v24 = vpack.c.bf16 %v2356_v45, %v2356_v45  ;;  %v2357_v21 = vmax.f32 %v2293_v18, 0.0  ;;  %v1889_v50 = vpop.f32.mrb[80].mxu0  ;;  %v3292_v28 = vpop.f32.mrb[112].mxu1 }
 0x207   :  { %2679 = vst.msk [vmem:[%s5242_s3 + $0x38] sm:$0xf] %vm2664_vm1, %v3180_v34  ;;  %v3181_v3 = vpack.c.bf16 %v2359_v37, %v2359_v37  ;;  %v4779_v5 = vadd.f32 %v1889_v50, %v4501_v22  ;;  %v4782_v4 = vadd.f32 %v3292_v28, %v4553_v14  ;;  %v1891_v53 = vpop.f32.mrb[81].mxu0  ;;  %v2082_v58 = vpop.f32.mrb[113].mxu1 }
 0x208   :  { %2677 = vst.msk [vmem:[%s5242_s3 + $0x30] sm:$0xf] %vm2664_vm1, %v3178_v24  ;;  %v3179_v13 = vpack.c.bf16 %v2357_v21, %v2357_v21  ;;  %v4789_v12 = vadd.f32 %v2082_v58, %v4543_v38  ;;  %v1892_v45 = vpop.f32.mrb[82].mxu0  ;;  %v3293_v18 = vpop.f32.mrb[114].mxu1 }
 0x209   :  { %2680 = vst.msk [vmem:[%s5242_s3 + $0x3c] sm:$0xf] %vm2664_vm1, %v3181_v3  ;;  %v2298_v22 = vadd.f32 %v4620_v1, %v4782_v4  ;;  %v4798_v14 = vadd.f32 %v1892_v45, %v4511_v33  ;;  %v4801_v34 = vadd.f32 %v3293_v18, %v4558_v32  ;;  %v2085_v37 = vpop.f32.mrb[115].mxu1  ;;  %v1894_v24 = vpop.f32.mrb[83].mxu0 }
 0x20a   :  { %2678 = vst.msk [vmem:[%s5242_s3 + $0x34] sm:$0xf] %vm2664_vm1, %v3179_v13  ;;  %v2296_v38 = vadd.f32 %v4620_v1, %v4789_v12  ;;  %v4810_v21 = vadd.f32 %v2085_v37, %v4548_v56 }
 0x20b   :  { %v2362_v50 = vmax.f32 %v2298_v22, 0.0  ;;  %v2299_v33 = vadd.f32 %v4620_v1, %v4801_v34 }
 0x20c   :  { %v2360_v28 = vmax.f32 %v2296_v38, 0.0  ;;  %v2297_v32 = vadd.f32 %v4620_v1, %v4810_v21 }
 0x20d   :  { %v3184_v3 = vpack.c.bf16 %v2362_v50, %v2362_v50  ;;  %v2363_v53 = vmax.f32 %v2299_v33, 0.0 }
 0x20e   :  { %v3182_v58 = vpack.c.bf16 %v2360_v28, %v2360_v28  ;;  %v2361_v45 = vmax.f32 %v2297_v32, 0.0  ;;  %v1897_v18 = vpop.f32.mrb[84].mxu0  ;;  %v3296_v13 = vpop.f32.mrb[116].mxu1 }
 0x20f   :  { %2683 = vst.msk [vmem:[%s5242_s3 + $0x48] sm:$0xf] %vm2664_vm1, %v3184_v3  ;;  %v3185_v56 = vpack.c.bf16 %v2363_v53, %v2363_v53  ;;  %v4821_v22 = vadd.f32 %v1897_v18, %v4516_v41  ;;  %v4824_v37 = vadd.f32 %v3296_v13, %v4573_v40  ;;  %v1899_v24 = vpop.f32.mrb[85].mxu0  ;;  %v2098_v38 = vpop.f32.mrb[117].mxu1 }
 0x210   :  { %2681 = vst.msk [vmem:[%s5242_s3 + $0x40] sm:$0xf] %vm2664_vm1, %v3182_v58  ;;  %v3183_v50 = vpack.c.bf16 %v2361_v45, %v2361_v45  ;;  %v4831_v33 = vadd.f32 %v2098_v38, %v4563_v62  ;;  %v1900_v28 = vpop.f32.mrb[86].mxu0  ;;  %v3297_v32 = vpop.f32.mrb[118].mxu1 }
 0x211   :  { %2684 = vst.msk [vmem:[%s5242_s3 + $0x4c] sm:$0xf] %vm2664_vm1, %v3185_v56  ;;  %v2302_v41 = vadd.f32 %v4620_v1, %v4824_v37  ;;  %v4840_v40 = vadd.f32 %v1900_v28, %v4520_v49  ;;  %v4843_v3 = vadd.f32 %v3297_v32, %v4578_v7  ;;  %v2101_v53 = vpop.f32.mrb[119].mxu1  ;;  %v1902_v58 = vpop.f32.mrb[87].mxu0 }
 0x212   :  { %2682 = vst.msk [vmem:[%s5242_s3 + $0x44] sm:$0xf] %vm2664_vm1, %v3183_v50  ;;  %v2300_v62 = vadd.f32 %v4620_v1, %v4831_v33  ;;  %v4852_v45 = vadd.f32 %v2101_v53, %v4568_v16 }
 0x213   :  { %v2366_v18 = vmax.f32 %v2302_v41, 0.0  ;;  %v2303_v49 = vadd.f32 %v4620_v1, %v4843_v3 }
 0x214   :  { %v2364_v13 = vmax.f32 %v2300_v62, 0.0  ;;  %v2301_v7 = vadd.f32 %v4620_v1, %v4852_v45 }
 0x215   :  { %v3188_v56 = vpack.c.bf16 %v2366_v18, %v2366_v18  ;;  %v2367_v24 = vmax.f32 %v2303_v49, 0.0 }
 0x216   :  { %v3186_v38 = vpack.c.bf16 %v2364_v13, %v2364_v13  ;;  %v2365_v28 = vmax.f32 %v2301_v7, 0.0  ;;  %v1905_v32 = vpop.f32.mrb[88].mxu0  ;;  %v3300_v50 = vpop.f32.mrb[120].mxu1 }
 0x217   :  { %2687 = vst.msk [vmem:[%s5242_s3 + $0x58] sm:$0xf] %vm2664_vm1, %v3188_v56  ;;  %v3189_v16 = vpack.c.bf16 %v2367_v24, %v2367_v24  ;;  %v4863_v41 = vadd.f32 %v1905_v32, %v4524_v57  ;;  %v4866_v53 = vadd.f32 %v3300_v50, %v4593_v27  ;;  %v1907_v58 = vpop.f32.mrb[89].mxu0  ;;  %v2114_v62 = vpop.f32.mrb[121].mxu1 }
 0x218   :  { %2685 = vst.msk [vmem:[%s5242_s3 + $0x50] sm:$0xf] %vm2664_vm1, %v3186_v38  ;;  %v3187_v18 = vpack.c.bf16 %v2365_v28, %v2365_v28  ;;  %v4873_v49 = vadd.f32 %v2114_v62, %v4583_v19  ;;  %v1908_v13 = vpop.f32.mrb[90].mxu0  ;;  %v3301_v7 = vpop.f32.mrb[122].mxu1 }
 0x219   :  { %2688 = vst.msk [vmem:[%s5242_s3 + $0x5c] sm:$0xf] %vm2664_vm1, %v3189_v16  ;;  %v2306_v57 = vadd.f32 %v4620_v1, %v4866_v53  ;;  %v4882_v27 = vadd.f32 %v1908_v13, %v4528_v2  ;;  %v4885_v56 = vadd.f32 %v3301_v7, %v4598_v31  ;;  %v2117_v24 = vpop.f32.mrb[123].mxu1  ;;  %v1910_v38 = vpop.f32.mrb[91].mxu0 }
 0x21a   :  { %2686 = vst.msk [vmem:[%s5242_s3 + $0x54] sm:$0xf] %vm2664_vm1, %v3187_v18  ;;  %v2304_v19 = vadd.f32 %v4620_v1, %v4873_v49  ;;  %v4894_v28 = vadd.f32 %v2117_v24, %v4588_v23 }
 0x21b   :  { %v2370_v32 = vmax.f32 %v2306_v57, 0.0  ;;  %v2307_v2 = vadd.f32 %v4620_v1, %v4885_v56 }
 0x21c   :  { %v2368_v50 = vmax.f32 %v2304_v19, 0.0  ;;  %v2305_v31 = vadd.f32 %v4620_v1, %v4894_v28 }
 0x21d   :  { %v3192_v16 = vpack.c.bf16 %v2370_v32, %v2370_v32  ;;  %v2371_v58 = vmax.f32 %v2307_v2, 0.0 }
 0x21e   :  { %v3190_v62 = vpack.c.bf16 %v2368_v50, %v2368_v50  ;;  %v2369_v13 = vmax.f32 %v2305_v31, 0.0  ;;  %v1913_v7 = vpop.f32.mrb[92].mxu0  ;;  %v3304_v18 = vpop.f32.mrb[124].mxu1 }
 0x21f   :  { %2691 = vst.msk [vmem:[%s5242_s3 + $0x68] sm:$0xf] %vm2664_vm1, %v3192_v16  ;;  %v3193_v23 = vpack.c.bf16 %v2371_v58, %v2371_v58  ;;  %v4905_v57 = vadd.f32 %v1913_v7, %v4532_v10  ;;  %v4908_v24 = vadd.f32 %v3304_v18, %v4613_v43  ;;  %v1915_v38 = vpop.f32.mrb[93].mxu0  ;;  %v2130_v19 = vpop.f32.mrb[125].mxu1 }
 0x220   :  { %2689 = vst.msk [vmem:[%s5242_s3 + $0x60] sm:$0xf] %vm2664_vm1, %v3190_v62  ;;  %v3191_v32 = vpack.c.bf16 %v2369_v13, %v2369_v13  ;;  %v4915_v2 = vadd.f32 %v2130_v19, %v4603_v35  ;;  %v1916_v50 = vpop.f32.mrb[94].mxu0  ;;  %v3305_v31 = vpop.f32.mrb[126].mxu1 }
 0x221   :  { %5264 = vst [vmem:[#allocation21_spill] sm:$0xff] %v4908_v24  ;;  %2692 = vst.msk [vmem:[%s5242_s3 + $0x6c] sm:$0xf] %vm2664_vm1, %v3193_v23  ;;  %v2310_v10 = vadd.f32 %v4620_v1, %v4908_v24  ;;  %v4924_v43 = vadd.f32 %v1916_v50, %v4536_v17  ;;  %v4927_v16 = vadd.f32 %v3305_v31, %v4618_v47  ;;  %v2133_v58 = vpop.f32.mrb[127].mxu1  ;;  %v1918_v62 = vpop.f32.mrb[95].mxu0 }
 0x222   :  { %2690 = vst.msk [vmem:[%s5242_s3 + $0x64] sm:$0xf] %vm2664_vm1, %v3191_v32  ;;  %v2308_v35 = vadd.f32 %v4620_v1, %v4915_v2  ;;  %v4936_v13 = vadd.f32 %v2133_v58, %v4608_v39 }
 0x223   :  { %5265 = vst [vmem:[#allocation22_spill] sm:$0xff] %v4927_v16  ;;  %v2374_v7 = vmax.f32 %v2310_v10, 0.0  ;;  %v2311_v17 = vadd.f32 %v4620_v1, %v4927_v16 }
 0x224   :  { %5266 = vst [vmem:[#allocation23_spill] sm:$0xff] %v4936_v13  ;;  %v2372_v18 = vmax.f32 %v2308_v35, 0.0  ;;  %v2309_v47 = vadd.f32 %v4620_v1, %v4936_v13 }
 0x225   :  { %v3196_v23 = vpack.c.bf16 %v2374_v7, %v2374_v7  ;;  %v2375_v38 = vmax.f32 %v2311_v17, 0.0 }
 0x226   :  { %v3194_v19 = vpack.c.bf16 %v2372_v18, %v2372_v18  ;;  %v2373_v50 = vmax.f32 %v2309_v47, 0.0  ;;  %v1921_v31 = vpop.f32.mrb[96].mxu0  ;;  %v3308_v32 = vpop.f32.mrb[128].mxu1 }
 0x227   :  { %2695 = vst.msk [vmem:[%s5242_s3 + $0x78] sm:$0xf] %vm2664_vm1, %v3196_v23  ;;  %v3197_v39 = vpack.c.bf16 %v2375_v38, %v2375_v38  ;;  %v4947_v10 = vadd.f32 %v1921_v31, %v4540_v30  ;;  %v2155_v58 = vadd.f32 %v3308_v32, %v4653_v59  ;;  %v1923_v62 = vpop.f32.mrb[97].mxu0  ;;  %v2146_v35 = vpop.f32.mrb[129].mxu1  ;;  %v5267_v32 = vld [vmem:[#allocation19_spill] sm:$0xff] }
 0x228   :  { %2693 = vst.msk [vmem:[%s5242_s3 + $0x70] sm:$0xf] %vm2664_vm1, %v3194_v19  ;;  %v3195_v7 = vpack.c.bf16 %v2373_v50, %v2373_v50  ;;  %v2147_v17 = vadd.f32 %v2146_v35, %v4623_v51  ;;  %v1924_v18 = vpop.f32.mrb[98].mxu0  ;;  %v3309_v47 = vpop.f32.mrb[130].mxu1 }
 0x229   :  { %2696 = vst.msk [vmem:[%s5242_s3 + $0x7c] sm:$0xf] %vm2664_vm1, %v3197_v39  ;;  %v2314_v30 = vadd.f32 %v4620_v1, %v2155_v58  ;;  %v2731_v59 = vsub.f32 %v4626_v0, %v2155_v58  ;;  %v4962_v23 = vadd.f32 %v1924_v18, %v4545_v48  ;;  %v2158_v38 = vadd.f32 %v3309_v47, %v4672_v6  ;;  %v2149_v19 = vpop.f32.mrb[131].mxu1  ;;  %v1926_v50 = vpop.f32.mrb[99].mxu0  ;;  %v5268_v47 = vld [vmem:[#allocation20_spill] sm:$0xff] }
 0x22a   :  { %2694 = vst.msk [vmem:[%s5242_s3 + $0x74] sm:$0xf] %vm2664_vm1, %v3195_v7  ;;  %v2312_v51 = vadd.f32 %v4620_v1, %v2147_v17  ;;  %v2729_v31 = vsub.f32 %v4629_v25, %v2147_v17  ;;  %v2150_v39 = vadd.f32 %v2149_v19, %v5267_v32 }
 0x22b   :  { %v2378_v62 = vmax.f32 %v2314_v30, 0.0  ;;  %v2763_v0 = vmul.f32 %v2731_v59, %v2731_v59  ;;  %v2315_v48 = vadd.f32 %v4620_v1, %v2158_v38  ;;  %v2732_v58 = vsub.f32 %v4637_v46, %v2158_v38  ;;  %v5269_v38 = vld [vmem:[#allocation5_spill] sm:$0xff] }
 0x22c   :  { %v2376_v6 = vmax.f32 %v2312_v51, 0.0  ;;  %v2761_v35 = vmul.f32 %v2729_v31, %v2729_v31  ;;  %v2313_v18 = vadd.f32 %v4620_v1, %v2150_v39  ;;  %v2730_v50 = vsub.f32 %v5268_v47, %v2150_v39 }
 0x22d   :  { %v3200_v16 = vpack.c.bf16 %v2378_v62, %v2378_v62  ;;  %v2379_v7 = vmax.f32 %v2315_v48, 0.0  ;;  %v2796_v24 = vsel %vm1309_vm0, %v2763_v0, 0.0  ;;  %v2764_v59 = vmul.f32 %v2732_v58, %v2732_v58 }
 0x22e   :  { %v3198_v13 = vpack.c.bf16 %v2376_v6, %v2376_v6  ;;  %v2377_v25 = vmax.f32 %v2313_v18, 0.0  ;;  %v2762_v17 = vmul.f32 %v2730_v50, %v2730_v50  ;;  %v1929_v19 = vpop.f32.mrb[100].mxu0  ;;  %v3312_v30 = vpop.f32.mrb[132].mxu1  ;;  %v2793_v62 = vsel %vm1309_vm0, %v2761_v35, 0.0 }
 0x22f   :  { %2699 = vst.msk [vmem:[%s5242_s3 + $0x88] sm:$0xf] %vm2664_vm1, %v3200_v16  ;;  %v3201_v46 = vpack.c.bf16 %v2379_v7, %v2379_v7  ;;  %v4982_v51 = vadd.f32 %v1929_v19, %v5269_v38  ;;  %v2171_v31 = vadd.f32 %v3312_v30, %v4737_v52  ;;  %v1931_v32 = vpop.f32.mrb[101].mxu0  ;;  %v2162_v39 = vpop.f32.mrb[133].mxu1 }
 0x230   :  { %2697 = vst.msk [vmem:[%s5242_s3 + $0x80] sm:$0xf] %vm2664_vm1, %v3198_v13  ;;  %v3199_v0 = vpack.c.bf16 %v2377_v25, %v2377_v25  ;;  %v2794_v48 = vsel %vm1309_vm0, %v2762_v17, 0.0  ;;  %v2163_v16 = vadd.f32 %v2162_v39, %v4695_v36  ;;  %v1932_v58 = vpop.f32.mrb[102].mxu0  ;;  %v3313_v6 = vpop.f32.mrb[134].mxu1  ;;  %v5270_v13 = vld [vmem:[#allocation6_spill] sm:$0xff] }
 0x231   :  { %2700 = vst.msk [vmem:[%s5242_s3 + $0x8c] sm:$0xf] %vm2664_vm1, %v3201_v46  ;;  %v2795_v52 = vadd.f32 %v2794_v48, %v2793_v62  ;;  %v2318_v18 = vadd.f32 %v4620_v1, %v2171_v31  ;;  %v2735_v47 = vsub.f32 %v4656_v20, %v2171_v31  ;;  %v4999_v50 = vadd.f32 %v1932_v58, %v5270_v13  ;;  %v2165_v35 = vpop.f32.mrb[135].mxu1  ;;  %v1934_v7 = vpop.f32.mrb[103].mxu0 }
 0x232   :  { %2698 = vst.msk [vmem:[%s5242_s3 + $0x84] sm:$0xf] %vm2664_vm1, %v3199_v0  ;;  %v2316_v36 = vadd.f32 %v4620_v1, %v2163_v16  ;;  %v2733_v25 = vsub.f32 %v4663_v9, %v2163_v16  ;;  %v2174_v17 = vadd.f32 %v3313_v6, %v4756_v11  ;;  %v2166_v19 = vadd.f32 %v2165_v35, %v4714_v42 }
 0x233   :  { %v2798_v20 = vsel %vm1309_vm0, %v2764_v59, 0.0  ;;  %v2797_v30 = vadd.f32 %v2796_v24, %v2795_v52  ;;  %v2382_v46 = vmax.f32 %v2318_v18, 0.0  ;;  %v2767_v58 = vmul.f32 %v2735_v47, %v2735_v47  ;;  %v5271_v52 = vld [vmem:[#allocation7_spill] sm:$0xff] }
 0x234   :  { %v2380_v38 = vmax.f32 %v2316_v36, 0.0  ;;  %v2765_v31 = vmul.f32 %v2733_v25, %v2733_v25  ;;  %v2319_v32 = vadd.f32 %v4620_v1, %v2174_v17  ;;  %v2736_v39 = vsub.f32 %v4675_v26, %v2174_v17 }
 0x235   :  { %v3204_v62 = vpack.c.bf16 %v2382_v46, %v2382_v46  ;;  %v2799_v0 = vadd.f32 %v2798_v20, %v2797_v30  ;;  %v2317_v48 = vadd.f32 %v4620_v1, %v2166_v19  ;;  %v2734_v26 = vsub.f32 %v4684_v54, %v2166_v19  ;;  %v5272_v19 = vld [vmem:[#allocation8_spill] sm:$0xff] }
 0x236   :  { %v3202_v9 = vpack.c.bf16 %v2380_v38, %v2380_v38  ;;  %v2800_v11 = vsel %vm1309_vm0, %v2765_v31, 0.0  ;;  %v2383_v16 = vmax.f32 %v2319_v32, 0.0  ;;  %v1937_v42 = vpop.f32.mrb[104].mxu0  ;;  %v3316_v6 = vpop.f32.mrb[136].mxu1  ;;  %v2768_v7 = vmul.f32 %v2736_v39, %v2736_v39 }
 0x237   :  { %2703 = vst.msk [vmem:[%s5242_s3 + $0x98] sm:$0xf] %vm2664_vm1, %v3204_v62  ;;  %v2801_v24 = vadd.f32 %v2800_v11, %v2799_v0  ;;  %v2381_v59 = vmax.f32 %v2317_v48, 0.0  ;;  %v5020_v18 = vadd.f32 %v1937_v42, %v5271_v52  ;;  %v1939_v13 = vpop.f32.mrb[105].mxu0  ;;  %v2178_v47 = vpop.f32.mrb[137].mxu1  ;;  %v2187_v36 = vadd.f32 %v3316_v6, %v4821_v22 }
 0x238   :  { %2701 = vst.msk [vmem:[%s5242_s3 + $0x90] sm:$0xf] %vm2664_vm1, %v3202_v9  ;;  %v3205_v35 = vpack.c.bf16 %v2383_v16, %v2383_v16  ;;  %v2179_v25 = vadd.f32 %v2178_v47, %v4779_v5  ;;  %v1940_v17 = vpop.f32.mrb[106].mxu0  ;;  %v3317_v20 = vpop.f32.mrb[138].mxu1  ;;  %v2766_v54 = vmul.f32 %v2734_v26, %v2734_v26  ;;  %v2804_v11 = vsel %vm1309_vm0, %v2767_v58, 0.0 }
 0x239   :  { %v3203_v30 = vpack.c.bf16 %v2381_v59, %v2381_v59  ;;  %v5029_v46 = vadd.f32 %v1940_v17, %v5272_v19  ;;  %v2190_v38 = vadd.f32 %v3317_v20, %v4840_v40  ;;  %v2181_v31 = vpop.f32.mrb[139].mxu1  ;;  %v1942_v32 = vpop.f32.mrb[107].mxu0  ;;  %v2322_v22 = vadd.f32 %v4620_v1, %v2187_v36 }
 0x23a   :  { %2704 = vst.msk [vmem:[%s5242_s3 + $0x9c] sm:$0xf] %vm2664_vm1, %v3205_v35  ;;  %v2739_v5 = vsub.f32 %v4698_v63, %v2187_v36  ;;  %v2320_v39 = vadd.f32 %v4620_v1, %v2179_v25  ;;  %v2737_v62 = vsub.f32 %v4705_v44, %v2179_v25  ;;  %v2802_v40 = vsel %vm1309_vm0, %v2766_v54, 0.0  ;;  %v5273_v54 = vld [vmem:[#allocation9_spill] sm:$0xff] }
 0x23b   :  { %2702 = vst.msk [vmem:[%s5242_s3 + $0x94] sm:$0xf] %vm2664_vm1, %v3203_v30  ;;  %v2323_v0 = vadd.f32 %v4620_v1, %v2190_v38  ;;  %v2740_v48 = vsub.f32 %v4717_v8, %v2190_v38  ;;  %v2182_v9 = vadd.f32 %v2181_v31, %v4798_v14  ;;  %v2803_v63 = vadd.f32 %v2802_v40, %v2801_v24 }
 0x23c   :  { %v2386_v16 = vmax.f32 %v2322_v22, 0.0  ;;  %v2384_v42 = vmax.f32 %v2320_v39, 0.0  ;;  %v2806_v44 = vsel %vm1309_vm0, %v2768_v7, 0.0  ;;  %v2769_v6 = vmul.f32 %v2737_v62, %v2737_v62  ;;  %v5274_v39 = vld [vmem:[#allocation10_spill] sm:$0xff] }
 0x23d   :  { %v2387_v59 = vmax.f32 %v2323_v0, 0.0  ;;  %v2321_v26 = vadd.f32 %v4620_v1, %v2182_v9  ;;  %v2805_v52 = vadd.f32 %v2804_v11, %v2803_v63  ;;  %v2771_v47 = vmul.f32 %v2739_v5, %v2739_v5 }
 0x23e   :  { %v3208_v13 = vpack.c.bf16 %v2386_v16, %v2386_v16  ;;  %v3206_v35 = vpack.c.bf16 %v2384_v42, %v2384_v42  ;;  %v1945_v36 = vpop.f32.mrb[108].mxu0  ;;  %v3320_v25 = vpop.f32.mrb[140].mxu1  ;;  %v2808_v8 = vsel %vm1309_vm0, %v2769_v6, 0.0  ;;  %v2772_v17 = vmul.f32 %v2740_v48, %v2740_v48 }
 0x23f   :  { %v3209_v14 = vpack.c.bf16 %v2387_v59, %v2387_v59  ;;  %v2385_v58 = vmax.f32 %v2321_v26, 0.0  ;;  %v1947_v24 = vpop.f32.mrb[109].mxu0  ;;  %v2194_v20 = vpop.f32.mrb[141].mxu1  ;;  %v2807_v7 = vadd.f32 %v2806_v44, %v2805_v52  ;;  %v2738_v30 = vsub.f32 %v4726_v55, %v2182_v9 }
 0x240   :  { %2707 = vst.msk [vmem:[%s5242_s3 + $0xa8] sm:$0xf] %vm2664_vm1, %v3208_v13  ;;  %2705 = vst.msk [vmem:[%s5242_s3 + $0xa0] sm:$0xf] %vm2664_vm1, %v3206_v35  ;;  %v5062_v19 = vadd.f32 %v1945_v36, %v5273_v54  ;;  %v2203_v38 = vadd.f32 %v3320_v25, %v4905_v57  ;;  %v1948_v31 = vpop.f32.mrb[110].mxu0  ;;  %v3321_v32 = vpop.f32.mrb[142].mxu1  ;;  %v2195_v5 = vadd.f32 %v2194_v20, %v4863_v41 }
 0x241   :  { %2708 = vst.msk [vmem:[%s5242_s3 + $0xac] sm:$0xf] %vm2664_vm1, %v3209_v14  ;;  %v3207_v22 = vpack.c.bf16 %v2385_v58, %v2385_v58  ;;  %v5071_v62 = vadd.f32 %v1948_v31, %v5274_v39  ;;  %v2206_v55 = vadd.f32 %v3321_v32, %v4924_v43  ;;  %v2197_v40 = vpop.f32.mrb[143].mxu1  ;;  %v1950_v0 = vpop.f32.mrb[111].mxu0  ;;  %v2809_v48 = vadd.f32 %v2808_v8, %v2807_v7  ;;  %v5275_v54 = vld [vmem:[#allocation11_spill] sm:$0xff]  ;;  %v5276_v39 = vld [vmem:[#allocation12_spill] sm:$0xff] }
 0x242   :  { %v2770_v9 = vmul.f32 %v2738_v30, %v2738_v30  ;;  %v2326_v57 = vadd.f32 %v4620_v1, %v2203_v38  ;;  %v2743_v11 = vsub.f32 %v4740_v29, %v2203_v38  ;;  %v2324_v41 = vadd.f32 %v4620_v1, %v2195_v5 }
 0x243   :  { %2706 = vst.msk [vmem:[%s5242_s3 + $0xa4] sm:$0xf] %vm2664_vm1, %v3207_v22  ;;  %v2741_v63 = vsub.f32 %v4747_v60, %v2195_v5  ;;  %v2327_v16 = vadd.f32 %v4620_v1, %v2206_v55  ;;  %v2744_v43 = vsub.f32 %v4759_v61, %v2206_v55  ;;  %v2812_v42 = vsel %vm1309_vm0, %v2771_v47, 0.0 }
 0x244   :  { %v2810_v44 = vsel %vm1309_vm0, %v2770_v9, 0.0  ;;  %v2390_v6 = vmax.f32 %v2326_v57, 0.0  ;;  %v2198_v29 = vadd.f32 %v2197_v40, %v4882_v27  ;;  %v2388_v26 = vmax.f32 %v2324_v41, 0.0 }
 0x245   :  { %v2811_v59 = vadd.f32 %v2810_v44, %v2809_v48  ;;  %v2773_v52 = vmul.f32 %v2741_v63, %v2741_v63  ;;  %v2391_v13 = vmax.f32 %v2327_v16, 0.0  ;;  %v2814_v35 = vsel %vm1309_vm0, %v2772_v17, 0.0 }
 0x246   :  { %v3212_v36 = vpack.c.bf16 %v2390_v6, %v2390_v6  ;;  %v2775_v25 = vmul.f32 %v2743_v11, %v2743_v11  ;;  %v2325_v60 = vadd.f32 %v4620_v1, %v2198_v29  ;;  %v1953_v8 = vpop.f32.mrb[112].mxu0  ;;  %v3324_v14 = vpop.f32.mrb[144].mxu1  ;;  %v3210_v58 = vpack.c.bf16 %v2388_v26, %v2388_v26 }
 0x247   :  { %v2813_v61 = vadd.f32 %v2812_v42, %v2811_v59  ;;  %v3213_v47 = vpack.c.bf16 %v2391_v13, %v2391_v13  ;;  %v2776_v24 = vmul.f32 %v2744_v43, %v2744_v43  ;;  %v1955_v20 = vpop.f32.mrb[113].mxu0  ;;  %v2210_v7 = vpop.f32.mrb[145].mxu1  ;;  %v2816_v27 = vsel %vm1309_vm0, %v2773_v52, 0.0 }
 0x248   :  { %2711 = vst.msk [vmem:[%s5242_s3 + $0xb8] sm:$0xf] %vm2664_vm1, %v3212_v36  ;;  %v2389_v17 = vmax.f32 %v2325_v60, 0.0  ;;  %v2742_v30 = vsub.f32 %v4768_v15, %v2198_v29  ;;  %v5096_v38 = vadd.f32 %v1953_v8, %v5275_v54  ;;  %v1956_v31 = vpop.f32.mrb[114].mxu0  ;;  %v3325_v32 = vpop.f32.mrb[146].mxu1  ;;  %v2219_v5 = vadd.f32 %v3324_v14, %v4982_v51 }
 0x249   :  { %2709 = vst.msk [vmem:[%s5242_s3 + $0xb0] sm:$0xf] %vm2664_vm1, %v3210_v58  ;;  %v2815_v22 = vadd.f32 %v2814_v35, %v2813_v61  ;;  %2712 = vst.msk [vmem:[%s5242_s3 + $0xbc] sm:$0xf] %vm2664_vm1, %v3213_v47  ;;  %v2211_v15 = vadd.f32 %v2210_v7, %v4947_v10  ;;  %v5109_v55 = vadd.f32 %v1956_v31, %v5276_v39  ;;  %v2213_v40 = vpop.f32.mrb[147].mxu1  ;;  %v1958_v0 = vpop.f32.mrb[115].mxu0 }
 0x24a   :  { %v3211_v48 = vpack.c.bf16 %v2389_v17, %v2389_v17  ;;  %v2774_v9 = vmul.f32 %v2742_v30, %v2742_v30  ;;  %v2222_v57 = vadd.f32 %v3325_v32, %v4999_v50  ;;  %v2214_v11 = vadd.f32 %v2213_v40, %v4962_v23 }
 0x24b   :  { %v2817_v41 = vadd.f32 %v2816_v27, %v2815_v22  ;;  %v2330_v63 = vadd.f32 %v4620_v1, %v2219_v5  ;;  %v2328_v16 = vadd.f32 %v4620_v1, %v2211_v15  ;;  %v2747_v51 = vsub.f32 %v4782_v4, %v2219_v5  ;;  %v5277_v27 = vld [vmem:[#allocation13_spill] sm:$0xff]  ;;  %v5278_v5 = vld [vmem:[#allocation14_spill] sm:$0xff] }
 0x24c   :  { %2710 = vst.msk [vmem:[%s5242_s3 + $0xb4] sm:$0xf] %vm2664_vm1, %v3211_v48  ;;  %v2818_v10 = vsel %vm1309_vm0, %v2774_v9, 0.0  ;;  %v2745_v43 = vsub.f32 %v4789_v12, %v2211_v15  ;;  %v2331_v50 = vadd.f32 %v4620_v1, %v2222_v57  ;;  %v2820_v23 = vsel %vm1309_vm0, %v2775_v25, 0.0 }
 0x24d   :  { %v2819_v42 = vadd.f32 %v2818_v10, %v2817_v41  ;;  %v2394_v44 = vmax.f32 %v2330_v63, 0.0  ;;  %v2392_v6 = vmax.f32 %v2328_v16, 0.0  ;;  %v2822_v29 = vsel %vm1309_vm0, %v2776_v24, 0.0 }
 0x24e   :  { %v2777_v59 = vmul.f32 %v2745_v43, %v2745_v43  ;;  %v2395_v26 = vmax.f32 %v2331_v50, 0.0  ;;  %v2329_v52 = vadd.f32 %v4620_v1, %v2214_v11  ;;  %v1961_v13 = vpop.f32.mrb[116].mxu0  ;;  %v3328_v35 = vpop.f32.mrb[148].mxu1  ;;  %v2748_v12 = vsub.f32 %v4801_v34, %v2222_v57 }
 0x24f   :  { %v2821_v36 = vadd.f32 %v2820_v23, %v2819_v42  ;;  %v3216_v60 = vpack.c.bf16 %v2394_v44, %v2394_v44  ;;  %v3214_v4 = vpack.c.bf16 %v2392_v6, %v2392_v6  ;;  %v1963_v8 = vpop.f32.mrb[117].mxu0  ;;  %v2226_v14 = vpop.f32.mrb[149].mxu1  ;;  %v2779_v61 = vmul.f32 %v2747_v51, %v2747_v51 }
 0x250   :  { %v2824_v25 = vsel %vm1309_vm0, %v2777_v59, 0.0  ;;  %v3217_v58 = vpack.c.bf16 %v2395_v26, %v2395_v26  ;;  %v2393_v47 = vmax.f32 %v2329_v52, 0.0  ;;  %v1964_v20 = vpop.f32.mrb[118].mxu0  ;;  %v3329_v24 = vpop.f32.mrb[150].mxu1  ;;  %v2746_v7 = vsub.f32 %v4810_v21, %v2214_v11 }
 0x251   :  { %2715 = vst.msk [vmem:[%s5242_s3 + $0xc8] sm:$0xf] %vm2664_vm1, %v3216_v60  ;;  %2713 = vst.msk [vmem:[%s5242_s3 + $0xc0] sm:$0xf] %vm2664_vm1, %v3214_v4  ;;  %v2823_v34 = vadd.f32 %v2822_v29, %v2821_v36  ;;  %v1962_v17 = vadd.f32 %v1961_v13, %v5277_v27  ;;  %v2235_v30 = vadd.f32 %v3328_v35, %v5062_v19  ;;  %v2229_v54 = vpop.f32.mrb[151].mxu1  ;;  %v1966_v31 = vpop.f32.mrb[119].mxu0 }
 0x252   :  { %2716 = vst.msk [vmem:[%s5242_s3 + $0xcc] sm:$0xf] %vm2664_vm1, %v3217_v58  ;;  %v3215_v32 = vpack.c.bf16 %v2393_v47, %v2393_v47  ;;  %v2227_v22 = vadd.f32 %v2226_v14, %v5020_v18  ;;  %v1965_v15 = vadd.f32 %v1964_v20, %v5278_v5  ;;  %v2238_v39 = vadd.f32 %v3329_v24, %v5071_v62  ;;  %v5279_v4 = vld [vmem:[#allocation15_spill] sm:$0xff]  ;;  %v5280_v58 = vld [vmem:[#allocation16_spill] sm:$0xff] }
 0x253   :  { %v2825_v40 = vadd.f32 %v2824_v25, %v2823_v34  ;;  %v2780_v21 = vmul.f32 %v2748_v12, %v2748_v12  ;;  %v2778_v0 = vmul.f32 %v2746_v7, %v2746_v7  ;;  %v2334_v48 = vadd.f32 %v4620_v1, %v2235_v30 }
 0x254   :  { %2714 = vst.msk [vmem:[%s5242_s3 + $0xc4] sm:$0xf] %vm2664_vm1, %v3215_v32  ;;  %v2751_v19 = vsub.f32 %v4824_v37, %v2235_v30  ;;  %v2332_v9 = vadd.f32 %v4620_v1, %v2227_v22  ;;  %v2749_v18 = vsub.f32 %v4831_v33, %v2227_v22  ;;  %v2335_v57 = vadd.f32 %v4620_v1, %v2238_v39  ;;  %v3712_v30 = vld [vmem:[#allocation2] ss:$0 sm:$0xff] }
 0x255   :  { %v2828_v62 = vsel %vm1309_vm0, %v2779_v61, 0.0  ;;  %v2826_v11 = vsel %vm1309_vm0, %v2778_v0, 0.0  ;;  %v2398_v41 = vmax.f32 %v2334_v48, 0.0  ;;  %v2230_v63 = vadd.f32 %v2229_v54, %v5029_v46 }
 0x256   :  { %v2827_v16 = vadd.f32 %v2826_v11, %v2825_v40  ;;  %v2396_v10 = vmax.f32 %v2332_v9, 0.0  ;;  %v2781_v51 = vmul.f32 %v2749_v18, %v2749_v18  ;;  %v2399_v43 = vmax.f32 %v2335_v57, 0.0  ;;  %v1969_v50 = vpop.f32.mrb[120].mxu0  ;;  %v3332_v23 = vpop.f32.mrb[152].mxu1 }
 0x257   :  { %v2830_v37 = vsel %vm1309_vm0, %v2780_v21, 0.0  ;;  %v3220_v42 = vpack.c.bf16 %v2398_v41, %v2398_v41  ;;  %v2752_v33 = vsub.f32 %v4843_v3, %v2238_v39  ;;  %v2333_v44 = vadd.f32 %v4620_v1, %v2230_v63  ;;  %v1971_v6 = vpop.f32.mrb[121].mxu0  ;;  %v2242_v29 = vpop.f32.mrb[153].mxu1 }
 0x258   :  { %v2829_v59 = vadd.f32 %v2828_v62, %v2827_v16  ;;  %v2783_v26 = vmul.f32 %v2751_v19, %v2751_v19  ;;  %v3218_v52 = vpack.c.bf16 %v2396_v10, %v2396_v10  ;;  %v3221_v13 = vpack.c.bf16 %v2399_v43, %v2399_v43  ;;  %v1972_v46 = vpop.f32.mrb[122].mxu0  ;;  %v3333_v35 = vpop.f32.mrb[154].mxu1 }
 0x259   :  { %2719 = vst.msk [vmem:[%s5242_s3 + $0xd8] sm:$0xf] %vm2664_vm1, %v3220_v42  ;;  %v2832_v36 = vsel %vm1309_vm0, %v2781_v51, 0.0  ;;  %v2397_v60 = vmax.f32 %v2333_v44, 0.0  ;;  %v2750_v3 = vsub.f32 %v4852_v45, %v2230_v63  ;;  %v1970_v1 = vadd.f32 %v1969_v50, %v5279_v4  ;;  %v2245_v12 = vpop.f32.mrb[155].mxu1  ;;  %v1974_v8 = vpop.f32.mrb[123].mxu0 }
 0x25a   :  { %2717 = vst.msk [vmem:[%s5242_s3 + $0xd0] sm:$0xf] %vm2664_vm1, %v3218_v52  ;;  %v2831_v14 = vadd.f32 %v2830_v37, %v2829_v59  ;;  %2720 = vst.msk [vmem:[%s5242_s3 + $0xdc] sm:$0xf] %vm2664_vm1, %v3221_v13  ;;  %v2251_v61 = vadd.f32 %v3332_v23, %v1962_v17  ;;  %v2243_v25 = vadd.f32 %v2242_v29, %v5096_v38  ;;  %v2836_v22 = vsel %vm1309_vm0, %v2783_v26, 0.0  ;;  %v5281_v42 = vld [vmem:[#allocation17_spill] sm:$0xff] }
 0x25b   :  { %v1973_v45 = vadd.f32 %v1972_v46, %v5280_v58  ;;  %v3219_v47 = vpack.c.bf16 %v2397_v60, %v2397_v60  ;;  %v2782_v20 = vmul.f32 %v2750_v3, %v2750_v3  ;;  %v2254_v24 = vadd.f32 %v3333_v35, %v1965_v15  ;;  %v5282_v29 = vld [vmem:[#allocation18_spill] sm:$0xff]  ;;  %v5283_v8 = vld [vmem:[#allocation23_spill] sm:$0xff] }
 0x25c   :  { %v2246_v34 = vadd.f32 %v2245_v12, %v5109_v55  ;;  %v2833_v7 = vadd.f32 %v2832_v36, %v2831_v14  ;;  %v2784_v27 = vmul.f32 %v2752_v33, %v2752_v33  ;;  %v2338_v54 = vadd.f32 %v3712_v30, %v2251_v61 }
 0x25d   :  { %v2336_v31 = vadd.f32 %v3712_v30, %v2243_v25  ;;  %2718 = vst.msk [vmem:[%s5242_s3 + $0xd4] sm:$0xf] %vm2664_vm1, %v3219_v47  ;;  %v2834_v17 = vsel %vm1309_vm0, %v2782_v20, 0.0  ;;  %v2753_v38 = vsub.f32 %v4873_v49, %v2243_v25  ;;  %v2339_v32 = vadd.f32 %v3712_v30, %v2254_v24  ;;  %v5284_v20 = vld [vmem:[#allocation21_spill] sm:$0xff] }
 0x25e   :  { %v2835_v5 = vadd.f32 %v2834_v17, %v2833_v7  ;;  %v2402_v15 = vmax.f32 %v2338_v54, 0.0  ;;  %v1977_v39 = vpop.f32.mrb[124].mxu0  ;;  %v3336_v40 = vpop.f32.mrb[156].mxu1  ;;  %v2755_v21 = vsub.f32 %v4866_v53, %v2251_v61  ;;  %v2337_v19 = vadd.f32 %v3712_v30, %v2246_v34 }
 0x25f   :  { %v2400_v55 = vmax.f32 %v2336_v31, 0.0  ;;  %v2785_v0 = vmul.f32 %v2753_v38, %v2753_v38  ;;  %v2403_v48 = vmax.f32 %v2339_v32, 0.0  ;;  %v1979_v9 = vpop.f32.mrb[125].mxu0  ;;  %v2258_v18 = vpop.f32.mrb[157].mxu1  ;;  %v2838_v57 = vsel %vm1309_vm0, %v2784_v27, 0.0  ;;  %v5285_v31 = vld [vmem:[#allocation22_spill] sm:$0xff] }
 0x260   :  { %v2837_v62 = vadd.f32 %v2836_v22, %v2835_v5  ;;  %v3224_v11 = vpack.c.bf16 %v2402_v15, %v2402_v15  ;;  %v1980_v41 = vpop.f32.mrb[126].mxu0  ;;  %v3337_v63 = vpop.f32.mrb[158].mxu1  ;;  %v2756_v51 = vsub.f32 %v4885_v56, %v2254_v24  ;;  %v2401_v43 = vmax.f32 %v2337_v19, 0.0 }
 0x261   :  { %v3222_v49 = vpack.c.bf16 %v2400_v55, %v2400_v55  ;;  %v2840_v16 = vsel %vm1309_vm0, %v2785_v0, 0.0  ;;  %v3225_v10 = vpack.c.bf16 %v2403_v48, %v2403_v48  ;;  %v2261_v50 = vpop.f32.mrb[159].mxu1  ;;  %v1982_v53 = vpop.f32.mrb[127].mxu0  ;;  %v2754_v37 = vsub.f32 %v4894_v28, %v2246_v34 }
 0x262   :  { %2723 = vst.msk [vmem:[%s5242_s3 + $0xe8] sm:$0xf] %vm2664_vm1, %v3224_v11  ;;  %v2839_v23 = vadd.f32 %v2838_v57, %v2837_v62  ;;  %v1978_v33 = vadd.f32 %v1977_v39, %v5281_v42  ;;  %v2259_v44 = vadd.f32 %v2258_v18, %v1970_v1  ;;  %v2787_v56 = vmul.f32 %v2755_v21, %v2755_v21 }
 0x263   :  { %2721 = vst.msk [vmem:[%s5242_s3 + $0xe0] sm:$0xf] %vm2664_vm1, %v3222_v49  ;;  %2724 = vst.msk [vmem:[%s5242_s3 + $0xec] sm:$0xf] %vm2664_vm1, %v3225_v10  ;;  %v3223_v6 = vpack.c.bf16 %v2401_v43, %v2401_v43  ;;  %v1981_v59 = vadd.f32 %v1980_v41, %v5282_v29  ;;  %v2262_v26 = vadd.f32 %v2261_v50, %v1973_v45 }
 0x264   :  { %v2841_v52 = vadd.f32 %v2840_v16, %v2839_v23  ;;  %v2786_v13 = vmul.f32 %v2754_v37, %v2754_v37  ;;  %v2267_v46 = vadd.f32 %v3336_v40, %v1978_v33  ;;  %v2340_v35 = vadd.f32 %v3712_v30, %v2259_v44 }
 0x265   :  { %v2788_v36 = vmul.f32 %v2756_v51, %v2756_v51  ;;  %2722 = vst.msk [vmem:[%s5242_s3 + $0xe4] sm:$0xf] %vm2664_vm1, %v3223_v6  ;;  %v2757_v28 = vsub.f32 %v4915_v2, %v2259_v44  ;;  %v2270_v60 = vadd.f32 %v3337_v63, %v1981_v59  ;;  %v2341_v3 = vadd.f32 %v3712_v30, %v2262_v26 }
 0x266   :  { %v2842_v4 = vsel %vm1309_vm0, %v2786_v13, 0.0  ;;  %v2342_v1 = vadd.f32 %v3712_v30, %v2267_v46  ;;  %v2404_v12 = vmax.f32 %v2340_v35, 0.0  ;;  %v2758_v14 = vsub.f32 %v5283_v8, %v2262_v26 }
 0x267   :  { %v2844_v61 = vsel %vm1309_vm0, %v2787_v56, 0.0  ;;  %v2843_v25 = vadd.f32 %v2842_v4, %v2841_v52  ;;  %v2789_v58 = vmul.f32 %v2757_v28, %v2757_v28  ;;  %v2343_v45 = vadd.f32 %v3712_v30, %v2270_v60 }
 0x268   :  { %v2406_v47 = vmax.f32 %v2342_v1, 0.0  ;;  %v2759_v24 = vsub.f32 %v5284_v20, %v2267_v46  ;;  %v3226_v34 = vpack.c.bf16 %v2404_v12, %v2404_v12  ;;  %v2405_v7 = vmax.f32 %v2341_v3, 0.0 }
 0x269   :  { %v2846_v2 = vsel %vm1309_vm0, %v2788_v36, 0.0  ;;  %v2845_v27 = vadd.f32 %v2844_v61, %v2843_v25  ;;  %v2407_v54 = vmax.f32 %v2343_v45, 0.0  ;;  %v2760_v17 = vsub.f32 %v5285_v31, %v2270_v60 }
 0x26a   :  { %v3228_v38 = vpack.c.bf16 %v2406_v47, %v2406_v47  ;;  %2725 = vst.msk [vmem:[%s5242_s3 + $0xf0] sm:$0xf] %vm2664_vm1, %v3226_v34  ;;  %v2848_v32 = vsel %vm1309_vm0, %v2789_v58, 0.0  ;;  %v3227_v30 = vpack.c.bf16 %v2405_v7, %v2405_v7  ;;  %v2790_v22 = vmul.f32 %v2758_v14, %v2758_v14 }
 0x26b   :  { %v2847_v5 = vadd.f32 %v2846_v2, %v2845_v27  ;;  %v3229_v15 = vpack.c.bf16 %v2407_v54, %v2407_v54  ;;  %v2791_v55 = vmul.f32 %v2759_v24, %v2759_v24  ;;  %v2792_v21 = vmul.f32 %v2760_v17, %v2760_v17 }
 0x26c   :  { %2727 = vst.msk [vmem:[%s5242_s3 + $0xf8] sm:$0xf] %vm2664_vm1, %v3228_v38  ;;  %2726 = vst.msk [vmem:[%s5242_s3 + $0xf4] sm:$0xf] %vm2664_vm1, %v3227_v30  ;;  %v2850_v39 = vsel %vm1309_vm0, %v2790_v22, 0.0 }
 0x26d   :  { %v2849_v40 = vadd.f32 %v2848_v32, %v2847_v5  ;;  %2728 = vst.msk [vmem:[%s5242_s3 + $0xfc] sm:$0xf] %vm2664_vm1, %v3229_v15  ;;  %v2852_v48 = vsel %vm1309_vm0, %v2791_v55, 0.0  ;;  %v2854_v9 = vsel %vm1309_vm0, %v2792_v21, 0.0 }
 0x26f   :  { %v2851_v0 = vadd.f32 %v2850_v39, %v2849_v40 }
 0x271   :  { %v2853_v19 = vadd.f32 %v2852_v48, %v2851_v0 }
 0x273   :  { %v2855_v18 = vadd.f32 %v2854_v9, %v2853_v19 }
 0x275   :  { %v2856_v57 = vrot.slane %v2855_v18, 4 }
 0x277   :  { %v2857_v62 = vadd.f32 %v2856_v57, %v2855_v18 }
 0x279   :  { %v2858_v11 = vrot.slane %v2857_v62, 2 }
 0x27b   :  { %v2859_v49 = vadd.f32 %v2858_v11, %v2857_v62 }
 0x27d   :  { %v2860_v41 = vrot.slane %v2859_v49, 1 }
 0x27f   :  { %v2861_v63 = vadd.f32 %v2860_v41, %v2859_v49 }
 0x281   :  { %2863 = vst.msk [vmem:[%s5243_s4] sm:$0x1] %vm2862_vm2, %v2861_v63 }
 0x282   :  { %2872 = vsyncpa [#allocation3], 1 }

// kernel: vgg19_feature_loss.18
= control target key start
LH: loop header
LB: loop body
LE: loop exit
PB: predicated region body
PF: predicated region fallthrough
CT: control target
= control target key end

     0   :  { %vm553_vm0 = vcmask 523264   ;;  %s1799_s1 = inlined_call_operand.vmem [shape: bf16[1,576,128], index: 1, kind: input, shape index: {}]   ;;  %s1800_s0 = inlined_call_operand.vmem [shape: bf16[128,576], index: 0, kind: input, shape index: {}]   ;;  %s1801_s2 = inlined_call_operand.vmem [shape: f32[1,128], index: 2, kind: input, shape index: {}]   ;;  %s1802_s3 = inlined_call_operand.vmem [shape: bf16[128,128], index: 3, kind: output, shape index: {0}]   ;;  %s1803_s4 = inlined_call_operand.vmem [shape: f32[1,128], index: 4, kind: output, shape index: {1}]  }
   0x1   :  { %v1362_v0 = vld [vmem:[%s1799_s1 + $0x40] sm:$0xff]   ;;  %v1366_v4 = vld [vmem:[%s1799_s1 + $0x48] sm:$0xff]   ;;  %v1370_v8 = vld [vmem:[%s1799_s1 + $0x50] sm:$0xff]  }
   0x2   :  { %v1363_v1 = vld [vmem:[%s1799_s1 + $0xc0] sm:$0xff]   ;;  %1190 = vmatprep.subr.bf16.mxu0 %v1362_v0  ;;  %v1367_v5 = vld [vmem:[%s1799_s1 + $0xc8] sm:$0xff]   ;;  %v1371_v9 = vld [vmem:[%s1799_s1 + $0xd0] sm:$0xff]  }
   0x3   :  { %v1364_v2 = vld [vmem:[%s1799_s1] sm:$0xff]   ;;  %1254 = vmatprep.subr.bf16.mxu1 %v1363_v1  ;;  %v1368_v6 = vld [vmem:[%s1799_s1 + $0x8] sm:$0xff]   ;;  %v1372_v10 = vld [vmem:[%s1799_s1 + $0x10] sm:$0xff]  }
   0x4   :  { %v1365_v3 = vld [vmem:[%s1799_s1 + $0x80] sm:$0xff]   ;;  %1191 = vmatpush3.bf16.msra.mxu0 %v1364_v2  ;;  %v1369_v7 = vld [vmem:[%s1799_s1 + $0x88] sm:$0xff]   ;;  %v1373_v11 = vld [vmem:[%s1799_s1 + $0x90] sm:$0xff]  }
   0x5   :  { %1255 = vmatpush3.bf16.msra.mxu1 %v1365_v3  ;;  %1192 = vmatprep.subr.bf16.mxu0 %v1366_v4  ;;  %v1374_v12 = vld [vmem:[%s1799_s1 + $0x58] sm:$0xff]   ;;  %v1378_v16 = vld [vmem:[%s1799_s1 + $0x60] sm:$0xff]   ;;  %v1382_v20 = vld [vmem:[%s1799_s1 + $0x68] sm:$0xff]  }
   0x6   :  { %1256 = vmatprep.subr.bf16.mxu1 %v1367_v5  ;;  %v1375_v13 = vld [vmem:[%s1799_s1 + $0xd8] sm:$0xff]   ;;  %v1379_v17 = vld [vmem:[%s1799_s1 + $0xe0] sm:$0xff]   ;;  %v1383_v21 = vld [vmem:[%s1799_s1 + $0xe8] sm:$0xff]  }
   0x7   :  { %v1376_v14 = vld [vmem:[%s1799_s1 + $0x18] sm:$0xff]   ;;  %v1380_v18 = vld [vmem:[%s1799_s1 + $0x20] sm:$0xff]   ;;  %v1384_v22 = vld [vmem:[%s1799_s1 + $0x28] sm:$0xff]  }
   0x8   :  { %1193 = vmatpush3.bf16.msra.mxu0 %v1368_v6  ;;  %v1377_v15 = vld [vmem:[%s1799_s1 + $0x98] sm:$0xff]   ;;  %v1381_v19 = vld [vmem:[%s1799_s1 + $0xa0] sm:$0xff]   ;;  %v1385_v23 = vld [vmem:[%s1799_s1 + $0xa8] sm:$0xff]  }
   0x9   :  { %1257 = vmatpush3.bf16.msra.mxu1 %v1369_v7  ;;  %1194 = vmatprep.subr.bf16.mxu0 %v1370_v8  ;;  %v1386_v24 = vld [vmem:[%s1799_s1 + $0x70] sm:$0xff]   ;;  %v1390_v28 = vld [vmem:[%s1799_s1 + $0x78] sm:$0xff]   ;;  %v1399_v35 = vld [vmem:[%s1800_s0 + $0xc] ss:$20 sps:$4 sm:$0xff]  }
   0xa   :  { %1258 = vmatprep.subr.bf16.mxu1 %v1371_v9  ;;  %v1387_v25 = vld [vmem:[%s1799_s1 + $0xf0] sm:$0xff]   ;;  %v1391_v29 = vld [vmem:[%s1799_s1 + $0xf8] sm:$0xff]   ;;  %v1400_v36 = vld [vmem:[%s1799_s1 + $0x100] sm:$0xff]   ;;  %707 = vmatprep.mubr.bf16.mxu1 %v1399_v35 }
   0xb   :  { %v1388_v26 = vld [vmem:[%s1799_s1 + $0x30] sm:$0xff]   ;;  %v1392_v30 = vld [vmem:[%s1799_s1 + $0x38] sm:$0xff]   ;;  %v1401_v37 = vld [vmem:[%s1800_s0 + $0x2c] ss:$20 sps:$4 sm:$0xff]  }
   0xc   :  { %1195 = vmatpush3.bf16.msra.mxu0 %v1372_v10  ;;  %v1389_v27 = vld [vmem:[%s1799_s1 + $0xb0] sm:$0xff]   ;;  %v1393_v31 = vld [vmem:[%s1799_s1 + $0xb8] sm:$0xff]   ;;  %v1413_v42 = vld [vmem:[%s1799_s1 + $0x108] sm:$0xff]  }
   0xd   :  { %1259 = vmatpush3.bf16.msra.mxu1 %v1373_v11  ;;  %1196 = vmatprep.subr.bf16.mxu0 %v1374_v12  ;;  %v1394_v32 = vld [vmem:[%s1800_s0] ss:$20 sps:$4 sm:$0xff]   ;;  %v1396_v33 = vld [vmem:[%s1800_s0 + $0x4] ss:$20 sps:$4 sm:$0xff]   ;;  %v1397_v34 = vld [vmem:[%s1800_s0 + $0x8] ss:$20 sps:$4 sm:$0xff]  }
   0xe   :  { %1260 = vmatprep.subr.bf16.mxu1 %v1375_v13  ;;  %610 = vmatprep.mubr.bf16.mxu0 %v1396_v33  ;;  %v1403_v38 = vld [vmem:[%s1800_s0 + $0x34] ss:$20 sps:$4 sm:$0xff]   ;;  %v1406_v40 = vld [vmem:[%s1800_s0 + $0x30] ss:$20 sps:$4 sm:$0xff]   ;;  %v1412_v45 = vld [vmem:[%s1800_s0 + $0x58] ss:$20 sps:$4 sm:$0xff]  }
   0xf   :  { %v1405_v39 = vld [vmem:[%s1800_s0 + $0x28] ss:$20 sps:$4 sm:$0xff]   ;;  %v1411_v44 = vld [vmem:[%s1800_s0 + $0x50] ss:$20 sps:$4 sm:$0xff]   ;;  %v1418_v50 = vld [vmem:[%s1800_s0 + $0x78] ss:$20 sps:$4 sm:$0xff]  }
  0x10   :  { %1197 = vmatpush3.bf16.msra.mxu0 %v1376_v14  ;;  %v1407_v41 = vld [vmem:[%s1800_s0 + $0x54] ss:$20 sps:$4 sm:$0xff]   ;;  %v1409_v43 = vld [vmem:[%s1800_s0 + $0x5c] ss:$20 sps:$4 sm:$0xff]   ;;  %v1416_v48 = vld [vmem:[%s1800_s0 + $0x84] ss:$20 sps:$4 sm:$0xff]  }
  0x11   :  { %1261 = vmatpush3.bf16.msra.mxu1 %v1377_v15  ;;  %1198 = vmatprep.subr.bf16.mxu0 %v1378_v16  ;;  %v1426_v46 = vld [vmem:[%s1799_s1 + $0x110] sm:$0xff]   ;;  %v1439_v49 = vld [vmem:[%s1799_s1 + $0x118] sm:$0xff]   ;;  %v1422_v53 = vld [vmem:[%s1800_s0 + $0xac] ss:$20 sps:$4 sm:$0xff]  }
  0x12   :  { %1262 = vmatprep.subr.bf16.mxu1 %v1379_v17  ;;  %v1414_v47 = vld [vmem:[%s1800_s0 + $0x7c] ss:$20 sps:$4 sm:$0xff]   ;;  %v1419_v51 = vld [vmem:[%s1800_s0 + $0x80] ss:$20 sps:$4 sm:$0xff]   ;;  %v1420_v52 = vld [vmem:[%s1800_s0 + $0xa4] ss:$20 sps:$4 sm:$0xff]  }
  0x13   :  { %v1424_v54 = vld [vmem:[%s1800_s0 + $0xa0] ss:$20 sps:$4 sm:$0xff]   ;;  %v1425_v55 = vld [vmem:[%s1800_s0 + $0xa8] ss:$20 sps:$4 sm:$0xff]   ;;  %v1432_v59 = vld [vmem:[%s1800_s0 + $0xd0] ss:$20 sps:$4 sm:$0xff]  }
  0x14   :  { %1199 = vmatpush3.bf16.msra.mxu0 %v1380_v18  ;;  %v1427_v56 = vld [vmem:[%s1800_s0 + $0xcc] ss:$20 sps:$4 sm:$0xff]   ;;  %v1429_v57 = vld [vmem:[%s1800_s0 + $0xd4] ss:$20 sps:$4 sm:$0xff]   ;;  %v1435_v61 = vld [vmem:[%s1800_s0 + $0xfc] ss:$20 sps:$4 sm:$0xff]  }
  0x15   :  { %1263 = vmatpush3.bf16.msra.mxu1 %v1381_v19  ;;  %1200 = vmatprep.subr.bf16.mxu0 %v1382_v20  ;;  %v1431_v58 = vld [vmem:[%s1800_s0 + $0xc8] ss:$20 sps:$4 sm:$0xff]   ;;  %v1437_v62 = vld [vmem:[%s1800_s0 + $0xf0] ss:$20 sps:$4 sm:$0xff]   ;;  %v1438_v63 = vld [vmem:[%s1800_s0 + $0xf8] ss:$20 sps:$4 sm:$0xff]  }
  0x16   :  { %1264 = vmatprep.subr.bf16.mxu1 %v1383_v21  ;;  %v1433_v60 = vld [vmem:[%s1800_s0 + $0xf4] ss:$20 sps:$4 sm:$0xff]   ;;  %v1440_v0 = vld [vmem:[%s1800_s0 + $0x11c] ss:$20 sps:$4 sm:$0xff]   ;;  %v1442_v1 = vld [vmem:[%s1800_s0 + $0x124] ss:$20 sps:$4 sm:$0xff]  }
  0x17   :  { %v1444_v2 = vld [vmem:[%s1800_s0 + $0x118] ss:$20 sps:$4 sm:$0xff]   ;;  %v1445_v3 = vld [vmem:[%s1800_s0 + $0x120] ss:$20 sps:$4 sm:$0xff]   ;;  %v1446_v4 = vld [vmem:[%s1800_s0 + $0x10] ss:$20 sps:$4 sm:$0xff]  }
  0x18   :  { %1201 = vmatpush3.bf16.msra.mxu0 %v1384_v22  ;;  %v1447_v5 = vld [vmem:[%s1800_s0 + $0xb0] ss:$20 sps:$4 sm:$0xff]   ;;  %v1448_v6 = vld [vmem:[%s1800_s0 + $0x38] ss:$20 sps:$4 sm:$0xff]   ;;  %v1450_v8 = vld [vmem:[%s1800_s0 + $0x60] ss:$20 sps:$4 sm:$0xff]  }
  0x19   :  { %1265 = vmatpush3.bf16.msra.mxu1 %v1385_v23  ;;  %1202 = vmatprep.subr.bf16.mxu0 %v1386_v24  ;;  %v1449_v7 = vld [vmem:[%s1800_s0 + $0xd8] ss:$20 sps:$4 sm:$0xff]   ;;  %v1451_v9 = vld [vmem:[%s1800_s0 + $0x100] ss:$20 sps:$4 sm:$0xff]   ;;  %v1452_v10 = vld [vmem:[%s1800_s0 + $0x88] ss:$20 sps:$4 sm:$0xff]  }
  0x1a   :  { %1266 = vmatprep.subr.bf16.mxu1 %v1387_v25  ;;  %v1453_v11 = vld [vmem:[%s1800_s0 + $0x128] ss:$20 sps:$4 sm:$0xff]  }
  0x1c   :  { %1203 = vmatpush3.bf16.msra.mxu0 %v1388_v26 }
  0x1d   :  { %1267 = vmatpush3.bf16.msra.mxu1 %v1389_v27  ;;  %1204 = vmatprep.subr.bf16.mxu0 %v1390_v28 }
  0x1e   :  { %1268 = vmatprep.subr.bf16.mxu1 %v1391_v29 }
  0x20   :  { %1205 = vmatpush3.bf16.msra.mxu0 %v1392_v30 }
  0x21   :  { %1269 = vmatpush3.bf16.msra.mxu1 %v1393_v31  ;;  %1330 = vmatprep.subr.bf16.mxu0 %v1400_v36 }
  0x22   :  { %1354 = vmatprep.subr.bf16.mxu1 %v1400_v36 }
  0x23   :  { %611 = vmatmul.mubr.bf16.vlgmr.msra.gmra.mrb[0].mxu0 %v1394_v32 }
  0x24   :  { %708 = vmatmul.mubr.bf16.vlgmr.msra.gmra.mrb[0].mxu1 %v1397_v34  ;;  %1331 = vmatpush3.bf16.msra.mxu0 %v1400_v36 }
  0x25   :  { %1358 = vmatpush3.bf16.msra.mxu1 %v1400_v36  ;;  %618 = vmatprep.mubr.bf16.mxu0 %v1401_v37 }
  0x26   :  { %715 = vmatprep.mubr.bf16.mxu1 %v1403_v38  ;;  %1332 = vmatprep.subr.bf16.mxu0 %v1413_v42 }
  0x27   :  { %1355 = vmatprep.subr.bf16.mxu1 %v1413_v42 }
  0x28   :  { %1333 = vmatpush3.bf16.msra.mxu0 %v1413_v42 }
  0x29   :  { %1359 = vmatpush3.bf16.msra.mxu1 %v1413_v42  ;;  %1334 = vmatprep.subr.bf16.mxu0 %v1426_v46 }
  0x2a   :  { %1356 = vmatprep.subr.bf16.mxu1 %v1426_v46 }
  0x2b   :  { %619 = vmatmul.mubr.bf16.gmra.mrb[4].mxu0 %v1405_v39 }
  0x2c   :  { %716 = vmatmul.mubr.bf16.gmra.mrb[4].mxu1 %v1406_v40  ;;  %626 = vmatprep.mubr.bf16.mxu0 %v1407_v41 }
  0x2d   :  { %723 = vmatprep.mubr.bf16.mxu1 %v1409_v43  ;;  %1335 = vmatpush3.bf16.msra.mxu0 %v1426_v46 }
  0x2e   :  { %1360 = vmatpush3.bf16.msra.mxu1 %v1426_v46  ;;  %1336 = vmatprep.subr.bf16.mxu0 %v1439_v49 }
  0x2f   :  { %1357 = vmatprep.subr.bf16.mxu1 %v1439_v49 }
  0x31   :  { %1337 = vmatpush3.bf16.msra.mxu0 %v1439_v49 }
  0x32   :  { %1361 = vmatpush3.bf16.msra.mxu1 %v1439_v49 }
  0x33   :  { %627 = vmatmul.mubr.bf16.gmra.mrb[8].mxu0 %v1411_v44 }
  0x34   :  { %724 = vmatmul.mubr.bf16.gmra.mrb[8].mxu1 %v1412_v45  ;;  %634 = vmatprep.mubr.bf16.mxu0 %v1414_v47 }
  0x35   :  { %731 = vmatprep.mubr.bf16.mxu1 %v1416_v48 }
  0x3b   :  { %635 = vmatmul.mubr.bf16.gmra.mrb[12].mxu0 %v1418_v50 }
  0x3c   :  { %732 = vmatmul.mubr.bf16.gmra.mrb[12].mxu1 %v1419_v51  ;;  %642 = vmatprep.mubr.bf16.mxu0 %v1420_v52 }
  0x3d   :  { %739 = vmatprep.mubr.bf16.mxu1 %v1422_v53 }
  0x43   :  { %643 = vmatmul.mubr.bf16.gmra.mrb[16].mxu0 %v1424_v54 }
  0x44   :  { %740 = vmatmul.mubr.bf16.gmra.mrb[16].mxu1 %v1425_v55  ;;  %650 = vmatprep.mubr.bf16.mxu0 %v1427_v56 }
  0x45   :  { %747 = vmatprep.mubr.bf16.mxu1 %v1429_v57 }
  0x4b   :  { %651 = vmatmul.mubr.bf16.gmra.mrb[20].mxu0 %v1431_v58 }
  0x4c   :  { %748 = vmatmul.mubr.bf16.gmra.mrb[20].mxu1 %v1432_v59  ;;  %658 = vmatprep.mubr.bf16.mxu0 %v1433_v60 }
  0x4d   :  { %755 = vmatprep.mubr.bf16.mxu1 %v1435_v61 }
  0x53   :  { %659 = vmatmul.mubr.bf16.gmra.mrb[24].mxu0 %v1437_v62 }
  0x54   :  { %756 = vmatmul.mubr.bf16.gmra.mrb[24].mxu1 %v1438_v63  ;;  %666 = vmatprep.mubr.bf16.mxu0 %v1440_v0 }
  0x55   :  { %763 = vmatprep.mubr.bf16.mxu1 %v1442_v1 }
  0x5b   :  { %667 = vmatmul.mubr.bf16.gmra.mrb[28].mxu0 %v1444_v2 }
  0x5c   :  { %764 = vmatmul.mubr.bf16.gmra.mrb[28].mxu1 %v1445_v3  ;;  %1338 = vmatprep.mubr.msk.bf16.mxu0 %vm553_vm0, %v1446_v4 }
  0x5d   :  { %1346 = vmatprep.mubr.msk.bf16.mxu1 %vm553_vm0, %v1447_v5 }
  0x63   :  { %1339 = vmatmul.mubr.msk.bf16.vlgmr.msra.gmra.mrb[32].mxu0 %vm553_vm0, %v1448_v6 }
  0x64   :  { %1347 = vmatmul.mubr.msk.bf16.vlgmr.msra.gmra.mrb[32].mxu1 %vm553_vm0, %v1449_v7  ;;  %1342 = vmatprep.mubr.msk.bf16.mxu0 %vm553_vm0, %v1450_v8 }
  0x65   :  { %1350 = vmatprep.mubr.msk.bf16.mxu1 %vm553_vm0, %v1451_v9 }
  0x6b   :  { %1343 = vmatmul.mubr.msk.bf16.gmra.mrb[36].mxu0 %vm553_vm0, %v1452_v10 }
  0x6c   :  { %1351 = vmatmul.mubr.msk.bf16.gmra.mrb[36].mxu1 %vm553_vm0, %v1453_v11 }
  0xf6   :  { %v1206_v12 = vpop.f32.mrb[0].mxu0 }
  0xf7   :  { %v1270_v13 = vpop.f32.mrb[0].mxu1  ;;  %v1207_v14 = vpop.f32.mrb[1].mxu0 }
  0xf8   :  { %v1208_v15 = vadd.f32 %v1207_v14, %v1206_v12  ;;  %v1271_v16 = vpop.f32.mrb[1].mxu1  ;;  %v1209_v17 = vpop.f32.mrb[2].mxu0 }
  0xf9   :  { %v1272_v18 = vadd.f32 %v1271_v16, %v1270_v13  ;;  %v1273_v19 = vpop.f32.mrb[2].mxu1  ;;  %v1210_v20 = vpop.f32.mrb[3].mxu0 }
  0xfa   :  { %v1211_v21 = vadd.f32 %v1210_v20, %v1209_v17  ;;  %v1274_v22 = vpop.f32.mrb[3].mxu1 }
  0xfb   :  { %v1275_v23 = vadd.f32 %v1274_v22, %v1273_v19  ;;  %v1715_v24 = vadd.f32 %v1272_v18, %v1208_v15 }
  0xfd   :  { %v1717_v25 = vadd.f32 %v1275_v23, %v1211_v21 }
  0xfe   :  { %v1212_v26 = vpop.f32.mrb[4].mxu0 }
  0xff   :  { %v1276_v27 = vpop.f32.mrb[4].mxu1  ;;  %v1213_v28 = vpop.f32.mrb[5].mxu0 }
 0x100   :  { %v1214_v29 = vadd.f32 %v1213_v28, %v1212_v26  ;;  %v1277_v30 = vpop.f32.mrb[5].mxu1  ;;  %v1215_v31 = vpop.f32.mrb[6].mxu0 }
 0x101   :  { %v1278_v32 = vadd.f32 %v1277_v30, %v1276_v27  ;;  %v1279_v33 = vpop.f32.mrb[6].mxu1  ;;  %v1216_v34 = vpop.f32.mrb[7].mxu0 }
 0x102   :  { %v1217_v35 = vadd.f32 %v1216_v34, %v1215_v31  ;;  %v1280_v36 = vpop.f32.mrb[7].mxu1 }
 0x103   :  { %v1281_v37 = vadd.f32 %v1280_v36, %v1279_v33  ;;  %v1719_v38 = vadd.f32 %v1278_v32, %v1214_v29 }
 0x105   :  { %v1721_v39 = vadd.f32 %v1281_v37, %v1217_v35 }
 0x106   :  { %v1218_v40 = vpop.f32.mrb[8].mxu0 }
 0x107   :  { %v1282_v41 = vpop.f32.mrb[8].mxu1  ;;  %v1219_v42 = vpop.f32.mrb[9].mxu0 }
 0x108   :  { %v1220_v43 = vadd.f32 %v1219_v42, %v1218_v40  ;;  %v1283_v44 = vpop.f32.mrb[9].mxu1  ;;  %v1221_v45 = vpop.f32.mrb[10].mxu0 }
 0x109   :  { %v1284_v46 = vadd.f32 %v1283_v44, %v1282_v41  ;;  %v1285_v47 = vpop.f32.mrb[10].mxu1  ;;  %v1222_v48 = vpop.f32.mrb[11].mxu0 }
 0x10a   :  { %v1223_v49 = vadd.f32 %v1222_v48, %v1221_v45  ;;  %v1286_v50 = vpop.f32.mrb[11].mxu1 }
 0x10b   :  { %v1287_v51 = vadd.f32 %v1286_v50, %v1285_v47  ;;  %v1723_v52 = vadd.f32 %v1284_v46, %v1220_v43 }
 0x10d   :  { %v1725_v53 = vadd.f32 %v1287_v51, %v1223_v49 }
 0x10e   :  { %v1224_v54 = vpop.f32.mrb[12].mxu0 }
 0x10f   :  { %v1288_v55 = vpop.f32.mrb[12].mxu1  ;;  %v1225_v56 = vpop.f32.mrb[13].mxu0 }
 0x110   :  { %v1226_v57 = vadd.f32 %v1225_v56, %v1224_v54  ;;  %v1289_v58 = vpop.f32.mrb[13].mxu1  ;;  %v1227_v59 = vpop.f32.mrb[14].mxu0 }
 0x111   :  { %v1290_v60 = vadd.f32 %v1289_v58, %v1288_v55  ;;  %v1291_v61 = vpop.f32.mrb[14].mxu1  ;;  %v1228_v62 = vpop.f32.mrb[15].mxu0 }
 0x112   :  { %v1229_v63 = vadd.f32 %v1228_v62, %v1227_v59  ;;  %v1292_v0 = vpop.f32.mrb[15].mxu1 }
 0x113   :  { %v1293_v1 = vadd.f32 %v1292_v0, %v1291_v61  ;;  %v1727_v2 = vadd.f32 %v1290_v60, %v1226_v57 }
 0x115   :  { %v1729_v3 = vadd.f32 %v1293_v1, %v1229_v63 }
 0x116   :  { %v1230_v4 = vpop.f32.mrb[16].mxu0 }
 0x117   :  { %v1294_v5 = vpop.f32.mrb[16].mxu1  ;;  %v1231_v6 = vpop.f32.mrb[17].mxu0 }
 0x118   :  { %v1232_v7 = vadd.f32 %v1231_v6, %v1230_v4  ;;  %v1295_v8 = vpop.f32.mrb[17].mxu1  ;;  %v1233_v9 = vpop.f32.mrb[18].mxu0 }
 0x119   :  { %v1296_v10 = vadd.f32 %v1295_v8, %v1294_v5  ;;  %v1297_v11 = vpop.f32.mrb[18].mxu1  ;;  %v1234_v12 = vpop.f32.mrb[19].mxu0  ;;  %v1742_v5 = vld [vmem:[%s1801_s2] ss:$0 sm:$0xff] }
 0x11a   :  { %v1235_v13 = vadd.f32 %v1234_v12, %v1233_v9  ;;  %v1298_v14 = vpop.f32.mrb[19].mxu1 }
 0x11b   :  { %v1299_v15 = vadd.f32 %v1298_v14, %v1297_v11  ;;  %v742_v16 = vadd.f32 %v1296_v10, %v1232_v7 }
 0x11d   :  { %v1731_v17 = vadd.f32 %v1299_v15, %v1235_v13 }
 0x11e   :  { %v1236_v18 = vpop.f32.mrb[20].mxu0 }
 0x11f   :  { %v1300_v19 = vpop.f32.mrb[20].mxu1  ;;  %v1237_v20 = vpop.f32.mrb[21].mxu0 }
 0x120   :  { %v1238_v21 = vadd.f32 %v1237_v20, %v1236_v18  ;;  %v1301_v22 = vpop.f32.mrb[21].mxu1  ;;  %v1239_v23 = vpop.f32.mrb[22].mxu0 }
 0x121   :  { %v1302_v26 = vadd.f32 %v1301_v22, %v1300_v19  ;;  %v1303_v27 = vpop.f32.mrb[22].mxu1  ;;  %v1240_v28 = vpop.f32.mrb[23].mxu0 }
 0x122   :  { %v1241_v29 = vadd.f32 %v1240_v28, %v1239_v23  ;;  %v1304_v30 = vpop.f32.mrb[23].mxu1 }
 0x123   :  { %v1305_v31 = vadd.f32 %v1304_v30, %v1303_v27  ;;  %v750_v32 = vadd.f32 %v1302_v26, %v1238_v21 }
 0x125   :  { %v753_v33 = vadd.f32 %v1305_v31, %v1241_v29 }
 0x126   :  { %v1242_v34 = vpop.f32.mrb[24].mxu0 }
 0x127   :  { %v1306_v35 = vpop.f32.mrb[24].mxu1  ;;  %v1243_v36 = vpop.f32.mrb[25].mxu0 }
 0x128   :  { %v1244_v37 = vadd.f32 %v1243_v36, %v1242_v34  ;;  %v1307_v40 = vpop.f32.mrb[25].mxu1  ;;  %v1245_v41 = vpop.f32.mrb[26].mxu0 }
 0x129   :  { %v1308_v42 = vadd.f32 %v1307_v40, %v1306_v35  ;;  %v1309_v43 = vpop.f32.mrb[26].mxu1  ;;  %v1246_v44 = vpop.f32.mrb[27].mxu0 }
 0x12a   :  { %v1247_v45 = vadd.f32 %v1246_v44, %v1245_v41  ;;  %v1310_v46 = vpop.f32.mrb[27].mxu1 }
 0x12b   :  { %v1311_v47 = vadd.f32 %v1310_v46, %v1309_v43  ;;  %v1733_v48 = vadd.f32 %v1308_v42, %v1244_v37 }
 0x12d   :  { %v1735_v49 = vadd.f32 %v1311_v47, %v1247_v45 }
 0x12e   :  { %v1248_v50 = vpop.f32.mrb[28].mxu0 }
 0x12f   :  { %v1312_v51 = vpop.f32.mrb[28].mxu1  ;;  %v1249_v54 = vpop.f32.mrb[29].mxu0 }
 0x130   :  { %v1250_v55 = vadd.f32 %v1249_v54, %v1248_v50  ;;  %v1313_v56 = vpop.f32.mrb[29].mxu1  ;;  %v1251_v57 = vpop.f32.mrb[30].mxu0 }
 0x131   :  { %v1314_v58 = vadd.f32 %v1313_v56, %v1312_v51  ;;  %v1315_v59 = vpop.f32.mrb[30].mxu1  ;;  %v1252_v60 = vpop.f32.mrb[31].mxu0 }
 0x132   :  { %v1253_v61 = vadd.f32 %v1252_v60, %v1251_v57  ;;  %v1316_v62 = vpop.f32.mrb[31].mxu1 }
 0x133   :  { %v1317_v63 = vadd.f32 %v1316_v62, %v1315_v59  ;;  %v766_v0 = vadd.f32 %v1314_v58, %v1250_v55 }
 0x135   :  { %v1737_v1 = vadd.f32 %v1317_v63, %v1253_v61 }
 0x136   :  { %v1340_v4 = vpop.f32.mrb[32].mxu0 }
 0x137   :  { %v815_v6 = vadd.f32 %v1340_v4, %v1719_v38  ;;  %v1348_v7 = vpop.f32.mrb[32].mxu1  ;;  %v806_v8 = vpop.f32.mrb[33].mxu0 }
 0x138   :  { %v847_v9 = vadd.f32 %v1348_v7, %v750_v32  ;;  %v807_v10 = vadd.f32 %v806_v8, %v1715_v24  ;;  %v838_v11 = vpop.f32.mrb[33].mxu1  ;;  %v1341_v12 = vpop.f32.mrb[34].mxu0 }
 0x139   :  { %v878_v13 = vadd.f32 %v1742_v5, %v815_v6  ;;  %v839_v14 = vadd.f32 %v838_v11, %v742_v16  ;;  %v818_v15 = vadd.f32 %v1341_v12, %v1721_v39  ;;  %v1349_v18 = vpop.f32.mrb[34].mxu1  ;;  %v809_v19 = vpop.f32.mrb[35].mxu0 }
 0x13a   :  { %v886_v20 = vadd.f32 %v1742_v5, %v847_v9  ;;  %v990_v21 = vsub.f32 %v815_v6, %v847_v9  ;;  %v876_v22 = vadd.f32 %v1742_v5, %v807_v10  ;;  %v850_v38 = vadd.f32 %v1349_v18, %v753_v33  ;;  %v841_v23 = vpop.f32.mrb[35].mxu1 }
 0x13b   :  { %v884_v26 = vadd.f32 %v1742_v5, %v839_v14  ;;  %v988_v27 = vsub.f32 %v807_v10, %v839_v14  ;;  %v879_v24 = vadd.f32 %v1742_v5, %v818_v15  ;;  %v894_v29 = vmax.f32 %v878_v13, 0.0 }
 0x13c   :  { %v887_v28 = vadd.f32 %v1742_v5, %v850_v38  ;;  %v902_v16 = vmax.f32 %v886_v20, 0.0  ;;  %v991_v39 = vsub.f32 %v818_v15, %v850_v38  ;;  %v892_v31 = vmax.f32 %v876_v22, 0.0 }
 0x13d   :  { %v895_v30 = vmax.f32 %v879_v24, 0.0  ;;  %v810_v34 = vadd.f32 %v809_v19, %v1717_v25  ;;  %v842_v35 = vadd.f32 %v841_v23, %v1731_v17  ;;  %v900_v33 = vmax.f32 %v884_v26, 0.0 }
 0x13e   :  { %v903_v32 = vmax.f32 %v887_v28, 0.0  ;;  %v1344_v36 = vpop.f32.mrb[36].mxu0  ;;  %v996_v37 = vmul.f32 %v988_v27, %v988_v27  ;;  %v998_v63 = vmul.f32 %v990_v21, %v990_v21 }
 0x13f   :  { %v1151_v40 = vpack.c.bf16 %v895_v30, %v894_v29  ;;  %v831_v41 = vadd.f32 %v1344_v36, %v1727_v2  ;;  %v1352_v42 = vpop.f32.mrb[36].mxu1  ;;  %v822_v43 = vpop.f32.mrb[37].mxu0  ;;  %v877_v45 = vadd.f32 %v1742_v5, %v810_v34  ;;  %v885_v46 = vadd.f32 %v1742_v5, %v842_v35 }
 0x140   :  { %v1171_v44 = vpack.c.bf16 %v903_v32, %v902_v16  ;;  %v989_v47 = vsub.f32 %v810_v34, %v842_v35  ;;  %v854_v50 = vpop.f32.mrb[37].mxu1  ;;  %v1345_v51 = vpop.f32.mrb[38].mxu0  ;;  %v863_v17 = vadd.f32 %v1352_v42, %v766_v0  ;;  %v823_v54 = vadd.f32 %v822_v43, %v1723_v52 }
 0x141   :  { %1183 = vst [vmem:[%s1802_s3 + $0x8] sm:$0xff] %v1151_v40   ;;  %v882_v25 = vadd.f32 %v1742_v5, %v831_v41  ;;  %v855_v2 = vadd.f32 %v854_v50, %v1733_v48  ;;  %v1353_v55 = vpop.f32.mrb[38].mxu1  ;;  %v825_v56 = vpop.f32.mrb[39].mxu0  ;;  %v893_v57 = vmax.f32 %v877_v45, 0.0  ;;  %v901_v58 = vmax.f32 %v885_v46, 0.0 }
 0x142   :  { %1187 = vst [vmem:[%s1802_s3 + $0x28] sm:$0xff] %v1171_v44   ;;  %v997_v59 = vmul.f32 %v989_v47, %v989_v47  ;;  %v834_v60 = vadd.f32 %v1345_v51, %v1729_v3  ;;  %v857_v61 = vpop.f32.mrb[39].mxu1  ;;  %v994_v62 = vsub.f32 %v831_v41, %v863_v17  ;;  %v999_v52 = vmul.f32 %v991_v39, %v991_v39 }
 0x143   :  { %v1146_v4 = vpack.c.bf16 %v893_v57, %v892_v31  ;;  %v1166_v0 = vpack.c.bf16 %v901_v58, %v900_v33  ;;  %v898_v7 = vmax.f32 %v882_v25, 0.0  ;;  %v890_v48 = vadd.f32 %v1742_v5, %v863_v17 }
 0x144   :  { %v1004_v6 = vadd.f32 %v997_v59, %v996_v37  ;;  %v992_v8 = vsub.f32 %v823_v54, %v855_v2  ;;  %v880_v9 = vadd.f32 %v1742_v5, %v823_v54  ;;  %v883_v10 = vadd.f32 %v1742_v5, %v834_v60 }
 0x145   :  { %1147 = vst [vmem:[%s1802_s3] sm:$0xff] %v1146_v4   ;;  %1186 = vst [vmem:[%s1802_s3 + $0x20] sm:$0xff] %v1166_v0   ;;  %v866_v11 = vadd.f32 %v1353_v55, %v1737_v1  ;;  %v888_v12 = vadd.f32 %v1742_v5, %v855_v2  ;;  %v826_v14 = vadd.f32 %v825_v56, %v1725_v53  ;;  %v906_v22 = vmax.f32 %v890_v48, 0.0 }
 0x146   :  { %v1005_v3 = vadd.f32 %v1004_v6, %v998_v63  ;;  %v1000_v13 = vmul.f32 %v992_v8, %v992_v8  ;;  %v858_v15 = vadd.f32 %v857_v61, %v1735_v49  ;;  %v899_v19 = vmax.f32 %v883_v10, 0.0 }
 0x147   :  { %v891_v20 = vadd.f32 %v1742_v5, %v866_v11  ;;  %v995_v21 = vsub.f32 %v834_v60, %v866_v11  ;;  %v881_v38 = vadd.f32 %v1742_v5, %v826_v14  ;;  %v896_v27 = vmax.f32 %v880_v9, 0.0 }
 0x148   :  { %v1006_v18 = vadd.f32 %v1005_v3, %v999_v52  ;;  %v889_v23 = vadd.f32 %v1742_v5, %v858_v15  ;;  %v993_v26 = vsub.f32 %v826_v14, %v858_v15  ;;  %v1161_v24 = vpack.c.bf16 %v899_v19, %v898_v7 }
 0x149   :  { %v907_v28 = vmax.f32 %v891_v20, 0.0  ;;  %v904_v29 = vmax.f32 %v888_v12, 0.0  ;;  %v897_v16 = vmax.f32 %v881_v38, 0.0  ;;  %v1002_v39 = vmul.f32 %v994_v62, %v994_v62 }
 0x14a   :  { %v1007_v1 = vadd.f32 %v1006_v18, %v1000_v13  ;;  %v905_v53 = vmax.f32 %v889_v23, 0.0  ;;  %v1001_v30 = vmul.f32 %v993_v26, %v993_v26  ;;  %1185 = vst [vmem:[%s1802_s3 + $0x18] sm:$0xff] %v1161_v24   ;;  %v1003_v5 = vmul.f32 %v995_v21, %v995_v21 }
 0x14b   :  { %v1181_v49 = vpack.c.bf16 %v907_v28, %v906_v22  ;;  %v1156_v31 = vpack.c.bf16 %v897_v16, %v896_v27 }
 0x14c   :  { %v1176_v32 = vpack.c.bf16 %v905_v53, %v904_v29  ;;  %v1008_v34 = vadd.f32 %v1007_v1, %v1001_v30 }
 0x14d   :  { %1189 = vst [vmem:[%s1802_s3 + $0x38] sm:$0xff] %v1181_v49   ;;  %1184 = vst [vmem:[%s1802_s3 + $0x10] sm:$0xff] %v1156_v31  }
 0x14e   :  { %1188 = vst [vmem:[%s1802_s3 + $0x30] sm:$0xff] %v1176_v32   ;;  %v1009_v35 = vadd.f32 %v1008_v34, %v1002_v39 }
 0x150   :  { %v1010_v36 = vadd.f32 %v1009_v35, %v1003_v5 }
 0x152   :  { %v1011_v33 = vrot.slane %v1010_v36, 4 }
 0x154   :  { %v1012_v37 = vadd.f32 %v1011_v33, %v1010_v36 }
 0x156   :  { %v1013_v40 = vrot.slane %v1012_v37, 2 }
 0x158   :  { %v1014_v41 = vadd.f32 %v1013_v40, %v1012_v37 }
 0x15a   :  { %v1015_v42 = vrot.slane %v1014_v41, 1 }
 0x15c   :  { %v1016_v43 = vadd.f32 %v1015_v42, %v1014_v41 }
 0x15e   :  { %1017 = vst [vmem:[%s1803_s4] sm:$0x1] %v1016_v43 }

// kernel: vgg19_feature_loss.20
= control target key start
LH: loop header
LB: loop body
LE: loop exit
PB: predicated region body
PF: predicated region fallthrough
CT: control target
= control target key end

     0   :  { %s1775_s15 = smov 0   ;;  %s1777_s16 = smov 0   ;;  %s1965_s0 = inlined_call_operand.vmem [shape: bf16[32,1152], index: 0, kind: input, shape index: {}]   ;;  %s1966_s1 = inlined_call_operand.vmem [shape: bf16[2,1152,128], index: 1, kind: input, shape index: {}]   ;;  %s1967_s2 = inlined_call_operand.vmem [shape: f32[1,256], index: 2, kind: input, shape index: {}]   ;;  %s1968_s3 = inlined_call_operand.vmem [shape: bf16[32,256], index: 3, kind: output, shape index: {0}]   ;;  %s1969_s4 = inlined_call_operand.vmem [shape: f32[1,256], index: 4, kind: output, shape index: {1}]  }
   0x1   :  { %s1779_s17 = smov 0  }
   0x2 LB: > { %s1788_s18 = sadd.s32 4294967295, %s1748_s17   ;;  %s1790_s19 = sadd.s32 1, %s1748_s17   ;;  %s1748_s17 = sphi %s1779_s17, %s1973_s17   ;;  %s1744_s16 = sphi %s1777_s16, %s1972_s16   ;;  %s1740_s15 = sphi %s1775_s15, %s1971_s15  }
   0x3   : > { %s92_s20 = ssub.s32 %s1748_s17, %s1790_s19  ;;  %s95_s21 = sadd.s32 1, %s1744_s16 }
   0x4   : > { %p93_p0 = scmp.eq.s32.totalorder %s92_s20, 0  ;;  %p105_p1 = scmp.ne.s32.totalorder %s1744_s16, %s1740_s15 }
   0x5   : > { %p106_p2 = scmp.eq.s32.totalorder %s1788_s18, 1  ;;  %p1344_p3 = scmp.ge.s32.totalorder %s1748_s17, 1 }
   0x6   : > { %s1798_s22 = scalar_select %p93_p0, %s1744_s16, %s95_s21  }
   0x7   : > { %p1800_p4 = por %p106_p2, %p105_p1  ;;  %p173_p5 = scmp.lt.s32.totalorder %s1748_s17, 3 }
   0x9   : > { %p174_p6 = pnand %p1344_p3, %p173_p5 }
   0xa   : > { %p204_p7 = scmp.lt.s32.totalorder (!%p174_p6), %s1788_s18, 1  ;;  %v1662_v0 = vld [vmem:[%s1965_s0 + $0x4] ss:$36 sps:$4 sm:$0xff] (!%p174_p6)   ;;  %v1665_v1 = vld [vmem:[%s1965_s0 + $0xc] ss:$36 sps:$4 sm:$0xff] (!%p174_p6)   ;;  %s196_s30 = sand.u32 (!%p174_p6), 1, %s1740_s15  }
   0xb   : > { %177 = sbr.rel (%p174_p6) target bundleno = 357 (0x165), region = 32  ;;  %936 = vmatprep.mubr.bf16.mxu0 (!%p174_p6), %v1662_v0  ;;  %985 = vmatprep.mubr.bf16.mxu1 (!%p174_p6), %v1665_v1  ;;  %v1660_v32 = vld [vmem:[%s1965_s0] ss:$36 sps:$4 sm:$0xff] (!%p174_p6)   ;;  %v1663_v34 = vld [vmem:[%s1965_s0 + $0x8] ss:$36 sps:$4 sm:$0xff] (!%p174_p6)   ;;  %s1345_s5 = sshll.u32 (!%p174_p6), %s196_s30, 4 }
   0xc   : > { %v1687_v36 = vld [vmem:[%s1965_s0 + $0x4c] ss:$36 sps:$4 sm:$0xff] (!%p174_p6)   ;;  %v1689_v39 = vld [vmem:[%s1965_s0 + $0x54] ss:$36 sps:$4 sm:$0xff] (!%p174_p6)   ;;  %s198_s15 = scalar_lea.vmem (!%p174_p6), [#allocation2], %s1345_s5 }
   0xd   : > { %v1692_v44 = vld [vmem:[%s1965_s0 + $0x48] ss:$36 sps:$4 sm:$0xff] (!%p174_p6)   ;;  %v1693_v47 = vld [vmem:[%s1965_s0 + $0x50] ss:$36 sps:$4 sm:$0xff] (!%p174_p6)  }
   0xe   : > { %v1705_v48 = vld [vmem:[%s1965_s0 + $0x14] ss:$36 sps:$4 sm:$0xff] (!%p174_p6)  }
  0x12   : > { %s1809_s26 = scalar_select %p204_p7, %s1788_s18, 1 }
  0x13   : > { %s1443_s10 = sshll.u32 (%p1800_p4), %s1788_s18, 2 }
  0x14   : > { %s1603_s29 = smul.u32 576, %s1809_s26  ;;  %s214_s9 = scalar_lea.vmem %s1969_s4, %s1809_s26 }
  0x15   : > { %s1207_s13 = scalar_lea.vmem (%p1800_p4), %s1968_s3, %s1443_s10 }
  0x16   : > { %s1818_s6 = scalar_lea.vmem %s1966_s1, %s1603_s29  ;;  %s211_s29 = scalar_lea.vmem %s1967_s2, %s1809_s26 }
  0x17   : > { %v1628_v2 = vld [vmem:[%s1818_s6 + $0x40] sm:$0xff]   ;;  %v1632_v6 = vld [vmem:[%s1818_s6 + $0x48] sm:$0xff]   ;;  %v1636_v10 = vld [vmem:[%s1818_s6 + $0x50] sm:$0xff]  }
  0x18   : > { %v1629_v3 = vld [vmem:[%s1818_s6 + $0xc0] sm:$0xff]   ;;  %1461 = vmatprep.subr.bf16.mxu0 %v1628_v2  ;;  %v1633_v7 = vld [vmem:[%s1818_s6 + $0xc8] sm:$0xff]   ;;  %v1637_v11 = vld [vmem:[%s1818_s6 + $0xd0] sm:$0xff]  }
  0x19   : > { %v1630_v4 = vld [vmem:[%s1818_s6] sm:$0xff]   ;;  %1489 = vmatprep.subr.bf16.mxu1 %v1629_v3  ;;  %v1634_v8 = vld [vmem:[%s1818_s6 + $0x8] sm:$0xff]   ;;  %v1638_v12 = vld [vmem:[%s1818_s6 + $0x10] sm:$0xff]  }
  0x1a   : > { %v1631_v5 = vld [vmem:[%s1818_s6 + $0x80] sm:$0xff]   ;;  %1462 = vmatpush3.bf16.msra.mxu0 %v1630_v4  ;;  %v1635_v9 = vld [vmem:[%s1818_s6 + $0x88] sm:$0xff]   ;;  %v1639_v13 = vld [vmem:[%s1818_s6 + $0x90] sm:$0xff]  }
  0x1b   : > { %1490 = vmatpush3.bf16.msra.mxu1 %v1631_v5  ;;  %1463 = vmatprep.subr.bf16.mxu0 %v1632_v6  ;;  %v1640_v14 = vld [vmem:[%s1818_s6 + $0x58] sm:$0xff]   ;;  %v1644_v18 = vld [vmem:[%s1818_s6 + $0x60] sm:$0xff]   ;;  %v1648_v22 = vld [vmem:[%s1818_s6 + $0x68] sm:$0xff]  }
  0x1c   : > { %1491 = vmatprep.subr.bf16.mxu1 %v1633_v7  ;;  %v1641_v15 = vld [vmem:[%s1818_s6 + $0xd8] sm:$0xff]   ;;  %v1645_v19 = vld [vmem:[%s1818_s6 + $0xe0] sm:$0xff]   ;;  %v1649_v23 = vld [vmem:[%s1818_s6 + $0xe8] sm:$0xff]  }
  0x1d   : > { %v1642_v16 = vld [vmem:[%s1818_s6 + $0x18] sm:$0xff]   ;;  %v1646_v20 = vld [vmem:[%s1818_s6 + $0x20] sm:$0xff]   ;;  %v1650_v24 = vld [vmem:[%s1818_s6 + $0x28] sm:$0xff]  }
  0x1e   : > { %1464 = vmatpush3.bf16.msra.mxu0 %v1634_v8  ;;  %v1643_v17 = vld [vmem:[%s1818_s6 + $0x98] sm:$0xff]   ;;  %v1647_v21 = vld [vmem:[%s1818_s6 + $0xa0] sm:$0xff]   ;;  %v1651_v25 = vld [vmem:[%s1818_s6 + $0xa8] sm:$0xff]  }
  0x1f   : > { %1492 = vmatpush3.bf16.msra.mxu1 %v1635_v9  ;;  %1465 = vmatprep.subr.bf16.mxu0 %v1636_v10  ;;  %v1652_v26 = vld [vmem:[%s1818_s6 + $0x70] sm:$0xff]   ;;  %v1656_v30 = vld [vmem:[%s1818_s6 + $0x78] sm:$0xff]   ;;  %v1666_v37 = vld [vmem:[%s1818_s6 + $0x140] sm:$0xff]  }
  0x20   : > { %1493 = vmatprep.subr.bf16.mxu1 %v1637_v11  ;;  %v1653_v27 = vld [vmem:[%s1818_s6 + $0xf0] sm:$0xff]   ;;  %v1657_v31 = vld [vmem:[%s1818_s6 + $0xf8] sm:$0xff]   ;;  %v1667_v38 = vld [vmem:[%s1818_s6 + $0x100] sm:$0xff]  }
  0x21   : > { %v1654_v28 = vld [vmem:[%s1818_s6 + $0x30] sm:$0xff]   ;;  %v1658_v33 = vld [vmem:[%s1818_s6 + $0x38] sm:$0xff]   ;;  %v1668_v40 = vld [vmem:[%s1818_s6 + $0x1c0] sm:$0xff]  }
  0x22   : > { %1466 = vmatpush3.bf16.msra.mxu0 %v1638_v12  ;;  %v1655_v29 = vld [vmem:[%s1818_s6 + $0xb0] sm:$0xff]   ;;  %v1659_v35 = vld [vmem:[%s1818_s6 + $0xb8] sm:$0xff]   ;;  %v1669_v41 = vld [vmem:[%s1818_s6 + $0x180] sm:$0xff]  }
  0x23   : > { %1494 = vmatpush3.bf16.msra.mxu1 %v1639_v13  ;;  %1467 = vmatprep.subr.bf16.mxu0 %v1640_v14  ;;  %v1670_v42 = vld [vmem:[%s1818_s6 + $0x148] sm:$0xff]   ;;  %v1674_v49 = vld [vmem:[%s1818_s6 + $0x150] sm:$0xff]   ;;  %v1678_v53 = vld [vmem:[%s1818_s6 + $0x158] sm:$0xff]  }
  0x24   : > { %1495 = vmatprep.subr.bf16.mxu1 %v1641_v15  ;;  %v1671_v43 = vld [vmem:[%s1818_s6 + $0x108] sm:$0xff]   ;;  %v1675_v50 = vld [vmem:[%s1818_s6 + $0x110] sm:$0xff]   ;;  %v1679_v54 = vld [vmem:[%s1818_s6 + $0x118] sm:$0xff]  }
  0x25   : > { %v1672_v45 = vld [vmem:[%s1818_s6 + $0x1c8] sm:$0xff]   ;;  %v1676_v51 = vld [vmem:[%s1818_s6 + $0x1d0] sm:$0xff]   ;;  %v1680_v55 = vld [vmem:[%s1818_s6 + $0x1d8] sm:$0xff]  }
  0x26   : > { %1468 = vmatpush3.bf16.msra.mxu0 %v1642_v16  ;;  %v1673_v46 = vld [vmem:[%s1818_s6 + $0x188] sm:$0xff]   ;;  %v1677_v52 = vld [vmem:[%s1818_s6 + $0x190] sm:$0xff]   ;;  %v1681_v56 = vld [vmem:[%s1818_s6 + $0x198] sm:$0xff]  }
  0x27   : > { %1496 = vmatpush3.bf16.msra.mxu1 %v1643_v17  ;;  %1469 = vmatprep.subr.bf16.mxu0 %v1644_v18  ;;  %v1682_v57 = vld [vmem:[%s1818_s6 + $0x160] sm:$0xff]   ;;  %v1686_v61 = vld [vmem:[%s1818_s6 + $0x168] sm:$0xff]   ;;  %v1696_v1 = vld [vmem:[%s1818_s6 + $0x170] sm:$0xff]  }
  0x28   : > { %1497 = vmatprep.subr.bf16.mxu1 %v1645_v19  ;;  %v1683_v58 = vld [vmem:[%s1818_s6 + $0x120] sm:$0xff]   ;;  %v1691_v62 = vld [vmem:[%s1818_s6 + $0x128] sm:$0xff]   ;;  %v1697_v2 = vld [vmem:[%s1818_s6 + $0x130] sm:$0xff]  }
  0x29   : > { %v1684_v59 = vld [vmem:[%s1818_s6 + $0x1e0] sm:$0xff]   ;;  %v1694_v63 = vld [vmem:[%s1818_s6 + $0x1e8] sm:$0xff]   ;;  %v1698_v3 = vld [vmem:[%s1818_s6 + $0x1f0] sm:$0xff]  }
  0x2a   : > { %1470 = vmatpush3.bf16.msra.mxu0 %v1646_v20  ;;  %v1685_v60 = vld [vmem:[%s1818_s6 + $0x1a0] sm:$0xff]   ;;  %v1695_v0 = vld [vmem:[%s1818_s6 + $0x1a8] sm:$0xff]   ;;  %v1699_v4 = vld [vmem:[%s1818_s6 + $0x1b0] sm:$0xff]  }
  0x2b   : > { %1498 = vmatpush3.bf16.msra.mxu1 %v1647_v21  ;;  %1471 = vmatprep.subr.bf16.mxu0 %v1648_v22  ;;  %v1700_v5 = vld [vmem:[%s1818_s6 + $0x178] sm:$0xff]   ;;  %v1703_v7 = vld [vmem:[%s1965_s0 + $0x10] ss:$36 sps:$4 sm:$0xff]   ;;  %v1707_v10 = vld [vmem:[%s1818_s6 + $0x200] sm:$0xff]  }
  0x2c   : > { %1499 = vmatprep.subr.bf16.mxu1 %v1649_v23  ;;  %v1701_v6 = vld [vmem:[%s1818_s6 + $0x138] sm:$0xff]   ;;  %v1711_v13 = vld [vmem:[%s1818_s6 + $0x208] sm:$0xff]   ;;  %v1715_v15 = vld [vmem:[%s1818_s6 + $0x210] sm:$0xff]  }
  0x2d   : > { %v1702_v8 = vld [vmem:[%s1818_s6 + $0x1f8] sm:$0xff]   ;;  %v1716_v16 = vld [vmem:[%s1965_s0 + $0x64] ss:$36 sps:$4 sm:$0xff]   ;;  %v1722_v23 = vld [vmem:[%s1818_s6 + $0x230] sm:$0xff]  }
  0x2e   : > { %1472 = vmatpush3.bf16.msra.mxu0 %v1650_v24  ;;  %v1706_v9 = vld [vmem:[%s1818_s6 + $0x1b8] sm:$0xff]   ;;  %v1718_v18 = vld [vmem:[%s1965_s0 + $0x60] ss:$36 sps:$4 sm:$0xff]   ;;  %v1721_v22 = vld [vmem:[%s1818_s6 + $0x228] sm:$0xff]  }
  0x2f   : > { %1500 = vmatpush3.bf16.msra.mxu1 %v1651_v25  ;;  %1473 = vmatprep.subr.bf16.mxu0 %v1652_v26  ;;  %v1708_v11 = vld [vmem:[%s1965_s0 + $0x18] ss:$36 sps:$4 sm:$0xff]   ;;  %v1724_v20 = vld [vmem:[%s1965_s0 + $0x20] ss:$36 sps:$4 sm:$0xff]   ;;  %v1725_v25 = vld [vmem:[%s1965_s0 + $0x68] ss:$36 sps:$4 sm:$0xff]  }
  0x30   : > { %1501 = vmatprep.subr.bf16.mxu1 %v1653_v27  ;;  %v1710_v12 = vld [vmem:[%s1965_s0 + $0x1c] ss:$36 sps:$4 sm:$0xff]  }
  0x31   : > { %v1712_v14 = vld [vmem:[%s1965_s0 + $0x5c] ss:$36 sps:$4 sm:$0xff]  }
  0x32   : > { %1474 = vmatpush3.bf16.msra.mxu0 %v1654_v28  ;;  %v1714_v17 = vld [vmem:[%s1965_s0 + $0x58] ss:$36 sps:$4 sm:$0xff]   ;;  %v1720_v21 = vld [vmem:[%s1818_s6 + $0x220] sm:$0xff]  }
  0x33   : > { %1502 = vmatpush3.bf16.msra.mxu1 %v1655_v29  ;;  %1475 = vmatprep.subr.bf16.mxu0 %v1656_v30  ;;  %v1719_v19 = vld [vmem:[%s1818_s6 + $0x218] sm:$0xff]  }
  0x34   : > { %1503 = vmatprep.subr.bf16.mxu1 %v1657_v31  ;;  %v1723_v24 = vld [vmem:[%s1818_s6 + $0x238] sm:$0xff]  }
  0x36   : > { %1476 = vmatpush3.bf16.msra.mxu0 %v1658_v33 }
  0x37   : > { %1504 = vmatpush3.bf16.msra.mxu1 %v1659_v35  ;;  %1517 = vmatprep.subr.bf16.mxu0 %v1666_v37 }
  0x38   : > { %1545 = vmatprep.subr.bf16.mxu1 %v1668_v40 }
  0x39   : > { %937 = vmatmul.mubr.bf16.vlgmr.msra.gmra.mrb[0].mxu0 %v1660_v32 }
  0x3a   : > { %986 = vmatmul.mubr.bf16.vlgmr.msra.gmra.mrb[0].mxu1 %v1663_v34  ;;  %1518 = vmatpush3.bf16.msra.mxu0 %v1667_v38 }
  0x3b   : > { %944 = vmatprep.mubr.bf16.mxu0 %v1687_v36  ;;  %1546 = vmatpush3.bf16.msra.mxu1 %v1669_v41 }
  0x3c   : > { %1519 = vmatprep.subr.bf16.mxu0 %v1670_v42  ;;  %993 = vmatprep.mubr.bf16.mxu1 %v1689_v39 }
  0x3d   : > { %1547 = vmatprep.subr.bf16.mxu1 %v1672_v45 }
  0x3e   : > { %1520 = vmatpush3.bf16.msra.mxu0 %v1671_v43 }
  0x3f   : > { %1548 = vmatpush3.bf16.msra.mxu1 %v1673_v46  ;;  %1521 = vmatprep.subr.bf16.mxu0 %v1674_v49 }
  0x40   : > { %1549 = vmatprep.subr.bf16.mxu1 %v1676_v51 }
  0x41   : > { %945 = vmatmul.mubr.bf16.gmra.mrb[4].mxu0 %v1692_v44 }
  0x42   : > { %1522 = vmatpush3.bf16.msra.mxu0 %v1675_v50  ;;  %994 = vmatmul.mubr.bf16.gmra.mrb[4].mxu1 %v1693_v47 }
  0x43   : > { %1034 = vmatprep.mubr.bf16.mxu0 %v1705_v48  ;;  %1550 = vmatpush3.bf16.msra.mxu1 %v1677_v52 }
  0x44   : > { %1523 = vmatprep.subr.bf16.mxu0 %v1678_v53  ;;  %1551 = vmatprep.subr.bf16.mxu1 %v1680_v55 }
  0x45   : > { %1083 = vmatprep.mubr.bf16.mxu1 %v1710_v12 }
  0x46   : > { %1524 = vmatpush3.bf16.msra.mxu0 %v1679_v54 }
  0x47   : > { %1552 = vmatpush3.bf16.msra.mxu1 %v1681_v56  ;;  %1525 = vmatprep.subr.bf16.mxu0 %v1682_v57 }
  0x48   : > { %1553 = vmatprep.subr.bf16.mxu1 %v1684_v59 }
  0x4a   : > { %1526 = vmatpush3.bf16.msra.mxu0 %v1683_v58 }
  0x4b   : > { %1554 = vmatpush3.bf16.msra.mxu1 %v1685_v60  ;;  %1527 = vmatprep.subr.bf16.mxu0 %v1686_v61 }
  0x4c   : > { %1555 = vmatprep.subr.bf16.mxu1 %v1694_v63 }
  0x4e   : > { %1528 = vmatpush3.bf16.msra.mxu0 %v1691_v62 }
  0x4f   : > { %1556 = vmatpush3.bf16.msra.mxu1 %v1695_v0  ;;  %1529 = vmatprep.subr.bf16.mxu0 %v1696_v1 }
  0x50   : > { %1557 = vmatprep.subr.bf16.mxu1 %v1698_v3 }
  0x52   : > { %1530 = vmatpush3.bf16.msra.mxu0 %v1697_v2 }
  0x53   : > { %1558 = vmatpush3.bf16.msra.mxu1 %v1699_v4  ;;  %1531 = vmatprep.subr.bf16.mxu0 %v1700_v5 }
  0x54   : > { %1559 = vmatprep.subr.bf16.mxu1 %v1702_v8 }
  0x56   : > { %1532 = vmatpush3.bf16.msra.mxu0 %v1701_v6 }
  0x57   : > { %1560 = vmatpush3.bf16.msra.mxu1 %v1706_v9  ;;  %1583 = vmatprep.subr.bf16.mxu0 %v1707_v10 }
  0x59   : > { %1035 = vmatmul.mubr.bf16.vlgmr.msra.gmra.mrb[8].mxu0 %v1703_v7 }
  0x5a   : > { %1584 = vmatpush3.bf16.msra.mxu0 %v1707_v10  ;;  %1084 = vmatmul.mubr.bf16.vlgmr.msra.gmra.mrb[8].mxu1 %v1708_v11 }
  0x5b   : > { %1585 = vmatprep.subr.bf16.mxu0 %v1711_v13  ;;  %1042 = vmatprep.mubr.bf16.mxu0 %v1712_v14 }
  0x5c   : > { %1091 = vmatprep.mubr.bf16.mxu1 %v1716_v16 }
  0x5e   : > { %1586 = vmatpush3.bf16.msra.mxu0 %v1711_v13 }
  0x5f   : > { %1587 = vmatprep.subr.bf16.mxu0 %v1715_v15 }
  0x61   : > { %1043 = vmatmul.mubr.bf16.gmra.mrb[12].mxu0 %v1714_v17 }
  0x62   : > { %1588 = vmatpush3.bf16.msra.mxu0 %v1715_v15  ;;  %1092 = vmatmul.mubr.bf16.gmra.mrb[12].mxu1 %v1718_v18 }
  0x63   : > { %1589 = vmatprep.subr.bf16.mxu0 %v1719_v19  ;;  %1599 = vmatprep.mubr.bf16.mxu0 %v1724_v20 }
  0x66   : > { %1590 = vmatpush3.bf16.msra.mxu0 %v1719_v19 }
  0x67   : > { %1591 = vmatprep.subr.bf16.mxu0 %v1720_v21 }
  0x6a   : > { %1592 = vmatpush3.bf16.msra.mxu0 %v1720_v21 }
  0x6b   : > { %1593 = vmatprep.subr.bf16.mxu0 %v1721_v22 }
  0x6e   : > { %1594 = vmatpush3.bf16.msra.mxu0 %v1721_v22 }
  0x6f   : > { %1595 = vmatprep.subr.bf16.mxu0 %v1722_v23 }
  0x72   : > { %1596 = vmatpush3.bf16.msra.mxu0 %v1722_v23  ;;  %v1437_v23 = vld [vmem:[%s211_s29] ss:$0 sm:$0xff] }
  0x73   : > { %1597 = vmatprep.subr.bf16.mxu0 %v1723_v24 }
  0x76   : > { %1598 = vmatpush3.bf16.msra.mxu0 %v1723_v24 }
  0x79   : > { %1600 = vmatmul.mubr.bf16.vlgmr.msra.gmra.mrb[16].mxu0 %v1725_v25 }
 0x10c   : > { %v1477_v26 = vpop.f32.mrb[0].mxu0 }
 0x10d   : > { %v1505_v27 = vpop.f32.mrb[0].mxu1  ;;  %v1478_v28 = vpop.f32.mrb[1].mxu0 }
 0x10e   : > { %v1479_v29 = vadd.f32 %v1478_v28, %v1477_v26  ;;  %v1506_v30 = vpop.f32.mrb[1].mxu1  ;;  %v1480_v31 = vpop.f32.mrb[2].mxu0 }
 0x10f   : > { %v1507_v32 = vadd.f32 %v1506_v30, %v1505_v27  ;;  %v1508_v33 = vpop.f32.mrb[2].mxu1  ;;  %v1481_v34 = vpop.f32.mrb[3].mxu0 }
 0x110   : > { %v1482_v35 = vadd.f32 %v1481_v34, %v1480_v31  ;;  %v1509_v36 = vpop.f32.mrb[3].mxu1 }
 0x111   : > { %v988_v37 = vadd.f32 %v1507_v32, %v1479_v29  ;;  %v1510_v38 = vadd.f32 %v1509_v36, %v1508_v33 }
 0x113   : > { %v991_v39 = vadd.f32 %v1510_v38, %v1482_v35 }
 0x114   : > { %v1483_v40 = vpop.f32.mrb[4].mxu0 }
 0x115   : > { %v1484_v41 = vpop.f32.mrb[5].mxu0  ;;  %v1511_v42 = vpop.f32.mrb[4].mxu1 }
 0x116   : > { %v1485_v43 = vadd.f32 %v1484_v41, %v1483_v40  ;;  %v1486_v44 = vpop.f32.mrb[6].mxu0  ;;  %v1512_v45 = vpop.f32.mrb[5].mxu1 }
 0x117   : > { %v1487_v46 = vpop.f32.mrb[7].mxu0  ;;  %v1513_v47 = vadd.f32 %v1512_v45, %v1511_v42  ;;  %v1514_v48 = vpop.f32.mrb[6].mxu1 }
 0x118   : > { %v1488_v49 = vadd.f32 %v1487_v46, %v1486_v44  ;;  %v1515_v50 = vpop.f32.mrb[7].mxu1 }
 0x119   : > { %v996_v51 = vadd.f32 %v1513_v47, %v1485_v43  ;;  %v1516_v52 = vadd.f32 %v1515_v50, %v1514_v48 }
 0x11b   : > { %v999_v53 = vadd.f32 %v1516_v52, %v1488_v49 }
 0x12c   : > { %v1533_v54 = vpop.f32.mrb[8].mxu0 }
 0x12d   : > { %v1534_v55 = vpop.f32.mrb[9].mxu0  ;;  %v1561_v58 = vpop.f32.mrb[8].mxu1 }
 0x12e   : > { %v1535_v56 = vadd.f32 %v1534_v55, %v1533_v54  ;;  %v1536_v57 = vpop.f32.mrb[10].mxu0  ;;  %v1562_v60 = vpop.f32.mrb[9].mxu1 }
 0x12f   : > { %v1537_v59 = vpop.f32.mrb[11].mxu0  ;;  %v1563_v63 = vadd.f32 %v1562_v60, %v1561_v58  ;;  %v1564_v0 = vpop.f32.mrb[10].mxu1 }
 0x130   : > { %v1037_v61 = vadd.f32 %v1535_v56, %v988_v37  ;;  %v1538_v62 = vadd.f32 %v1537_v59, %v1536_v57  ;;  %v1565_v1 = vpop.f32.mrb[11].mxu1 }
 0x131   : > { %v1566_v3 = vadd.f32 %v1565_v1, %v1564_v0 }
 0x132   : > { %v1040_v2 = vadd.f32 %v1538_v62, %v991_v39  ;;  %v1086_v4 = vadd.f32 %v1563_v63, %v1037_v61 }
 0x134   : > { %v1539_v5 = vpop.f32.mrb[12].mxu0  ;;  %v1089_v6 = vadd.f32 %v1566_v3, %v1040_v2 }
 0x135   : > { %v1540_v7 = vpop.f32.mrb[13].mxu0  ;;  %v1567_v10 = vpop.f32.mrb[12].mxu1 }
 0x136   : > { %v1541_v8 = vadd.f32 %v1540_v7, %v1539_v5  ;;  %v1542_v9 = vpop.f32.mrb[14].mxu0  ;;  %v1568_v12 = vpop.f32.mrb[13].mxu1 }
 0x137   : > { %v1543_v11 = vpop.f32.mrb[15].mxu0  ;;  %v1569_v15 = vadd.f32 %v1568_v12, %v1567_v10  ;;  %v1570_v16 = vpop.f32.mrb[14].mxu1 }
 0x138   : > { %v1045_v13 = vadd.f32 %v1541_v8, %v996_v51  ;;  %v1544_v14 = vadd.f32 %v1543_v11, %v1542_v9  ;;  %v1571_v17 = vpop.f32.mrb[15].mxu1 }
 0x139   : > { %v1572_v19 = vadd.f32 %v1571_v17, %v1570_v16 }
 0x13a   : > { %v1048_v18 = vadd.f32 %v1544_v14, %v999_v53  ;;  %v1094_v20 = vadd.f32 %v1569_v15, %v1045_v13 }
 0x13c   : > { %v1097_v21 = vadd.f32 %v1572_v19, %v1048_v18 }
 0x14c   : > { %v1601_v22 = vpop.f32.mrb[16].mxu0 }
 0x14d   : > { %v1143_v24 = vadd.f32 %v1601_v22, %v1094_v20  ;;  %v1134_v25 = vpop.f32.mrb[17].mxu0 }
 0x14e   : > { %v1135_v26 = vadd.f32 %v1134_v25, %v1086_v4  ;;  %v1602_v27 = vpop.f32.mrb[18].mxu0 }
 0x14f   : > { %v1158_v28 = vadd.f32 %v1437_v23, %v1143_v24  ;;  %v1146_v29 = vadd.f32 %v1602_v27, %v1097_v21  ;;  %v1137_v30 = vpop.f32.mrb[19].mxu0 }
 0x150   : > { %v1156_v31 = vadd.f32 %v1437_v23, %v1135_v26  ;;  %v1184_v32 = vsub.f32 %v1135_v26, %v1143_v24  ;;  %v1138_v33 = vadd.f32 %v1137_v30, %v1089_v6 }
 0x151   : > { %v1159_v34 = vadd.f32 %v1437_v23, %v1146_v29  ;;  %v1162_v37 = vmax.f32 %v1158_v28, 0.0 }
 0x152   : > { %v1157_v35 = vadd.f32 %v1437_v23, %v1138_v33  ;;  %v1185_v36 = vsub.f32 %v1138_v33, %v1146_v29  ;;  %v1160_v39 = vmax.f32 %v1156_v31, 0.0  ;;  %v1186_v40 = vmul.f32 %v1184_v32, %v1184_v32 }
 0x153   : > { %v1163_v38 = vmax.f32 %v1159_v34, 0.0 }
 0x154   : > { %v1161_v41 = vmax.f32 %v1157_v35, 0.0  ;;  %v1187_v42 = vmul.f32 %v1185_v36, %v1185_v36 }
 0x155   : > { %v1458_v43 = vpack.c.bf16 %v1163_v38, %v1162_v37 }
 0x156   : > { %v1453_v44 = vpack.c.bf16 %v1161_v41, %v1160_v39  ;;  %v1188_v45 = vadd.f32 %v1187_v42, %v1186_v40 }
 0x157   : > { %1460 = vst [vmem:[%s198_s15 + $0x8] sm:$0xff] %v1458_v43  }
 0x158   : > { %1454 = vst [vmem:[%s198_s15] sm:$0xff] %v1453_v44   ;;  %v1189_v46 = vrot.slane %v1188_v45, 4 }
 0x15a   : > { %v1190_v47 = vadd.f32 %v1189_v46, %v1188_v45 }
 0x15c   : > { %v1191_v48 = vrot.slane %v1190_v47, 2 }
 0x15e   : > { %v1192_v49 = vadd.f32 %v1191_v48, %v1190_v47  ;;  %1205 = sbr.rel (!%p1800_p4) target bundleno = 357 (0x165), region = 36  ;;  %v1227_v54 = vld [vmem:[%s198_s15 + $0x8] sm:$0xf] (%p1800_p4)  ;;  %v1229_v55 = vld [vmem:[%s198_s15 + $0xc] sm:$0xf] (%p1800_p4) }
 0x15f   : > { %v1223_v52 = vld [vmem:[%s198_s15] sm:$0xf] (%p1800_p4)  ;;  %v1225_v53 = vld [vmem:[%s198_s15 + $0x4] sm:$0xf] (%p1800_p4)  ;;  %1228 = vst [vmem:[%s1207_s13 + $0x10] sm:$0xf] (%p1800_p4), %v1227_v54 }
 0x160   : > { %v1193_v50 = vrot.slane %v1192_v49, 1  ;;  %1224 = vst [vmem:[%s1207_s13] sm:$0xf] (%p1800_p4), %v1223_v52  ;;  %1226 = vst [vmem:[%s1207_s13 + $0x8] sm:$0xf] (%p1800_p4), %v1225_v53 }
 0x161   : > { %1230 = vst [vmem:[%s1207_s13 + $0x18] sm:$0xf] (%p1800_p4), %v1229_v55 }
 0x162   : > { %v1194_v51 = vadd.f32 %v1193_v50, %v1192_v49 }
 0x164   : > { %1195 = vst [vmem:[%s214_s9] sm:$0x1] %v1194_v51 }
 0x165 PF: > { %p12_p8 = scmp.ge.s32.totalorder %s1790_s19, 4   ;;  %s1971_s15 = smov %s1744_s16 }
 0x166   : > { %s1972_s16 = smov %s1798_s22  ;;  %s1973_s17 = smov %s1790_s19 }
 0x167   :  { %14 = sbr.rel (!%p12_p8) target bundleno = 2 (0x2), region = 118 }

// kernel: vgg19_feature_loss.19
= control target key start
LH: loop header
LB: loop body
LE: loop exit
PB: predicated region body
PF: predicated region fallthrough
CT: control target
= control target key end

     0   :  { %s2992_s1 = inlined_call_operand.vmem [shape: bf16[1,1152,128], index: 1, kind: input, shape index: {}]   ;;  %s2993_s0 = inlined_call_operand.vmem [shape: bf16[128,1152], index: 0, kind: input, shape index: {}]   ;;  %s2994_s2 = inlined_call_operand.vmem [shape: f32[1,128], index: 2, kind: input, shape index: {}]   ;;  %s2995_s3 = inlined_call_operand.vmem [shape: bf16[128,128], index: 3, kind: output, shape index: {0}]   ;;  %s2996_s4 = inlined_call_operand.vmem [shape: f32[1,128], index: 4, kind: output, shape index: {1}]  }
   0x1   :  { %v2227_v0 = vld [vmem:[%s2992_s1 + $0x40] sm:$0xff]   ;;  %v2231_v4 = vld [vmem:[%s2992_s1 + $0x48] sm:$0xff]   ;;  %v2235_v8 = vld [vmem:[%s2992_s1 + $0x50] sm:$0xff]  }
   0x2   :  { %v2228_v1 = vld [vmem:[%s2992_s1 + $0xc0] sm:$0xff]   ;;  %1907 = vmatprep.subr.bf16.mxu0 %v2227_v0  ;;  %v2232_v5 = vld [vmem:[%s2992_s1 + $0xc8] sm:$0xff]   ;;  %v2236_v9 = vld [vmem:[%s2992_s1 + $0xd0] sm:$0xff]  }
   0x3   :  { %v2229_v2 = vld [vmem:[%s2992_s1] sm:$0xff]   ;;  %1971 = vmatprep.subr.bf16.mxu1 %v2228_v1  ;;  %v2233_v6 = vld [vmem:[%s2992_s1 + $0x8] sm:$0xff]   ;;  %v2237_v10 = vld [vmem:[%s2992_s1 + $0x10] sm:$0xff]  }
   0x4   :  { %v2230_v3 = vld [vmem:[%s2992_s1 + $0x80] sm:$0xff]   ;;  %1908 = vmatpush3.bf16.msra.mxu0 %v2229_v2  ;;  %v2234_v7 = vld [vmem:[%s2992_s1 + $0x88] sm:$0xff]   ;;  %v2238_v11 = vld [vmem:[%s2992_s1 + $0x90] sm:$0xff]  }
   0x5   :  { %1972 = vmatpush3.bf16.msra.mxu1 %v2230_v3  ;;  %1909 = vmatprep.subr.bf16.mxu0 %v2231_v4  ;;  %v2239_v12 = vld [vmem:[%s2992_s1 + $0x58] sm:$0xff]   ;;  %v2243_v16 = vld [vmem:[%s2992_s1 + $0x60] sm:$0xff]   ;;  %v2247_v20 = vld [vmem:[%s2992_s1 + $0x68] sm:$0xff]  }
   0x6   :  { %1973 = vmatprep.subr.bf16.mxu1 %v2232_v5  ;;  %v2240_v13 = vld [vmem:[%s2992_s1 + $0xd8] sm:$0xff]   ;;  %v2244_v17 = vld [vmem:[%s2992_s1 + $0xe0] sm:$0xff]   ;;  %v2248_v21 = vld [vmem:[%s2992_s1 + $0xe8] sm:$0xff]  }
   0x7   :  { %v2241_v14 = vld [vmem:[%s2992_s1 + $0x18] sm:$0xff]   ;;  %v2245_v18 = vld [vmem:[%s2992_s1 + $0x20] sm:$0xff]   ;;  %v2249_v22 = vld [vmem:[%s2992_s1 + $0x28] sm:$0xff]  }
   0x8   :  { %1910 = vmatpush3.bf16.msra.mxu0 %v2233_v6  ;;  %v2242_v15 = vld [vmem:[%s2992_s1 + $0x98] sm:$0xff]   ;;  %v2246_v19 = vld [vmem:[%s2992_s1 + $0xa0] sm:$0xff]   ;;  %v2250_v23 = vld [vmem:[%s2992_s1 + $0xa8] sm:$0xff]  }
   0x9   :  { %1974 = vmatpush3.bf16.msra.mxu1 %v2234_v7  ;;  %1911 = vmatprep.subr.bf16.mxu0 %v2235_v8  ;;  %v2251_v24 = vld [vmem:[%s2992_s1 + $0x70] sm:$0xff]   ;;  %v2255_v28 = vld [vmem:[%s2992_s1 + $0x78] sm:$0xff]   ;;  %v2259_v32 = vld [vmem:[%s2993_s0] ss:$36 sps:$4 sm:$0xff]  }
   0xa   :  { %1975 = vmatprep.subr.bf16.mxu1 %v2236_v9  ;;  %v2252_v25 = vld [vmem:[%s2992_s1 + $0xf0] sm:$0xff]   ;;  %v2256_v29 = vld [vmem:[%s2992_s1 + $0xf8] sm:$0xff]   ;;  %v2261_v33 = vld [vmem:[%s2993_s0 + $0x4] ss:$36 sps:$4 sm:$0xff]  }
   0xb   :  { %v2253_v26 = vld [vmem:[%s2992_s1 + $0x30] sm:$0xff]   ;;  %v2257_v30 = vld [vmem:[%s2992_s1 + $0x38] sm:$0xff]   ;;  %v2262_v34 = vld [vmem:[%s2993_s0 + $0x8] ss:$36 sps:$4 sm:$0xff]   ;;  %1073 = vmatprep.mubr.bf16.mxu0 %v2261_v33 }
   0xc   :  { %1912 = vmatpush3.bf16.msra.mxu0 %v2237_v10  ;;  %v2254_v27 = vld [vmem:[%s2992_s1 + $0xb0] sm:$0xff]   ;;  %v2258_v31 = vld [vmem:[%s2992_s1 + $0xb8] sm:$0xff]   ;;  %v2265_v36 = vld [vmem:[%s2992_s1 + $0x140] sm:$0xff]  }
   0xd   :  { %1976 = vmatpush3.bf16.msra.mxu1 %v2238_v11  ;;  %1913 = vmatprep.subr.bf16.mxu0 %v2239_v12  ;;  %v2264_v35 = vld [vmem:[%s2993_s0 + $0xc] ss:$36 sps:$4 sm:$0xff]   ;;  %v2266_v37 = vld [vmem:[%s2992_s1 + $0x1c0] sm:$0xff]   ;;  %v2271_v41 = vld [vmem:[%s2993_s0 + $0x54] ss:$36 sps:$4 sm:$0xff]  }
   0xe   :  { %1977 = vmatprep.subr.bf16.mxu1 %v2240_v13  ;;  %1170 = vmatprep.mubr.bf16.mxu1 %v2264_v35  ;;  %v2267_v38 = vld [vmem:[%s2992_s1 + $0x100] sm:$0xff]   ;;  %v2269_v40 = vld [vmem:[%s2993_s0 + $0x4c] ss:$36 sps:$4 sm:$0xff]   ;;  %v2279_v48 = vld [vmem:[%s2993_s0 + $0x94] ss:$36 sps:$4 sm:$0xff]  }
   0xf   :  { %v2268_v39 = vld [vmem:[%s2992_s1 + $0x180] sm:$0xff]   ;;  %v2273_v42 = vld [vmem:[%s2993_s0 + $0x48] ss:$36 sps:$4 sm:$0xff]   ;;  %v2274_v43 = vld [vmem:[%s2993_s0 + $0x50] ss:$36 sps:$4 sm:$0xff]  }
  0x10   :  { %1914 = vmatpush3.bf16.msra.mxu0 %v2241_v14  ;;  %v2275_v44 = vld [vmem:[%s2992_s1 + $0x148] sm:$0xff]   ;;  %v2281_v49 = vld [vmem:[%s2993_s0 + $0x9c] ss:$36 sps:$4 sm:$0xff]   ;;  %v2283_v50 = vld [vmem:[%s2993_s0 + $0x90] ss:$36 sps:$4 sm:$0xff]  }
  0x11   :  { %1978 = vmatpush3.bf16.msra.mxu1 %v2242_v15  ;;  %1915 = vmatprep.subr.bf16.mxu0 %v2243_v16  ;;  %v2276_v45 = vld [vmem:[%s2992_s1 + $0x1c8] sm:$0xff]   ;;  %v2284_v51 = vld [vmem:[%s2993_s0 + $0x98] ss:$36 sps:$4 sm:$0xff]   ;;  %v2285_v52 = vld [vmem:[%s2992_s1 + $0x150] sm:$0xff]  }
  0x12   :  { %1979 = vmatprep.subr.bf16.mxu1 %v2244_v17  ;;  %v2277_v46 = vld [vmem:[%s2992_s1 + $0x108] sm:$0xff]   ;;  %v2286_v53 = vld [vmem:[%s2992_s1 + $0x1d0] sm:$0xff]   ;;  %v2289_v56 = vld [vmem:[%s2993_s0 + $0xdc] ss:$36 sps:$4 sm:$0xff]  }
  0x13   :  { %v2278_v47 = vld [vmem:[%s2992_s1 + $0x188] sm:$0xff]   ;;  %v2287_v54 = vld [vmem:[%s2992_s1 + $0x110] sm:$0xff]   ;;  %v2293_v58 = vld [vmem:[%s2993_s0 + $0xd8] ss:$36 sps:$4 sm:$0xff]  }
  0x14   :  { %1916 = vmatpush3.bf16.msra.mxu0 %v2245_v18  ;;  %v2288_v55 = vld [vmem:[%s2992_s1 + $0x190] sm:$0xff]   ;;  %v2291_v57 = vld [vmem:[%s2993_s0 + $0xe4] ss:$36 sps:$4 sm:$0xff]   ;;  %v2295_v60 = vld [vmem:[%s2992_s1 + $0x158] sm:$0xff]  }
  0x15   :  { %1980 = vmatpush3.bf16.msra.mxu1 %v2246_v19  ;;  %1917 = vmatprep.subr.bf16.mxu0 %v2247_v20  ;;  %v2294_v59 = vld [vmem:[%s2993_s0 + $0xe0] ss:$36 sps:$4 sm:$0xff]   ;;  %v2296_v61 = vld [vmem:[%s2992_s1 + $0x1d8] sm:$0xff]   ;;  %v2301_v1 = vld [vmem:[%s2993_s0 + $0x12c] ss:$36 sps:$4 sm:$0xff]  }
  0x16   :  { %1981 = vmatprep.subr.bf16.mxu1 %v2248_v21  ;;  %v2297_v62 = vld [vmem:[%s2992_s1 + $0x118] sm:$0xff]   ;;  %v2299_v0 = vld [vmem:[%s2993_s0 + $0x124] ss:$36 sps:$4 sm:$0xff]   ;;  %v2309_v8 = vld [vmem:[%s2993_s0 + $0x16c] ss:$36 sps:$4 sm:$0xff]  }
  0x17   :  { %v2298_v63 = vld [vmem:[%s2992_s1 + $0x198] sm:$0xff]   ;;  %v2303_v2 = vld [vmem:[%s2993_s0 + $0x120] ss:$36 sps:$4 sm:$0xff]   ;;  %v2304_v4 = vld [vmem:[%s2993_s0 + $0x128] ss:$36 sps:$4 sm:$0xff]  }
  0x18   :  { %1918 = vmatpush3.bf16.msra.mxu0 %v2249_v22  ;;  %v2305_v3 = vld [vmem:[%s2992_s1 + $0x160] sm:$0xff]   ;;  %v2311_v9 = vld [vmem:[%s2993_s0 + $0x174] ss:$36 sps:$4 sm:$0xff]   ;;  %v2315_v10 = vld [vmem:[%s2992_s1 + $0x168] sm:$0xff]  }
  0x19   :  { %1982 = vmatpush3.bf16.msra.mxu1 %v2250_v23  ;;  %1919 = vmatprep.subr.bf16.mxu0 %v2251_v24  ;;  %v2306_v5 = vld [vmem:[%s2992_s1 + $0x1e0] sm:$0xff]   ;;  %v2316_v11 = vld [vmem:[%s2992_s1 + $0x1e8] sm:$0xff]   ;;  %v2314_v15 = vld [vmem:[%s2993_s0 + $0x170] ss:$36 sps:$4 sm:$0xff]  }
  0x1a   :  { %1983 = vmatprep.subr.bf16.mxu1 %v2252_v25  ;;  %v2307_v6 = vld [vmem:[%s2992_s1 + $0x120] sm:$0xff]   ;;  %v2313_v12 = vld [vmem:[%s2993_s0 + $0x168] ss:$36 sps:$4 sm:$0xff]   ;;  %v2319_v16 = vld [vmem:[%s2993_s0 + $0x1b4] ss:$36 sps:$4 sm:$0xff]  }
  0x1b   :  { %v2308_v7 = vld [vmem:[%s2992_s1 + $0x1a0] sm:$0xff]   ;;  %v2317_v13 = vld [vmem:[%s2992_s1 + $0x128] sm:$0xff]   ;;  %v2325_v18 = vld [vmem:[%s2992_s1 + $0x170] sm:$0xff]  }
  0x1c   :  { %1920 = vmatpush3.bf16.msra.mxu0 %v2253_v26  ;;  %v2318_v14 = vld [vmem:[%s2992_s1 + $0x1a8] sm:$0xff]   ;;  %v2321_v17 = vld [vmem:[%s2993_s0 + $0x1bc] ss:$36 sps:$4 sm:$0xff]   ;;  %v2326_v19 = vld [vmem:[%s2992_s1 + $0x1f0] sm:$0xff]  }
  0x1d   :  { %1984 = vmatpush3.bf16.msra.mxu1 %v2254_v27  ;;  %1921 = vmatprep.subr.bf16.mxu0 %v2255_v28  ;;  %v2327_v20 = vld [vmem:[%s2992_s1 + $0x130] sm:$0xff]   ;;  %v2324_v23 = vld [vmem:[%s2993_s0 + $0x1b8] ss:$36 sps:$4 sm:$0xff]   ;;  %v2331_v25 = vld [vmem:[%s2993_s0 + $0x204] ss:$36 sps:$4 sm:$0xff]  }
  0x1e   :  { %1985 = vmatprep.subr.bf16.mxu1 %v2256_v29  ;;  %v2328_v21 = vld [vmem:[%s2992_s1 + $0x1b0] sm:$0xff]   ;;  %v2329_v24 = vld [vmem:[%s2993_s0 + $0x1fc] ss:$36 sps:$4 sm:$0xff]  }
  0x1f   :  { %v2323_v22 = vld [vmem:[%s2993_s0 + $0x1b0] ss:$36 sps:$4 sm:$0xff]   ;;  %v2335_v26 = vld [vmem:[%s2992_s1 + $0x178] sm:$0xff]  }
  0x20   :  { %1922 = vmatpush3.bf16.msra.mxu0 %v2257_v30  ;;  %v2336_v27 = vld [vmem:[%s2992_s1 + $0x1f8] sm:$0xff]   ;;  %v2339_v35 = vld [vmem:[%s2993_s0 + $0x10] ss:$36 sps:$4 sm:$0xff]  }
  0x21   :  { %1986 = vmatpush3.bf16.msra.mxu1 %v2258_v31  ;;  %2035 = vmatprep.subr.bf16.mxu0 %v2265_v36  ;;  %v2337_v28 = vld [vmem:[%s2992_s1 + $0x138] sm:$0xff]   ;;  %v2334_v31 = vld [vmem:[%s2993_s0 + $0x200] ss:$36 sps:$4 sm:$0xff]  }
  0x22   :  { %2099 = vmatprep.subr.bf16.mxu1 %v2266_v37  ;;  %v2338_v29 = vld [vmem:[%s2992_s1 + $0x1b8] sm:$0xff]  }
  0x23   :  { %1074 = vmatmul.mubr.bf16.vlgmr.msra.gmra.mrb[0].mxu0 %v2259_v32  ;;  %v2333_v30 = vld [vmem:[%s2993_s0 + $0x1f8] ss:$36 sps:$4 sm:$0xff]   ;;  %v2345_v32 = vld [vmem:[%s2992_s1 + $0x200] sm:$0xff]  }
  0x24   :  { %1171 = vmatmul.mubr.bf16.vlgmr.msra.gmra.mrb[0].mxu1 %v2262_v34  ;;  %2036 = vmatpush3.bf16.msra.mxu0 %v2267_v38  ;;  %v2341_v33 = vld [vmem:[%s2993_s0 + $0x14] ss:$36 sps:$4 sm:$0xff]   ;;  %v2344_v34 = vld [vmem:[%s2993_s0 + $0x1c] ss:$36 sps:$4 sm:$0xff]   ;;  %v2348_v38 = vld [vmem:[%s2993_s0 + $0x64] ss:$36 sps:$4 sm:$0xff]  }
  0x25   :  { %2100 = vmatpush3.bf16.msra.mxu1 %v2268_v39  ;;  %1081 = vmatprep.mubr.bf16.mxu0 %v2269_v40  ;;  %v2342_v36 = vld [vmem:[%s2993_s0 + $0x18] ss:$36 sps:$4 sm:$0xff]   ;;  %v2352_v39 = vld [vmem:[%s2992_s1 + $0x208] sm:$0xff]   ;;  %v2359_v40 = vld [vmem:[%s2992_s1 + $0x210] sm:$0xff]  }
  0x26   :  { %1178 = vmatprep.mubr.bf16.mxu1 %v2271_v41  ;;  %2037 = vmatprep.subr.bf16.mxu0 %v2275_v44  ;;  %v2346_v37 = vld [vmem:[%s2993_s0 + $0x5c] ss:$36 sps:$4 sm:$0xff]   ;;  %v2355_v44 = vld [vmem:[%s2993_s0 + $0xac] ss:$36 sps:$4 sm:$0xff]  }
  0x27   :  { %2101 = vmatprep.subr.bf16.mxu1 %v2276_v45  ;;  %v2350_v41 = vld [vmem:[%s2993_s0 + $0x58] ss:$36 sps:$4 sm:$0xff]  }
  0x28   :  { %2038 = vmatpush3.bf16.msra.mxu0 %v2277_v46  ;;  %v2366_v45 = vld [vmem:[%s2992_s1 + $0x218] sm:$0xff]   ;;  %v2373_v46 = vld [vmem:[%s2992_s1 + $0x220] sm:$0xff]  }
  0x29   :  { %2102 = vmatpush3.bf16.msra.mxu1 %v2278_v47  ;;  %2039 = vmatprep.subr.bf16.mxu0 %v2285_v52  ;;  %v2357_v47 = vld [vmem:[%s2993_s0 + $0xa0] ss:$36 sps:$4 sm:$0xff]   ;;  %v2364_v52 = vld [vmem:[%s2993_s0 + $0xe8] ss:$36 sps:$4 sm:$0xff]  }
  0x2a   :  { %2103 = vmatprep.subr.bf16.mxu1 %v2286_v53  ;;  %v2387_v53 = vld [vmem:[%s2992_s1 + $0x230] sm:$0xff]  }
  0x2b   :  { %1082 = vmatmul.mubr.bf16.gmra.mrb[4].mxu0 %v2273_v42  ;;  %v2351_v42 = vld [vmem:[%s2993_s0 + $0x60] ss:$36 sps:$4 sm:$0xff]  }
  0x2c   :  { %1179 = vmatmul.mubr.bf16.gmra.mrb[4].mxu1 %v2274_v43  ;;  %1089 = vmatprep.mubr.bf16.mxu0 %v2279_v48  ;;  %v2353_v43 = vld [vmem:[%s2993_s0 + $0xa4] ss:$36 sps:$4 sm:$0xff]  }
  0x2d   :  { %1186 = vmatprep.mubr.bf16.mxu1 %v2281_v49  ;;  %2040 = vmatpush3.bf16.msra.mxu0 %v2287_v54  ;;  %v2358_v48 = vld [vmem:[%s2993_s0 + $0xa8] ss:$36 sps:$4 sm:$0xff]   ;;  %v2365_v54 = vld [vmem:[%s2993_s0 + $0xf0] ss:$36 sps:$4 sm:$0xff]  }
  0x2e   :  { %2104 = vmatpush3.bf16.msra.mxu1 %v2288_v55  ;;  %2041 = vmatprep.subr.bf16.mxu0 %v2295_v60  ;;  %v2360_v49 = vld [vmem:[%s2993_s0 + $0xec] ss:$36 sps:$4 sm:$0xff]   ;;  %v2367_v55 = vld [vmem:[%s2993_s0 + $0x134] ss:$36 sps:$4 sm:$0xff]   ;;  %v2374_v60 = vld [vmem:[%s2993_s0 + $0x17c] ss:$36 sps:$4 sm:$0xff]  }
  0x2f   :  { %2105 = vmatprep.subr.bf16.mxu1 %v2296_v61  ;;  %v2376_v61 = vld [vmem:[%s2993_s0 + $0x184] ss:$36 sps:$4 sm:$0xff]  }
  0x31   :  { %2042 = vmatpush3.bf16.msra.mxu0 %v2297_v62  ;;  %v2378_v62 = vld [vmem:[%s2993_s0 + $0x178] ss:$36 sps:$4 sm:$0xff]  }
  0x32   :  { %2106 = vmatpush3.bf16.msra.mxu1 %v2298_v63  ;;  %2043 = vmatprep.subr.bf16.mxu0 %v2305_v3  ;;  %v2379_v63 = vld [vmem:[%s2993_s0 + $0x180] ss:$36 sps:$4 sm:$0xff]   ;;  %v2386_v3 = vld [vmem:[%s2993_s0 + $0x1c8] ss:$36 sps:$4 sm:$0xff]  }
  0x33   :  { %1090 = vmatmul.mubr.bf16.gmra.mrb[8].mxu0 %v2283_v50  ;;  %2107 = vmatprep.subr.bf16.mxu1 %v2306_v5  ;;  %v2362_v50 = vld [vmem:[%s2993_s0 + $0xf4] ss:$36 sps:$4 sm:$0xff]  }
  0x34   :  { %1187 = vmatmul.mubr.bf16.gmra.mrb[8].mxu1 %v2284_v51  ;;  %1097 = vmatprep.mubr.bf16.mxu0 %v2289_v56  ;;  %v2380_v51 = vld [vmem:[%s2992_s1 + $0x228] sm:$0xff]   ;;  %v2369_v56 = vld [vmem:[%s2993_s0 + $0x13c] ss:$36 sps:$4 sm:$0xff]   ;;  %v2390_v5 = vld [vmem:[%s2993_s0 + $0x214] ss:$36 sps:$4 sm:$0xff]  }
  0x35   :  { %1194 = vmatprep.mubr.bf16.mxu1 %v2291_v57  ;;  %2044 = vmatpush3.bf16.msra.mxu0 %v2307_v6  ;;  %v2394_v57 = vld [vmem:[%s2992_s1 + $0x238] sm:$0xff]   ;;  %v2392_v6 = vld [vmem:[%s2993_s0 + $0x208] ss:$36 sps:$4 sm:$0xff]  }
  0x36   :  { %2108 = vmatpush3.bf16.msra.mxu1 %v2308_v7  ;;  %2045 = vmatprep.subr.bf16.mxu0 %v2315_v10  ;;  %v2393_v7 = vld [vmem:[%s2993_s0 + $0x210] ss:$36 sps:$4 sm:$0xff]   ;;  %v2397_v10 = vld [vmem:[%s2993_s0 + $0x68] ss:$36 sps:$4 sm:$0xff]  }
  0x37   :  { %2109 = vmatprep.subr.bf16.mxu1 %v2316_v11  ;;  %v2398_v11 = vld [vmem:[%s2993_s0 + $0x188] ss:$36 sps:$4 sm:$0xff]  }
  0x39   :  { %2046 = vmatpush3.bf16.msra.mxu0 %v2317_v13  ;;  %v2400_v13 = vld [vmem:[%s2993_s0 + $0x1d0] ss:$36 sps:$4 sm:$0xff]  }
  0x3a   :  { %2110 = vmatpush3.bf16.msra.mxu1 %v2318_v14  ;;  %2047 = vmatprep.subr.bf16.mxu0 %v2325_v18  ;;  %v2401_v14 = vld [vmem:[%s2993_s0 + $0xf8] ss:$36 sps:$4 sm:$0xff]  }
  0x3b   :  { %1098 = vmatmul.mubr.bf16.gmra.mrb[12].mxu0 %v2293_v58  ;;  %2111 = vmatprep.subr.bf16.mxu1 %v2326_v19  ;;  %v2371_v58 = vld [vmem:[%s2993_s0 + $0x130] ss:$36 sps:$4 sm:$0xff]  }
  0x3c   :  { %1195 = vmatmul.mubr.bf16.gmra.mrb[12].mxu1 %v2294_v59  ;;  %1105 = vmatprep.mubr.bf16.mxu0 %v2299_v0  ;;  %v2372_v59 = vld [vmem:[%s2993_s0 + $0x138] ss:$36 sps:$4 sm:$0xff]   ;;  %v2381_v0 = vld [vmem:[%s2993_s0 + $0x1c4] ss:$36 sps:$4 sm:$0xff]  }
  0x3d   :  { %1202 = vmatprep.mubr.bf16.mxu1 %v2301_v1  ;;  %2048 = vmatpush3.bf16.msra.mxu0 %v2327_v20  ;;  %v2383_v1 = vld [vmem:[%s2993_s0 + $0x1cc] ss:$36 sps:$4 sm:$0xff]  }
  0x3e   :  { %2112 = vmatpush3.bf16.msra.mxu1 %v2328_v21  ;;  %2049 = vmatprep.subr.bf16.mxu0 %v2335_v26 }
  0x3f   :  { %2113 = vmatprep.subr.bf16.mxu1 %v2336_v27 }
  0x41   :  { %2050 = vmatpush3.bf16.msra.mxu0 %v2337_v28 }
  0x42   :  { %2114 = vmatpush3.bf16.msra.mxu1 %v2338_v29  ;;  %2179 = vmatprep.subr.bf16.mxu0 %v2345_v32 }
  0x43   :  { %1106 = vmatmul.mubr.bf16.gmra.mrb[16].mxu0 %v2303_v2  ;;  %2211 = vmatprep.subr.bf16.mxu1 %v2345_v32  ;;  %v2385_v2 = vld [vmem:[%s2993_s0 + $0x1c0] ss:$36 sps:$4 sm:$0xff]  }
  0x44   :  { %1203 = vmatmul.mubr.bf16.gmra.mrb[16].mxu1 %v2304_v4  ;;  %1113 = vmatprep.mubr.bf16.mxu0 %v2309_v8  ;;  %v2388_v4 = vld [vmem:[%s2993_s0 + $0x20c] ss:$36 sps:$4 sm:$0xff]   ;;  %v2395_v8 = vld [vmem:[%s2993_s0 + $0x20] ss:$36 sps:$4 sm:$0xff]  }
  0x45   :  { %1210 = vmatprep.mubr.bf16.mxu1 %v2311_v9  ;;  %v2396_v9 = vld [vmem:[%s2993_s0 + $0x140] ss:$36 sps:$4 sm:$0xff]  }
  0x4b   :  { %1114 = vmatmul.mubr.bf16.gmra.mrb[20].mxu0 %v2313_v12  ;;  %v2399_v12 = vld [vmem:[%s2993_s0 + $0xb0] ss:$36 sps:$4 sm:$0xff]  }
  0x4c   :  { %1211 = vmatmul.mubr.bf16.gmra.mrb[20].mxu1 %v2314_v15  ;;  %1121 = vmatprep.mubr.bf16.mxu0 %v2319_v16  ;;  %v2402_v15 = vld [vmem:[%s2993_s0 + $0x218] ss:$36 sps:$4 sm:$0xff]  }
  0x4d   :  { %1218 = vmatprep.mubr.bf16.mxu1 %v2321_v17 }
  0x53   :  { %1122 = vmatmul.mubr.bf16.gmra.mrb[24].mxu0 %v2323_v22 }
  0x54   :  { %1219 = vmatmul.mubr.bf16.gmra.mrb[24].mxu1 %v2324_v23  ;;  %1129 = vmatprep.mubr.bf16.mxu0 %v2329_v24 }
  0x55   :  { %1226 = vmatprep.mubr.bf16.mxu1 %v2331_v25 }
  0x5b   :  { %1130 = vmatmul.mubr.bf16.gmra.mrb[28].mxu0 %v2333_v30 }
  0x5c   :  { %1227 = vmatmul.mubr.bf16.gmra.mrb[28].mxu1 %v2334_v31  ;;  %1267 = vmatprep.mubr.bf16.mxu0 %v2341_v33 }
  0x5d   :  { %1364 = vmatprep.mubr.bf16.mxu1 %v2344_v34 }
  0x63   :  { %1268 = vmatmul.mubr.bf16.vlgmr.msra.gmra.mrb[32].mxu0 %v2339_v35 }
  0x64   :  { %1365 = vmatmul.mubr.bf16.vlgmr.msra.gmra.mrb[32].mxu1 %v2342_v36  ;;  %2180 = vmatpush3.bf16.msra.mxu0 %v2345_v32 }
  0x65   :  { %2219 = vmatpush3.bf16.msra.mxu1 %v2345_v32  ;;  %1275 = vmatprep.mubr.bf16.mxu0 %v2346_v37 }
  0x66   :  { %1372 = vmatprep.mubr.bf16.mxu1 %v2348_v38  ;;  %2181 = vmatprep.subr.bf16.mxu0 %v2352_v39 }
  0x67   :  { %2212 = vmatprep.subr.bf16.mxu1 %v2352_v39 }
  0x68   :  { %2182 = vmatpush3.bf16.msra.mxu0 %v2352_v39 }
  0x69   :  { %2220 = vmatpush3.bf16.msra.mxu1 %v2352_v39  ;;  %2183 = vmatprep.subr.bf16.mxu0 %v2359_v40 }
  0x6a   :  { %2213 = vmatprep.subr.bf16.mxu1 %v2359_v40 }
  0x6b   :  { %1276 = vmatmul.mubr.bf16.gmra.mrb[36].mxu0 %v2350_v41 }
  0x6c   :  { %1373 = vmatmul.mubr.bf16.gmra.mrb[36].mxu1 %v2351_v42  ;;  %1283 = vmatprep.mubr.bf16.mxu0 %v2353_v43 }
  0x6d   :  { %1380 = vmatprep.mubr.bf16.mxu1 %v2355_v44  ;;  %2184 = vmatpush3.bf16.msra.mxu0 %v2359_v40 }
  0x6e   :  { %2221 = vmatpush3.bf16.msra.mxu1 %v2359_v40  ;;  %2185 = vmatprep.subr.bf16.mxu0 %v2366_v45 }
  0x6f   :  { %2214 = vmatprep.subr.bf16.mxu1 %v2366_v45 }
  0x71   :  { %2186 = vmatpush3.bf16.msra.mxu0 %v2366_v45 }
  0x72   :  { %2222 = vmatpush3.bf16.msra.mxu1 %v2366_v45  ;;  %2187 = vmatprep.subr.bf16.mxu0 %v2373_v46 }
  0x73   :  { %1284 = vmatmul.mubr.bf16.gmra.mrb[40].mxu0 %v2357_v47  ;;  %2215 = vmatprep.subr.bf16.mxu1 %v2373_v46 }
  0x74   :  { %1381 = vmatmul.mubr.bf16.gmra.mrb[40].mxu1 %v2358_v48  ;;  %1291 = vmatprep.mubr.bf16.mxu0 %v2360_v49 }
  0x75   :  { %1388 = vmatprep.mubr.bf16.mxu1 %v2362_v50  ;;  %2188 = vmatpush3.bf16.msra.mxu0 %v2373_v46 }
  0x76   :  { %2223 = vmatpush3.bf16.msra.mxu1 %v2373_v46  ;;  %2189 = vmatprep.subr.bf16.mxu0 %v2380_v51 }
  0x77   :  { %2216 = vmatprep.subr.bf16.mxu1 %v2380_v51 }
  0x79   :  { %2190 = vmatpush3.bf16.msra.mxu0 %v2380_v51 }
  0x7a   :  { %2224 = vmatpush3.bf16.msra.mxu1 %v2380_v51  ;;  %2191 = vmatprep.subr.bf16.mxu0 %v2387_v53 }
  0x7b   :  { %1292 = vmatmul.mubr.bf16.gmra.mrb[44].mxu0 %v2364_v52  ;;  %2217 = vmatprep.subr.bf16.mxu1 %v2387_v53 }
  0x7c   :  { %1389 = vmatmul.mubr.bf16.gmra.mrb[44].mxu1 %v2365_v54  ;;  %1299 = vmatprep.mubr.bf16.mxu0 %v2367_v55 }
  0x7d   :  { %1396 = vmatprep.mubr.bf16.mxu1 %v2369_v56  ;;  %2192 = vmatpush3.bf16.msra.mxu0 %v2387_v53 }
  0x7e   :  { %2225 = vmatpush3.bf16.msra.mxu1 %v2387_v53  ;;  %2193 = vmatprep.subr.bf16.mxu0 %v2394_v57 }
  0x7f   :  { %2218 = vmatprep.subr.bf16.mxu1 %v2394_v57 }
  0x81   :  { %2194 = vmatpush3.bf16.msra.mxu0 %v2394_v57 }
  0x82   :  { %2226 = vmatpush3.bf16.msra.mxu1 %v2394_v57 }
  0x83   :  { %1300 = vmatmul.mubr.bf16.gmra.mrb[48].mxu0 %v2371_v58 }
  0x84   :  { %1397 = vmatmul.mubr.bf16.gmra.mrb[48].mxu1 %v2372_v59  ;;  %1307 = vmatprep.mubr.bf16.mxu0 %v2374_v60 }
  0x85   :  { %1404 = vmatprep.mubr.bf16.mxu1 %v2376_v61 }
  0x8b   :  { %1308 = vmatmul.mubr.bf16.gmra.mrb[52].mxu0 %v2378_v62 }
  0x8c   :  { %1405 = vmatmul.mubr.bf16.gmra.mrb[52].mxu1 %v2379_v63  ;;  %1315 = vmatprep.mubr.bf16.mxu0 %v2381_v0 }
  0x8d   :  { %1412 = vmatprep.mubr.bf16.mxu1 %v2383_v1 }
  0x93   :  { %1316 = vmatmul.mubr.bf16.gmra.mrb[56].mxu0 %v2385_v2 }
  0x94   :  { %1413 = vmatmul.mubr.bf16.gmra.mrb[56].mxu1 %v2386_v3  ;;  %1323 = vmatprep.mubr.bf16.mxu0 %v2388_v4 }
  0x95   :  { %1420 = vmatprep.mubr.bf16.mxu1 %v2390_v5 }
  0x9b   :  { %1324 = vmatmul.mubr.bf16.gmra.mrb[60].mxu0 %v2392_v6 }
  0x9c   :  { %1421 = vmatmul.mubr.bf16.gmra.mrb[60].mxu1 %v2393_v7  ;;  %2195 = vmatprep.mubr.bf16.mxu0 %v2395_v8 }
  0x9d   :  { %2203 = vmatprep.mubr.bf16.mxu1 %v2396_v9 }
  0xa3   :  { %2196 = vmatmul.mubr.bf16.vlgmr.msra.gmra.mrb[64].mxu0 %v2397_v10 }
  0xa4   :  { %2204 = vmatmul.mubr.bf16.vlgmr.msra.gmra.mrb[64].mxu1 %v2398_v11  ;;  %2199 = vmatprep.mubr.bf16.mxu0 %v2399_v12 }
  0xa5   :  { %2207 = vmatprep.mubr.bf16.mxu1 %v2400_v13 }
  0xab   :  { %2200 = vmatmul.mubr.bf16.gmra.mrb[68].mxu0 %v2401_v14 }
  0xac   :  { %2208 = vmatmul.mubr.bf16.gmra.mrb[68].mxu1 %v2402_v15 }
  0xf6   :  { %v1923_v16 = vpop.f32.mrb[0].mxu0 }
  0xf7   :  { %v1987_v17 = vpop.f32.mrb[0].mxu1  ;;  %v1924_v18 = vpop.f32.mrb[1].mxu0 }
  0xf8   :  { %v1925_v19 = vadd.f32 %v1924_v18, %v1923_v16  ;;  %v1988_v20 = vpop.f32.mrb[1].mxu1  ;;  %v1926_v21 = vpop.f32.mrb[2].mxu0 }
  0xf9   :  { %v1989_v22 = vadd.f32 %v1988_v20, %v1987_v17  ;;  %v1990_v23 = vpop.f32.mrb[2].mxu1  ;;  %v1927_v24 = vpop.f32.mrb[3].mxu0 }
  0xfa   :  { %v1928_v25 = vadd.f32 %v1927_v24, %v1926_v21  ;;  %v1991_v26 = vpop.f32.mrb[3].mxu1 }
  0xfb   :  { %v2860_v27 = vadd.f32 %v1989_v22, %v1925_v19  ;;  %v1992_v28 = vadd.f32 %v1991_v26, %v1990_v23 }
  0xfd   :  { %v2862_v29 = vadd.f32 %v1992_v28, %v1928_v25 }
  0xfe   :  { %v1929_v30 = vpop.f32.mrb[4].mxu0 }
  0xff   :  { %v1993_v31 = vpop.f32.mrb[4].mxu1  ;;  %v1930_v32 = vpop.f32.mrb[5].mxu0 }
 0x100   :  { %v1931_v33 = vadd.f32 %v1930_v32, %v1929_v30  ;;  %v1994_v34 = vpop.f32.mrb[5].mxu1  ;;  %v1932_v35 = vpop.f32.mrb[6].mxu0 }
 0x101   :  { %v1995_v36 = vadd.f32 %v1994_v34, %v1993_v31  ;;  %v1996_v37 = vpop.f32.mrb[6].mxu1  ;;  %v1933_v38 = vpop.f32.mrb[7].mxu0 }
 0x102   :  { %v1934_v39 = vadd.f32 %v1933_v38, %v1932_v35  ;;  %v1997_v40 = vpop.f32.mrb[7].mxu1 }
 0x103   :  { %v2864_v41 = vadd.f32 %v1995_v36, %v1931_v33  ;;  %v1998_v42 = vadd.f32 %v1997_v40, %v1996_v37 }
 0x105   :  { %v2866_v43 = vadd.f32 %v1998_v42, %v1934_v39 }
 0x106   :  { %v1935_v44 = vpop.f32.mrb[8].mxu0 }
 0x107   :  { %v1999_v45 = vpop.f32.mrb[8].mxu1  ;;  %v1936_v46 = vpop.f32.mrb[9].mxu0 }
 0x108   :  { %v1937_v47 = vadd.f32 %v1936_v46, %v1935_v44  ;;  %v2000_v48 = vpop.f32.mrb[9].mxu1  ;;  %v1938_v49 = vpop.f32.mrb[10].mxu0 }
 0x109   :  { %v2001_v50 = vadd.f32 %v2000_v48, %v1999_v45  ;;  %v2002_v51 = vpop.f32.mrb[10].mxu1  ;;  %v1939_v52 = vpop.f32.mrb[11].mxu0 }
 0x10a   :  { %v1940_v53 = vadd.f32 %v1939_v52, %v1938_v49  ;;  %v2003_v54 = vpop.f32.mrb[11].mxu1 }
 0x10b   :  { %v2868_v55 = vadd.f32 %v2001_v50, %v1937_v47  ;;  %v2004_v56 = vadd.f32 %v2003_v54, %v2002_v51 }
 0x10d   :  { %v2870_v57 = vadd.f32 %v2004_v56, %v1940_v53 }
 0x10e   :  { %v1941_v58 = vpop.f32.mrb[12].mxu0 }
 0x10f   :  { %v2005_v59 = vpop.f32.mrb[12].mxu1  ;;  %v1942_v60 = vpop.f32.mrb[13].mxu0 }
 0x110   :  { %v1943_v61 = vadd.f32 %v1942_v60, %v1941_v58  ;;  %v2006_v62 = vpop.f32.mrb[13].mxu1  ;;  %v1944_v63 = vpop.f32.mrb[14].mxu0 }
 0x111   :  { %v2007_v0 = vadd.f32 %v2006_v62, %v2005_v59  ;;  %v2008_v1 = vpop.f32.mrb[14].mxu1  ;;  %v1945_v2 = vpop.f32.mrb[15].mxu0 }
 0x112   :  { %v1946_v3 = vadd.f32 %v1945_v2, %v1944_v63  ;;  %v2009_v4 = vpop.f32.mrb[15].mxu1 }
 0x113   :  { %v2872_v5 = vadd.f32 %v2007_v0, %v1943_v61  ;;  %v2010_v6 = vadd.f32 %v2009_v4, %v2008_v1 }
 0x115   :  { %v2874_v7 = vadd.f32 %v2010_v6, %v1946_v3 }
 0x116   :  { %v1947_v8 = vpop.f32.mrb[16].mxu0 }
 0x117   :  { %v2011_v9 = vpop.f32.mrb[16].mxu1  ;;  %v1948_v10 = vpop.f32.mrb[17].mxu0 }
 0x118   :  { %v1949_v11 = vadd.f32 %v1948_v10, %v1947_v8  ;;  %v2012_v12 = vpop.f32.mrb[17].mxu1  ;;  %v1950_v13 = vpop.f32.mrb[18].mxu0 }
 0x119   :  { %v2013_v14 = vadd.f32 %v2012_v12, %v2011_v9  ;;  %v2014_v15 = vpop.f32.mrb[18].mxu1  ;;  %v1951_v16 = vpop.f32.mrb[19].mxu0 }
 0x11a   :  { %v1952_v17 = vadd.f32 %v1951_v16, %v1950_v13  ;;  %v2015_v18 = vpop.f32.mrb[19].mxu1 }
 0x11b   :  { %v2876_v19 = vadd.f32 %v2013_v14, %v1949_v11  ;;  %v2016_v20 = vadd.f32 %v2015_v18, %v2014_v15 }
 0x11d   :  { %v2878_v21 = vadd.f32 %v2016_v20, %v1952_v17 }
 0x11e   :  { %v1953_v22 = vpop.f32.mrb[20].mxu0 }
 0x11f   :  { %v2017_v23 = vpop.f32.mrb[20].mxu1  ;;  %v1954_v24 = vpop.f32.mrb[21].mxu0 }
 0x120   :  { %v1955_v25 = vadd.f32 %v1954_v24, %v1953_v22  ;;  %v2018_v26 = vpop.f32.mrb[21].mxu1  ;;  %v1956_v28 = vpop.f32.mrb[22].mxu0 }
 0x121   :  { %v2019_v30 = vadd.f32 %v2018_v26, %v2017_v23  ;;  %v2020_v31 = vpop.f32.mrb[22].mxu1  ;;  %v1957_v32 = vpop.f32.mrb[23].mxu0 }
 0x122   :  { %v1958_v33 = vadd.f32 %v1957_v32, %v1956_v28  ;;  %v2021_v34 = vpop.f32.mrb[23].mxu1 }
 0x123   :  { %v2880_v35 = vadd.f32 %v2019_v30, %v1955_v25  ;;  %v2022_v36 = vadd.f32 %v2021_v34, %v2020_v31 }
 0x125   :  { %v2882_v37 = vadd.f32 %v2022_v36, %v1958_v33 }
 0x126   :  { %v1959_v38 = vpop.f32.mrb[24].mxu0 }
 0x127   :  { %v2023_v39 = vpop.f32.mrb[24].mxu1  ;;  %v1960_v40 = vpop.f32.mrb[25].mxu0 }
 0x128   :  { %v1961_v42 = vadd.f32 %v1960_v40, %v1959_v38  ;;  %v2024_v44 = vpop.f32.mrb[25].mxu1  ;;  %v1962_v45 = vpop.f32.mrb[26].mxu0 }
 0x129   :  { %v2025_v46 = vadd.f32 %v2024_v44, %v2023_v39  ;;  %v2026_v47 = vpop.f32.mrb[26].mxu1  ;;  %v1963_v48 = vpop.f32.mrb[27].mxu0 }
 0x12a   :  { %v1964_v49 = vadd.f32 %v1963_v48, %v1962_v45  ;;  %v2027_v50 = vpop.f32.mrb[27].mxu1 }
 0x12b   :  { %v2884_v51 = vadd.f32 %v2025_v46, %v1961_v42  ;;  %v2028_v52 = vadd.f32 %v2027_v50, %v2026_v47 }
 0x12d   :  { %v2886_v53 = vadd.f32 %v2028_v52, %v1964_v49 }
 0x12e   :  { %v1965_v54 = vpop.f32.mrb[28].mxu0 }
 0x12f   :  { %v2029_v56 = vpop.f32.mrb[28].mxu1  ;;  %v1966_v58 = vpop.f32.mrb[29].mxu0 }
 0x130   :  { %v1967_v59 = vadd.f32 %v1966_v58, %v1965_v54  ;;  %v2030_v60 = vpop.f32.mrb[29].mxu1  ;;  %v1968_v61 = vpop.f32.mrb[30].mxu0 }
 0x131   :  { %v2031_v62 = vadd.f32 %v2030_v60, %v2029_v56  ;;  %v2032_v63 = vpop.f32.mrb[30].mxu1  ;;  %v1969_v0 = vpop.f32.mrb[31].mxu0 }
 0x132   :  { %v1970_v1 = vadd.f32 %v1969_v0, %v1968_v61  ;;  %v2033_v2 = vpop.f32.mrb[31].mxu1 }
 0x133   :  { %v2888_v3 = vadd.f32 %v2031_v62, %v1967_v59  ;;  %v2034_v4 = vadd.f32 %v2033_v2, %v2032_v63 }
 0x135   :  { %v2890_v6 = vadd.f32 %v2034_v4, %v1970_v1 }
 0x136   :  { %v2051_v8 = vpop.f32.mrb[32].mxu0 }
 0x137   :  { %v2115_v9 = vpop.f32.mrb[32].mxu1  ;;  %v2052_v10 = vpop.f32.mrb[33].mxu0 }
 0x138   :  { %v2053_v11 = vadd.f32 %v2052_v10, %v2051_v8  ;;  %v2116_v12 = vpop.f32.mrb[33].mxu1  ;;  %v2054_v13 = vpop.f32.mrb[34].mxu0 }
 0x139   :  { %v2117_v14 = vadd.f32 %v2116_v12, %v2115_v9  ;;  %v2118_v15 = vpop.f32.mrb[34].mxu1  ;;  %v2055_v16 = vpop.f32.mrb[35].mxu0 }
 0x13a   :  { %v1270_v17 = vadd.f32 %v2053_v11, %v2860_v27  ;;  %v2056_v18 = vadd.f32 %v2055_v16, %v2054_v13  ;;  %v2119_v20 = vpop.f32.mrb[35].mxu1 }
 0x13b   :  { %v2120_v22 = vadd.f32 %v2119_v20, %v2118_v15 }
 0x13c   :  { %v1273_v23 = vadd.f32 %v2056_v18, %v2862_v29  ;;  %v2894_v24 = vadd.f32 %v2117_v14, %v1270_v17 }
 0x13e   :  { %v2057_v25 = vpop.f32.mrb[36].mxu0  ;;  %v2896_v26 = vadd.f32 %v2120_v22, %v1273_v23 }
 0x13f   :  { %v2121_v28 = vpop.f32.mrb[36].mxu1  ;;  %v2058_v30 = vpop.f32.mrb[37].mxu0 }
 0x140   :  { %v2059_v31 = vadd.f32 %v2058_v30, %v2057_v25  ;;  %v2122_v32 = vpop.f32.mrb[37].mxu1  ;;  %v2060_v33 = vpop.f32.mrb[38].mxu0 }
 0x141   :  { %v2123_v34 = vadd.f32 %v2122_v32, %v2121_v28  ;;  %v2124_v36 = vpop.f32.mrb[38].mxu1  ;;  %v2061_v38 = vpop.f32.mrb[39].mxu0 }
 0x142   :  { %v1278_v27 = vadd.f32 %v2059_v31, %v2864_v41  ;;  %v2062_v39 = vadd.f32 %v2061_v38, %v2060_v33  ;;  %v2125_v40 = vpop.f32.mrb[39].mxu1 }
 0x143   :  { %v2126_v42 = vadd.f32 %v2125_v40, %v2124_v36 }
 0x144   :  { %v1281_v29 = vadd.f32 %v2062_v39, %v2866_v43  ;;  %v2900_v44 = vadd.f32 %v2123_v34, %v1278_v27 }
 0x146   :  { %v2063_v45 = vpop.f32.mrb[40].mxu0  ;;  %v2902_v46 = vadd.f32 %v2126_v42, %v1281_v29 }
 0x147   :  { %v2127_v47 = vpop.f32.mrb[40].mxu1  ;;  %v2064_v48 = vpop.f32.mrb[41].mxu0 }
 0x148   :  { %v2065_v49 = vadd.f32 %v2064_v48, %v2063_v45  ;;  %v2128_v50 = vpop.f32.mrb[41].mxu1  ;;  %v2066_v52 = vpop.f32.mrb[42].mxu0 }
 0x149   :  { %v2129_v54 = vadd.f32 %v2128_v50, %v2127_v47  ;;  %v2130_v56 = vpop.f32.mrb[42].mxu1  ;;  %v2067_v58 = vpop.f32.mrb[43].mxu0 }
 0x14a   :  { %v1286_v41 = vadd.f32 %v2065_v49, %v2868_v55  ;;  %v2068_v59 = vadd.f32 %v2067_v58, %v2066_v52  ;;  %v2131_v60 = vpop.f32.mrb[43].mxu1 }
 0x14b   :  { %v2132_v61 = vadd.f32 %v2131_v60, %v2130_v56 }
 0x14c   :  { %v1289_v43 = vadd.f32 %v2068_v59, %v2870_v57  ;;  %v2906_v62 = vadd.f32 %v2129_v54, %v1286_v41 }
 0x14e   :  { %v2069_v63 = vpop.f32.mrb[44].mxu0  ;;  %v2908_v0 = vadd.f32 %v2132_v61, %v1289_v43 }
 0x14f   :  { %v2133_v1 = vpop.f32.mrb[44].mxu1  ;;  %v2070_v2 = vpop.f32.mrb[45].mxu0 }
 0x150   :  { %v2071_v4 = vadd.f32 %v2070_v2, %v2069_v63  ;;  %v2134_v8 = vpop.f32.mrb[45].mxu1  ;;  %v2072_v9 = vpop.f32.mrb[46].mxu0 }
 0x151   :  { %v2135_v10 = vadd.f32 %v2134_v8, %v2133_v1  ;;  %v2136_v11 = vpop.f32.mrb[46].mxu1  ;;  %v2073_v12 = vpop.f32.mrb[47].mxu0 }
 0x152   :  { %v1294_v55 = vadd.f32 %v2071_v4, %v2872_v5  ;;  %v2074_v13 = vadd.f32 %v2073_v12, %v2072_v9  ;;  %v2137_v14 = vpop.f32.mrb[47].mxu1 }
 0x153   :  { %v2138_v15 = vadd.f32 %v2137_v14, %v2136_v11 }
 0x154   :  { %v1297_v57 = vadd.f32 %v2074_v13, %v2874_v7  ;;  %v2912_v16 = vadd.f32 %v2135_v10, %v1294_v55 }
 0x156   :  { %v2075_v17 = vpop.f32.mrb[48].mxu0  ;;  %v2914_v18 = vadd.f32 %v2138_v15, %v1297_v57 }
 0x157   :  { %v2139_v20 = vpop.f32.mrb[48].mxu1  ;;  %v2076_v22 = vpop.f32.mrb[49].mxu0 }
 0x158   :  { %v2077_v23 = vadd.f32 %v2076_v22, %v2075_v17  ;;  %v2140_v25 = vpop.f32.mrb[49].mxu1  ;;  %v2078_v28 = vpop.f32.mrb[50].mxu0 }
 0x159   :  { %v2141_v30 = vadd.f32 %v2140_v25, %v2139_v20  ;;  %v2142_v31 = vpop.f32.mrb[50].mxu1  ;;  %v2079_v32 = vpop.f32.mrb[51].mxu0 }
 0x15a   :  { %v1302_v5 = vadd.f32 %v2077_v23, %v2876_v19  ;;  %v2080_v33 = vadd.f32 %v2079_v32, %v2078_v28  ;;  %v2143_v34 = vpop.f32.mrb[51].mxu1 }
 0x15b   :  { %v2144_v36 = vadd.f32 %v2143_v34, %v2142_v31 }
 0x15c   :  { %v1305_v7 = vadd.f32 %v2080_v33, %v2878_v21  ;;  %v1399_v38 = vadd.f32 %v2141_v30, %v1302_v5  ;;  %v2933_v33 = vld [vmem:[%s2994_s2] ss:$0 sm:$0xff] }
 0x15e   :  { %v2081_v27 = vpop.f32.mrb[52].mxu0  ;;  %v2918_v39 = vadd.f32 %v2144_v36, %v1305_v7 }
 0x15f   :  { %v2145_v40 = vpop.f32.mrb[52].mxu1  ;;  %v2082_v42 = vpop.f32.mrb[53].mxu0 }
 0x160   :  { %v2083_v29 = vadd.f32 %v2082_v42, %v2081_v27  ;;  %v2146_v45 = vpop.f32.mrb[53].mxu1  ;;  %v2084_v47 = vpop.f32.mrb[54].mxu0 }
 0x161   :  { %v2147_v48 = vadd.f32 %v2146_v45, %v2145_v40  ;;  %v2148_v49 = vpop.f32.mrb[54].mxu1  ;;  %v2085_v50 = vpop.f32.mrb[55].mxu0 }
 0x162   :  { %v1310_v52 = vadd.f32 %v2083_v29, %v2880_v35  ;;  %v2086_v19 = vadd.f32 %v2085_v50, %v2084_v47  ;;  %v2149_v54 = vpop.f32.mrb[55].mxu1 }
 0x163   :  { %v2150_v56 = vadd.f32 %v2149_v54, %v2148_v49 }
 0x164   :  { %v1313_v58 = vadd.f32 %v2086_v19, %v2882_v37  ;;  %v1407_v21 = vadd.f32 %v2147_v48, %v1310_v52 }
 0x166   :  { %v2087_v41 = vpop.f32.mrb[56].mxu0  ;;  %v1410_v59 = vadd.f32 %v2150_v56, %v1313_v58 }
 0x167   :  { %v2151_v60 = vpop.f32.mrb[56].mxu1  ;;  %v2088_v61 = vpop.f32.mrb[57].mxu0 }
 0x168   :  { %v2089_v43 = vadd.f32 %v2088_v61, %v2087_v41  ;;  %v2152_v63 = vpop.f32.mrb[57].mxu1  ;;  %v2090_v1 = vpop.f32.mrb[58].mxu0 }
 0x169   :  { %v2153_v2 = vadd.f32 %v2152_v63, %v2151_v60  ;;  %v2154_v4 = vpop.f32.mrb[58].mxu1  ;;  %v2091_v8 = vpop.f32.mrb[59].mxu0 }
 0x16a   :  { %v1318_v9 = vadd.f32 %v2089_v43, %v2884_v51  ;;  %v2092_v10 = vadd.f32 %v2091_v8, %v2090_v1  ;;  %v2155_v35 = vpop.f32.mrb[59].mxu1 }
 0x16b   :  { %v2156_v11 = vadd.f32 %v2155_v35, %v2154_v4 }
 0x16c   :  { %v1321_v12 = vadd.f32 %v2092_v10, %v2886_v53  ;;  %v2924_v55 = vadd.f32 %v2153_v2, %v1318_v9 }
 0x16e   :  { %v2093_v37 = vpop.f32.mrb[60].mxu0  ;;  %v2926_v13 = vadd.f32 %v2156_v11, %v1321_v12 }
 0x16f   :  { %v2157_v14 = vpop.f32.mrb[60].mxu1  ;;  %v2094_v15 = vpop.f32.mrb[61].mxu0 }
 0x170   :  { %v2095_v57 = vadd.f32 %v2094_v15, %v2093_v37  ;;  %v2158_v17 = vpop.f32.mrb[61].mxu1  ;;  %v2096_v20 = vpop.f32.mrb[62].mxu0 }
 0x171   :  { %v2159_v22 = vadd.f32 %v2158_v17, %v2157_v14  ;;  %v2160_v23 = vpop.f32.mrb[62].mxu1  ;;  %v2097_v25 = vpop.f32.mrb[63].mxu0 }
 0x172   :  { %v1326_v51 = vadd.f32 %v2095_v57, %v2888_v3  ;;  %v2098_v28 = vadd.f32 %v2097_v25, %v2096_v20  ;;  %v2161_v30 = vpop.f32.mrb[63].mxu1 }
 0x173   :  { %v2162_v31 = vadd.f32 %v2161_v30, %v2160_v23 }
 0x174   :  { %v1329_v53 = vadd.f32 %v2098_v28, %v2890_v6  ;;  %v1423_v32 = vadd.f32 %v2159_v22, %v1326_v51 }
 0x176   :  { %v2197_v5 = vpop.f32.mrb[64].mxu0  ;;  %v2935_v34 = vadd.f32 %v2162_v31, %v1329_v53 }
 0x177   :  { %v1472_v36 = vadd.f32 %v2197_v5, %v2900_v44  ;;  %v2205_v7 = vpop.f32.mrb[64].mxu1  ;;  %v1463_v27 = vpop.f32.mrb[65].mxu0 }
 0x178   :  { %v1504_v40 = vadd.f32 %v2205_v7, %v1407_v21  ;;  %v1464_v3 = vadd.f32 %v1463_v27, %v2894_v24  ;;  %v1495_v42 = vpop.f32.mrb[65].mxu1  ;;  %v2198_v29 = vpop.f32.mrb[66].mxu0 }
 0x179   :  { %v1535_v6 = vadd.f32 %v2933_v33, %v1472_v36  ;;  %v1496_v45 = vadd.f32 %v1495_v42, %v1399_v38  ;;  %v1475_v47 = vadd.f32 %v2198_v29, %v2902_v46  ;;  %v2206_v48 = vpop.f32.mrb[66].mxu1  ;;  %v1466_v49 = vpop.f32.mrb[67].mxu0 }
 0x17a   :  { %v1543_v50 = vadd.f32 %v2933_v33, %v1504_v40  ;;  %v1647_v52 = vsub.f32 %v1472_v36, %v1504_v40  ;;  %v1533_v19 = vadd.f32 %v2933_v33, %v1464_v3  ;;  %v1507_v44 = vadd.f32 %v2206_v48, %v1410_v59  ;;  %v1498_v54 = vpop.f32.mrb[67].mxu1 }
 0x17b   :  { %v1541_v56 = vadd.f32 %v2933_v33, %v1496_v45  ;;  %v1645_v58 = vsub.f32 %v1464_v3, %v1496_v45  ;;  %v1536_v24 = vadd.f32 %v2933_v33, %v1475_v47  ;;  %v1551_v41 = vmax.f32 %v1535_v6, 0.0 }
 0x17c   :  { %v1544_v21 = vadd.f32 %v2933_v33, %v1507_v44  ;;  %v1559_v38 = vmax.f32 %v1543_v50, 0.0  ;;  %v1648_v46 = vsub.f32 %v1475_v47, %v1507_v44  ;;  %v1549_v61 = vmax.f32 %v1533_v19, 0.0 }
 0x17d   :  { %v1552_v60 = vmax.f32 %v1536_v24, 0.0  ;;  %v1467_v63 = vadd.f32 %v1466_v49, %v2896_v26  ;;  %v1499_v1 = vadd.f32 %v1498_v54, %v2918_v39  ;;  %v1557_v59 = vmax.f32 %v1541_v56, 0.0 }
 0x17e   :  { %v1560_v43 = vmax.f32 %v1544_v21, 0.0  ;;  %v2201_v2 = vpop.f32.mrb[68].mxu0  ;;  %v1653_v4 = vmul.f32 %v1645_v58, %v1645_v58  ;;  %v1655_v53 = vmul.f32 %v1647_v52, %v1647_v52 }
 0x17f   :  { %v1868_v8 = vpack.c.bf16 %v1552_v60, %v1551_v41  ;;  %v1488_v9 = vadd.f32 %v2201_v2, %v2912_v16  ;;  %v2209_v10 = vpop.f32.mrb[68].mxu1  ;;  %v1479_v35 = vpop.f32.mrb[69].mxu0  ;;  %v1534_v12 = vadd.f32 %v2933_v33, %v1467_v63  ;;  %v1542_v37 = vadd.f32 %v2933_v33, %v1499_v1 }
 0x180   :  { %v1888_v11 = vpack.c.bf16 %v1560_v43, %v1559_v38  ;;  %v1646_v14 = vsub.f32 %v1467_v63, %v1499_v1  ;;  %v1511_v15 = vpop.f32.mrb[69].mxu1  ;;  %v2202_v57 = vpop.f32.mrb[70].mxu0  ;;  %v1520_v39 = vadd.f32 %v2209_v10, %v1423_v32  ;;  %v1480_v17 = vadd.f32 %v1479_v35, %v2906_v62 }
 0x181   :  { %1900 = vst [vmem:[%s2995_s3 + $0x8] sm:$0xff] %v1868_v8   ;;  %v1539_v26 = vadd.f32 %v2933_v33, %v1488_v9  ;;  %v1512_v16 = vadd.f32 %v1511_v15, %v2924_v55  ;;  %v2210_v20 = vpop.f32.mrb[70].mxu1  ;;  %v1482_v22 = vpop.f32.mrb[71].mxu0  ;;  %v1550_v23 = vmax.f32 %v1534_v12, 0.0  ;;  %v1558_v25 = vmax.f32 %v1542_v37, 0.0 }
 0x182   :  { %1904 = vst [vmem:[%s2995_s3 + $0x28] sm:$0xff] %v1888_v11   ;;  %v1654_v51 = vmul.f32 %v1646_v14, %v1646_v14  ;;  %v1491_v28 = vadd.f32 %v2202_v57, %v2914_v18  ;;  %v1514_v30 = vpop.f32.mrb[71].mxu1  ;;  %v1651_v31 = vsub.f32 %v1488_v9, %v1520_v39  ;;  %v1656_v62 = vmul.f32 %v1648_v46, %v1648_v46 }
 0x183   :  { %v1863_v5 = vpack.c.bf16 %v1550_v23, %v1549_v61  ;;  %v1883_v32 = vpack.c.bf16 %v1558_v25, %v1557_v59  ;;  %v1555_v7 = vmax.f32 %v1539_v26, 0.0  ;;  %v1547_v55 = vadd.f32 %v2933_v33, %v1520_v39 }
 0x184   :  { %v1661_v36 = vadd.f32 %v1654_v51, %v1653_v4  ;;  %v1649_v27 = vsub.f32 %v1480_v17, %v1512_v16  ;;  %v1537_v40 = vadd.f32 %v2933_v33, %v1480_v17  ;;  %v1540_v3 = vadd.f32 %v2933_v33, %v1491_v28 }
 0x185   :  { %1864 = vst [vmem:[%s2995_s3] sm:$0xff] %v1863_v5   ;;  %1903 = vst [vmem:[%s2995_s3 + $0x20] sm:$0xff] %v1883_v32   ;;  %v1523_v42 = vadd.f32 %v2210_v20, %v2935_v34  ;;  %v1545_v29 = vadd.f32 %v2933_v33, %v1512_v16  ;;  %v1483_v45 = vadd.f32 %v1482_v22, %v2908_v0  ;;  %v1563_v19 = vmax.f32 %v1547_v55, 0.0 }
 0x186   :  { %v1662_v18 = vadd.f32 %v1661_v36, %v1655_v53  ;;  %v1657_v6 = vmul.f32 %v1649_v27, %v1649_v27  ;;  %v1515_v47 = vadd.f32 %v1514_v30, %v2926_v13  ;;  %v1556_v49 = vmax.f32 %v1540_v3, 0.0 }
 0x187   :  { %v1548_v50 = vadd.f32 %v2933_v33, %v1523_v42  ;;  %v1652_v52 = vsub.f32 %v1491_v28, %v1523_v42  ;;  %v1538_v44 = vadd.f32 %v2933_v33, %v1483_v45  ;;  %v1553_v58 = vmax.f32 %v1537_v40, 0.0 }
 0x188   :  { %v1663_v48 = vadd.f32 %v1662_v18, %v1656_v62  ;;  %v1546_v54 = vadd.f32 %v2933_v33, %v1515_v47  ;;  %v1650_v56 = vsub.f32 %v1483_v45, %v1515_v47  ;;  %v1878_v24 = vpack.c.bf16 %v1556_v49, %v1555_v7 }
 0x189   :  { %v1564_v21 = vmax.f32 %v1548_v50, 0.0  ;;  %v1561_v41 = vmax.f32 %v1545_v29, 0.0  ;;  %v1554_v38 = vmax.f32 %v1538_v44, 0.0  ;;  %v1659_v46 = vmul.f32 %v1651_v31, %v1651_v31 }
 0x18a   :  { %v1664_v34 = vadd.f32 %v1663_v48, %v1657_v6  ;;  %v1562_v0 = vmax.f32 %v1546_v54, 0.0  ;;  %v1658_v60 = vmul.f32 %v1650_v56, %v1650_v56  ;;  %1902 = vst [vmem:[%s2995_s3 + $0x18] sm:$0xff] %v1878_v24   ;;  %v1660_v33 = vmul.f32 %v1652_v52, %v1652_v52 }
 0x18b   :  { %v1898_v13 = vpack.c.bf16 %v1564_v21, %v1563_v19  ;;  %v1873_v61 = vpack.c.bf16 %v1554_v38, %v1553_v58 }
 0x18c   :  { %v1893_v43 = vpack.c.bf16 %v1562_v0, %v1561_v41  ;;  %v1665_v63 = vadd.f32 %v1664_v34, %v1658_v60 }
 0x18d   :  { %1906 = vst [vmem:[%s2995_s3 + $0x38] sm:$0xff] %v1898_v13   ;;  %1901 = vst [vmem:[%s2995_s3 + $0x10] sm:$0xff] %v1873_v61  }
 0x18e   :  { %1905 = vst [vmem:[%s2995_s3 + $0x30] sm:$0xff] %v1893_v43   ;;  %v1666_v1 = vadd.f32 %v1665_v63, %v1659_v46 }
 0x190   :  { %v1667_v2 = vadd.f32 %v1666_v1, %v1660_v33 }
 0x192   :  { %v1668_v59 = vrot.slane %v1667_v2, 4 }
 0x194   :  { %v1669_v4 = vadd.f32 %v1668_v59, %v1667_v2 }
 0x196   :  { %v1670_v8 = vrot.slane %v1669_v4, 2 }
 0x198   :  { %v1671_v9 = vadd.f32 %v1670_v8, %v1669_v4 }
 0x19a   :  { %v1672_v10 = vrot.slane %v1671_v9, 1 }
 0x19c   :  { %v1673_v35 = vadd.f32 %v1672_v10, %v1671_v9 }
 0x19e   :  { %1674 = vst [vmem:[%s2996_s4] sm:$0x1] %v1673_v35 }

// kernel: vgg19_feature_loss.21
= control target key start
LH: loop header
LB: loop body
LE: loop exit
PB: predicated region body
PF: predicated region fallthrough
CT: control target
= control target key end

     0   :  { %s2967_s15 = smov 0   ;;  %s2969_s16 = smov 0   ;;  %s3283_s0 = inlined_call_operand.vmem [shape: bf16[32,2304], index: 0, kind: input, shape index: {}]   ;;  %s3284_s1 = inlined_call_operand.vmem [shape: bf16[2,2304,128], index: 1, kind: input, shape index: {}]   ;;  %s3285_s2 = inlined_call_operand.vmem [shape: f32[1,256], index: 2, kind: input, shape index: {}]   ;;  %s3286_s3 = inlined_call_operand.vmem [shape: bf16[32,256], index: 3, kind: output, shape index: {0}]   ;;  %s3287_s4 = inlined_call_operand.vmem [shape: f32[1,256], index: 4, kind: output, shape index: {1}]  }
   0x1   :  { %s2971_s17 = smov 0  }
   0x2 LB: > { %s2980_s18 = sadd.s32 4294967295, %s2940_s17   ;;  %s2982_s19 = sadd.s32 1, %s2940_s17   ;;  %s2940_s17 = sphi %s2971_s17, %s3291_s17   ;;  %s2936_s16 = sphi %s2969_s16, %s3290_s16   ;;  %s2932_s15 = sphi %s2967_s15, %s3289_s15  }
   0x3   : > { %s92_s20 = ssub.s32 %s2940_s17, %s2982_s19  ;;  %s95_s21 = sadd.s32 1, %s2936_s16 }
   0x4   : > { %p93_p0 = scmp.eq.s32.totalorder %s92_s20, 0  ;;  %p105_p1 = scmp.ne.s32.totalorder %s2936_s16, %s2932_s15 }
   0x5   : > { %p106_p2 = scmp.eq.s32.totalorder %s2980_s18, 1  ;;  %p2220_p3 = scmp.ge.s32.totalorder %s2940_s17, 1 }
   0x6   : > { %s2990_s22 = scalar_select %p93_p0, %s2936_s16, %s95_s21  }
   0x7   : > { %p2992_p4 = por %p106_p2, %p105_p1  ;;  %p173_p5 = scmp.lt.s32.totalorder %s2940_s17, 3 }
   0x9   : > { %p174_p6 = pnand %p2220_p3, %p173_p5 }
   0xa   : > { %p204_p7 = scmp.lt.s32.totalorder (!%p174_p6), %s2980_s18, 1  ;;  %v2754_v0 = vld [vmem:[%s3283_s0 + $0x4] ss:$72 sps:$4 sm:$0xff] (!%p174_p6)   ;;  %v2752_v32 = vld [vmem:[%s3283_s0] ss:$72 sps:$4 sm:$0xff] (!%p174_p6)   ;;  %s196_s30 = sand.u32 (!%p174_p6), 1, %s2932_s15  }
   0xb   : > { %177 = sbr.rel (%p174_p6) target bundleno = 424 (0x1a8), region = 32  ;;  %v2757_v1 = vld [vmem:[%s3283_s0 + $0xc] ss:$72 sps:$4 sm:$0xff] (!%p174_p6)   ;;  %1616 = vmatprep.mubr.bf16.mxu0 (!%p174_p6), %v2754_v0  ;;  %v2755_v34 = vld [vmem:[%s3283_s0 + $0x8] ss:$72 sps:$4 sm:$0xff] (!%p174_p6)   ;;  %s2221_s5 = sshll.u32 (!%p174_p6), %s196_s30, 4 }
   0xc   : > { %1665 = vmatprep.mubr.bf16.mxu1 (!%p174_p6), %v2757_v1  ;;  %v2780_v36 = vld [vmem:[%s3283_s0 + $0x94] ss:$72 sps:$4 sm:$0xff] (!%p174_p6)   ;;  %v2786_v44 = vld [vmem:[%s3283_s0 + $0x90] ss:$72 sps:$4 sm:$0xff] (!%p174_p6)   ;;  %s198_s15 = scalar_lea.vmem (!%p174_p6), [#allocation2], %s2221_s5 }
   0xd   : > { %v2782_v38 = vld [vmem:[%s3283_s0 + $0x9c] ss:$72 sps:$4 sm:$0xff] (!%p174_p6)   ;;  %v2787_v46 = vld [vmem:[%s3283_s0 + $0x98] ss:$72 sps:$4 sm:$0xff] (!%p174_p6)  }
   0xe   : > { %v2798_v48 = vld [vmem:[%s3283_s0 + $0x14] ss:$72 sps:$4 sm:$0xff] (!%p174_p6)  }
  0x12   : > { %s3001_s26 = scalar_select %p204_p7, %s2980_s18, 1 }
  0x13   : > { %s2409_s10 = sshll.u32 (%p2992_p4), %s2980_s18, 2 }
  0x14   : > { %s2695_s29 = smul.u32 1152, %s3001_s26  ;;  %s214_s9 = scalar_lea.vmem %s3287_s4, %s3001_s26 }
  0x15   : > { %s2083_s13 = scalar_lea.vmem (%p2992_p4), %s3286_s3, %s2409_s10 }
  0x16   : > { %s3010_s6 = scalar_lea.vmem %s3284_s1, %s2695_s29  ;;  %s211_s29 = scalar_lea.vmem %s3285_s2, %s3001_s26 }
  0x17   : > { %v2720_v2 = vld [vmem:[%s3010_s6 + $0x40] sm:$0xff]   ;;  %v2724_v6 = vld [vmem:[%s3010_s6 + $0x48] sm:$0xff]   ;;  %v2728_v10 = vld [vmem:[%s3010_s6 + $0x50] sm:$0xff]  }
  0x18   : > { %v2721_v3 = vld [vmem:[%s3010_s6 + $0xc0] sm:$0xff]   ;;  %2427 = vmatprep.subr.bf16.mxu0 %v2720_v2  ;;  %v2725_v7 = vld [vmem:[%s3010_s6 + $0xc8] sm:$0xff]   ;;  %v2729_v11 = vld [vmem:[%s3010_s6 + $0xd0] sm:$0xff]  }
  0x19   : > { %v2722_v4 = vld [vmem:[%s3010_s6] sm:$0xff]   ;;  %2455 = vmatprep.subr.bf16.mxu1 %v2721_v3  ;;  %v2726_v8 = vld [vmem:[%s3010_s6 + $0x8] sm:$0xff]   ;;  %v2730_v12 = vld [vmem:[%s3010_s6 + $0x10] sm:$0xff]  }
  0x1a   : > { %v2723_v5 = vld [vmem:[%s3010_s6 + $0x80] sm:$0xff]   ;;  %2428 = vmatpush3.bf16.msra.mxu0 %v2722_v4  ;;  %v2727_v9 = vld [vmem:[%s3010_s6 + $0x88] sm:$0xff]   ;;  %v2731_v13 = vld [vmem:[%s3010_s6 + $0x90] sm:$0xff]  }
  0x1b   : > { %2456 = vmatpush3.bf16.msra.mxu1 %v2723_v5  ;;  %2429 = vmatprep.subr.bf16.mxu0 %v2724_v6  ;;  %v2732_v14 = vld [vmem:[%s3010_s6 + $0x58] sm:$0xff]   ;;  %v2736_v18 = vld [vmem:[%s3010_s6 + $0x60] sm:$0xff]   ;;  %v2740_v22 = vld [vmem:[%s3010_s6 + $0x68] sm:$0xff]  }
  0x1c   : > { %2457 = vmatprep.subr.bf16.mxu1 %v2725_v7  ;;  %v2733_v15 = vld [vmem:[%s3010_s6 + $0xd8] sm:$0xff]   ;;  %v2737_v19 = vld [vmem:[%s3010_s6 + $0xe0] sm:$0xff]   ;;  %v2741_v23 = vld [vmem:[%s3010_s6 + $0xe8] sm:$0xff]  }
  0x1d   : > { %v2734_v16 = vld [vmem:[%s3010_s6 + $0x18] sm:$0xff]   ;;  %v2738_v20 = vld [vmem:[%s3010_s6 + $0x20] sm:$0xff]   ;;  %v2742_v24 = vld [vmem:[%s3010_s6 + $0x28] sm:$0xff]  }
  0x1e   : > { %2430 = vmatpush3.bf16.msra.mxu0 %v2726_v8  ;;  %v2735_v17 = vld [vmem:[%s3010_s6 + $0x98] sm:$0xff]   ;;  %v2739_v21 = vld [vmem:[%s3010_s6 + $0xa0] sm:$0xff]   ;;  %v2743_v25 = vld [vmem:[%s3010_s6 + $0xa8] sm:$0xff]  }
  0x1f   : > { %2458 = vmatpush3.bf16.msra.mxu1 %v2727_v9  ;;  %2431 = vmatprep.subr.bf16.mxu0 %v2728_v10  ;;  %v2744_v26 = vld [vmem:[%s3010_s6 + $0x70] sm:$0xff]   ;;  %v2748_v30 = vld [vmem:[%s3010_s6 + $0x78] sm:$0xff]   ;;  %v2758_v37 = vld [vmem:[%s3010_s6 + $0x140] sm:$0xff]  }
  0x20   : > { %2459 = vmatprep.subr.bf16.mxu1 %v2729_v11  ;;  %v2745_v27 = vld [vmem:[%s3010_s6 + $0xf0] sm:$0xff]   ;;  %v2749_v31 = vld [vmem:[%s3010_s6 + $0xf8] sm:$0xff]   ;;  %v2759_v39 = vld [vmem:[%s3010_s6 + $0x1c0] sm:$0xff]  }
  0x21   : > { %v2746_v28 = vld [vmem:[%s3010_s6 + $0x30] sm:$0xff]   ;;  %v2750_v33 = vld [vmem:[%s3010_s6 + $0x38] sm:$0xff]   ;;  %v2760_v40 = vld [vmem:[%s3010_s6 + $0x100] sm:$0xff]  }
  0x22   : > { %2432 = vmatpush3.bf16.msra.mxu0 %v2730_v12  ;;  %v2747_v29 = vld [vmem:[%s3010_s6 + $0xb0] sm:$0xff]   ;;  %v2751_v35 = vld [vmem:[%s3010_s6 + $0xb8] sm:$0xff]   ;;  %v2761_v41 = vld [vmem:[%s3010_s6 + $0x180] sm:$0xff]  }
  0x23   : > { %2460 = vmatpush3.bf16.msra.mxu1 %v2731_v13  ;;  %2433 = vmatprep.subr.bf16.mxu0 %v2732_v14  ;;  %v2762_v42 = vld [vmem:[%s3010_s6 + $0x148] sm:$0xff]   ;;  %v2766_v49 = vld [vmem:[%s3010_s6 + $0x150] sm:$0xff]   ;;  %v2770_v53 = vld [vmem:[%s3010_s6 + $0x158] sm:$0xff]  }
  0x24   : > { %2461 = vmatprep.subr.bf16.mxu1 %v2733_v15  ;;  %v2763_v43 = vld [vmem:[%s3010_s6 + $0x1c8] sm:$0xff]   ;;  %v2767_v50 = vld [vmem:[%s3010_s6 + $0x1d0] sm:$0xff]   ;;  %v2771_v54 = vld [vmem:[%s3010_s6 + $0x1d8] sm:$0xff]  }
  0x25   : > { %v2764_v45 = vld [vmem:[%s3010_s6 + $0x108] sm:$0xff]   ;;  %v2768_v51 = vld [vmem:[%s3010_s6 + $0x110] sm:$0xff]   ;;  %v2772_v55 = vld [vmem:[%s3010_s6 + $0x118] sm:$0xff]  }
  0x26   : > { %2434 = vmatpush3.bf16.msra.mxu0 %v2734_v16  ;;  %v2765_v47 = vld [vmem:[%s3010_s6 + $0x188] sm:$0xff]   ;;  %v2769_v52 = vld [vmem:[%s3010_s6 + $0x190] sm:$0xff]   ;;  %v2773_v56 = vld [vmem:[%s3010_s6 + $0x198] sm:$0xff]  }
  0x27   : > { %2462 = vmatpush3.bf16.msra.mxu1 %v2735_v17  ;;  %2435 = vmatprep.subr.bf16.mxu0 %v2736_v18  ;;  %v2774_v57 = vld [vmem:[%s3010_s6 + $0x160] sm:$0xff]   ;;  %v2778_v61 = vld [vmem:[%s3010_s6 + $0x168] sm:$0xff]   ;;  %v2788_v1 = vld [vmem:[%s3010_s6 + $0x170] sm:$0xff]  }
  0x28   : > { %2463 = vmatprep.subr.bf16.mxu1 %v2737_v19  ;;  %v2775_v58 = vld [vmem:[%s3010_s6 + $0x1e0] sm:$0xff]   ;;  %v2779_v62 = vld [vmem:[%s3010_s6 + $0x1e8] sm:$0xff]   ;;  %v2789_v2 = vld [vmem:[%s3010_s6 + $0x1f0] sm:$0xff]  }
  0x29   : > { %v2776_v59 = vld [vmem:[%s3010_s6 + $0x120] sm:$0xff]   ;;  %v2784_v63 = vld [vmem:[%s3010_s6 + $0x128] sm:$0xff]   ;;  %v2790_v3 = vld [vmem:[%s3010_s6 + $0x130] sm:$0xff]  }
  0x2a   : > { %2436 = vmatpush3.bf16.msra.mxu0 %v2738_v20  ;;  %v2777_v60 = vld [vmem:[%s3010_s6 + $0x1a0] sm:$0xff]   ;;  %v2785_v0 = vld [vmem:[%s3010_s6 + $0x1a8] sm:$0xff]   ;;  %v2791_v4 = vld [vmem:[%s3010_s6 + $0x1b0] sm:$0xff]  }
  0x2b   : > { %2464 = vmatpush3.bf16.msra.mxu1 %v2739_v21  ;;  %2437 = vmatprep.subr.bf16.mxu0 %v2740_v22  ;;  %v2792_v5 = vld [vmem:[%s3010_s6 + $0x178] sm:$0xff]   ;;  %v2802_v12 = vld [vmem:[%s3010_s6 + $0x240] sm:$0xff]   ;;  %v2806_v16 = vld [vmem:[%s3010_s6 + $0x248] sm:$0xff]  }
  0x2c   : > { %2465 = vmatprep.subr.bf16.mxu1 %v2741_v23  ;;  %v2793_v6 = vld [vmem:[%s3010_s6 + $0x1f8] sm:$0xff]   ;;  %v2803_v13 = vld [vmem:[%s3010_s6 + $0x2c0] sm:$0xff]   ;;  %v2807_v17 = vld [vmem:[%s3010_s6 + $0x2c8] sm:$0xff]  }
  0x2d   : > { %v2796_v7 = vld [vmem:[%s3283_s0 + $0x10] ss:$72 sps:$4 sm:$0xff]   ;;  %v2801_v11 = vld [vmem:[%s3283_s0 + $0x1c] ss:$72 sps:$4 sm:$0xff]   ;;  %v2808_v18 = vld [vmem:[%s3010_s6 + $0x208] sm:$0xff]  }
  0x2e   : > { %2438 = vmatpush3.bf16.msra.mxu0 %v2742_v24  ;;  %v2794_v8 = vld [vmem:[%s3010_s6 + $0x138] sm:$0xff]   ;;  %v2804_v14 = vld [vmem:[%s3010_s6 + $0x200] sm:$0xff]   ;;  %v2809_v19 = vld [vmem:[%s3010_s6 + $0x288] sm:$0xff]  }
  0x2f   : > { %2466 = vmatpush3.bf16.msra.mxu1 %v2743_v25  ;;  %2439 = vmatprep.subr.bf16.mxu0 %v2744_v26  ;;  %v2795_v9 = vld [vmem:[%s3010_s6 + $0x1b8] sm:$0xff]   ;;  %v2805_v15 = vld [vmem:[%s3010_s6 + $0x280] sm:$0xff]   ;;  %v2813_v22 = vld [vmem:[%s3010_s6 + $0x250] sm:$0xff]  }
  0x30   : > { %2467 = vmatprep.subr.bf16.mxu1 %v2745_v27  ;;  %v2799_v10 = vld [vmem:[%s3283_s0 + $0x18] ss:$72 sps:$4 sm:$0xff]   ;;  %v2810_v20 = vld [vmem:[%s3283_s0 + $0xa4] ss:$72 sps:$4 sm:$0xff]   ;;  %v2814_v23 = vld [vmem:[%s3010_s6 + $0x2d0] sm:$0xff]  }
  0x31   : > { %v2812_v21 = vld [vmem:[%s3283_s0 + $0xa0] ss:$72 sps:$4 sm:$0xff]   ;;  %v2815_v24 = vld [vmem:[%s3283_s0 + $0xac] ss:$72 sps:$4 sm:$0xff]  }
  0x32   : > { %2440 = vmatpush3.bf16.msra.mxu0 %v2746_v28  ;;  %v2817_v25 = vld [vmem:[%s3010_s6 + $0x210] sm:$0xff]   ;;  %v2820_v28 = vld [vmem:[%s3010_s6 + $0x258] sm:$0xff]  }
  0x33   : > { %2468 = vmatpush3.bf16.msra.mxu1 %v2747_v29  ;;  %2441 = vmatprep.subr.bf16.mxu0 %v2748_v30  ;;  %v2818_v26 = vld [vmem:[%s3010_s6 + $0x290] sm:$0xff]   ;;  %v2821_v29 = vld [vmem:[%s3010_s6 + $0x2d8] sm:$0xff]  }
  0x34   : > { %2469 = vmatprep.subr.bf16.mxu1 %v2749_v31  ;;  %v2819_v27 = vld [vmem:[%s3283_s0 + $0xa8] ss:$72 sps:$4 sm:$0xff]   ;;  %v2822_v30 = vld [vmem:[%s3010_s6 + $0x218] sm:$0xff]  }
  0x35   : > { %v2823_v31 = vld [vmem:[%s3010_s6 + $0x298] sm:$0xff]  }
  0x36   : > { %2442 = vmatpush3.bf16.msra.mxu0 %v2750_v33  ;;  %v2825_v33 = vld [vmem:[%s3010_s6 + $0x2e0] sm:$0xff]  }
  0x37   : > { %2470 = vmatpush3.bf16.msra.mxu1 %v2751_v35  ;;  %2483 = vmatprep.subr.bf16.mxu0 %v2758_v37  ;;  %v2827_v35 = vld [vmem:[%s3010_s6 + $0x2a0] sm:$0xff]   ;;  %v2829_v37 = vld [vmem:[%s3010_s6 + $0x2e8] sm:$0xff]  }
  0x38   : > { %2511 = vmatprep.subr.bf16.mxu1 %v2759_v39  ;;  %v2831_v39 = vld [vmem:[%s3010_s6 + $0x2a8] sm:$0xff]  }
  0x39   : > { %1617 = vmatmul.mubr.bf16.vlgmr.msra.gmra.mrb[0].mxu0 %v2752_v32  ;;  %v2824_v32 = vld [vmem:[%s3010_s6 + $0x260] sm:$0xff]  }
  0x3a   : > { %1666 = vmatmul.mubr.bf16.vlgmr.msra.gmra.mrb[0].mxu1 %v2755_v34  ;;  %2484 = vmatpush3.bf16.msra.mxu0 %v2760_v40  ;;  %v2826_v34 = vld [vmem:[%s3010_s6 + $0x220] sm:$0xff]   ;;  %v2832_v40 = vld [vmem:[%s3010_s6 + $0x270] sm:$0xff]  }
  0x3b   : > { %2512 = vmatpush3.bf16.msra.mxu1 %v2761_v41  ;;  %1624 = vmatprep.mubr.bf16.mxu0 %v2780_v36  ;;  %v2828_v36 = vld [vmem:[%s3010_s6 + $0x268] sm:$0xff]   ;;  %v2833_v41 = vld [vmem:[%s3010_s6 + $0x2f0] sm:$0xff]  }
  0x3c   : > { %2485 = vmatprep.subr.bf16.mxu0 %v2762_v42  ;;  %1673 = vmatprep.mubr.bf16.mxu1 %v2782_v38  ;;  %v2830_v38 = vld [vmem:[%s3010_s6 + $0x228] sm:$0xff]   ;;  %v2834_v42 = vld [vmem:[%s3010_s6 + $0x230] sm:$0xff]  }
  0x3d   : > { %2513 = vmatprep.subr.bf16.mxu1 %v2763_v43  ;;  %v2835_v43 = vld [vmem:[%s3010_s6 + $0x2b0] sm:$0xff]  }
  0x3e   : > { %2486 = vmatpush3.bf16.msra.mxu0 %v2764_v45  ;;  %v2837_v45 = vld [vmem:[%s3010_s6 + $0x2f8] sm:$0xff]  }
  0x3f   : > { %2514 = vmatpush3.bf16.msra.mxu1 %v2765_v47  ;;  %2487 = vmatprep.subr.bf16.mxu0 %v2766_v49  ;;  %v2839_v47 = vld [vmem:[%s3010_s6 + $0x2b8] sm:$0xff]   ;;  %v2842_v49 = vld [vmem:[%s3283_s0 + $0x24] ss:$72 sps:$4 sm:$0xff]  }
  0x40   : > { %2515 = vmatprep.subr.bf16.mxu1 %v2767_v50  ;;  %v2843_v50 = vld [vmem:[%s3283_s0 + $0x28] ss:$72 sps:$4 sm:$0xff]  }
  0x41   : > { %1625 = vmatmul.mubr.bf16.gmra.mrb[4].mxu0 %v2786_v44  ;;  %v2836_v44 = vld [vmem:[%s3010_s6 + $0x278] sm:$0xff]  }
  0x42   : > { %2488 = vmatpush3.bf16.msra.mxu0 %v2768_v51  ;;  %1674 = vmatmul.mubr.bf16.gmra.mrb[4].mxu1 %v2787_v46  ;;  %v2838_v46 = vld [vmem:[%s3010_s6 + $0x238] sm:$0xff]   ;;  %v2845_v51 = vld [vmem:[%s3283_s0 + $0x2c] ss:$72 sps:$4 sm:$0xff]  }
  0x43   : > { %2516 = vmatpush3.bf16.msra.mxu1 %v2769_v52  ;;  %1714 = vmatprep.mubr.bf16.mxu0 %v2798_v48  ;;  %v2840_v48 = vld [vmem:[%s3283_s0 + $0x20] ss:$72 sps:$4 sm:$0xff]  }
  0x44   : > { %2489 = vmatprep.subr.bf16.mxu0 %v2770_v53  ;;  %2517 = vmatprep.subr.bf16.mxu1 %v2771_v54  ;;  %v2846_v52 = vld [vmem:[%s3010_s6 + $0x340] sm:$0xff]  }
  0x45   : > { %1763 = vmatprep.mubr.bf16.mxu1 %v2801_v11  ;;  %v2847_v53 = vld [vmem:[%s3010_s6 + $0x3c0] sm:$0xff]  }
  0x46   : > { %2490 = vmatpush3.bf16.msra.mxu0 %v2772_v55  ;;  %v2848_v54 = vld [vmem:[%s3010_s6 + $0x300] sm:$0xff]  }
  0x47   : > { %2518 = vmatpush3.bf16.msra.mxu1 %v2773_v56  ;;  %2491 = vmatprep.subr.bf16.mxu0 %v2774_v57  ;;  %v2849_v55 = vld [vmem:[%s3010_s6 + $0x380] sm:$0xff]   ;;  %v2850_v56 = vld [vmem:[%s3010_s6 + $0x348] sm:$0xff]  }
  0x48   : > { %2519 = vmatprep.subr.bf16.mxu1 %v2775_v58  ;;  %v2851_v57 = vld [vmem:[%s3010_s6 + $0x3c8] sm:$0xff]   ;;  %v2871_v11 = vld [vmem:[%s3010_s6 + $0x3a0] sm:$0xff]  }
  0x49   : > { %v2852_v58 = vld [vmem:[%s3010_s6 + $0x308] sm:$0xff]  }
  0x4a   : > { %2492 = vmatpush3.bf16.msra.mxu0 %v2776_v59  ;;  %v2853_v59 = vld [vmem:[%s3010_s6 + $0x388] sm:$0xff]  }
  0x4b   : > { %2520 = vmatpush3.bf16.msra.mxu1 %v2777_v60  ;;  %2493 = vmatprep.subr.bf16.mxu0 %v2778_v61  ;;  %v2854_v60 = vld [vmem:[%s3283_s0 + $0xb4] ss:$72 sps:$4 sm:$0xff]   ;;  %v2856_v61 = vld [vmem:[%s3283_s0 + $0xb0] ss:$72 sps:$4 sm:$0xff]  }
  0x4c   : > { %2521 = vmatprep.subr.bf16.mxu1 %v2779_v62  ;;  %v2857_v62 = vld [vmem:[%s3010_s6 + $0x350] sm:$0xff]  }
  0x4e   : > { %2494 = vmatpush3.bf16.msra.mxu0 %v2784_v63  ;;  %v2858_v63 = vld [vmem:[%s3010_s6 + $0x3d0] sm:$0xff]  }
  0x4f   : > { %2522 = vmatpush3.bf16.msra.mxu1 %v2785_v0  ;;  %2495 = vmatprep.subr.bf16.mxu0 %v2788_v1  ;;  %v2859_v0 = vld [vmem:[%s3283_s0 + $0xbc] ss:$72 sps:$4 sm:$0xff]   ;;  %v2861_v1 = vld [vmem:[%s3010_s6 + $0x310] sm:$0xff]  }
  0x50   : > { %2523 = vmatprep.subr.bf16.mxu1 %v2789_v2  ;;  %v2862_v2 = vld [vmem:[%s3010_s6 + $0x390] sm:$0xff]  }
  0x52   : > { %2496 = vmatpush3.bf16.msra.mxu0 %v2790_v3  ;;  %v2863_v3 = vld [vmem:[%s3283_s0 + $0xb8] ss:$72 sps:$4 sm:$0xff]  }
  0x53   : > { %2524 = vmatpush3.bf16.msra.mxu1 %v2791_v4  ;;  %2497 = vmatprep.subr.bf16.mxu0 %v2792_v5  ;;  %v2864_v4 = vld [vmem:[%s3010_s6 + $0x358] sm:$0xff]  }
  0x54   : > { %2525 = vmatprep.subr.bf16.mxu1 %v2793_v6  ;;  %v2865_v5 = vld [vmem:[%s3010_s6 + $0x3d8] sm:$0xff]  }
  0x55   : > { %v2866_v6 = vld [vmem:[%s3010_s6 + $0x318] sm:$0xff]  }
  0x56   : > { %2498 = vmatpush3.bf16.msra.mxu0 %v2794_v8  ;;  %v2868_v8 = vld [vmem:[%s3010_s6 + $0x360] sm:$0xff]  }
  0x57   : > { %2526 = vmatpush3.bf16.msra.mxu1 %v2795_v9  ;;  %2539 = vmatprep.subr.bf16.mxu0 %v2802_v12  ;;  %v2869_v9 = vld [vmem:[%s3010_s6 + $0x3e0] sm:$0xff]   ;;  %v2872_v12 = vld [vmem:[%s3010_s6 + $0x368] sm:$0xff]  }
  0x58   : > { %2567 = vmatprep.subr.bf16.mxu1 %v2803_v13  ;;  %v2873_v13 = vld [vmem:[%s3010_s6 + $0x3e8] sm:$0xff]  }
  0x59   : > { %1715 = vmatmul.mubr.bf16.vlgmr.msra.gmra.mrb[8].mxu0 %v2796_v7  ;;  %v2867_v7 = vld [vmem:[%s3010_s6 + $0x398] sm:$0xff]  }
  0x5a   : > { %1764 = vmatmul.mubr.bf16.vlgmr.msra.gmra.mrb[8].mxu1 %v2799_v10  ;;  %2540 = vmatpush3.bf16.msra.mxu0 %v2804_v14  ;;  %v2870_v10 = vld [vmem:[%s3010_s6 + $0x320] sm:$0xff]   ;;  %v2874_v14 = vld [vmem:[%s3010_s6 + $0x328] sm:$0xff]  }
  0x5b   : > { %2568 = vmatpush3.bf16.msra.mxu1 %v2805_v15  ;;  %2541 = vmatprep.subr.bf16.mxu0 %v2806_v16  ;;  %v2875_v15 = vld [vmem:[%s3010_s6 + $0x3a8] sm:$0xff]   ;;  %v2876_v16 = vld [vmem:[%s3010_s6 + $0x370] sm:$0xff]  }
  0x5c   : > { %2569 = vmatprep.subr.bf16.mxu1 %v2807_v17  ;;  %1722 = vmatprep.mubr.bf16.mxu0 %v2810_v20  ;;  %v2877_v17 = vld [vmem:[%s3010_s6 + $0x3f0] sm:$0xff]   ;;  %v2880_v20 = vld [vmem:[%s3010_s6 + $0x378] sm:$0xff]  }
  0x5d   : > { %1771 = vmatprep.mubr.bf16.mxu1 %v2815_v24  ;;  %v2884_v24 = vld [vmem:[%s3283_s0 + $0x30] ss:$72 sps:$4 sm:$0xff]  }
  0x5e   : > { %2542 = vmatpush3.bf16.msra.mxu0 %v2808_v18  ;;  %v2878_v18 = vld [vmem:[%s3010_s6 + $0x330] sm:$0xff]  }
  0x5f   : > { %2570 = vmatpush3.bf16.msra.mxu1 %v2809_v19  ;;  %2543 = vmatprep.subr.bf16.mxu0 %v2813_v22  ;;  %v2879_v19 = vld [vmem:[%s3010_s6 + $0x3b0] sm:$0xff]   ;;  %v2882_v22 = vld [vmem:[%s3010_s6 + $0x338] sm:$0xff]  }
  0x60   : > { %2571 = vmatprep.subr.bf16.mxu1 %v2814_v23  ;;  %v2883_v23 = vld [vmem:[%s3010_s6 + $0x3b8] sm:$0xff]  }
  0x61   : > { %1723 = vmatmul.mubr.bf16.gmra.mrb[12].mxu0 %v2812_v21  ;;  %v2881_v21 = vld [vmem:[%s3010_s6 + $0x3f8] sm:$0xff]  }
  0x62   : > { %2544 = vmatpush3.bf16.msra.mxu0 %v2817_v25  ;;  %1772 = vmatmul.mubr.bf16.gmra.mrb[12].mxu1 %v2819_v27  ;;  %v2886_v25 = vld [vmem:[%s3283_s0 + $0x34] ss:$72 sps:$4 sm:$0xff]  }
  0x63   : > { %2572 = vmatpush3.bf16.msra.mxu1 %v2818_v26  ;;  %2545 = vmatprep.subr.bf16.mxu0 %v2820_v28  ;;  %v2887_v26 = vld [vmem:[%s3283_s0 + $0x38] ss:$72 sps:$4 sm:$0xff]   ;;  %v2889_v27 = vld [vmem:[%s3283_s0 + $0x3c] ss:$72 sps:$4 sm:$0xff]  }
  0x64   : > { %2573 = vmatprep.subr.bf16.mxu1 %v2821_v29  ;;  %1812 = vmatprep.mubr.bf16.mxu0 %v2842_v49  ;;  %v2890_v28 = vld [vmem:[%s3010_s6 + $0x440] sm:$0xff]   ;;  %v2911_v49 = vld [vmem:[%s3010_s6 + $0x438] sm:$0xff]  }
  0x65   : > { %1861 = vmatprep.mubr.bf16.mxu1 %v2845_v51  ;;  %v2891_v29 = vld [vmem:[%s3010_s6 + $0x400] sm:$0xff]   ;;  %v2915_v51 = vld [vmem:[%s3283_s0 + $0xd0] ss:$72 sps:$4 sm:$0xff]  }
  0x66   : > { %2546 = vmatpush3.bf16.msra.mxu0 %v2822_v30  ;;  %v2892_v30 = vld [vmem:[%s3010_s6 + $0x448] sm:$0xff]  }
  0x67   : > { %2574 = vmatpush3.bf16.msra.mxu1 %v2823_v31  ;;  %2547 = vmatprep.subr.bf16.mxu0 %v2824_v32  ;;  %v2893_v31 = vld [vmem:[%s3010_s6 + $0x408] sm:$0xff]  }
  0x68   : > { %2575 = vmatprep.subr.bf16.mxu1 %v2825_v33  ;;  %v2894_v32 = vld [vmem:[%s3283_s0 + $0xc4] ss:$72 sps:$4 sm:$0xff]   ;;  %v2896_v33 = vld [vmem:[%s3283_s0 + $0xc0] ss:$72 sps:$4 sm:$0xff]  }
  0x6a   : > { %2548 = vmatpush3.bf16.msra.mxu0 %v2826_v34  ;;  %v2897_v34 = vld [vmem:[%s3010_s6 + $0x450] sm:$0xff]  }
  0x6b   : > { %2576 = vmatpush3.bf16.msra.mxu1 %v2827_v35  ;;  %2549 = vmatprep.subr.bf16.mxu0 %v2828_v36  ;;  %v2898_v35 = vld [vmem:[%s3283_s0 + $0xcc] ss:$72 sps:$4 sm:$0xff]  }
  0x6c   : > { %2577 = vmatprep.subr.bf16.mxu1 %v2829_v37  ;;  %v2900_v36 = vld [vmem:[%s3010_s6 + $0x410] sm:$0xff]  }
  0x6d   : > { %v2901_v37 = vld [vmem:[%s3283_s0 + $0xc8] ss:$72 sps:$4 sm:$0xff]  }
  0x6e   : > { %2550 = vmatpush3.bf16.msra.mxu0 %v2830_v38  ;;  %v2902_v38 = vld [vmem:[%s3010_s6 + $0x458] sm:$0xff]  }
  0x6f   : > { %2578 = vmatpush3.bf16.msra.mxu1 %v2831_v39  ;;  %2551 = vmatprep.subr.bf16.mxu0 %v2832_v40  ;;  %v2903_v39 = vld [vmem:[%s3010_s6 + $0x418] sm:$0xff]   ;;  %v2904_v40 = vld [vmem:[%s3010_s6 + $0x460] sm:$0xff]  }
  0x70   : > { %2579 = vmatprep.subr.bf16.mxu1 %v2833_v41  ;;  %v2905_v41 = vld [vmem:[%s3010_s6 + $0x420] sm:$0xff]  }
  0x72   : > { %2552 = vmatpush3.bf16.msra.mxu0 %v2834_v42  ;;  %v2906_v42 = vld [vmem:[%s3010_s6 + $0x468] sm:$0xff]  }
  0x73   : > { %2580 = vmatpush3.bf16.msra.mxu1 %v2835_v43  ;;  %2553 = vmatprep.subr.bf16.mxu0 %v2836_v44  ;;  %v2907_v43 = vld [vmem:[%s3010_s6 + $0x428] sm:$0xff]  }
  0x74   : > { %2581 = vmatprep.subr.bf16.mxu1 %v2837_v45  ;;  %v2914_v44 = vld [vmem:[%s3283_s0 + $0x44] ss:$72 sps:$4 sm:$0xff]   ;;  %v2908_v45 = vld [vmem:[%s3010_s6 + $0x470] sm:$0xff]  }
  0x76   : > { %2554 = vmatpush3.bf16.msra.mxu0 %v2838_v46  ;;  %v2917_v46 = vld [vmem:[%s3283_s0 + $0xd4] ss:$72 sps:$4 sm:$0xff]  }
  0x77   : > { %2582 = vmatpush3.bf16.msra.mxu1 %v2839_v47  ;;  %2595 = vmatprep.subr.bf16.mxu0 %v2846_v52  ;;  %v2909_v47 = vld [vmem:[%s3010_s6 + $0x430] sm:$0xff]  }
  0x78   : > { %2623 = vmatprep.subr.bf16.mxu1 %v2847_v53 }
  0x79   : > { %1813 = vmatmul.mubr.bf16.vlgmr.msra.gmra.mrb[16].mxu0 %v2840_v48  ;;  %v2910_v48 = vld [vmem:[%s3010_s6 + $0x478] sm:$0xff]  }
  0x7a   : > { %1862 = vmatmul.mubr.bf16.vlgmr.msra.gmra.mrb[16].mxu1 %v2843_v50  ;;  %2596 = vmatpush3.bf16.msra.mxu0 %v2848_v54  ;;  %v2912_v50 = vld [vmem:[%s3283_s0 + $0x40] ss:$72 sps:$4 sm:$0xff]  }
  0x7b   : > { %2624 = vmatpush3.bf16.msra.mxu1 %v2849_v55  ;;  %2597 = vmatprep.subr.bf16.mxu0 %v2850_v56 }
  0x7c   : > { %2625 = vmatprep.subr.bf16.mxu1 %v2851_v57  ;;  %1820 = vmatprep.mubr.bf16.mxu0 %v2854_v60 }
  0x7d   : > { %1869 = vmatprep.mubr.bf16.mxu1 %v2859_v0 }
  0x7e   : > { %2598 = vmatpush3.bf16.msra.mxu0 %v2852_v58 }
  0x7f   : > { %2626 = vmatpush3.bf16.msra.mxu1 %v2853_v59  ;;  %2599 = vmatprep.subr.bf16.mxu0 %v2857_v62 }
  0x80   : > { %2627 = vmatprep.subr.bf16.mxu1 %v2858_v63 }
  0x81   : > { %1821 = vmatmul.mubr.bf16.gmra.mrb[20].mxu0 %v2856_v61 }
  0x82   : > { %2600 = vmatpush3.bf16.msra.mxu0 %v2861_v1  ;;  %1870 = vmatmul.mubr.bf16.gmra.mrb[20].mxu1 %v2863_v3 }
  0x83   : > { %2628 = vmatpush3.bf16.msra.mxu1 %v2862_v2  ;;  %2601 = vmatprep.subr.bf16.mxu0 %v2864_v4 }
  0x84   : > { %2629 = vmatprep.subr.bf16.mxu1 %v2865_v5  ;;  %1910 = vmatprep.mubr.bf16.mxu0 %v2886_v25 }
  0x85   : > { %1959 = vmatprep.mubr.bf16.mxu1 %v2889_v27 }
  0x86   : > { %2602 = vmatpush3.bf16.msra.mxu0 %v2866_v6 }
  0x87   : > { %2630 = vmatpush3.bf16.msra.mxu1 %v2867_v7  ;;  %2603 = vmatprep.subr.bf16.mxu0 %v2868_v8 }
  0x88   : > { %2631 = vmatprep.subr.bf16.mxu1 %v2869_v9 }
  0x8a   : > { %2604 = vmatpush3.bf16.msra.mxu0 %v2870_v10 }
  0x8b   : > { %2632 = vmatpush3.bf16.msra.mxu1 %v2871_v11  ;;  %2605 = vmatprep.subr.bf16.mxu0 %v2872_v12 }
  0x8c   : > { %2633 = vmatprep.subr.bf16.mxu1 %v2873_v13 }
  0x8e   : > { %2606 = vmatpush3.bf16.msra.mxu0 %v2874_v14 }
  0x8f   : > { %2634 = vmatpush3.bf16.msra.mxu1 %v2875_v15  ;;  %2607 = vmatprep.subr.bf16.mxu0 %v2876_v16 }
  0x90   : > { %2635 = vmatprep.subr.bf16.mxu1 %v2877_v17 }
  0x92   : > { %2608 = vmatpush3.bf16.msra.mxu0 %v2878_v18 }
  0x93   : > { %2636 = vmatpush3.bf16.msra.mxu1 %v2879_v19  ;;  %2609 = vmatprep.subr.bf16.mxu0 %v2880_v20 }
  0x94   : > { %2637 = vmatprep.subr.bf16.mxu1 %v2881_v21 }
  0x96   : > { %2610 = vmatpush3.bf16.msra.mxu0 %v2882_v22 }
  0x97   : > { %2638 = vmatpush3.bf16.msra.mxu1 %v2883_v23  ;;  %2651 = vmatprep.subr.bf16.mxu0 %v2890_v28 }
  0x98   : > { %2679 = vmatprep.subr.bf16.mxu1 %v2890_v28 }
  0x99   : > { %1911 = vmatmul.mubr.bf16.vlgmr.msra.gmra.mrb[24].mxu0 %v2884_v24 }
  0x9a   : > { %1960 = vmatmul.mubr.bf16.vlgmr.msra.gmra.mrb[24].mxu1 %v2887_v26  ;;  %2652 = vmatpush3.bf16.msra.mxu0 %v2891_v29 }
  0x9b   : > { %2687 = vmatpush3.bf16.msra.mxu1 %v2891_v29  ;;  %2653 = vmatprep.subr.bf16.mxu0 %v2892_v30 }
  0x9c   : > { %2680 = vmatprep.subr.bf16.mxu1 %v2892_v30  ;;  %1918 = vmatprep.mubr.bf16.mxu0 %v2894_v32 }
  0x9d   : > { %1967 = vmatprep.mubr.bf16.mxu1 %v2898_v35 }
  0x9e   : > { %2654 = vmatpush3.bf16.msra.mxu0 %v2893_v31 }
  0x9f   : > { %2688 = vmatpush3.bf16.msra.mxu1 %v2893_v31  ;;  %2655 = vmatprep.subr.bf16.mxu0 %v2897_v34 }
  0xa0   : > { %2681 = vmatprep.subr.bf16.mxu1 %v2897_v34 }
  0xa1   : > { %1919 = vmatmul.mubr.bf16.gmra.mrb[28].mxu0 %v2896_v33 }
  0xa2   : > { %2656 = vmatpush3.bf16.msra.mxu0 %v2900_v36  ;;  %1968 = vmatmul.mubr.bf16.gmra.mrb[28].mxu1 %v2901_v37 }
  0xa3   : > { %2689 = vmatpush3.bf16.msra.mxu1 %v2900_v36  ;;  %2657 = vmatprep.subr.bf16.mxu0 %v2902_v38 }
  0xa4   : > { %2682 = vmatprep.subr.bf16.mxu1 %v2902_v38  ;;  %2008 = vmatprep.mubr.bf16.mxu0 %v2914_v44 }
  0xa5   : > { %2016 = vmatprep.mubr.bf16.mxu1 %v2917_v46 }
  0xa6   : > { %2658 = vmatpush3.bf16.msra.mxu0 %v2903_v39 }
  0xa7   : > { %2690 = vmatpush3.bf16.msra.mxu1 %v2903_v39  ;;  %2659 = vmatprep.subr.bf16.mxu0 %v2904_v40 }
  0xa8   : > { %2683 = vmatprep.subr.bf16.mxu1 %v2904_v40 }
  0xaa   : > { %2660 = vmatpush3.bf16.msra.mxu0 %v2905_v41 }
  0xab   : > { %2691 = vmatpush3.bf16.msra.mxu1 %v2905_v41  ;;  %2661 = vmatprep.subr.bf16.mxu0 %v2906_v42 }
  0xac   : > { %2684 = vmatprep.subr.bf16.mxu1 %v2906_v42 }
  0xae   : > { %2662 = vmatpush3.bf16.msra.mxu0 %v2907_v43 }
  0xaf   : > { %2692 = vmatpush3.bf16.msra.mxu1 %v2907_v43  ;;  %2663 = vmatprep.subr.bf16.mxu0 %v2908_v45 }
  0xb0   : > { %2685 = vmatprep.subr.bf16.mxu1 %v2908_v45 }
  0xb2   : > { %2664 = vmatpush3.bf16.msra.mxu0 %v2909_v47 }
  0xb3   : > { %2693 = vmatpush3.bf16.msra.mxu1 %v2909_v47  ;;  %2665 = vmatprep.subr.bf16.mxu0 %v2910_v48 }
  0xb4   : > { %2686 = vmatprep.subr.bf16.mxu1 %v2910_v48 }
  0xb6   : > { %2666 = vmatpush3.bf16.msra.mxu0 %v2911_v49 }
  0xb7   : > { %2694 = vmatpush3.bf16.msra.mxu1 %v2911_v49 }
  0xb9   : > { %2009 = vmatmul.mubr.bf16.vlgmr.msra.gmra.mrb[32].mxu0 %v2912_v50 }
  0xba   : > { %2017 = vmatmul.mubr.bf16.vlgmr.msra.gmra.mrb[32].mxu1 %v2915_v51 }
 0x10c   : > { %v2443_v52 = vpop.f32.mrb[0].mxu0 }
 0x10d   : > { %v2471_v53 = vpop.f32.mrb[0].mxu1  ;;  %v2444_v54 = vpop.f32.mrb[1].mxu0 }
 0x10e   : > { %v2445_v55 = vadd.f32 %v2444_v54, %v2443_v52  ;;  %v2472_v56 = vpop.f32.mrb[1].mxu1  ;;  %v2446_v57 = vpop.f32.mrb[2].mxu0 }
 0x10f   : > { %v2473_v58 = vadd.f32 %v2472_v56, %v2471_v53  ;;  %v2474_v59 = vpop.f32.mrb[2].mxu1  ;;  %v2447_v60 = vpop.f32.mrb[3].mxu0 }
 0x110   : > { %v2448_v61 = vadd.f32 %v2447_v60, %v2446_v57  ;;  %v2475_v62 = vpop.f32.mrb[3].mxu1 }
 0x111   : > { %v1668_v63 = vadd.f32 %v2473_v58, %v2445_v55  ;;  %v2476_v0 = vadd.f32 %v2475_v62, %v2474_v59 }
 0x113   : > { %v1671_v1 = vadd.f32 %v2476_v0, %v2448_v61 }
 0x114   : > { %v2449_v2 = vpop.f32.mrb[4].mxu0 }
 0x115   : > { %v2477_v3 = vpop.f32.mrb[4].mxu1  ;;  %v2450_v4 = vpop.f32.mrb[5].mxu0 }
 0x116   : > { %v2451_v5 = vadd.f32 %v2450_v4, %v2449_v2  ;;  %v2478_v6 = vpop.f32.mrb[5].mxu1  ;;  %v2452_v7 = vpop.f32.mrb[6].mxu0 }
 0x117   : > { %v2479_v8 = vadd.f32 %v2478_v6, %v2477_v3  ;;  %v2480_v9 = vpop.f32.mrb[6].mxu1  ;;  %v2453_v10 = vpop.f32.mrb[7].mxu0 }
 0x118   : > { %v2454_v11 = vadd.f32 %v2453_v10, %v2452_v7  ;;  %v2481_v12 = vpop.f32.mrb[7].mxu1 }
 0x119   : > { %v1676_v13 = vadd.f32 %v2479_v8, %v2451_v5  ;;  %v2482_v14 = vadd.f32 %v2481_v12, %v2480_v9 }
 0x11b   : > { %v1679_v15 = vadd.f32 %v2482_v14, %v2454_v11 }
 0x12c   : > { %v2499_v16 = vpop.f32.mrb[8].mxu0 }
 0x12d   : > { %v2527_v17 = vpop.f32.mrb[8].mxu1  ;;  %v2500_v18 = vpop.f32.mrb[9].mxu0 }
 0x12e   : > { %v2501_v19 = vadd.f32 %v2500_v18, %v2499_v16  ;;  %v2528_v20 = vpop.f32.mrb[9].mxu1  ;;  %v2502_v21 = vpop.f32.mrb[10].mxu0 }
 0x12f   : > { %v2529_v22 = vadd.f32 %v2528_v20, %v2527_v17  ;;  %v2530_v23 = vpop.f32.mrb[10].mxu1  ;;  %v2503_v24 = vpop.f32.mrb[11].mxu0 }
 0x130   : > { %v1717_v25 = vadd.f32 %v2501_v19, %v1668_v63  ;;  %v2504_v26 = vadd.f32 %v2503_v24, %v2502_v21  ;;  %v2531_v27 = vpop.f32.mrb[11].mxu1 }
 0x131   : > { %v2532_v28 = vadd.f32 %v2531_v27, %v2530_v23 }
 0x132   : > { %v1766_v29 = vadd.f32 %v2529_v22, %v1717_v25  ;;  %v1720_v30 = vadd.f32 %v2504_v26, %v1671_v1 }
 0x134   : > { %v1769_v31 = vadd.f32 %v2532_v28, %v1720_v30  ;;  %v2505_v32 = vpop.f32.mrb[12].mxu0 }
 0x135   : > { %v2506_v33 = vpop.f32.mrb[13].mxu0  ;;  %v2533_v39 = vpop.f32.mrb[12].mxu1 }
 0x136   : > { %v2507_v34 = vadd.f32 %v2506_v33, %v2505_v32  ;;  %v2508_v35 = vpop.f32.mrb[14].mxu0  ;;  %v2534_v41 = vpop.f32.mrb[13].mxu1 }
 0x137   : > { %v2509_v36 = vpop.f32.mrb[15].mxu0  ;;  %v2535_v42 = vadd.f32 %v2534_v41, %v2533_v39  ;;  %v2536_v43 = vpop.f32.mrb[14].mxu1 }
 0x138   : > { %v1725_v37 = vadd.f32 %v2507_v34, %v1676_v13  ;;  %v2510_v38 = vadd.f32 %v2509_v36, %v2508_v35  ;;  %v2537_v44 = vpop.f32.mrb[15].mxu1 }
 0x139   : > { %v2538_v46 = vadd.f32 %v2537_v44, %v2536_v43 }
 0x13a   : > { %v1728_v40 = vadd.f32 %v2510_v38, %v1679_v15  ;;  %v1774_v45 = vadd.f32 %v2535_v42, %v1725_v37 }
 0x13c   : > { %v1777_v47 = vadd.f32 %v2538_v46, %v1728_v40 }
 0x14c   : > { %v2555_v48 = vpop.f32.mrb[16].mxu0 }
 0x14d   : > { %v2556_v49 = vpop.f32.mrb[17].mxu0  ;;  %v2583_v50 = vpop.f32.mrb[16].mxu1 }
 0x14e   : > { %v2557_v51 = vadd.f32 %v2556_v49, %v2555_v48  ;;  %v2558_v52 = vpop.f32.mrb[18].mxu0  ;;  %v2584_v53 = vpop.f32.mrb[17].mxu1 }
 0x14f   : > { %v2559_v54 = vpop.f32.mrb[19].mxu0  ;;  %v2585_v56 = vadd.f32 %v2584_v53, %v2583_v50  ;;  %v2586_v57 = vpop.f32.mrb[18].mxu1 }
 0x150   : > { %v1815_v55 = vadd.f32 %v2557_v51, %v1766_v29  ;;  %v2560_v58 = vadd.f32 %v2559_v54, %v2558_v52  ;;  %v2587_v59 = vpop.f32.mrb[19].mxu1  ;;  %v2403_v54 = vld [vmem:[%s211_s29] ss:$0 sm:$0xff] }
 0x151   : > { %v2588_v62 = vadd.f32 %v2587_v59, %v2586_v57 }
 0x152   : > { %v1864_v60 = vadd.f32 %v2585_v56, %v1815_v55  ;;  %v1818_v61 = vadd.f32 %v2560_v58, %v1769_v31 }
 0x154   : > { %v1867_v63 = vadd.f32 %v2588_v62, %v1818_v61  ;;  %v2561_v0 = vpop.f32.mrb[20].mxu0 }
 0x155   : > { %v2562_v1 = vpop.f32.mrb[21].mxu0  ;;  %v2589_v7 = vpop.f32.mrb[20].mxu1 }
 0x156   : > { %v2563_v2 = vadd.f32 %v2562_v1, %v2561_v0  ;;  %v2564_v3 = vpop.f32.mrb[22].mxu0  ;;  %v2590_v9 = vpop.f32.mrb[21].mxu1 }
 0x157   : > { %v2565_v4 = vpop.f32.mrb[23].mxu0  ;;  %v2591_v10 = vadd.f32 %v2590_v9, %v2589_v7  ;;  %v2592_v11 = vpop.f32.mrb[22].mxu1 }
 0x158   : > { %v1823_v5 = vadd.f32 %v2563_v2, %v1774_v45  ;;  %v2566_v6 = vadd.f32 %v2565_v4, %v2564_v3  ;;  %v2593_v12 = vpop.f32.mrb[23].mxu1 }
 0x159   : > { %v2594_v14 = vadd.f32 %v2593_v12, %v2592_v11 }
 0x15a   : > { %v1826_v8 = vadd.f32 %v2566_v6, %v1777_v47  ;;  %v1872_v13 = vadd.f32 %v2591_v10, %v1823_v5 }
 0x15c   : > { %v1875_v15 = vadd.f32 %v2594_v14, %v1826_v8 }
 0x16c   : > { %v2611_v16 = vpop.f32.mrb[24].mxu0 }
 0x16d   : > { %v2639_v17 = vpop.f32.mrb[24].mxu1  ;;  %v2612_v18 = vpop.f32.mrb[25].mxu0 }
 0x16e   : > { %v2613_v19 = vadd.f32 %v2612_v18, %v2611_v16  ;;  %v2640_v20 = vpop.f32.mrb[25].mxu1  ;;  %v2614_v21 = vpop.f32.mrb[26].mxu0 }
 0x16f   : > { %v2641_v22 = vadd.f32 %v2640_v20, %v2639_v17  ;;  %v2642_v23 = vpop.f32.mrb[26].mxu1  ;;  %v2615_v24 = vpop.f32.mrb[27].mxu0 }
 0x170   : > { %v1913_v25 = vadd.f32 %v2613_v19, %v1864_v60  ;;  %v2616_v26 = vadd.f32 %v2615_v24, %v2614_v21  ;;  %v2643_v27 = vpop.f32.mrb[27].mxu1 }
 0x171   : > { %v2644_v28 = vadd.f32 %v2643_v27, %v2642_v23 }
 0x172   : > { %v1962_v29 = vadd.f32 %v2641_v22, %v1913_v25  ;;  %v1916_v30 = vadd.f32 %v2616_v26, %v1867_v63 }
 0x174   : > { %v1965_v31 = vadd.f32 %v2644_v28, %v1916_v30  ;;  %v2617_v32 = vpop.f32.mrb[28].mxu0 }
 0x175   : > { %v2618_v33 = vpop.f32.mrb[29].mxu0  ;;  %v2645_v36 = vpop.f32.mrb[28].mxu1 }
 0x176   : > { %v2619_v34 = vadd.f32 %v2618_v33, %v2617_v32  ;;  %v2620_v35 = vpop.f32.mrb[30].mxu0  ;;  %v2646_v38 = vpop.f32.mrb[29].mxu1 }
 0x177   : > { %v2621_v37 = vpop.f32.mrb[31].mxu0  ;;  %v2647_v41 = vadd.f32 %v2646_v38, %v2645_v36  ;;  %v2648_v42 = vpop.f32.mrb[30].mxu1 }
 0x178   : > { %v1921_v39 = vadd.f32 %v2619_v34, %v1872_v13  ;;  %v2622_v40 = vadd.f32 %v2621_v37, %v2620_v35  ;;  %v2649_v43 = vpop.f32.mrb[31].mxu1 }
 0x179   : > { %v2650_v46 = vadd.f32 %v2649_v43, %v2648_v42 }
 0x17a   : > { %v1924_v44 = vadd.f32 %v2622_v40, %v1875_v15  ;;  %v1970_v45 = vadd.f32 %v2647_v41, %v1921_v39 }
 0x17c   : > { %v1973_v47 = vadd.f32 %v2650_v46, %v1924_v44 }
 0x18c   : > { %v2667_v48 = vpop.f32.mrb[32].mxu0 }
 0x18d   : > { %v2673_v49 = vpop.f32.mrb[32].mxu1  ;;  %v2668_v50 = vpop.f32.mrb[33].mxu0 }
 0x18e   : > { %v2669_v51 = vadd.f32 %v2668_v50, %v2667_v48  ;;  %v2674_v52 = vpop.f32.mrb[33].mxu1  ;;  %v2670_v53 = vpop.f32.mrb[34].mxu0 }
 0x18f   : > { %v2675_v55 = vadd.f32 %v2674_v52, %v2673_v49  ;;  %v2676_v56 = vpop.f32.mrb[34].mxu1  ;;  %v2671_v57 = vpop.f32.mrb[35].mxu0 }
 0x190   : > { %v2011_v58 = vadd.f32 %v2669_v51, %v1962_v29  ;;  %v2672_v59 = vadd.f32 %v2671_v57, %v2670_v53  ;;  %v2677_v60 = vpop.f32.mrb[35].mxu1 }
 0x191   : > { %v2019_v61 = vadd.f32 %v2675_v55, %v1970_v45  ;;  %v2678_v62 = vadd.f32 %v2677_v60, %v2676_v56 }
 0x192   : > { %v2032_v63 = vadd.f32 %v2403_v54, %v2011_v58  ;;  %v2014_v0 = vadd.f32 %v2672_v59, %v1965_v31 }
 0x193   : > { %v2034_v1 = vadd.f32 %v2403_v54, %v2019_v61  ;;  %v2060_v2 = vsub.f32 %v2011_v58, %v2019_v61  ;;  %v2022_v3 = vadd.f32 %v2678_v62, %v1973_v47 }
 0x194   : > { %v2033_v4 = vadd.f32 %v2403_v54, %v2014_v0  ;;  %v2036_v7 = vmax.f32 %v2032_v63, 0.0 }
 0x195   : > { %v2035_v5 = vadd.f32 %v2403_v54, %v2022_v3  ;;  %v2061_v6 = vsub.f32 %v2014_v0, %v2022_v3  ;;  %v2038_v9 = vmax.f32 %v2034_v1, 0.0  ;;  %v2062_v10 = vmul.f32 %v2060_v2, %v2060_v2 }
 0x196   : > { %v2037_v8 = vmax.f32 %v2033_v4, 0.0 }
 0x197   : > { %v2039_v11 = vmax.f32 %v2035_v5, 0.0  ;;  %v2063_v12 = vmul.f32 %v2061_v6, %v2061_v6 }
 0x198   : > { %v2419_v13 = vpack.c.bf16 %v2037_v8, %v2036_v7 }
 0x199   : > { %v2424_v14 = vpack.c.bf16 %v2039_v11, %v2038_v9  ;;  %v2064_v15 = vadd.f32 %v2063_v12, %v2062_v10 }
 0x19a   : > { %2420 = vst [vmem:[%s198_s15] sm:$0xff] %v2419_v13  }
 0x19b   : > { %2426 = vst [vmem:[%s198_s15 + $0x8] sm:$0xff] %v2424_v14   ;;  %v2065_v16 = vrot.slane %v2064_v15, 4 }
 0x19d   : > { %v2066_v17 = vadd.f32 %v2065_v16, %v2064_v15 }
 0x19f   : > { %v2067_v18 = vrot.slane %v2066_v17, 2 }
 0x1a1   : > { %v2068_v19 = vadd.f32 %v2067_v18, %v2066_v17  ;;  %2081 = sbr.rel (!%p2992_p4) target bundleno = 424 (0x1a8), region = 36  ;;  %v2099_v22 = vld [vmem:[%s198_s15] sm:$0xf] (%p2992_p4)  ;;  %v2101_v23 = vld [vmem:[%s198_s15 + $0x4] sm:$0xf] (%p2992_p4) }
 0x1a2   : > { %v2103_v24 = vld [vmem:[%s198_s15 + $0x8] sm:$0xf] (%p2992_p4)  ;;  %v2105_v25 = vld [vmem:[%s198_s15 + $0xc] sm:$0xf] (%p2992_p4)  ;;  %2100 = vst [vmem:[%s2083_s13] sm:$0xf] (%p2992_p4), %v2099_v22 }
 0x1a3   : > { %v2069_v20 = vrot.slane %v2068_v19, 1  ;;  %2102 = vst [vmem:[%s2083_s13 + $0x8] sm:$0xf] (%p2992_p4), %v2101_v23  ;;  %2104 = vst [vmem:[%s2083_s13 + $0x10] sm:$0xf] (%p2992_p4), %v2103_v24 }
 0x1a4   : > { %2106 = vst [vmem:[%s2083_s13 + $0x18] sm:$0xf] (%p2992_p4), %v2105_v25 }
 0x1a5   : > { %v2070_v21 = vadd.f32 %v2069_v20, %v2068_v19 }
 0x1a7   : > { %2071 = vst [vmem:[%s214_s9] sm:$0x1] %v2070_v21 }
 0x1a8 PF: > { %p12_p8 = scmp.ge.s32.totalorder %s2982_s19, 4   ;;  %s3289_s15 = smov %s2936_s16 }
 0x1a9   : > { %s3290_s16 = smov %s2990_s22  ;;  %s3291_s17 = smov %s2982_s19 }
 0x1aa   :  { %14 = sbr.rel (!%p12_p8) target bundleno = 2 (0x2), region = 118 }

// kernel: vgg19_feature_loss.24
= control target key start
LH: loop header
LB: loop body
LE: loop exit
PB: predicated region body
PF: predicated region fallthrough
CT: control target
= control target key end

     0   :  { %s2490_s15 = smov 0   ;;  %s2728_s0 = inlined_call_operand.vmem [shape: bf16[8,2304], index: 0, kind: input, shape index: {}]   ;;  %s2729_s1 = inlined_call_operand.vmem [shape: bf16[4,2304,128], index: 1, kind: input, shape index: {}]   ;;  %s2730_s2 = inlined_call_operand.vmem [shape: f32[1,512], index: 2, kind: input, shape index: {}]   ;;  %s2731_s3 = inlined_call_operand.vmem [shape: bf16[8,512], index: 3, kind: output, shape index: {0}]   ;;  %s2732_s4 = inlined_call_operand.vmem [shape: f32[1,512], index: 4, kind: output, shape index: {1}]  }
   0x1 LB: > { %s1916_s16 = sadd.s32 4294967295, %s2463_s15   ;;  %p1920_p0 = scmp.ge.s32.totalorder %s2463_s15, 1  ;;  %s2463_s15 = sphi %s2490_s15, %s15_s15  }
   0x2   : > { %p173_p1 = scmp.lt.s32.totalorder %s2463_s15, 5 }
   0x4   : > { %p174_p2 = pnand %p1920_p0, %p173_p1 }
   0x5   : > { %p204_p3 = scmp.lt.s32.totalorder (!%p174_p2), %s1916_s16, 3  ;;  %v2501_v0 = vld [vmem:[%s2728_s0] sm:$0xff] (!%p174_p2)  ;;  %v2506_v1 = vld [vmem:[%s2728_s0 + $0x8] sm:$0xff] (!%p174_p2)  ;;  %v2552_v33 = vld [vmem:[%s2728_s0 + $0x10] sm:$0xff] (!%p174_p2)  ;;  %vm1820_vm0 = vcmask (!%p174_p2), 1043456  }
   0x6   : > { %177 = sbr.rel (%p174_p2) target bundleno = 416 (0x1a0), region = 32  ;;  %v1924_v2 = vcombine.high (!%p174_p2), %v2501_v0, %v2501_v0  ;;  %v1926_v3 = vcombine.high (!%p174_p2), %v2506_v1, %v2506_v1  ;;  %v2559_v36 = vld [vmem:[%s2728_s0 + $0x18] sm:$0xff] (!%p174_p2)  ;;  %v1923_v38 = vcombine.low (!%p174_p2), %v2501_v0, %v2501_v0  ;;  %v1925_v39 = vcombine.low (!%p174_p2), %v2506_v1, %v2506_v1 }
   0x7   : > { %v1928_v42 = vcombine.high (!%p174_p2), %v2552_v33, %v2552_v33  ;;  %v1930_v45 = vcombine.high (!%p174_p2), %v2559_v36, %v2559_v36 }
   0x8   : > { %1476 = vmatprep.mubr.bf16.mxu0 (!%p174_p2), %v1924_v2  ;;  %1516 = vmatprep.mubr.bf16.mxu1 (!%p174_p2), %v1926_v3 }
   0xd   : > { %s2734_s16 = smov (!%p204_p3, %s1916_s16), 3 }
   0xe   : > { %s2286_s21 = smul.u32 1152, %s2734_s16  ;;  %s211_s17 = scalar_lea.vmem %s2730_s2, %s2734_s16 }
   0xf   : > { %s1922_s18 = sshll.u32 %s2734_s16, 2 }
  0x10   : > { %s2518_s24 = scalar_lea.vmem %s2729_s1, %s2286_s21  ;;  %s215_s21 = scalar_lea.vmem %s2731_s3, %s1922_s18 }
  0x11   : > { %v2295_v4 = vld [vmem:[%s2518_s24 + $0x40] sm:$0xff]   ;;  %v2299_v8 = vld [vmem:[%s2518_s24 + $0x48] sm:$0xff]   ;;  %v2303_v12 = vld [vmem:[%s2518_s24 + $0x50] sm:$0xff]  }
  0x12   : > { %v2296_v5 = vld [vmem:[%s2518_s24 + $0xc0] sm:$0xff]   ;;  %2088 = vmatprep.subr.bf16.mxu0 %v2295_v4  ;;  %v2300_v9 = vld [vmem:[%s2518_s24 + $0xc8] sm:$0xff]   ;;  %v2304_v13 = vld [vmem:[%s2518_s24 + $0xd0] sm:$0xff]  }
  0x13   : > { %v2297_v6 = vld [vmem:[%s2518_s24] sm:$0xff]   ;;  %2110 = vmatprep.subr.bf16.mxu1 %v2296_v5  ;;  %v2301_v10 = vld [vmem:[%s2518_s24 + $0x8] sm:$0xff]   ;;  %v2305_v14 = vld [vmem:[%s2518_s24 + $0x10] sm:$0xff]  }
  0x14   : > { %v2298_v7 = vld [vmem:[%s2518_s24 + $0x80] sm:$0xff]   ;;  %2089 = vmatpush3.bf16.msra.mxu0 %v2297_v6  ;;  %v2302_v11 = vld [vmem:[%s2518_s24 + $0x88] sm:$0xff]   ;;  %v2306_v15 = vld [vmem:[%s2518_s24 + $0x90] sm:$0xff]  }
  0x15   : > { %2111 = vmatpush3.bf16.msra.mxu1 %v2298_v7  ;;  %2090 = vmatprep.subr.bf16.mxu0 %v2299_v8  ;;  %v2307_v16 = vld [vmem:[%s2518_s24 + $0x58] sm:$0xff]   ;;  %v2311_v20 = vld [vmem:[%s2518_s24 + $0x60] sm:$0xff]   ;;  %v2315_v24 = vld [vmem:[%s2518_s24 + $0x68] sm:$0xff]  }
  0x16   : > { %2112 = vmatprep.subr.bf16.mxu1 %v2300_v9  ;;  %v2308_v17 = vld [vmem:[%s2518_s24 + $0xd8] sm:$0xff]   ;;  %v2312_v21 = vld [vmem:[%s2518_s24 + $0xe0] sm:$0xff]   ;;  %v2316_v25 = vld [vmem:[%s2518_s24 + $0xe8] sm:$0xff]  }
  0x17   : > { %v2309_v18 = vld [vmem:[%s2518_s24 + $0x18] sm:$0xff]   ;;  %v2313_v22 = vld [vmem:[%s2518_s24 + $0x20] sm:$0xff]   ;;  %v2317_v26 = vld [vmem:[%s2518_s24 + $0x28] sm:$0xff]  }
  0x18   : > { %2091 = vmatpush3.bf16.msra.mxu0 %v2301_v10  ;;  %v2310_v19 = vld [vmem:[%s2518_s24 + $0x98] sm:$0xff]   ;;  %v2314_v23 = vld [vmem:[%s2518_s24 + $0xa0] sm:$0xff]   ;;  %v2318_v27 = vld [vmem:[%s2518_s24 + $0xa8] sm:$0xff]  }
  0x19   : > { %2113 = vmatpush3.bf16.msra.mxu1 %v2302_v11  ;;  %2092 = vmatprep.subr.bf16.mxu0 %v2303_v12  ;;  %v2319_v28 = vld [vmem:[%s2518_s24 + $0x70] sm:$0xff]   ;;  %v2323_v32 = vld [vmem:[%s2518_s24 + $0x78] sm:$0xff]   ;;  %v2331_v40 = vld [vmem:[%s2518_s24 + $0x140] sm:$0xff]   ;;  %v1927_v11 = vcombine.low %v2552_v33, %v2552_v33 }
  0x1a   : > { %2114 = vmatprep.subr.bf16.mxu1 %v2304_v13  ;;  %v2320_v29 = vld [vmem:[%s2518_s24 + $0xf0] sm:$0xff]   ;;  %v2324_v34 = vld [vmem:[%s2518_s24 + $0xf8] sm:$0xff]   ;;  %v2332_v41 = vld [vmem:[%s2518_s24 + $0x100] sm:$0xff]  }
  0x1b   : > { %v2321_v30 = vld [vmem:[%s2518_s24 + $0x30] sm:$0xff]   ;;  %v2325_v35 = vld [vmem:[%s2518_s24 + $0x38] sm:$0xff]   ;;  %v2333_v43 = vld [vmem:[%s2518_s24 + $0x1c0] sm:$0xff]  }
  0x1c   : > { %2093 = vmatpush3.bf16.msra.mxu0 %v2305_v14  ;;  %v2322_v31 = vld [vmem:[%s2518_s24 + $0xb0] sm:$0xff]   ;;  %v2326_v37 = vld [vmem:[%s2518_s24 + $0xb8] sm:$0xff]   ;;  %v2334_v44 = vld [vmem:[%s2518_s24 + $0x180] sm:$0xff]   ;;  %v1929_v14 = vcombine.low %v2559_v36, %v2559_v36 }
  0x1d   : > { %2115 = vmatpush3.bf16.msra.mxu1 %v2306_v15  ;;  %2094 = vmatprep.subr.bf16.mxu0 %v2307_v16  ;;  %v2335_v46 = vld [vmem:[%s2518_s24 + $0x148] sm:$0xff]   ;;  %v2339_v50 = vld [vmem:[%s2518_s24 + $0x150] sm:$0xff]   ;;  %v2343_v54 = vld [vmem:[%s2518_s24 + $0x158] sm:$0xff]  }
  0x1e   : > { %2116 = vmatprep.subr.bf16.mxu1 %v2308_v17  ;;  %v2336_v47 = vld [vmem:[%s2518_s24 + $0x108] sm:$0xff]   ;;  %v2340_v51 = vld [vmem:[%s2518_s24 + $0x110] sm:$0xff]   ;;  %v2344_v55 = vld [vmem:[%s2518_s24 + $0x118] sm:$0xff]  }
  0x1f   : > { %v2337_v48 = vld [vmem:[%s2518_s24 + $0x1c8] sm:$0xff]   ;;  %v2341_v52 = vld [vmem:[%s2518_s24 + $0x1d0] sm:$0xff]   ;;  %v2345_v56 = vld [vmem:[%s2518_s24 + $0x1d8] sm:$0xff]  }
  0x20   : > { %2095 = vmatpush3.bf16.msra.mxu0 %v2309_v18  ;;  %v2338_v49 = vld [vmem:[%s2518_s24 + $0x188] sm:$0xff]   ;;  %v2342_v53 = vld [vmem:[%s2518_s24 + $0x190] sm:$0xff]   ;;  %v2346_v57 = vld [vmem:[%s2518_s24 + $0x198] sm:$0xff]  }
  0x21   : > { %2117 = vmatpush3.bf16.msra.mxu1 %v2310_v19  ;;  %2096 = vmatprep.subr.bf16.mxu0 %v2311_v20  ;;  %v2347_v58 = vld [vmem:[%s2518_s24 + $0x160] sm:$0xff]   ;;  %v2351_v62 = vld [vmem:[%s2518_s24 + $0x168] sm:$0xff]   ;;  %v2355_v2 = vld [vmem:[%s2518_s24 + $0x170] sm:$0xff]  }
  0x22   : > { %2118 = vmatprep.subr.bf16.mxu1 %v2312_v21  ;;  %v2348_v59 = vld [vmem:[%s2518_s24 + $0x120] sm:$0xff]   ;;  %v2352_v63 = vld [vmem:[%s2518_s24 + $0x128] sm:$0xff]   ;;  %v2356_v3 = vld [vmem:[%s2518_s24 + $0x130] sm:$0xff]  }
  0x23   : > { %v2349_v60 = vld [vmem:[%s2518_s24 + $0x1e0] sm:$0xff]   ;;  %v2353_v0 = vld [vmem:[%s2518_s24 + $0x1e8] sm:$0xff]   ;;  %v2357_v4 = vld [vmem:[%s2518_s24 + $0x1f0] sm:$0xff]  }
  0x24   : > { %2097 = vmatpush3.bf16.msra.mxu0 %v2313_v22  ;;  %v2350_v61 = vld [vmem:[%s2518_s24 + $0x1a0] sm:$0xff]   ;;  %v2354_v1 = vld [vmem:[%s2518_s24 + $0x1a8] sm:$0xff]   ;;  %v2358_v5 = vld [vmem:[%s2518_s24 + $0x1b0] sm:$0xff]  }
  0x25   : > { %2119 = vmatpush3.bf16.msra.mxu1 %v2314_v23  ;;  %2098 = vmatprep.subr.bf16.mxu0 %v2315_v24  ;;  %v2359_v6 = vld [vmem:[%s2518_s24 + $0x178] sm:$0xff]   ;;  %v2602_v7 = vld [vmem:[%s2728_s0 + $0x20] sm:$0xff]  ;;  %v2609_v10 = vld [vmem:[%s2728_s0 + $0x28] sm:$0xff] }
  0x26   : > { %2120 = vmatprep.subr.bf16.mxu1 %v2316_v25  ;;  %v2360_v8 = vld [vmem:[%s2518_s24 + $0x138] sm:$0xff]   ;;  %v2365_v13 = vld [vmem:[%s2518_s24 + $0x240] sm:$0xff]   ;;  %v1932_v16 = vcombine.high %v2602_v7, %v2602_v7  ;;  %v1934_v19 = vcombine.high %v2609_v10, %v2609_v10  ;;  %v2371_v20 = vld [vmem:[%s2518_s24 + $0x248] sm:$0xff]  }
  0x27   : > { %v2361_v9 = vld [vmem:[%s2518_s24 + $0x1f8] sm:$0xff]   ;;  %v2368_v15 = vld [vmem:[%s2518_s24 + $0x200] sm:$0xff]   ;;  %v2372_v21 = vld [vmem:[%s2518_s24 + $0x208] sm:$0xff]  }
  0x28   : > { %2099 = vmatpush3.bf16.msra.mxu0 %v2317_v26  ;;  %v2364_v12 = vld [vmem:[%s2518_s24 + $0x1b8] sm:$0xff]   ;;  %v2369_v17 = vld [vmem:[%s2518_s24 + $0x2c0] sm:$0xff]   ;;  %v2373_v22 = vld [vmem:[%s2518_s24 + $0x2c8] sm:$0xff]  }
  0x29   : > { %2121 = vmatpush3.bf16.msra.mxu1 %v2318_v27  ;;  %2100 = vmatprep.subr.bf16.mxu0 %v2319_v28  ;;  %v2370_v18 = vld [vmem:[%s2518_s24 + $0x280] sm:$0xff]   ;;  %v2374_v23 = vld [vmem:[%s2518_s24 + $0x288] sm:$0xff]   ;;  %v2375_v24 = vld [vmem:[%s2518_s24 + $0x250] sm:$0xff]  }
  0x2a   : > { %2122 = vmatprep.subr.bf16.mxu1 %v2320_v29  ;;  %v2376_v25 = vld [vmem:[%s2518_s24 + $0x210] sm:$0xff]   ;;  %v2379_v28 = vld [vmem:[%s2518_s24 + $0x258] sm:$0xff]   ;;  %v2384_v33 = vld [vmem:[%s2518_s24 + $0x220] sm:$0xff]  }
  0x2b   : > { %v2377_v26 = vld [vmem:[%s2518_s24 + $0x2d0] sm:$0xff]   ;;  %v2380_v29 = vld [vmem:[%s2518_s24 + $0x218] sm:$0xff]   ;;  %v2387_v36 = vld [vmem:[%s2518_s24 + $0x268] sm:$0xff]  }
  0x2c   : > { %2101 = vmatpush3.bf16.msra.mxu0 %v2321_v30  ;;  %v2378_v27 = vld [vmem:[%s2518_s24 + $0x290] sm:$0xff]   ;;  %v2381_v30 = vld [vmem:[%s2518_s24 + $0x2d8] sm:$0xff]  }
  0x2d   : > { %2123 = vmatpush3.bf16.msra.mxu1 %v2322_v31  ;;  %2102 = vmatprep.subr.bf16.mxu0 %v2323_v32  ;;  %v2382_v31 = vld [vmem:[%s2518_s24 + $0x298] sm:$0xff]   ;;  %v2383_v32 = vld [vmem:[%s2518_s24 + $0x260] sm:$0xff]  }
  0x2e   : > { %2124 = vmatprep.subr.bf16.mxu1 %v2324_v34  ;;  %v2385_v34 = vld [vmem:[%s2518_s24 + $0x2e0] sm:$0xff]  }
  0x30   : > { %2103 = vmatpush3.bf16.msra.mxu0 %v2325_v35  ;;  %v2386_v35 = vld [vmem:[%s2518_s24 + $0x2a0] sm:$0xff]  }
  0x31   : > { %2125 = vmatpush3.bf16.msra.mxu1 %v2326_v37  ;;  %2132 = vmatprep.subr.bf16.mxu0 %v2331_v40  ;;  %v2388_v37 = vld [vmem:[%s2518_s24 + $0x228] sm:$0xff]   ;;  %v2391_v40 = vld [vmem:[%s2518_s24 + $0x270] sm:$0xff]  }
  0x32   : > { %2154 = vmatprep.subr.bf16.mxu1 %v2333_v43  ;;  %v2394_v43 = vld [vmem:[%s2518_s24 + $0x2b0] sm:$0xff]  }
  0x33   : > { %1477 = vmatmul.mubr.bf16.vlgmr.msra.gmra.mrb[0].mxu0 %v1923_v38  ;;  %v2389_v38 = vld [vmem:[%s2518_s24 + $0x2e8] sm:$0xff]  }
  0x34   : > { %1517 = vmatmul.mubr.bf16.vlgmr.msra.gmra.mrb[0].mxu1 %v1925_v39  ;;  %2133 = vmatpush3.bf16.msra.mxu0 %v2332_v41  ;;  %v2390_v39 = vld [vmem:[%s2518_s24 + $0x2a8] sm:$0xff]   ;;  %v2392_v41 = vld [vmem:[%s2518_s24 + $0x230] sm:$0xff]  }
  0x35   : > { %1556 = vmatprep.mubr.bf16.mxu0 %v1928_v42  ;;  %2155 = vmatpush3.bf16.msra.mxu1 %v2334_v44  ;;  %v2393_v42 = vld [vmem:[%s2518_s24 + $0x2f0] sm:$0xff]   ;;  %v2395_v44 = vld [vmem:[%s2518_s24 + $0x278] sm:$0xff]  }
  0x36   : > { %2134 = vmatprep.subr.bf16.mxu0 %v2335_v46  ;;  %1596 = vmatprep.mubr.bf16.mxu1 %v1930_v45  ;;  %v2396_v45 = vld [vmem:[%s2518_s24 + $0x238] sm:$0xff]  }
  0x37   : > { %2156 = vmatprep.subr.bf16.mxu1 %v2337_v48  ;;  %v2397_v46 = vld [vmem:[%s2518_s24 + $0x2f8] sm:$0xff]  }
  0x38   : > { %2135 = vmatpush3.bf16.msra.mxu0 %v2336_v47  ;;  %v1931_v47 = vcombine.low %v2602_v7, %v2602_v7  ;;  %v2400_v48 = vld [vmem:[%s2518_s24 + $0x2b8] sm:$0xff]   ;;  %v2424_v7 = vld [vmem:[%s2518_s24 + $0x328] sm:$0xff]  }
  0x39   : > { %2157 = vmatpush3.bf16.msra.mxu1 %v2338_v49  ;;  %2136 = vmatprep.subr.bf16.mxu0 %v2339_v50  ;;  %v2401_v49 = vld [vmem:[%s2518_s24 + $0x340] sm:$0xff]   ;;  %v1933_v50 = vcombine.low %v2609_v10, %v2609_v10  ;;  %v2427_v10 = vld [vmem:[%s2518_s24 + $0x370] sm:$0xff]  }
  0x3a   : > { %2158 = vmatprep.subr.bf16.mxu1 %v2341_v52  ;;  %v2405_v52 = vld [vmem:[%s2518_s24 + $0x3c0] sm:$0xff]  }
  0x3c   : > { %2137 = vmatpush3.bf16.msra.mxu0 %v2340_v51  ;;  %v2404_v51 = vld [vmem:[%s2518_s24 + $0x300] sm:$0xff]  }
  0x3d   : > { %2159 = vmatpush3.bf16.msra.mxu1 %v2342_v53  ;;  %2138 = vmatprep.subr.bf16.mxu0 %v2343_v54  ;;  %v2406_v53 = vld [vmem:[%s2518_s24 + $0x380] sm:$0xff]   ;;  %v2407_v54 = vld [vmem:[%s2518_s24 + $0x348] sm:$0xff]  }
  0x3e   : > { %2160 = vmatprep.subr.bf16.mxu1 %v2345_v56  ;;  %v2409_v56 = vld [vmem:[%s2518_s24 + $0x3c8] sm:$0xff]  }
  0x40   : > { %2139 = vmatpush3.bf16.msra.mxu0 %v2344_v55  ;;  %v2408_v55 = vld [vmem:[%s2518_s24 + $0x308] sm:$0xff]  }
  0x41   : > { %2161 = vmatpush3.bf16.msra.mxu1 %v2346_v57  ;;  %2140 = vmatprep.subr.bf16.mxu0 %v2347_v58  ;;  %v2410_v57 = vld [vmem:[%s2518_s24 + $0x388] sm:$0xff]   ;;  %v2411_v58 = vld [vmem:[%s2518_s24 + $0x350] sm:$0xff]  }
  0x42   : > { %2162 = vmatprep.subr.bf16.mxu1 %v2349_v60  ;;  %v2413_v60 = vld [vmem:[%s2518_s24 + $0x3d0] sm:$0xff]  }
  0x44   : > { %2141 = vmatpush3.bf16.msra.mxu0 %v2348_v59  ;;  %v2412_v59 = vld [vmem:[%s2518_s24 + $0x310] sm:$0xff]  }
  0x45   : > { %2163 = vmatpush3.bf16.msra.mxu1 %v2350_v61  ;;  %2142 = vmatprep.subr.bf16.mxu0 %v2351_v62  ;;  %v2414_v61 = vld [vmem:[%s2518_s24 + $0x390] sm:$0xff]   ;;  %v2415_v62 = vld [vmem:[%s2518_s24 + $0x358] sm:$0xff]  }
  0x46   : > { %2164 = vmatprep.subr.bf16.mxu1 %v2353_v0  ;;  %v2417_v0 = vld [vmem:[%s2518_s24 + $0x3d8] sm:$0xff]  }
  0x48   : > { %2143 = vmatpush3.bf16.msra.mxu0 %v2352_v63  ;;  %v2416_v63 = vld [vmem:[%s2518_s24 + $0x318] sm:$0xff]  }
  0x49   : > { %2165 = vmatpush3.bf16.msra.mxu1 %v2354_v1  ;;  %2144 = vmatprep.subr.bf16.mxu0 %v2355_v2  ;;  %v2418_v1 = vld [vmem:[%s2518_s24 + $0x398] sm:$0xff]   ;;  %v2419_v2 = vld [vmem:[%s2518_s24 + $0x360] sm:$0xff]  }
  0x4a   : > { %2166 = vmatprep.subr.bf16.mxu1 %v2357_v4  ;;  %v2421_v4 = vld [vmem:[%s2518_s24 + $0x3e0] sm:$0xff]  }
  0x4c   : > { %2145 = vmatpush3.bf16.msra.mxu0 %v2356_v3  ;;  %v2420_v3 = vld [vmem:[%s2518_s24 + $0x320] sm:$0xff]  }
  0x4d   : > { %2167 = vmatpush3.bf16.msra.mxu1 %v2358_v5  ;;  %2146 = vmatprep.subr.bf16.mxu0 %v2359_v6  ;;  %v2422_v5 = vld [vmem:[%s2518_s24 + $0x3a0] sm:$0xff]   ;;  %v2423_v6 = vld [vmem:[%s2518_s24 + $0x368] sm:$0xff]  }
  0x4e   : > { %2168 = vmatprep.subr.bf16.mxu1 %v2361_v9  ;;  %v2426_v9 = vld [vmem:[%s2518_s24 + $0x3a8] sm:$0xff]  }
  0x50   : > { %2147 = vmatpush3.bf16.msra.mxu0 %v2360_v8  ;;  %v2425_v8 = vld [vmem:[%s2518_s24 + $0x3e8] sm:$0xff]  }
  0x51   : > { %2169 = vmatpush3.bf16.msra.mxu1 %v2364_v12  ;;  %2176 = vmatprep.subr.bf16.mxu0 %v2365_v13  ;;  %v2429_v12 = vld [vmem:[%s2518_s24 + $0x3f0] sm:$0xff]  }
  0x52   : > { %2198 = vmatprep.subr.bf16.mxu1 %v2369_v17  ;;  %v2430_v13 = vld [vmem:[%s2518_s24 + $0x3b0] sm:$0xff]  }
  0x53   : > { %1557 = vmatmul.mubr.bf16.vlgmr.msra.gmra.mrb[4].mxu0 %v1927_v11  ;;  %v2428_v11 = vld [vmem:[%s2518_s24 + $0x330] sm:$0xff]  }
  0x54   : > { %2177 = vmatpush3.bf16.msra.mxu0 %v2368_v15  ;;  %1597 = vmatmul.mubr.bf16.vlgmr.msra.gmra.mrb[4].mxu1 %v1929_v14  ;;  %v2431_v14 = vld [vmem:[%s2518_s24 + $0x378] sm:$0xff]   ;;  %v226_v17 = vld [vmem:[%s2728_s0 + $0x30] sm:$0xff] }
  0x55   : > { %1636 = vmatprep.mubr.bf16.mxu0 %v1932_v16  ;;  %2199 = vmatpush3.bf16.msra.mxu1 %v2370_v18  ;;  %v2432_v15 = vld [vmem:[%s2518_s24 + $0x338] sm:$0xff]   ;;  %v1935_v18 = vcombine.low %v226_v17, %v226_v17 }
  0x56   : > { %2178 = vmatprep.subr.bf16.mxu0 %v2371_v20  ;;  %1676 = vmatprep.mubr.bf16.mxu1 %v1934_v19  ;;  %v2433_v16 = vld [vmem:[%s2518_s24 + $0x3f8] sm:$0xff]   ;;  %v1936_v19 = vcombine.high %v226_v17, %v226_v17 }
  0x57   : > { %2200 = vmatprep.subr.bf16.mxu1 %v2373_v22  ;;  %v2436_v20 = vld [vmem:[%s2518_s24 + $0x3b8] sm:$0xff]  }
  0x58   : > { %2179 = vmatpush3.bf16.msra.mxu0 %v2372_v21  ;;  %v2437_v21 = vld [vmem:[%s2518_s24 + $0x440] sm:$0xff]   ;;  %v227_v22 = vld [vmem:[%s2728_s0 + $0x38] sm:$0xff] }
  0x59   : > { %2201 = vmatpush3.bf16.msra.mxu1 %v2374_v23  ;;  %2180 = vmatprep.subr.bf16.mxu0 %v2375_v24  ;;  %v1937_v23 = vcombine.low %v227_v22, %v227_v22  ;;  %v1938_v24 = vcombine.high %v227_v22, %v227_v22 }
  0x5a   : > { %2202 = vmatprep.subr.bf16.mxu1 %v2377_v26  ;;  %v2441_v26 = vld [vmem:[%s2518_s24 + $0x448] sm:$0xff]  }
  0x5c   : > { %2181 = vmatpush3.bf16.msra.mxu0 %v2376_v25  ;;  %v2440_v25 = vld [vmem:[%s2518_s24 + $0x400] sm:$0xff]  }
  0x5d   : > { %2203 = vmatpush3.bf16.msra.mxu1 %v2378_v27  ;;  %2182 = vmatprep.subr.bf16.mxu0 %v2379_v28  ;;  %v2442_v27 = vld [vmem:[%s2518_s24 + $0x408] sm:$0xff]   ;;  %v2443_v28 = vld [vmem:[%s2518_s24 + $0x450] sm:$0xff]  }
  0x5e   : > { %2204 = vmatprep.subr.bf16.mxu1 %v2381_v30  ;;  %v2445_v30 = vld [vmem:[%s2518_s24 + $0x458] sm:$0xff]  }
  0x60   : > { %2183 = vmatpush3.bf16.msra.mxu0 %v2380_v29  ;;  %v2444_v29 = vld [vmem:[%s2518_s24 + $0x410] sm:$0xff]  }
  0x61   : > { %2205 = vmatpush3.bf16.msra.mxu1 %v2382_v31  ;;  %2184 = vmatprep.subr.bf16.mxu0 %v2383_v32  ;;  %v2446_v31 = vld [vmem:[%s2518_s24 + $0x418] sm:$0xff]   ;;  %v2447_v32 = vld [vmem:[%s2518_s24 + $0x460] sm:$0xff]  }
  0x62   : > { %2206 = vmatprep.subr.bf16.mxu1 %v2385_v34  ;;  %v228_v34 = vld [vmem:[%s2728_s0 + $0x40] sm:$0xff] }
  0x64   : > { %2185 = vmatpush3.bf16.msra.mxu0 %v2384_v33  ;;  %v2448_v33 = vld [vmem:[%s2518_s24 + $0x420] sm:$0xff]  }
  0x65   : > { %2207 = vmatpush3.bf16.msra.mxu1 %v2386_v35  ;;  %2186 = vmatprep.subr.bf16.mxu0 %v2387_v36  ;;  %v2449_v35 = vld [vmem:[%s2518_s24 + $0x468] sm:$0xff]   ;;  %v1940_v36 = vcombine.high %v228_v34, %v228_v34 }
  0x66   : > { %2208 = vmatprep.subr.bf16.mxu1 %v2389_v38  ;;  %v2451_v38 = vld [vmem:[%s2518_s24 + $0x470] sm:$0xff]  }
  0x68   : > { %2187 = vmatpush3.bf16.msra.mxu0 %v2388_v37  ;;  %v2450_v37 = vld [vmem:[%s2518_s24 + $0x428] sm:$0xff]  }
  0x69   : > { %2209 = vmatpush3.bf16.msra.mxu1 %v2390_v39  ;;  %2188 = vmatprep.subr.bf16.mxu0 %v2391_v40  ;;  %v2452_v39 = vld [vmem:[%s2518_s24 + $0x430] sm:$0xff]   ;;  %v2453_v40 = vld [vmem:[%s2518_s24 + $0x478] sm:$0xff]  }
  0x6a   : > { %2210 = vmatprep.subr.bf16.mxu1 %v2393_v42  ;;  %v1939_v42 = vcombine.low %v228_v34, %v228_v34 }
  0x6c   : > { %2189 = vmatpush3.bf16.msra.mxu0 %v2392_v41  ;;  %v2454_v41 = vld [vmem:[%s2518_s24 + $0x438] sm:$0xff]   ;;  %s218_s24 = scalar_lea.vmem %s2732_s4, %s2734_s16 }
  0x6d   : > { %2211 = vmatpush3.bf16.msra.mxu1 %v2394_v43  ;;  %2190 = vmatprep.subr.bf16.mxu0 %v2395_v44 }
  0x6e   : > { %2212 = vmatprep.subr.bf16.mxu1 %v2397_v46 }
  0x70   : > { %2191 = vmatpush3.bf16.msra.mxu0 %v2396_v45 }
  0x71   : > { %2213 = vmatpush3.bf16.msra.mxu1 %v2400_v48  ;;  %2220 = vmatprep.subr.bf16.mxu0 %v2401_v49 }
  0x72   : > { %2242 = vmatprep.subr.bf16.mxu1 %v2405_v52 }
  0x73   : > { %1637 = vmatmul.mubr.bf16.vlgmr.msra.gmra.mrb[8].mxu0 %v1931_v47 }
  0x74   : > { %2221 = vmatpush3.bf16.msra.mxu0 %v2404_v51  ;;  %1677 = vmatmul.mubr.bf16.vlgmr.msra.gmra.mrb[8].mxu1 %v1933_v50 }
  0x75   : > { %2243 = vmatpush3.bf16.msra.mxu1 %v2406_v53  ;;  %2222 = vmatprep.subr.bf16.mxu0 %v2407_v54 }
  0x76   : > { %2244 = vmatprep.subr.bf16.mxu1 %v2409_v56  ;;  %1716 = vmatprep.mubr.bf16.mxu0 %v1936_v19 }
  0x77   : > { %1756 = vmatprep.mubr.bf16.mxu1 %v1938_v24 }
  0x78   : > { %2223 = vmatpush3.bf16.msra.mxu0 %v2408_v55 }
  0x79   : > { %2245 = vmatpush3.bf16.msra.mxu1 %v2410_v57  ;;  %2224 = vmatprep.subr.bf16.mxu0 %v2411_v58 }
  0x7a   : > { %2246 = vmatprep.subr.bf16.mxu1 %v2413_v60 }
  0x7c   : > { %2225 = vmatpush3.bf16.msra.mxu0 %v2412_v59 }
  0x7d   : > { %2247 = vmatpush3.bf16.msra.mxu1 %v2414_v61  ;;  %2226 = vmatprep.subr.bf16.mxu0 %v2415_v62 }
  0x7e   : > { %2248 = vmatprep.subr.bf16.mxu1 %v2417_v0 }
  0x80   : > { %2227 = vmatpush3.bf16.msra.mxu0 %v2416_v63 }
  0x81   : > { %2249 = vmatpush3.bf16.msra.mxu1 %v2418_v1  ;;  %2228 = vmatprep.subr.bf16.mxu0 %v2419_v2 }
  0x82   : > { %2250 = vmatprep.subr.bf16.mxu1 %v2421_v4 }
  0x84   : > { %2229 = vmatpush3.bf16.msra.mxu0 %v2420_v3 }
  0x85   : > { %2251 = vmatpush3.bf16.msra.mxu1 %v2422_v5  ;;  %2230 = vmatprep.subr.bf16.mxu0 %v2423_v6 }
  0x86   : > { %2252 = vmatprep.subr.bf16.mxu1 %v2425_v8 }
  0x88   : > { %2231 = vmatpush3.bf16.msra.mxu0 %v2424_v7 }
  0x89   : > { %2253 = vmatpush3.bf16.msra.mxu1 %v2426_v9  ;;  %2232 = vmatprep.subr.bf16.mxu0 %v2427_v10 }
  0x8a   : > { %2254 = vmatprep.subr.bf16.mxu1 %v2429_v12 }
  0x8c   : > { %2233 = vmatpush3.bf16.msra.mxu0 %v2428_v11 }
  0x8d   : > { %2255 = vmatpush3.bf16.msra.mxu1 %v2430_v13  ;;  %2234 = vmatprep.subr.bf16.mxu0 %v2431_v14 }
  0x8e   : > { %2256 = vmatprep.subr.bf16.mxu1 %v2433_v16 }
  0x90   : > { %2235 = vmatpush3.bf16.msra.mxu0 %v2432_v15 }
  0x91   : > { %2257 = vmatpush3.bf16.msra.mxu1 %v2436_v20  ;;  %2264 = vmatprep.subr.bf16.mxu0 %v2437_v21 }
  0x93   : > { %1717 = vmatmul.mubr.bf16.vlgmr.msra.gmra.mrb[12].mxu0 %v1935_v18 }
  0x94   : > { %2265 = vmatpush3.bf16.msra.mxu0 %v2440_v25  ;;  %1757 = vmatmul.mubr.bf16.vlgmr.msra.gmra.mrb[12].mxu1 %v1937_v23 }
  0x95   : > { %2266 = vmatprep.subr.bf16.mxu0 %v2441_v26  ;;  %1796 = vmatprep.mubr.bf16.mxu0 %v1940_v36 }
  0x98   : > { %2267 = vmatpush3.bf16.msra.mxu0 %v2442_v27 }
  0x99   : > { %2268 = vmatprep.subr.bf16.mxu0 %v2443_v28 }
  0x9c   : > { %2269 = vmatpush3.bf16.msra.mxu0 %v2444_v29 }
  0x9d   : > { %2270 = vmatprep.subr.bf16.mxu0 %v2445_v30  ;;  %v2085_v30 = vld [vmem:[%s211_s17] ss:$0 sm:$0xff] }
  0xa0   : > { %2271 = vmatpush3.bf16.msra.mxu0 %v2446_v31 }
  0xa1   : > { %2272 = vmatprep.subr.bf16.mxu0 %v2447_v32 }
  0xa4   : > { %2273 = vmatpush3.bf16.msra.mxu0 %v2448_v33 }
  0xa5   : > { %2274 = vmatprep.subr.bf16.mxu0 %v2449_v35 }
  0xa8   : > { %2275 = vmatpush3.bf16.msra.mxu0 %v2450_v37 }
  0xa9   : > { %2276 = vmatprep.subr.bf16.mxu0 %v2451_v38 }
  0xac   : > { %2277 = vmatpush3.bf16.msra.mxu0 %v2452_v39 }
  0xad   : > { %2278 = vmatprep.subr.bf16.mxu0 %v2453_v40 }
  0xb0   : > { %2279 = vmatpush3.bf16.msra.mxu0 %v2454_v41 }
  0xb3   : > { %1797 = vmatmul.mubr.bf16.vlgmr.msra.gmra.mrb[16].mxu0 %v1939_v42 }
 0x106   : > { %v2104_v43 = vpop.f32.mrb[0].mxu0 }
 0x107   : > { %v2126_v44 = vpop.f32.mrb[0].mxu1  ;;  %v2105_v45 = vpop.f32.mrb[1].mxu0 }
 0x108   : > { %v2106_v46 = vadd.f32 %v2105_v45, %v2104_v43  ;;  %v2127_v47 = vpop.f32.mrb[1].mxu1  ;;  %v2107_v48 = vpop.f32.mrb[2].mxu0 }
 0x109   : > { %v2128_v49 = vadd.f32 %v2127_v47, %v2126_v44  ;;  %v2108_v50 = vpop.f32.mrb[3].mxu0  ;;  %v2129_v51 = vpop.f32.mrb[2].mxu1 }
 0x10a   : > { %v2130_v52 = vpop.f32.mrb[3].mxu1 }
 0x10b   : > { %v1519_v53 = vadd.f32 %v2128_v49, %v2106_v46 }
 0x126   : > { %v2148_v54 = vpop.f32.mrb[4].mxu0 }
 0x127   : > { %v2149_v55 = vpop.f32.mrb[5].mxu0  ;;  %v2170_v58 = vpop.f32.mrb[4].mxu1 }
 0x128   : > { %v2150_v56 = vadd.f32 %v2149_v55, %v2148_v54  ;;  %v2151_v57 = vpop.f32.mrb[6].mxu0  ;;  %v2171_v60 = vpop.f32.mrb[5].mxu1 }
 0x129   : > { %v2152_v59 = vpop.f32.mrb[7].mxu0  ;;  %v2172_v62 = vadd.f32 %v2171_v60, %v2170_v58  ;;  %v2173_v63 = vpop.f32.mrb[6].mxu1 }
 0x12a   : > { %v1559_v61 = vadd.f32 %v2150_v56, %v1519_v53  ;;  %v2174_v0 = vpop.f32.mrb[7].mxu1 }
 0x12c   : > { %v1599_v1 = vadd.f32 %v2172_v62, %v1559_v61 }
 0x146   : > { %v2192_v2 = vpop.f32.mrb[8].mxu0 }
 0x147   : > { %v2193_v3 = vpop.f32.mrb[9].mxu0  ;;  %v2214_v6 = vpop.f32.mrb[8].mxu1 }
 0x148   : > { %v2194_v4 = vadd.f32 %v2193_v3, %v2192_v2  ;;  %v2195_v5 = vpop.f32.mrb[10].mxu0  ;;  %v2215_v8 = vpop.f32.mrb[9].mxu1 }
 0x149   : > { %v2196_v7 = vpop.f32.mrb[11].mxu0  ;;  %v2216_v10 = vadd.f32 %v2215_v8, %v2214_v6  ;;  %v2217_v11 = vpop.f32.mrb[10].mxu1 }
 0x14a   : > { %v1639_v9 = vadd.f32 %v2194_v4, %v1599_v1  ;;  %v2218_v12 = vpop.f32.mrb[11].mxu1 }
 0x14c   : > { %v1679_v13 = vadd.f32 %v2216_v10, %v1639_v9 }
 0x166   : > { %v2236_v14 = vpop.f32.mrb[12].mxu0 }
 0x167   : > { %v2237_v15 = vpop.f32.mrb[13].mxu0  ;;  %v2258_v18 = vpop.f32.mrb[12].mxu1 }
 0x168   : > { %v2238_v16 = vadd.f32 %v2237_v15, %v2236_v14  ;;  %v2239_v17 = vpop.f32.mrb[14].mxu0  ;;  %v2259_v20 = vpop.f32.mrb[13].mxu1 }
 0x169   : > { %v2240_v19 = vpop.f32.mrb[15].mxu0  ;;  %v2260_v22 = vadd.f32 %v2259_v20, %v2258_v18  ;;  %v2261_v23 = vpop.f32.mrb[14].mxu1 }
 0x16a   : > { %v1719_v21 = vadd.f32 %v2238_v16, %v1679_v13  ;;  %v2262_v24 = vpop.f32.mrb[15].mxu1 }
 0x16c   : > { %v1759_v25 = vadd.f32 %v2260_v22, %v1719_v21 }
 0x186   : > { %v2280_v26 = vpop.f32.mrb[16].mxu0 }
 0x187   : > { %v2281_v27 = vpop.f32.mrb[17].mxu0 }
 0x188   : > { %v2282_v28 = vadd.f32 %v2281_v27, %v2280_v26  ;;  %v2283_v29 = vpop.f32.mrb[18].mxu0 }
 0x189   : > { %v2284_v31 = vpop.f32.mrb[19].mxu0 }
 0x18a   : > { %v1799_v32 = vadd.f32 %v2282_v28, %v1759_v25 }
 0x18c   : > { %v1811_v33 = vadd.f32 %v2085_v30, %v1799_v32  ;;  %v1816_v34 = vrot.slane %v1799_v32, 4 }
 0x18e   : > { %v1812_v35 = vmax.f32 %v1811_v33, 0.0  ;;  %v1818_v36 = vsub.f32 %v1799_v32, %v1816_v34 }
 0x190   : > { %v1813_v37 = vpack.c.bf16 %v1812_v35, %v1812_v35  ;;  %v1819_v38 = vmul.f32 %v1818_v36, %v1818_v36 }
 0x192   : > { %1814 = vst [vmem:[%s215_s21] sm:$0xf] %v1813_v37  ;;  %v1821_v39 = vsel %vm1820_vm0, %v1819_v38, 0.0 }
 0x193   : > { %v1822_v40 = vrot.slane %v1821_v39, 4 }
 0x195   : > { %v1823_v41 = vadd.f32 %v1822_v40, %v1821_v39 }
 0x197   : > { %v1824_v42 = vrot.slane %v1823_v41, 2 }
 0x199   : > { %v1825_v43 = vadd.f32 %v1824_v42, %v1823_v41 }
 0x19b   : > { %v1826_v44 = vrot.slane %v1825_v43, 1 }
 0x19d   : > { %v1827_v45 = vadd.f32 %v1826_v44, %v1825_v43 }
 0x19f   : > { %1828 = vst [vmem:[%s218_s24] sm:$0x1] %v1827_v45 }
 0x1a0 PF: > { %s15_s15 = sadd.s32 1, %s2463_s15  }
 0x1a1   : > { %p12_p4 = scmp.ge.s32.totalorder %s15_s15, 6  }
 0x1a3   :  { %14 = sbr.rel (!%p12_p4) target bundleno = 1 (0x1), region = 77 }

// kernel: vgg19_feature_loss.25
= control target key start
LH: loop header
LB: loop body
LE: loop exit
PB: predicated region body
PF: predicated region fallthrough
CT: control target
= control target key end

     0   :  { %s4596_s15 = smov 0   ;;  %s5008_s0 = inlined_call_operand.vmem [shape: bf16[8,4608], index: 0, kind: input, shape index: {}]   ;;  %s5009_s1 = inlined_call_operand.vmem [shape: bf16[4,4608,128], index: 1, kind: input, shape index: {}]   ;;  %s5010_s2 = inlined_call_operand.vmem [shape: f32[1,512], index: 2, kind: input, shape index: {}]   ;;  %s5011_s3 = inlined_call_operand.vmem [shape: bf16[8,512], index: 3, kind: output, shape index: {0}]   ;;  %s5012_s4 = inlined_call_operand.vmem [shape: f32[1,512], index: 4, kind: output, shape index: {1}]  }
   0x1 LB: > { %s3500_s16 = sadd.s32 4294967295, %s4569_s15   ;;  %p3504_p0 = scmp.ge.s32.totalorder %s4569_s15, 1  ;;  %s4569_s15 = sphi %s4596_s15, %s15_s15  }
   0x2   : > { %p173_p1 = scmp.lt.s32.totalorder %s4569_s15, 5 }
   0x4   : > { %p174_p2 = pnand %p3504_p0, %p173_p1 }
   0x5   : > { %p204_p3 = scmp.lt.s32.totalorder (!%p174_p2), %s3500_s16, 3  ;;  %v4607_v0 = vld [vmem:[%s5008_s0] sm:$0xff] (!%p174_p2)  ;;  %v4612_v1 = vld [vmem:[%s5008_s0 + $0x8] sm:$0xff] (!%p174_p2)  ;;  %v4658_v33 = vld [vmem:[%s5008_s0 + $0x10] sm:$0xff] (!%p174_p2)  ;;  %vm3404_vm0 = vcmask (!%p174_p2), 1043456  }
   0x6   : > { %177 = sbr.rel (%p174_p2) target bundleno = 546 (0x222), region = 32  ;;  %v3508_v2 = vcombine.high (!%p174_p2), %v4607_v0, %v4607_v0  ;;  %v3510_v3 = vcombine.high (!%p174_p2), %v4612_v1, %v4612_v1  ;;  %v4664_v35 = vld [vmem:[%s5008_s0 + $0x18] sm:$0xff] (!%p174_p2)  ;;  %v3507_v38 = vcombine.low (!%p174_p2), %v4607_v0, %v4607_v0  ;;  %v3509_v39 = vcombine.low (!%p174_p2), %v4612_v1, %v4612_v1 }
   0x7   : > { %v3512_v42 = vcombine.high (!%p174_p2), %v4658_v33, %v4658_v33  ;;  %v3514_v44 = vcombine.high (!%p174_p2), %v4664_v35, %v4664_v35 }
   0x8   : > { %2700 = vmatprep.mubr.bf16.mxu0 (!%p174_p2), %v3508_v2  ;;  %2740 = vmatprep.mubr.bf16.mxu1 (!%p174_p2), %v3510_v3 }
   0xd   : > { %s5014_s16 = smov (!%p204_p3, %s3500_s16), 3 }
   0xe   : > { %s4230_s21 = smul.u32 2304, %s5014_s16  ;;  %s211_s9 = scalar_lea.vmem %s5010_s2, %s5014_s16 }
   0xf   : > { %s3506_s10 = sshll.u32 %s5014_s16, 2  ;;  %s218_s18 = scalar_lea.vmem %s5012_s4, %s5014_s16 }
  0x10   : > { %s4624_s24 = scalar_lea.vmem %s5009_s1, %s4230_s21  ;;  %s215_s13 = scalar_lea.vmem %s5011_s3, %s3506_s10 }
  0x11   : > { %v4239_v4 = vld [vmem:[%s4624_s24 + $0x40] sm:$0xff]   ;;  %v4243_v8 = vld [vmem:[%s4624_s24 + $0x48] sm:$0xff]   ;;  %v4247_v12 = vld [vmem:[%s4624_s24 + $0x50] sm:$0xff]  }
  0x12   : > { %v4240_v5 = vld [vmem:[%s4624_s24 + $0xc0] sm:$0xff]   ;;  %3834 = vmatprep.subr.bf16.mxu0 %v4239_v4  ;;  %v4244_v9 = vld [vmem:[%s4624_s24 + $0xc8] sm:$0xff]   ;;  %v4248_v13 = vld [vmem:[%s4624_s24 + $0xd0] sm:$0xff]  }
  0x13   : > { %v4241_v6 = vld [vmem:[%s4624_s24] sm:$0xff]   ;;  %3856 = vmatprep.subr.bf16.mxu1 %v4240_v5  ;;  %v4245_v10 = vld [vmem:[%s4624_s24 + $0x8] sm:$0xff]   ;;  %v4249_v14 = vld [vmem:[%s4624_s24 + $0x10] sm:$0xff]  }
  0x14   : > { %v4242_v7 = vld [vmem:[%s4624_s24 + $0x80] sm:$0xff]   ;;  %3835 = vmatpush3.bf16.msra.mxu0 %v4241_v6  ;;  %v4246_v11 = vld [vmem:[%s4624_s24 + $0x88] sm:$0xff]   ;;  %v4250_v15 = vld [vmem:[%s4624_s24 + $0x90] sm:$0xff]  }
  0x15   : > { %3857 = vmatpush3.bf16.msra.mxu1 %v4242_v7  ;;  %3836 = vmatprep.subr.bf16.mxu0 %v4243_v8  ;;  %v4251_v16 = vld [vmem:[%s4624_s24 + $0x58] sm:$0xff]   ;;  %v4255_v20 = vld [vmem:[%s4624_s24 + $0x60] sm:$0xff]   ;;  %v4259_v24 = vld [vmem:[%s4624_s24 + $0x68] sm:$0xff]  }
  0x16   : > { %3858 = vmatprep.subr.bf16.mxu1 %v4244_v9  ;;  %v4252_v17 = vld [vmem:[%s4624_s24 + $0xd8] sm:$0xff]   ;;  %v4256_v21 = vld [vmem:[%s4624_s24 + $0xe0] sm:$0xff]   ;;  %v4260_v25 = vld [vmem:[%s4624_s24 + $0xe8] sm:$0xff]  }
  0x17   : > { %v4253_v18 = vld [vmem:[%s4624_s24 + $0x18] sm:$0xff]   ;;  %v4257_v22 = vld [vmem:[%s4624_s24 + $0x20] sm:$0xff]   ;;  %v4261_v26 = vld [vmem:[%s4624_s24 + $0x28] sm:$0xff]  }
  0x18   : > { %3837 = vmatpush3.bf16.msra.mxu0 %v4245_v10  ;;  %v4254_v19 = vld [vmem:[%s4624_s24 + $0x98] sm:$0xff]   ;;  %v4258_v23 = vld [vmem:[%s4624_s24 + $0xa0] sm:$0xff]   ;;  %v4262_v27 = vld [vmem:[%s4624_s24 + $0xa8] sm:$0xff]  }
  0x19   : > { %3859 = vmatpush3.bf16.msra.mxu1 %v4246_v11  ;;  %3838 = vmatprep.subr.bf16.mxu0 %v4247_v12  ;;  %v4263_v28 = vld [vmem:[%s4624_s24 + $0x70] sm:$0xff]   ;;  %v4267_v32 = vld [vmem:[%s4624_s24 + $0x78] sm:$0xff]   ;;  %v4275_v40 = vld [vmem:[%s4624_s24 + $0x140] sm:$0xff]   ;;  %v3511_v12 = vcombine.low %v4658_v33, %v4658_v33 }
  0x1a   : > { %3860 = vmatprep.subr.bf16.mxu1 %v4248_v13  ;;  %v4264_v29 = vld [vmem:[%s4624_s24 + $0xf0] sm:$0xff]   ;;  %v4268_v34 = vld [vmem:[%s4624_s24 + $0xf8] sm:$0xff]   ;;  %v4276_v41 = vld [vmem:[%s4624_s24 + $0x1c0] sm:$0xff]   ;;  %v3513_v13 = vcombine.low %v4664_v35, %v4664_v35 }
  0x1b   : > { %v4265_v30 = vld [vmem:[%s4624_s24 + $0x30] sm:$0xff]   ;;  %v4269_v36 = vld [vmem:[%s4624_s24 + $0x38] sm:$0xff]   ;;  %v4277_v43 = vld [vmem:[%s4624_s24 + $0x100] sm:$0xff]  }
  0x1c   : > { %3839 = vmatpush3.bf16.msra.mxu0 %v4249_v14  ;;  %v4266_v31 = vld [vmem:[%s4624_s24 + $0xb0] sm:$0xff]   ;;  %v4270_v37 = vld [vmem:[%s4624_s24 + $0xb8] sm:$0xff]   ;;  %v4278_v45 = vld [vmem:[%s4624_s24 + $0x180] sm:$0xff]  }
  0x1d   : > { %3861 = vmatpush3.bf16.msra.mxu1 %v4250_v15  ;;  %3840 = vmatprep.subr.bf16.mxu0 %v4251_v16  ;;  %v4279_v46 = vld [vmem:[%s4624_s24 + $0x148] sm:$0xff]   ;;  %v4283_v50 = vld [vmem:[%s4624_s24 + $0x150] sm:$0xff]   ;;  %v4287_v54 = vld [vmem:[%s4624_s24 + $0x158] sm:$0xff]  }
  0x1e   : > { %3862 = vmatprep.subr.bf16.mxu1 %v4252_v17  ;;  %v4280_v47 = vld [vmem:[%s4624_s24 + $0x1c8] sm:$0xff]   ;;  %v4284_v51 = vld [vmem:[%s4624_s24 + $0x1d0] sm:$0xff]   ;;  %v4288_v55 = vld [vmem:[%s4624_s24 + $0x1d8] sm:$0xff]  }
  0x1f   : > { %v4281_v48 = vld [vmem:[%s4624_s24 + $0x108] sm:$0xff]   ;;  %v4285_v52 = vld [vmem:[%s4624_s24 + $0x110] sm:$0xff]   ;;  %v4289_v56 = vld [vmem:[%s4624_s24 + $0x118] sm:$0xff]  }
  0x20   : > { %3841 = vmatpush3.bf16.msra.mxu0 %v4253_v18  ;;  %v4282_v49 = vld [vmem:[%s4624_s24 + $0x188] sm:$0xff]   ;;  %v4286_v53 = vld [vmem:[%s4624_s24 + $0x190] sm:$0xff]   ;;  %v4290_v57 = vld [vmem:[%s4624_s24 + $0x198] sm:$0xff]  }
  0x21   : > { %3863 = vmatpush3.bf16.msra.mxu1 %v4254_v19  ;;  %3842 = vmatprep.subr.bf16.mxu0 %v4255_v20  ;;  %v4291_v58 = vld [vmem:[%s4624_s24 + $0x160] sm:$0xff]   ;;  %v4295_v62 = vld [vmem:[%s4624_s24 + $0x168] sm:$0xff]   ;;  %v4299_v2 = vld [vmem:[%s4624_s24 + $0x170] sm:$0xff]  }
  0x22   : > { %3864 = vmatprep.subr.bf16.mxu1 %v4256_v21  ;;  %v4292_v59 = vld [vmem:[%s4624_s24 + $0x1e0] sm:$0xff]   ;;  %v4296_v63 = vld [vmem:[%s4624_s24 + $0x1e8] sm:$0xff]   ;;  %v4300_v3 = vld [vmem:[%s4624_s24 + $0x1f0] sm:$0xff]  }
  0x23   : > { %v4293_v60 = vld [vmem:[%s4624_s24 + $0x120] sm:$0xff]   ;;  %v4297_v0 = vld [vmem:[%s4624_s24 + $0x128] sm:$0xff]   ;;  %v4301_v4 = vld [vmem:[%s4624_s24 + $0x130] sm:$0xff]  }
  0x24   : > { %3843 = vmatpush3.bf16.msra.mxu0 %v4257_v22  ;;  %v4294_v61 = vld [vmem:[%s4624_s24 + $0x1a0] sm:$0xff]   ;;  %v4298_v1 = vld [vmem:[%s4624_s24 + $0x1a8] sm:$0xff]   ;;  %v4302_v5 = vld [vmem:[%s4624_s24 + $0x1b0] sm:$0xff]  }
  0x25   : > { %3865 = vmatpush3.bf16.msra.mxu1 %v4258_v23  ;;  %3844 = vmatprep.subr.bf16.mxu0 %v4259_v24  ;;  %v4303_v6 = vld [vmem:[%s4624_s24 + $0x178] sm:$0xff]   ;;  %v4708_v7 = vld [vmem:[%s5008_s0 + $0x20] sm:$0xff]  ;;  %v4714_v9 = vld [vmem:[%s5008_s0 + $0x28] sm:$0xff] }
  0x26   : > { %3866 = vmatprep.subr.bf16.mxu1 %v4260_v25  ;;  %v4304_v8 = vld [vmem:[%s4624_s24 + $0x1f8] sm:$0xff]   ;;  %v4311_v14 = vld [vmem:[%s4624_s24 + $0x240] sm:$0xff]   ;;  %v3516_v16 = vcombine.high %v4708_v7, %v4708_v7  ;;  %v3518_v18 = vcombine.high %v4714_v9, %v4714_v9  ;;  %v4315_v20 = vld [vmem:[%s4624_s24 + $0x248] sm:$0xff]  }
  0x27   : > { %v4305_v10 = vld [vmem:[%s4624_s24 + $0x138] sm:$0xff]   ;;  %v4312_v15 = vld [vmem:[%s4624_s24 + $0x2c0] sm:$0xff]   ;;  %v4316_v21 = vld [vmem:[%s4624_s24 + $0x2c8] sm:$0xff]  }
  0x28   : > { %3845 = vmatpush3.bf16.msra.mxu0 %v4261_v26  ;;  %v4306_v11 = vld [vmem:[%s4624_s24 + $0x1b8] sm:$0xff]   ;;  %v4313_v17 = vld [vmem:[%s4624_s24 + $0x200] sm:$0xff]   ;;  %v4317_v22 = vld [vmem:[%s4624_s24 + $0x208] sm:$0xff]  }
  0x29   : > { %3867 = vmatpush3.bf16.msra.mxu1 %v4262_v27  ;;  %3846 = vmatprep.subr.bf16.mxu0 %v4263_v28  ;;  %v4314_v19 = vld [vmem:[%s4624_s24 + $0x280] sm:$0xff]   ;;  %v4318_v23 = vld [vmem:[%s4624_s24 + $0x288] sm:$0xff]   ;;  %v4319_v24 = vld [vmem:[%s4624_s24 + $0x250] sm:$0xff]  }
  0x2a   : > { %3868 = vmatprep.subr.bf16.mxu1 %v4264_v29  ;;  %v4320_v25 = vld [vmem:[%s4624_s24 + $0x2d0] sm:$0xff]   ;;  %v4323_v28 = vld [vmem:[%s4624_s24 + $0x258] sm:$0xff]   ;;  %v4328_v33 = vld [vmem:[%s4624_s24 + $0x2e0] sm:$0xff]  }
  0x2b   : > { %v4321_v26 = vld [vmem:[%s4624_s24 + $0x210] sm:$0xff]   ;;  %v4324_v29 = vld [vmem:[%s4624_s24 + $0x2d8] sm:$0xff]   ;;  %v4330_v35 = vld [vmem:[%s4624_s24 + $0x2a0] sm:$0xff]  }
  0x2c   : > { %3847 = vmatpush3.bf16.msra.mxu0 %v4265_v30  ;;  %v4322_v27 = vld [vmem:[%s4624_s24 + $0x290] sm:$0xff]   ;;  %v4325_v30 = vld [vmem:[%s4624_s24 + $0x218] sm:$0xff]  }
  0x2d   : > { %3869 = vmatpush3.bf16.msra.mxu1 %v4266_v31  ;;  %3848 = vmatprep.subr.bf16.mxu0 %v4267_v32  ;;  %v4326_v31 = vld [vmem:[%s4624_s24 + $0x298] sm:$0xff]   ;;  %v4327_v32 = vld [vmem:[%s4624_s24 + $0x260] sm:$0xff]  }
  0x2e   : > { %3870 = vmatprep.subr.bf16.mxu1 %v4268_v34  ;;  %v4329_v34 = vld [vmem:[%s4624_s24 + $0x220] sm:$0xff]  }
  0x30   : > { %3849 = vmatpush3.bf16.msra.mxu0 %v4269_v36  ;;  %v4331_v36 = vld [vmem:[%s4624_s24 + $0x268] sm:$0xff]  }
  0x31   : > { %3871 = vmatpush3.bf16.msra.mxu1 %v4270_v37  ;;  %3878 = vmatprep.subr.bf16.mxu0 %v4275_v40  ;;  %v4332_v37 = vld [vmem:[%s4624_s24 + $0x2e8] sm:$0xff]   ;;  %v4335_v40 = vld [vmem:[%s4624_s24 + $0x270] sm:$0xff]  }
  0x32   : > { %3900 = vmatprep.subr.bf16.mxu1 %v4276_v41  ;;  %v4336_v41 = vld [vmem:[%s4624_s24 + $0x2f0] sm:$0xff]  }
  0x33   : > { %2701 = vmatmul.mubr.bf16.vlgmr.msra.gmra.mrb[0].mxu0 %v3507_v38  ;;  %v4333_v38 = vld [vmem:[%s4624_s24 + $0x228] sm:$0xff]  }
  0x34   : > { %2741 = vmatmul.mubr.bf16.vlgmr.msra.gmra.mrb[0].mxu1 %v3509_v39  ;;  %3879 = vmatpush3.bf16.msra.mxu0 %v4277_v43  ;;  %v4334_v39 = vld [vmem:[%s4624_s24 + $0x2a8] sm:$0xff]   ;;  %v4338_v43 = vld [vmem:[%s4624_s24 + $0x2b0] sm:$0xff]  }
  0x35   : > { %3901 = vmatpush3.bf16.msra.mxu1 %v4278_v45  ;;  %2780 = vmatprep.mubr.bf16.mxu0 %v3512_v42  ;;  %v4337_v42 = vld [vmem:[%s4624_s24 + $0x230] sm:$0xff]   ;;  %v4340_v45 = vld [vmem:[%s4624_s24 + $0x2f8] sm:$0xff]  }
  0x36   : > { %3880 = vmatprep.subr.bf16.mxu0 %v4279_v46  ;;  %2820 = vmatprep.mubr.bf16.mxu1 %v3514_v44  ;;  %v4339_v44 = vld [vmem:[%s4624_s24 + $0x278] sm:$0xff]  }
  0x37   : > { %3902 = vmatprep.subr.bf16.mxu1 %v4280_v47  ;;  %v4341_v46 = vld [vmem:[%s4624_s24 + $0x238] sm:$0xff]  }
  0x38   : > { %3881 = vmatpush3.bf16.msra.mxu0 %v4281_v48  ;;  %v4342_v47 = vld [vmem:[%s4624_s24 + $0x2b8] sm:$0xff]   ;;  %v3515_v48 = vcombine.low %v4708_v7, %v4708_v7  ;;  %v4368_v7 = vld [vmem:[%s4624_s24 + $0x3e8] sm:$0xff]  }
  0x39   : > { %3903 = vmatpush3.bf16.msra.mxu1 %v4282_v49  ;;  %3882 = vmatprep.subr.bf16.mxu0 %v4283_v50  ;;  %v3517_v49 = vcombine.low %v4714_v9, %v4714_v9  ;;  %v4347_v50 = vld [vmem:[%s4624_s24 + $0x340] sm:$0xff]   ;;  %v4370_v9 = vld [vmem:[%s4624_s24 + $0x3a8] sm:$0xff]  }
  0x3a   : > { %3904 = vmatprep.subr.bf16.mxu1 %v4284_v51  ;;  %v4348_v51 = vld [vmem:[%s4624_s24 + $0x3c0] sm:$0xff]  }
  0x3c   : > { %3883 = vmatpush3.bf16.msra.mxu0 %v4285_v52  ;;  %v4349_v52 = vld [vmem:[%s4624_s24 + $0x300] sm:$0xff]  }
  0x3d   : > { %3905 = vmatpush3.bf16.msra.mxu1 %v4286_v53  ;;  %3884 = vmatprep.subr.bf16.mxu0 %v4287_v54  ;;  %v4350_v53 = vld [vmem:[%s4624_s24 + $0x380] sm:$0xff]   ;;  %v4351_v54 = vld [vmem:[%s4624_s24 + $0x348] sm:$0xff]  }
  0x3e   : > { %3906 = vmatprep.subr.bf16.mxu1 %v4288_v55  ;;  %v4352_v55 = vld [vmem:[%s4624_s24 + $0x3c8] sm:$0xff]  }
  0x40   : > { %3885 = vmatpush3.bf16.msra.mxu0 %v4289_v56  ;;  %v4353_v56 = vld [vmem:[%s4624_s24 + $0x308] sm:$0xff]  }
  0x41   : > { %3907 = vmatpush3.bf16.msra.mxu1 %v4290_v57  ;;  %3886 = vmatprep.subr.bf16.mxu0 %v4291_v58  ;;  %v4354_v57 = vld [vmem:[%s4624_s24 + $0x388] sm:$0xff]   ;;  %v4355_v58 = vld [vmem:[%s4624_s24 + $0x350] sm:$0xff]  }
  0x42   : > { %3908 = vmatprep.subr.bf16.mxu1 %v4292_v59  ;;  %v4356_v59 = vld [vmem:[%s4624_s24 + $0x3d0] sm:$0xff]  }
  0x44   : > { %3887 = vmatpush3.bf16.msra.mxu0 %v4293_v60  ;;  %v4357_v60 = vld [vmem:[%s4624_s24 + $0x310] sm:$0xff]  }
  0x45   : > { %3909 = vmatpush3.bf16.msra.mxu1 %v4294_v61  ;;  %3888 = vmatprep.subr.bf16.mxu0 %v4295_v62  ;;  %v4358_v61 = vld [vmem:[%s4624_s24 + $0x390] sm:$0xff]   ;;  %v4359_v62 = vld [vmem:[%s4624_s24 + $0x358] sm:$0xff]  }
  0x46   : > { %3910 = vmatprep.subr.bf16.mxu1 %v4296_v63  ;;  %v4360_v63 = vld [vmem:[%s4624_s24 + $0x3d8] sm:$0xff]  }
  0x48   : > { %3889 = vmatpush3.bf16.msra.mxu0 %v4297_v0  ;;  %v4361_v0 = vld [vmem:[%s4624_s24 + $0x318] sm:$0xff]  }
  0x49   : > { %3911 = vmatpush3.bf16.msra.mxu1 %v4298_v1  ;;  %3890 = vmatprep.subr.bf16.mxu0 %v4299_v2  ;;  %v4362_v1 = vld [vmem:[%s4624_s24 + $0x398] sm:$0xff]   ;;  %v4363_v2 = vld [vmem:[%s4624_s24 + $0x360] sm:$0xff]  }
  0x4a   : > { %3912 = vmatprep.subr.bf16.mxu1 %v4300_v3  ;;  %v4364_v3 = vld [vmem:[%s4624_s24 + $0x3e0] sm:$0xff]  }
  0x4c   : > { %3891 = vmatpush3.bf16.msra.mxu0 %v4301_v4  ;;  %v4365_v4 = vld [vmem:[%s4624_s24 + $0x320] sm:$0xff]  }
  0x4d   : > { %3913 = vmatpush3.bf16.msra.mxu1 %v4302_v5  ;;  %3892 = vmatprep.subr.bf16.mxu0 %v4303_v6  ;;  %v4366_v5 = vld [vmem:[%s4624_s24 + $0x3a0] sm:$0xff]   ;;  %v4367_v6 = vld [vmem:[%s4624_s24 + $0x368] sm:$0xff]  }
  0x4e   : > { %3914 = vmatprep.subr.bf16.mxu1 %v4304_v8  ;;  %v4369_v8 = vld [vmem:[%s4624_s24 + $0x328] sm:$0xff]  }
  0x50   : > { %3893 = vmatpush3.bf16.msra.mxu0 %v4305_v10  ;;  %v4371_v10 = vld [vmem:[%s4624_s24 + $0x370] sm:$0xff]  }
  0x51   : > { %3915 = vmatpush3.bf16.msra.mxu1 %v4306_v11  ;;  %3922 = vmatprep.subr.bf16.mxu0 %v4311_v14  ;;  %v4372_v11 = vld [vmem:[%s4624_s24 + $0x3f0] sm:$0xff]   ;;  %v4375_v14 = vld [vmem:[%s4624_s24 + $0x378] sm:$0xff]  }
  0x52   : > { %3944 = vmatprep.subr.bf16.mxu1 %v4312_v15  ;;  %v4376_v15 = vld [vmem:[%s4624_s24 + $0x3f8] sm:$0xff]  }
  0x53   : > { %2781 = vmatmul.mubr.bf16.vlgmr.msra.gmra.mrb[4].mxu0 %v3511_v12  ;;  %v4373_v12 = vld [vmem:[%s4624_s24 + $0x330] sm:$0xff]  }
  0x54   : > { %2821 = vmatmul.mubr.bf16.vlgmr.msra.gmra.mrb[4].mxu1 %v3513_v13  ;;  %3923 = vmatpush3.bf16.msra.mxu0 %v4313_v17  ;;  %v4374_v13 = vld [vmem:[%s4624_s24 + $0x3b0] sm:$0xff]   ;;  %v4378_v17 = vld [vmem:[%s4624_s24 + $0x3b8] sm:$0xff]  }
  0x55   : > { %3945 = vmatpush3.bf16.msra.mxu1 %v4314_v19  ;;  %2860 = vmatprep.mubr.bf16.mxu0 %v3516_v16  ;;  %v4377_v16 = vld [vmem:[%s4624_s24 + $0x338] sm:$0xff]  }
  0x56   : > { %3924 = vmatprep.subr.bf16.mxu0 %v4315_v20  ;;  %2900 = vmatprep.mubr.bf16.mxu1 %v3518_v18  ;;  %v226_v18 = vld [vmem:[%s5008_s0 + $0x30] sm:$0xff]  ;;  %v227_v19 = vld [vmem:[%s5008_s0 + $0x38] sm:$0xff] }
  0x57   : > { %3946 = vmatprep.subr.bf16.mxu1 %v4316_v21  ;;  %v3519_v20 = vcombine.low %v226_v18, %v226_v18  ;;  %v3520_v21 = vcombine.high %v226_v18, %v226_v18  ;;  %v4439_v18 = vld [vmem:[%s4624_s24 + $0x568] sm:$0xff]  }
  0x58   : > { %3925 = vmatpush3.bf16.msra.mxu0 %v4317_v22  ;;  %v3521_v22 = vcombine.low %v227_v19, %v227_v19 }
  0x59   : > { %3947 = vmatpush3.bf16.msra.mxu1 %v4318_v23  ;;  %3926 = vmatprep.subr.bf16.mxu0 %v4319_v24  ;;  %v3522_v23 = vcombine.high %v227_v19, %v227_v19  ;;  %v4383_v24 = vld [vmem:[%s4624_s24 + $0x440] sm:$0xff]   ;;  %v4440_v19 = vld [vmem:[%s4624_s24 + $0x5e8] sm:$0xff]  }
  0x5a   : > { %3948 = vmatprep.subr.bf16.mxu1 %v4320_v25  ;;  %v4384_v25 = vld [vmem:[%s4624_s24 + $0x4c0] sm:$0xff]  }
  0x5c   : > { %3927 = vmatpush3.bf16.msra.mxu0 %v4321_v26  ;;  %v4385_v26 = vld [vmem:[%s4624_s24 + $0x400] sm:$0xff]  }
  0x5d   : > { %3949 = vmatpush3.bf16.msra.mxu1 %v4322_v27  ;;  %3928 = vmatprep.subr.bf16.mxu0 %v4323_v28  ;;  %v4386_v27 = vld [vmem:[%s4624_s24 + $0x480] sm:$0xff]   ;;  %v4387_v28 = vld [vmem:[%s4624_s24 + $0x448] sm:$0xff]  }
  0x5e   : > { %3950 = vmatprep.subr.bf16.mxu1 %v4324_v29  ;;  %v4388_v29 = vld [vmem:[%s4624_s24 + $0x4c8] sm:$0xff]  }
  0x60   : > { %3929 = vmatpush3.bf16.msra.mxu0 %v4325_v30  ;;  %v4389_v30 = vld [vmem:[%s4624_s24 + $0x408] sm:$0xff]  }
  0x61   : > { %3951 = vmatpush3.bf16.msra.mxu1 %v4326_v31  ;;  %3930 = vmatprep.subr.bf16.mxu0 %v4327_v32  ;;  %v4390_v31 = vld [vmem:[%s4624_s24 + $0x488] sm:$0xff]   ;;  %v4391_v32 = vld [vmem:[%s4624_s24 + $0x450] sm:$0xff]  }
  0x62   : > { %3952 = vmatprep.subr.bf16.mxu1 %v4328_v33  ;;  %v4392_v33 = vld [vmem:[%s4624_s24 + $0x4d0] sm:$0xff]  }
  0x64   : > { %3931 = vmatpush3.bf16.msra.mxu0 %v4329_v34  ;;  %v4393_v34 = vld [vmem:[%s4624_s24 + $0x410] sm:$0xff]  }
  0x65   : > { %3953 = vmatpush3.bf16.msra.mxu1 %v4330_v35  ;;  %3932 = vmatprep.subr.bf16.mxu0 %v4331_v36  ;;  %v4394_v35 = vld [vmem:[%s4624_s24 + $0x490] sm:$0xff]   ;;  %v4395_v36 = vld [vmem:[%s4624_s24 + $0x458] sm:$0xff]  }
  0x66   : > { %3954 = vmatprep.subr.bf16.mxu1 %v4332_v37  ;;  %v4396_v37 = vld [vmem:[%s4624_s24 + $0x4d8] sm:$0xff]  }
  0x68   : > { %3933 = vmatpush3.bf16.msra.mxu0 %v4333_v38  ;;  %v4397_v38 = vld [vmem:[%s4624_s24 + $0x418] sm:$0xff]  }
  0x69   : > { %3955 = vmatpush3.bf16.msra.mxu1 %v4334_v39  ;;  %3934 = vmatprep.subr.bf16.mxu0 %v4335_v40  ;;  %v4398_v39 = vld [vmem:[%s4624_s24 + $0x498] sm:$0xff]   ;;  %v4399_v40 = vld [vmem:[%s4624_s24 + $0x460] sm:$0xff]  }
  0x6a   : > { %3956 = vmatprep.subr.bf16.mxu1 %v4336_v41  ;;  %v4400_v41 = vld [vmem:[%s4624_s24 + $0x4e0] sm:$0xff]  }
  0x6c   : > { %3935 = vmatpush3.bf16.msra.mxu0 %v4337_v42  ;;  %v4401_v42 = vld [vmem:[%s4624_s24 + $0x420] sm:$0xff]  }
  0x6d   : > { %3957 = vmatpush3.bf16.msra.mxu1 %v4338_v43  ;;  %3936 = vmatprep.subr.bf16.mxu0 %v4339_v44  ;;  %v4402_v43 = vld [vmem:[%s4624_s24 + $0x4a0] sm:$0xff]   ;;  %v4403_v44 = vld [vmem:[%s4624_s24 + $0x468] sm:$0xff]  }
  0x6e   : > { %3958 = vmatprep.subr.bf16.mxu1 %v4340_v45  ;;  %v4404_v45 = vld [vmem:[%s4624_s24 + $0x4e8] sm:$0xff]  }
  0x70   : > { %3937 = vmatpush3.bf16.msra.mxu0 %v4341_v46  ;;  %v4405_v46 = vld [vmem:[%s4624_s24 + $0x428] sm:$0xff]  }
  0x71   : > { %3959 = vmatpush3.bf16.msra.mxu1 %v4342_v47  ;;  %3966 = vmatprep.subr.bf16.mxu0 %v4347_v50  ;;  %v4406_v47 = vld [vmem:[%s4624_s24 + $0x4a8] sm:$0xff]   ;;  %v4409_v50 = vld [vmem:[%s4624_s24 + $0x430] sm:$0xff]  }
  0x72   : > { %3988 = vmatprep.subr.bf16.mxu1 %v4348_v51  ;;  %v4410_v51 = vld [vmem:[%s4624_s24 + $0x4b0] sm:$0xff]  }
  0x73   : > { %2861 = vmatmul.mubr.bf16.vlgmr.msra.gmra.mrb[8].mxu0 %v3515_v48  ;;  %v4407_v48 = vld [vmem:[%s4624_s24 + $0x470] sm:$0xff]  }
  0x74   : > { %2901 = vmatmul.mubr.bf16.vlgmr.msra.gmra.mrb[8].mxu1 %v3517_v49  ;;  %3967 = vmatpush3.bf16.msra.mxu0 %v4349_v52  ;;  %v4408_v49 = vld [vmem:[%s4624_s24 + $0x4f0] sm:$0xff]   ;;  %v4411_v52 = vld [vmem:[%s4624_s24 + $0x478] sm:$0xff]  }
  0x75   : > { %3989 = vmatpush3.bf16.msra.mxu1 %v4350_v53  ;;  %3968 = vmatprep.subr.bf16.mxu0 %v4351_v54  ;;  %v4412_v53 = vld [vmem:[%s4624_s24 + $0x4f8] sm:$0xff]  }
  0x76   : > { %3990 = vmatprep.subr.bf16.mxu1 %v4352_v55  ;;  %2940 = vmatprep.mubr.bf16.mxu0 %v3520_v21  ;;  %v4413_v54 = vld [vmem:[%s4624_s24 + $0x438] sm:$0xff]   ;;  %v4442_v21 = vld [vmem:[%s4624_s24 + $0x5a8] sm:$0xff]  }
  0x77   : > { %2980 = vmatprep.mubr.bf16.mxu1 %v3522_v23  ;;  %v4414_v55 = vld [vmem:[%s4624_s24 + $0x4b8] sm:$0xff]   ;;  %v4444_v23 = vld [vmem:[%s4624_s24 + $0x5f0] sm:$0xff]  }
  0x78   : > { %3969 = vmatpush3.bf16.msra.mxu0 %v4353_v56  ;;  %v228_v56 = vld [vmem:[%s5008_s0 + $0x40] sm:$0xff] }
  0x79   : > { %3991 = vmatpush3.bf16.msra.mxu1 %v4354_v57  ;;  %3970 = vmatprep.subr.bf16.mxu0 %v4355_v58  ;;  %v3523_v57 = vcombine.low %v228_v56, %v228_v56  ;;  %v3524_v58 = vcombine.high %v228_v56, %v228_v56  ;;  %v4475_v56 = vld [vmem:[%s4624_s24 + $0x668] sm:$0xff]  }
  0x7a   : > { %3992 = vmatprep.subr.bf16.mxu1 %v4356_v59  ;;  %v229_v59 = vld [vmem:[%s5008_s0 + $0x48] sm:$0xff] }
  0x7c   : > { %3971 = vmatpush3.bf16.msra.mxu0 %v4357_v60  ;;  %v3525_v60 = vcombine.low %v229_v59, %v229_v59 }
  0x7d   : > { %3993 = vmatpush3.bf16.msra.mxu1 %v4358_v61  ;;  %3972 = vmatprep.subr.bf16.mxu0 %v4359_v62  ;;  %v3526_v61 = vcombine.high %v229_v59, %v229_v59  ;;  %v4419_v62 = vld [vmem:[%s4624_s24 + $0x540] sm:$0xff]   ;;  %v4478_v59 = vld [vmem:[%s4624_s24 + $0x6a8] sm:$0xff]  }
  0x7e   : > { %3994 = vmatprep.subr.bf16.mxu1 %v4360_v63  ;;  %v4420_v63 = vld [vmem:[%s4624_s24 + $0x5c0] sm:$0xff]  }
  0x80   : > { %3973 = vmatpush3.bf16.msra.mxu0 %v4361_v0  ;;  %v4421_v0 = vld [vmem:[%s4624_s24 + $0x500] sm:$0xff]  }
  0x81   : > { %3995 = vmatpush3.bf16.msra.mxu1 %v4362_v1  ;;  %3974 = vmatprep.subr.bf16.mxu0 %v4363_v2  ;;  %v4422_v1 = vld [vmem:[%s4624_s24 + $0x580] sm:$0xff]   ;;  %v4423_v2 = vld [vmem:[%s4624_s24 + $0x548] sm:$0xff]  }
  0x82   : > { %3996 = vmatprep.subr.bf16.mxu1 %v4364_v3  ;;  %v4424_v3 = vld [vmem:[%s4624_s24 + $0x5c8] sm:$0xff]  }
  0x84   : > { %3975 = vmatpush3.bf16.msra.mxu0 %v4365_v4  ;;  %v4425_v4 = vld [vmem:[%s4624_s24 + $0x508] sm:$0xff]  }
  0x85   : > { %3997 = vmatpush3.bf16.msra.mxu1 %v4366_v5  ;;  %3976 = vmatprep.subr.bf16.mxu0 %v4367_v6  ;;  %v4426_v5 = vld [vmem:[%s4624_s24 + $0x588] sm:$0xff]   ;;  %v4427_v6 = vld [vmem:[%s4624_s24 + $0x550] sm:$0xff]  }
  0x86   : > { %3998 = vmatprep.subr.bf16.mxu1 %v4368_v7  ;;  %v4428_v7 = vld [vmem:[%s4624_s24 + $0x5d0] sm:$0xff]  }
  0x88   : > { %3977 = vmatpush3.bf16.msra.mxu0 %v4369_v8  ;;  %v4429_v8 = vld [vmem:[%s4624_s24 + $0x510] sm:$0xff]  }
  0x89   : > { %3999 = vmatpush3.bf16.msra.mxu1 %v4370_v9  ;;  %3978 = vmatprep.subr.bf16.mxu0 %v4371_v10  ;;  %v4430_v9 = vld [vmem:[%s4624_s24 + $0x590] sm:$0xff]   ;;  %v4431_v10 = vld [vmem:[%s4624_s24 + $0x558] sm:$0xff]  }
  0x8a   : > { %4000 = vmatprep.subr.bf16.mxu1 %v4372_v11  ;;  %v4432_v11 = vld [vmem:[%s4624_s24 + $0x5d8] sm:$0xff]  }
  0x8c   : > { %3979 = vmatpush3.bf16.msra.mxu0 %v4373_v12  ;;  %v4433_v12 = vld [vmem:[%s4624_s24 + $0x518] sm:$0xff]  }
  0x8d   : > { %4001 = vmatpush3.bf16.msra.mxu1 %v4374_v13  ;;  %3980 = vmatprep.subr.bf16.mxu0 %v4375_v14  ;;  %v4434_v13 = vld [vmem:[%s4624_s24 + $0x598] sm:$0xff]   ;;  %v4435_v14 = vld [vmem:[%s4624_s24 + $0x560] sm:$0xff]  }
  0x8e   : > { %4002 = vmatprep.subr.bf16.mxu1 %v4376_v15  ;;  %v4436_v15 = vld [vmem:[%s4624_s24 + $0x5e0] sm:$0xff]  }
  0x90   : > { %3981 = vmatpush3.bf16.msra.mxu0 %v4377_v16  ;;  %v4437_v16 = vld [vmem:[%s4624_s24 + $0x520] sm:$0xff]  }
  0x91   : > { %4003 = vmatpush3.bf16.msra.mxu1 %v4378_v17  ;;  %4010 = vmatprep.subr.bf16.mxu0 %v4383_v24  ;;  %v4438_v17 = vld [vmem:[%s4624_s24 + $0x5a0] sm:$0xff]   ;;  %v4445_v24 = vld [vmem:[%s4624_s24 + $0x530] sm:$0xff]  }
  0x92   : > { %4032 = vmatprep.subr.bf16.mxu1 %v4384_v25  ;;  %v4446_v25 = vld [vmem:[%s4624_s24 + $0x5b0] sm:$0xff]  }
  0x93   : > { %2941 = vmatmul.mubr.bf16.vlgmr.msra.gmra.mrb[12].mxu0 %v3519_v20  ;;  %v4441_v20 = vld [vmem:[%s4624_s24 + $0x528] sm:$0xff]  }
  0x94   : > { %2981 = vmatmul.mubr.bf16.vlgmr.msra.gmra.mrb[12].mxu1 %v3521_v22  ;;  %4011 = vmatpush3.bf16.msra.mxu0 %v4385_v26  ;;  %v4443_v22 = vld [vmem:[%s4624_s24 + $0x570] sm:$0xff]   ;;  %v4447_v26 = vld [vmem:[%s4624_s24 + $0x578] sm:$0xff]  }
  0x95   : > { %4033 = vmatpush3.bf16.msra.mxu1 %v4386_v27  ;;  %4012 = vmatprep.subr.bf16.mxu0 %v4387_v28  ;;  %v4448_v27 = vld [vmem:[%s4624_s24 + $0x5f8] sm:$0xff]  }
  0x96   : > { %4034 = vmatprep.subr.bf16.mxu1 %v4388_v29  ;;  %3020 = vmatprep.mubr.bf16.mxu0 %v3524_v58  ;;  %v4449_v28 = vld [vmem:[%s4624_s24 + $0x538] sm:$0xff]   ;;  %v4477_v58 = vld [vmem:[%s4624_s24 + $0x628] sm:$0xff]  }
  0x97   : > { %3060 = vmatprep.mubr.bf16.mxu1 %v3526_v61  ;;  %v4450_v29 = vld [vmem:[%s4624_s24 + $0x5b8] sm:$0xff]   ;;  %v4480_v61 = vld [vmem:[%s4624_s24 + $0x6f0] sm:$0xff]  }
  0x98   : > { %4013 = vmatpush3.bf16.msra.mxu0 %v4389_v30  ;;  %v230_v30 = vld [vmem:[%s5008_s0 + $0x50] sm:$0xff] }
  0x99   : > { %4035 = vmatpush3.bf16.msra.mxu1 %v4390_v31  ;;  %4014 = vmatprep.subr.bf16.mxu0 %v4391_v32  ;;  %v231_v31 = vld [vmem:[%s5008_s0 + $0x58] sm:$0xff]  ;;  %v3527_v32 = vcombine.low %v230_v30, %v230_v30 }
  0x9a   : > { %4036 = vmatprep.subr.bf16.mxu1 %v4392_v33  ;;  %v3528_v33 = vcombine.high %v230_v30, %v230_v30 }
  0x9c   : > { %4015 = vmatpush3.bf16.msra.mxu0 %v4393_v34  ;;  %v3529_v34 = vcombine.low %v231_v31, %v231_v31 }
  0x9d   : > { %4037 = vmatpush3.bf16.msra.mxu1 %v4394_v35  ;;  %4016 = vmatprep.subr.bf16.mxu0 %v4395_v36  ;;  %v3530_v35 = vcombine.high %v231_v31, %v231_v31  ;;  %v4455_v36 = vld [vmem:[%s4624_s24 + $0x640] sm:$0xff]  }
  0x9e   : > { %4038 = vmatprep.subr.bf16.mxu1 %v4396_v37  ;;  %v4456_v37 = vld [vmem:[%s4624_s24 + $0x6c0] sm:$0xff]  }
  0xa0   : > { %4017 = vmatpush3.bf16.msra.mxu0 %v4397_v38  ;;  %v4457_v38 = vld [vmem:[%s4624_s24 + $0x600] sm:$0xff]  }
  0xa1   : > { %4039 = vmatpush3.bf16.msra.mxu1 %v4398_v39  ;;  %4018 = vmatprep.subr.bf16.mxu0 %v4399_v40  ;;  %v4458_v39 = vld [vmem:[%s4624_s24 + $0x680] sm:$0xff]   ;;  %v4459_v40 = vld [vmem:[%s4624_s24 + $0x648] sm:$0xff]  }
  0xa2   : > { %4040 = vmatprep.subr.bf16.mxu1 %v4400_v41  ;;  %v4460_v41 = vld [vmem:[%s4624_s24 + $0x6c8] sm:$0xff]  }
  0xa4   : > { %4019 = vmatpush3.bf16.msra.mxu0 %v4401_v42  ;;  %v4461_v42 = vld [vmem:[%s4624_s24 + $0x608] sm:$0xff]  }
  0xa5   : > { %4041 = vmatpush3.bf16.msra.mxu1 %v4402_v43  ;;  %4020 = vmatprep.subr.bf16.mxu0 %v4403_v44  ;;  %v4462_v43 = vld [vmem:[%s4624_s24 + $0x688] sm:$0xff]   ;;  %v4463_v44 = vld [vmem:[%s4624_s24 + $0x650] sm:$0xff]  }
  0xa6   : > { %4042 = vmatprep.subr.bf16.mxu1 %v4404_v45  ;;  %v4464_v45 = vld [vmem:[%s4624_s24 + $0x6d0] sm:$0xff]  }
  0xa8   : > { %4021 = vmatpush3.bf16.msra.mxu0 %v4405_v46  ;;  %v4465_v46 = vld [vmem:[%s4624_s24 + $0x610] sm:$0xff]  }
  0xa9   : > { %4043 = vmatpush3.bf16.msra.mxu1 %v4406_v47  ;;  %4022 = vmatprep.subr.bf16.mxu0 %v4407_v48  ;;  %v4466_v47 = vld [vmem:[%s4624_s24 + $0x690] sm:$0xff]   ;;  %v4467_v48 = vld [vmem:[%s4624_s24 + $0x658] sm:$0xff]  }
  0xaa   : > { %4044 = vmatprep.subr.bf16.mxu1 %v4408_v49  ;;  %v4468_v49 = vld [vmem:[%s4624_s24 + $0x6d8] sm:$0xff]  }
  0xac   : > { %4023 = vmatpush3.bf16.msra.mxu0 %v4409_v50  ;;  %v4469_v50 = vld [vmem:[%s4624_s24 + $0x618] sm:$0xff]  }
  0xad   : > { %4045 = vmatpush3.bf16.msra.mxu1 %v4410_v51  ;;  %4024 = vmatprep.subr.bf16.mxu0 %v4411_v52  ;;  %v4470_v51 = vld [vmem:[%s4624_s24 + $0x698] sm:$0xff]   ;;  %v4471_v52 = vld [vmem:[%s4624_s24 + $0x660] sm:$0xff]  }
  0xae   : > { %4046 = vmatprep.subr.bf16.mxu1 %v4412_v53  ;;  %v4472_v53 = vld [vmem:[%s4624_s24 + $0x6e0] sm:$0xff]  }
  0xb0   : > { %4025 = vmatpush3.bf16.msra.mxu0 %v4413_v54  ;;  %v4473_v54 = vld [vmem:[%s4624_s24 + $0x620] sm:$0xff]  }
  0xb1   : > { %4047 = vmatpush3.bf16.msra.mxu1 %v4414_v55  ;;  %4054 = vmatprep.subr.bf16.mxu0 %v4419_v62  ;;  %v4474_v55 = vld [vmem:[%s4624_s24 + $0x6a0] sm:$0xff]   ;;  %v4481_v62 = vld [vmem:[%s4624_s24 + $0x630] sm:$0xff]  }
  0xb2   : > { %4076 = vmatprep.subr.bf16.mxu1 %v4420_v63  ;;  %v4482_v63 = vld [vmem:[%s4624_s24 + $0x6b0] sm:$0xff]  }
  0xb3   : > { %3021 = vmatmul.mubr.bf16.vlgmr.msra.gmra.mrb[16].mxu0 %v3523_v57  ;;  %v4476_v57 = vld [vmem:[%s4624_s24 + $0x6e8] sm:$0xff]  }
  0xb4   : > { %3061 = vmatmul.mubr.bf16.vlgmr.msra.gmra.mrb[16].mxu1 %v3525_v60  ;;  %4055 = vmatpush3.bf16.msra.mxu0 %v4421_v0  ;;  %v4479_v60 = vld [vmem:[%s4624_s24 + $0x670] sm:$0xff]   ;;  %v4483_v0 = vld [vmem:[%s4624_s24 + $0x678] sm:$0xff]  }
  0xb5   : > { %4077 = vmatpush3.bf16.msra.mxu1 %v4422_v1  ;;  %4056 = vmatprep.subr.bf16.mxu0 %v4423_v2  ;;  %v4484_v1 = vld [vmem:[%s4624_s24 + $0x6f8] sm:$0xff]  }
  0xb6   : > { %4078 = vmatprep.subr.bf16.mxu1 %v4424_v3  ;;  %3100 = vmatprep.mubr.bf16.mxu0 %v3528_v33  ;;  %v4485_v2 = vld [vmem:[%s4624_s24 + $0x638] sm:$0xff]   ;;  %v4511_v33 = vld [vmem:[%s4624_s24 + $0x768] sm:$0xff]  }
  0xb7   : > { %3140 = vmatprep.mubr.bf16.mxu1 %v3530_v35  ;;  %v4486_v3 = vld [vmem:[%s4624_s24 + $0x6b8] sm:$0xff]  }
  0xb8   : > { %4057 = vmatpush3.bf16.msra.mxu0 %v4425_v4  ;;  %v232_v4 = vld [vmem:[%s5008_s0 + $0x60] sm:$0xff] }
  0xb9   : > { %4079 = vmatpush3.bf16.msra.mxu1 %v4426_v5  ;;  %4058 = vmatprep.subr.bf16.mxu0 %v4427_v6  ;;  %v233_v5 = vld [vmem:[%s5008_s0 + $0x68] sm:$0xff]  ;;  %v3531_v6 = vcombine.low %v232_v4, %v232_v4 }
  0xba   : > { %4080 = vmatprep.subr.bf16.mxu1 %v4428_v7  ;;  %v3532_v7 = vcombine.high %v232_v4, %v232_v4  ;;  %v4536_v4 = vld [vmem:[%s4624_s24 + $0x8d0] sm:$0xff]  }
  0xbc   : > { %4059 = vmatpush3.bf16.msra.mxu0 %v4429_v8  ;;  %v3533_v8 = vcombine.low %v233_v5, %v233_v5 }
  0xbd   : > { %4081 = vmatpush3.bf16.msra.mxu1 %v4430_v9  ;;  %4060 = vmatprep.subr.bf16.mxu0 %v4431_v10  ;;  %v4491_v9 = vld [vmem:[%s4624_s24 + $0x740] sm:$0xff]   ;;  %v3534_v10 = vcombine.high %v233_v5, %v233_v5  ;;  %v4537_v5 = vld [vmem:[%s4624_s24 + $0x810] sm:$0xff]  }
  0xbe   : > { %4082 = vmatprep.subr.bf16.mxu1 %v4432_v11  ;;  %v4492_v11 = vld [vmem:[%s4624_s24 + $0x7c0] sm:$0xff]  }
  0xc0   : > { %4061 = vmatpush3.bf16.msra.mxu0 %v4433_v12  ;;  %v4493_v12 = vld [vmem:[%s4624_s24 + $0x700] sm:$0xff]  }
  0xc1   : > { %4083 = vmatpush3.bf16.msra.mxu1 %v4434_v13  ;;  %4062 = vmatprep.subr.bf16.mxu0 %v4435_v14  ;;  %v4494_v13 = vld [vmem:[%s4624_s24 + $0x780] sm:$0xff]   ;;  %v4495_v14 = vld [vmem:[%s4624_s24 + $0x748] sm:$0xff]  }
  0xc2   : > { %4084 = vmatprep.subr.bf16.mxu1 %v4436_v15  ;;  %v4496_v15 = vld [vmem:[%s4624_s24 + $0x7c8] sm:$0xff]  }
  0xc4   : > { %4063 = vmatpush3.bf16.msra.mxu0 %v4437_v16  ;;  %v4497_v16 = vld [vmem:[%s4624_s24 + $0x708] sm:$0xff]  }
  0xc5   : > { %4085 = vmatpush3.bf16.msra.mxu1 %v4438_v17  ;;  %4064 = vmatprep.subr.bf16.mxu0 %v4439_v18  ;;  %v4498_v17 = vld [vmem:[%s4624_s24 + $0x788] sm:$0xff]   ;;  %v4499_v18 = vld [vmem:[%s4624_s24 + $0x750] sm:$0xff]  }
  0xc6   : > { %4086 = vmatprep.subr.bf16.mxu1 %v4440_v19  ;;  %v4500_v19 = vld [vmem:[%s4624_s24 + $0x7d0] sm:$0xff]  }
  0xc8   : > { %4065 = vmatpush3.bf16.msra.mxu0 %v4441_v20  ;;  %v4501_v20 = vld [vmem:[%s4624_s24 + $0x710] sm:$0xff]  }
  0xc9   : > { %4087 = vmatpush3.bf16.msra.mxu1 %v4442_v21  ;;  %4066 = vmatprep.subr.bf16.mxu0 %v4443_v22  ;;  %v4502_v21 = vld [vmem:[%s4624_s24 + $0x790] sm:$0xff]   ;;  %v4503_v22 = vld [vmem:[%s4624_s24 + $0x758] sm:$0xff]  }
  0xca   : > { %4088 = vmatprep.subr.bf16.mxu1 %v4444_v23  ;;  %v4504_v23 = vld [vmem:[%s4624_s24 + $0x7d8] sm:$0xff]  }
  0xcc   : > { %4067 = vmatpush3.bf16.msra.mxu0 %v4445_v24  ;;  %v4505_v24 = vld [vmem:[%s4624_s24 + $0x718] sm:$0xff]  }
  0xcd   : > { %4089 = vmatpush3.bf16.msra.mxu1 %v4446_v25  ;;  %4068 = vmatprep.subr.bf16.mxu0 %v4447_v26  ;;  %v4506_v25 = vld [vmem:[%s4624_s24 + $0x798] sm:$0xff]   ;;  %v4507_v26 = vld [vmem:[%s4624_s24 + $0x760] sm:$0xff]  }
  0xce   : > { %4090 = vmatprep.subr.bf16.mxu1 %v4448_v27  ;;  %v4508_v27 = vld [vmem:[%s4624_s24 + $0x7e0] sm:$0xff]  }
  0xd0   : > { %4069 = vmatpush3.bf16.msra.mxu0 %v4449_v28  ;;  %v4509_v28 = vld [vmem:[%s4624_s24 + $0x720] sm:$0xff]  }
  0xd1   : > { %4091 = vmatpush3.bf16.msra.mxu1 %v4450_v29  ;;  %4098 = vmatprep.subr.bf16.mxu0 %v4455_v36  ;;  %v4510_v29 = vld [vmem:[%s4624_s24 + $0x7a0] sm:$0xff]  }
  0xd2   : > { %4120 = vmatprep.subr.bf16.mxu1 %v4456_v37 }
  0xd3   : > { %3101 = vmatmul.mubr.bf16.vlgmr.msra.gmra.mrb[20].mxu0 %v3527_v32 }
  0xd4   : > { %3141 = vmatmul.mubr.bf16.vlgmr.msra.gmra.mrb[20].mxu1 %v3529_v34  ;;  %4099 = vmatpush3.bf16.msra.mxu0 %v4457_v38  ;;  %v4512_v34 = vld [vmem:[%s4624_s24 + $0x7e8] sm:$0xff]  }
  0xd5   : > { %4121 = vmatpush3.bf16.msra.mxu1 %v4458_v39  ;;  %4100 = vmatprep.subr.bf16.mxu0 %v4459_v40  ;;  %v4513_v40 = vld [vmem:[%s4624_s24 + $0x728] sm:$0xff]  }
  0xd6   : > { %4122 = vmatprep.subr.bf16.mxu1 %v4460_v41  ;;  %3180 = vmatprep.mubr.bf16.mxu0 %v3532_v7  ;;  %v4514_v41 = vld [vmem:[%s4624_s24 + $0x7a8] sm:$0xff]   ;;  %v4539_v7 = vld [vmem:[%s4624_s24 + $0x858] sm:$0xff]  }
  0xd7   : > { %3220 = vmatprep.mubr.bf16.mxu1 %v3534_v10  ;;  %v4542_v10 = vld [vmem:[%s4624_s24 + $0x898] sm:$0xff]  }
  0xd8   : > { %4101 = vmatpush3.bf16.msra.mxu0 %v4461_v42 }
  0xd9   : > { %4123 = vmatpush3.bf16.msra.mxu1 %v4462_v43  ;;  %4102 = vmatprep.subr.bf16.mxu0 %v4463_v44 }
  0xda   : > { %4124 = vmatprep.subr.bf16.mxu1 %v4464_v45  ;;  %v4515_v45 = vld [vmem:[%s4624_s24 + $0x770] sm:$0xff]  }
  0xdc   : > { %4103 = vmatpush3.bf16.msra.mxu0 %v4465_v46  ;;  %v4516_v46 = vld [vmem:[%s4624_s24 + $0x7f0] sm:$0xff]  }
  0xdd   : > { %4125 = vmatpush3.bf16.msra.mxu1 %v4466_v47  ;;  %4104 = vmatprep.subr.bf16.mxu0 %v4467_v48  ;;  %v4517_v47 = vld [vmem:[%s4624_s24 + $0x730] sm:$0xff]  }
  0xde   : > { %4126 = vmatprep.subr.bf16.mxu1 %v4468_v49  ;;  %v4518_v48 = vld [vmem:[%s4624_s24 + $0x7b0] sm:$0xff]   ;;  %v4519_v49 = vld [vmem:[%s4624_s24 + $0x778] sm:$0xff]  }
  0xe0   : > { %4105 = vmatpush3.bf16.msra.mxu0 %v4469_v50  ;;  %v4520_v50 = vld [vmem:[%s4624_s24 + $0x7f8] sm:$0xff]  }
  0xe1   : > { %4127 = vmatpush3.bf16.msra.mxu1 %v4470_v51  ;;  %4106 = vmatprep.subr.bf16.mxu0 %v4471_v52  ;;  %v4521_v51 = vld [vmem:[%s4624_s24 + $0x738] sm:$0xff]  }
  0xe2   : > { %4128 = vmatprep.subr.bf16.mxu1 %v4472_v53  ;;  %v4522_v52 = vld [vmem:[%s4624_s24 + $0x7b8] sm:$0xff]   ;;  %v234_v53 = vld [vmem:[%s5008_s0 + $0x70] sm:$0xff] }
  0xe4   : > { %4107 = vmatpush3.bf16.msra.mxu0 %v4473_v54  ;;  %v235_v54 = vld [vmem:[%s5008_s0 + $0x78] sm:$0xff] }
  0xe5   : > { %4129 = vmatpush3.bf16.msra.mxu1 %v4474_v55  ;;  %4108 = vmatprep.subr.bf16.mxu0 %v4475_v56  ;;  %v3535_v55 = vcombine.low %v234_v53, %v234_v53  ;;  %v3536_v56 = vcombine.high %v234_v53, %v234_v53 }
  0xe6   : > { %4130 = vmatprep.subr.bf16.mxu1 %v4476_v57  ;;  %v3537_v57 = vcombine.low %v235_v54, %v235_v54 }
  0xe8   : > { %4109 = vmatpush3.bf16.msra.mxu0 %v4477_v58  ;;  %v4527_v58 = vld [vmem:[%s4624_s24 + $0x840] sm:$0xff]  }
  0xe9   : > { %4131 = vmatpush3.bf16.msra.mxu1 %v4478_v59  ;;  %4110 = vmatprep.subr.bf16.mxu0 %v4479_v60  ;;  %v3538_v59 = vcombine.high %v235_v54, %v235_v54  ;;  %v4528_v60 = vld [vmem:[%s4624_s24 + $0x8c0] sm:$0xff]  }
  0xea   : > { %4132 = vmatprep.subr.bf16.mxu1 %v4480_v61  ;;  %v4529_v61 = vld [vmem:[%s4624_s24 + $0x800] sm:$0xff]  }
  0xec   : > { %4111 = vmatpush3.bf16.msra.mxu0 %v4481_v62  ;;  %v4530_v62 = vld [vmem:[%s4624_s24 + $0x880] sm:$0xff]  }
  0xed   : > { %4133 = vmatpush3.bf16.msra.mxu1 %v4482_v63  ;;  %4112 = vmatprep.subr.bf16.mxu0 %v4483_v0  ;;  %v4531_v63 = vld [vmem:[%s4624_s24 + $0x848] sm:$0xff]  }
  0xee   : > { %4134 = vmatprep.subr.bf16.mxu1 %v4484_v1  ;;  %v4532_v0 = vld [vmem:[%s4624_s24 + $0x8c8] sm:$0xff]  }
  0xef   : > { %v4533_v1 = vld [vmem:[%s4624_s24 + $0x808] sm:$0xff]  }
  0xf0   : > { %4113 = vmatpush3.bf16.msra.mxu0 %v4485_v2  ;;  %v4534_v2 = vld [vmem:[%s4624_s24 + $0x888] sm:$0xff]  }
  0xf1   : > { %4135 = vmatpush3.bf16.msra.mxu1 %v4486_v3  ;;  %4142 = vmatprep.subr.bf16.mxu0 %v4491_v9  ;;  %v4535_v3 = vld [vmem:[%s4624_s24 + $0x850] sm:$0xff]   ;;  %v4541_v9 = vld [vmem:[%s4624_s24 + $0x818] sm:$0xff]  }
  0xf2   : > { %4164 = vmatprep.subr.bf16.mxu1 %v4492_v11  ;;  %v4543_v11 = vld [vmem:[%s4624_s24 + $0x860] sm:$0xff]  }
  0xf3   : > { %3181 = vmatmul.mubr.bf16.vlgmr.msra.gmra.mrb[24].mxu0 %v3531_v6  ;;  %v4538_v6 = vld [vmem:[%s4624_s24 + $0x890] sm:$0xff]  }
  0xf4   : > { %3221 = vmatmul.mubr.bf16.vlgmr.msra.gmra.mrb[24].mxu1 %v3533_v8  ;;  %4143 = vmatpush3.bf16.msra.mxu0 %v4493_v12  ;;  %v4540_v8 = vld [vmem:[%s4624_s24 + $0x8d8] sm:$0xff]   ;;  %v4544_v12 = vld [vmem:[%s4624_s24 + $0x8e0] sm:$0xff]  }
  0xf5   : > { %4165 = vmatpush3.bf16.msra.mxu1 %v4494_v13  ;;  %4144 = vmatprep.subr.bf16.mxu0 %v4495_v14  ;;  %v4545_v13 = vld [vmem:[%s4624_s24 + $0x820] sm:$0xff]  }
  0xf6   : > { %4166 = vmatprep.subr.bf16.mxu1 %v4496_v15  ;;  %3260 = vmatprep.mubr.bf16.mxu0 %v3536_v56  ;;  %v4546_v15 = vld [vmem:[%s4624_s24 + $0x8a0] sm:$0xff]  }
  0xf7   : > { %3300 = vmatprep.mubr.bf16.mxu1 %v3538_v59 }
  0xf8   : > { %4145 = vmatpush3.bf16.msra.mxu0 %v4497_v16 }
  0xf9   : > { %4167 = vmatpush3.bf16.msra.mxu1 %v4498_v17  ;;  %4146 = vmatprep.subr.bf16.mxu0 %v4499_v18  ;;  %v4547_v18 = vld [vmem:[%s4624_s24 + $0x868] sm:$0xff]  }
  0xfa   : > { %4168 = vmatprep.subr.bf16.mxu1 %v4500_v19 }
  0xfc   : > { %4147 = vmatpush3.bf16.msra.mxu0 %v4501_v20 }
  0xfd   : > { %4169 = vmatpush3.bf16.msra.mxu1 %v4502_v21  ;;  %4148 = vmatprep.subr.bf16.mxu0 %v4503_v22  ;;  %v4548_v21 = vld [vmem:[%s4624_s24 + $0x8e8] sm:$0xff]  }
  0xfe   : > { %4170 = vmatprep.subr.bf16.mxu1 %v4504_v23 }
 0x100   : > { %4149 = vmatpush3.bf16.msra.mxu0 %v4505_v24 }
 0x101   : > { %4171 = vmatpush3.bf16.msra.mxu1 %v4506_v25  ;;  %4150 = vmatprep.subr.bf16.mxu0 %v4507_v26  ;;  %v4549_v26 = vld [vmem:[%s4624_s24 + $0x828] sm:$0xff]  }
 0x102   : > { %4172 = vmatprep.subr.bf16.mxu1 %v4508_v27 }
 0x104   : > { %4151 = vmatpush3.bf16.msra.mxu0 %v4509_v28  ;;  %v4550_v28 = vld [vmem:[%s4624_s24 + $0x8a8] sm:$0xff]  }
 0x105   : > { %4173 = vmatpush3.bf16.msra.mxu1 %v4510_v29  ;;  %4152 = vmatprep.subr.bf16.mxu0 %v4511_v33  ;;  %v4553_v33 = vld [vmem:[%s4624_s24 + $0x830] sm:$0xff]  }
 0x106   : > { %v3850_v30 = vpop.f32.mrb[0].mxu0  ;;  %4174 = vmatprep.subr.bf16.mxu1 %v4512_v34  ;;  %v4554_v34 = vld [vmem:[%s4624_s24 + $0x8b0] sm:$0xff]  }
 0x107   : > { %v3872_v31 = vpop.f32.mrb[0].mxu1  ;;  %v3851_v32 = vpop.f32.mrb[1].mxu0 }
 0x108   : > { %v3852_v35 = vadd.f32 %v3851_v32, %v3850_v30  ;;  %v3873_v36 = vpop.f32.mrb[1].mxu1  ;;  %v3853_v37 = vpop.f32.mrb[2].mxu0  ;;  %4153 = vmatpush3.bf16.msra.mxu0 %v4513_v40  ;;  %v4552_v32 = vld [vmem:[%s4624_s24 + $0x8f0] sm:$0xff]   ;;  %v237_v40 = vld [vmem:[%s5008_s0 + $0x88] sm:$0xff] }
 0x109   : > { %v3874_v38 = vadd.f32 %v3873_v36, %v3872_v31  ;;  %v3875_v39 = vpop.f32.mrb[2].mxu1  ;;  %v3854_v42 = vpop.f32.mrb[3].mxu0  ;;  %4175 = vmatpush3.bf16.msra.mxu1 %v4514_v41  ;;  %4154 = vmatprep.subr.bf16.mxu0 %v4515_v45  ;;  %v4551_v31 = vld [vmem:[%s4624_s24 + $0x870] sm:$0xff]   ;;  %v4556_v36 = vld [vmem:[%s4624_s24 + $0x8f8] sm:$0xff]  }
 0x10a   : > { %v3876_v44 = vpop.f32.mrb[3].mxu1  ;;  %4176 = vmatprep.subr.bf16.mxu1 %v4516_v46  ;;  %v4557_v37 = vld [vmem:[%s4624_s24 + $0x838] sm:$0xff]   ;;  %v236_v39 = vld [vmem:[%s5008_s0 + $0x80] sm:$0xff] }
 0x10b   : > { %v4938_v43 = vadd.f32 %v3874_v38, %v3852_v35  ;;  %v4555_v35 = vld [vmem:[%s4624_s24 + $0x878] sm:$0xff]   ;;  %v3539_v41 = vcombine.low %v236_v39, %v236_v39  ;;  %v3540_v42 = vcombine.high %v236_v39, %v236_v39  ;;  %v3542_v44 = vcombine.high %v237_v40, %v237_v40 }
 0x10c   : > { %4155 = vmatpush3.bf16.msra.mxu0 %v4517_v47  ;;  %v4558_v38 = vld [vmem:[%s4624_s24 + $0x8b8] sm:$0xff]  }
 0x10d   : > { %4177 = vmatpush3.bf16.msra.mxu1 %v4518_v48  ;;  %4156 = vmatprep.subr.bf16.mxu0 %v4519_v49 }
 0x10e   : > { %4178 = vmatprep.subr.bf16.mxu1 %v4520_v50 }
 0x110   : > { %4157 = vmatpush3.bf16.msra.mxu0 %v4521_v51 }
 0x111   : > { %4179 = vmatpush3.bf16.msra.mxu1 %v4522_v52  ;;  %4186 = vmatprep.subr.bf16.mxu0 %v4527_v58 }
 0x112   : > { %4208 = vmatprep.subr.bf16.mxu1 %v4528_v60 }
 0x113   : > { %3261 = vmatmul.mubr.bf16.vlgmr.msra.gmra.mrb[28].mxu0 %v3535_v55 }
 0x114   : > { %3301 = vmatmul.mubr.bf16.vlgmr.msra.gmra.mrb[28].mxu1 %v3537_v57  ;;  %4187 = vmatpush3.bf16.msra.mxu0 %v4529_v61 }
 0x115   : > { %4209 = vmatpush3.bf16.msra.mxu1 %v4530_v62  ;;  %4188 = vmatprep.subr.bf16.mxu0 %v4531_v63 }
 0x116   : > { %4210 = vmatprep.subr.bf16.mxu1 %v4532_v0  ;;  %3340 = vmatprep.mubr.bf16.mxu0 %v3540_v42 }
 0x117   : > { %3380 = vmatprep.mubr.bf16.mxu1 %v3542_v44 }
 0x118   : > { %4189 = vmatpush3.bf16.msra.mxu0 %v4533_v1 }
 0x119   : > { %4211 = vmatpush3.bf16.msra.mxu1 %v4534_v2  ;;  %4190 = vmatprep.subr.bf16.mxu0 %v4535_v3 }
 0x11a   : > { %4212 = vmatprep.subr.bf16.mxu1 %v4536_v4 }
 0x11c   : > { %4191 = vmatpush3.bf16.msra.mxu0 %v4537_v5 }
 0x11d   : > { %4213 = vmatpush3.bf16.msra.mxu1 %v4538_v6  ;;  %4192 = vmatprep.subr.bf16.mxu0 %v4539_v7 }
 0x11e   : > { %4214 = vmatprep.subr.bf16.mxu1 %v4540_v8 }
 0x120   : > { %4193 = vmatpush3.bf16.msra.mxu0 %v4541_v9 }
 0x121   : > { %4215 = vmatpush3.bf16.msra.mxu1 %v4542_v10  ;;  %4194 = vmatprep.subr.bf16.mxu0 %v4543_v11 }
 0x122   : > { %4216 = vmatprep.subr.bf16.mxu1 %v4544_v12 }
 0x124   : > { %4195 = vmatpush3.bf16.msra.mxu0 %v4545_v13 }
 0x125   : > { %4217 = vmatpush3.bf16.msra.mxu1 %v4546_v15  ;;  %4196 = vmatprep.subr.bf16.mxu0 %v4547_v18 }
 0x126   : > { %v3894_v14 = vpop.f32.mrb[4].mxu0  ;;  %4218 = vmatprep.subr.bf16.mxu1 %v4548_v21 }
 0x127   : > { %v3916_v16 = vpop.f32.mrb[4].mxu1  ;;  %v3895_v17 = vpop.f32.mrb[5].mxu0 }
 0x128   : > { %v3896_v19 = vadd.f32 %v3895_v17, %v3894_v14  ;;  %v3917_v20 = vpop.f32.mrb[5].mxu1  ;;  %v3897_v23 = vpop.f32.mrb[6].mxu0  ;;  %4197 = vmatpush3.bf16.msra.mxu0 %v4549_v26 }
 0x129   : > { %v3918_v22 = vadd.f32 %v3917_v20, %v3916_v16  ;;  %v3919_v24 = vpop.f32.mrb[6].mxu1  ;;  %v3898_v27 = vpop.f32.mrb[7].mxu0  ;;  %4219 = vmatpush3.bf16.msra.mxu1 %v4550_v28  ;;  %4198 = vmatprep.subr.bf16.mxu0 %v4551_v31 }
 0x12a   : > { %v2783_v25 = vadd.f32 %v3896_v19, %v4938_v43  ;;  %v3920_v29 = vpop.f32.mrb[7].mxu1  ;;  %4220 = vmatprep.subr.bf16.mxu1 %v4552_v32  ;;  %v3541_v43 = vcombine.low %v237_v40, %v237_v40 }
 0x12c   : > { %v2823_v30 = vadd.f32 %v3918_v22, %v2783_v25  ;;  %4199 = vmatpush3.bf16.msra.mxu0 %v4553_v33 }
 0x12d   : > { %4221 = vmatpush3.bf16.msra.mxu1 %v4554_v34  ;;  %4200 = vmatprep.subr.bf16.mxu0 %v4555_v35 }
 0x12e   : > { %4222 = vmatprep.subr.bf16.mxu1 %v4556_v36 }
 0x130   : > { %4201 = vmatpush3.bf16.msra.mxu0 %v4557_v37 }
 0x131   : > { %4223 = vmatpush3.bf16.msra.mxu1 %v4558_v38 }
 0x133   : > { %3341 = vmatmul.mubr.bf16.vlgmr.msra.gmra.mrb[32].mxu0 %v3539_v41 }
 0x134   : > { %3381 = vmatmul.mubr.bf16.vlgmr.msra.gmra.mrb[32].mxu1 %v3541_v43 }
 0x146   : > { %v3938_v45 = vpop.f32.mrb[8].mxu0 }
 0x147   : > { %v3960_v46 = vpop.f32.mrb[8].mxu1  ;;  %v3939_v47 = vpop.f32.mrb[9].mxu0 }
 0x148   : > { %v3940_v48 = vadd.f32 %v3939_v47, %v3938_v45  ;;  %v3961_v49 = vpop.f32.mrb[9].mxu1  ;;  %v3941_v50 = vpop.f32.mrb[10].mxu0 }
 0x149   : > { %v3962_v51 = vadd.f32 %v3961_v49, %v3960_v46  ;;  %v3963_v52 = vpop.f32.mrb[10].mxu1  ;;  %v3942_v53 = vpop.f32.mrb[11].mxu0 }
 0x14a   : > { %v2863_v54 = vadd.f32 %v3940_v48, %v2823_v30  ;;  %v3964_v55 = vpop.f32.mrb[11].mxu1 }
 0x14c   : > { %v2903_v56 = vadd.f32 %v3962_v51, %v2863_v54 }
 0x166   : > { %v3982_v57 = vpop.f32.mrb[12].mxu0 }
 0x167   : > { %v4004_v58 = vpop.f32.mrb[12].mxu1  ;;  %v3983_v59 = vpop.f32.mrb[13].mxu0 }
 0x168   : > { %v4005_v60 = vpop.f32.mrb[13].mxu1  ;;  %v3984_v61 = vadd.f32 %v3983_v59, %v3982_v57  ;;  %v3985_v63 = vpop.f32.mrb[14].mxu0 }
 0x169   : > { %v4006_v62 = vadd.f32 %v4005_v60, %v4004_v58  ;;  %v4007_v0 = vpop.f32.mrb[14].mxu1  ;;  %v3986_v1 = vpop.f32.mrb[15].mxu0 }
 0x16a   : > { %v4008_v2 = vpop.f32.mrb[15].mxu1  ;;  %v2943_v3 = vadd.f32 %v3984_v61, %v2903_v56  ;;  %v3831_v0 = vld [vmem:[%s211_s9] ss:$0 sm:$0xff] }
 0x16c   : > { %v2983_v4 = vadd.f32 %v4006_v62, %v2943_v3 }
 0x186   : > { %v4026_v5 = vpop.f32.mrb[16].mxu0 }
 0x187   : > { %v4048_v6 = vpop.f32.mrb[16].mxu1  ;;  %v4027_v7 = vpop.f32.mrb[17].mxu0 }
 0x188   : > { %v4049_v8 = vpop.f32.mrb[17].mxu1  ;;  %v4028_v9 = vadd.f32 %v4027_v7, %v4026_v5  ;;  %v4029_v11 = vpop.f32.mrb[18].mxu0 }
 0x189   : > { %v4050_v10 = vadd.f32 %v4049_v8, %v4048_v6  ;;  %v4051_v12 = vpop.f32.mrb[18].mxu1  ;;  %v4030_v13 = vpop.f32.mrb[19].mxu0 }
 0x18a   : > { %v4052_v14 = vpop.f32.mrb[19].mxu1  ;;  %v3023_v15 = vadd.f32 %v4028_v9, %v2983_v4 }
 0x18c   : > { %v3063_v16 = vadd.f32 %v4050_v10, %v3023_v15 }
 0x1a6   : > { %v4070_v17 = vpop.f32.mrb[20].mxu0 }
 0x1a7   : > { %v4092_v18 = vpop.f32.mrb[20].mxu1  ;;  %v4071_v19 = vpop.f32.mrb[21].mxu0 }
 0x1a8   : > { %v4072_v20 = vadd.f32 %v4071_v19, %v4070_v17  ;;  %v4093_v21 = vpop.f32.mrb[21].mxu1  ;;  %v4073_v22 = vpop.f32.mrb[22].mxu0 }
 0x1a9   : > { %v4094_v23 = vadd.f32 %v4093_v21, %v4092_v18  ;;  %v4095_v24 = vpop.f32.mrb[22].mxu1  ;;  %v4074_v25 = vpop.f32.mrb[23].mxu0 }
 0x1aa   : > { %v3103_v26 = vadd.f32 %v4072_v20, %v3063_v16  ;;  %v4096_v27 = vpop.f32.mrb[23].mxu1 }
 0x1ac   : > { %v3143_v28 = vadd.f32 %v4094_v23, %v3103_v26 }
 0x1c6   : > { %v4114_v29 = vpop.f32.mrb[24].mxu0 }
 0x1c7   : > { %v4136_v30 = vpop.f32.mrb[24].mxu1  ;;  %v4115_v31 = vpop.f32.mrb[25].mxu0 }
 0x1c8   : > { %v4116_v32 = vadd.f32 %v4115_v31, %v4114_v29  ;;  %v4137_v33 = vpop.f32.mrb[25].mxu1  ;;  %v4117_v34 = vpop.f32.mrb[26].mxu0 }
 0x1c9   : > { %v4138_v35 = vadd.f32 %v4137_v33, %v4136_v30  ;;  %v4139_v36 = vpop.f32.mrb[26].mxu1  ;;  %v4118_v37 = vpop.f32.mrb[27].mxu0 }
 0x1ca   : > { %v3183_v38 = vadd.f32 %v4116_v32, %v3143_v28  ;;  %v4140_v39 = vpop.f32.mrb[27].mxu1 }
 0x1cc   : > { %v3223_v40 = vadd.f32 %v4138_v35, %v3183_v38 }
 0x1e6   : > { %v4158_v41 = vpop.f32.mrb[28].mxu0 }
 0x1e7   : > { %v4180_v42 = vpop.f32.mrb[28].mxu1  ;;  %v4159_v43 = vpop.f32.mrb[29].mxu0 }
 0x1e8   : > { %v4160_v44 = vadd.f32 %v4159_v43, %v4158_v41  ;;  %v4181_v45 = vpop.f32.mrb[29].mxu1  ;;  %v4161_v46 = vpop.f32.mrb[30].mxu0 }
 0x1e9   : > { %v4182_v47 = vadd.f32 %v4181_v45, %v4180_v42  ;;  %v4183_v48 = vpop.f32.mrb[30].mxu1  ;;  %v4162_v49 = vpop.f32.mrb[31].mxu0 }
 0x1ea   : > { %v3263_v50 = vadd.f32 %v4160_v44, %v3223_v40  ;;  %v4184_v51 = vpop.f32.mrb[31].mxu1 }
 0x1ec   : > { %v3303_v52 = vadd.f32 %v4182_v47, %v3263_v50 }
 0x206   : > { %v4202_v53 = vpop.f32.mrb[32].mxu0 }
 0x207   : > { %v4224_v54 = vpop.f32.mrb[32].mxu1  ;;  %v4203_v55 = vpop.f32.mrb[33].mxu0 }
 0x208   : > { %v4204_v56 = vadd.f32 %v4203_v55, %v4202_v53  ;;  %v4225_v57 = vpop.f32.mrb[33].mxu1  ;;  %v4205_v58 = vpop.f32.mrb[34].mxu0 }
 0x209   : > { %v4226_v59 = vadd.f32 %v4225_v57, %v4224_v54  ;;  %v4227_v60 = vpop.f32.mrb[34].mxu1  ;;  %v4206_v61 = vpop.f32.mrb[35].mxu0 }
 0x20a   : > { %v3343_v62 = vadd.f32 %v4204_v56, %v3303_v52  ;;  %v4228_v63 = vpop.f32.mrb[35].mxu1 }
 0x20c   : > { %v3383_v1 = vadd.f32 %v4226_v59, %v3343_v62 }
 0x20e   : > { %v3395_v2 = vadd.f32 %v3831_v0, %v3383_v1  ;;  %v3400_v3 = vrot.slane %v3383_v1, 4 }
 0x210   : > { %v3396_v4 = vmax.f32 %v3395_v2, 0.0  ;;  %v3402_v5 = vsub.f32 %v3383_v1, %v3400_v3 }
 0x212   : > { %v3397_v6 = vpack.c.bf16 %v3396_v4, %v3396_v4  ;;  %v3403_v7 = vmul.f32 %v3402_v5, %v3402_v5 }
 0x214   : > { %3398 = vst [vmem:[%s215_s13] sm:$0xf] %v3397_v6  ;;  %v3405_v8 = vsel %vm3404_vm0, %v3403_v7, 0.0 }
 0x215   : > { %v3406_v9 = vrot.slane %v3405_v8, 4 }
 0x217   : > { %v3407_v10 = vadd.f32 %v3406_v9, %v3405_v8 }
 0x219   : > { %v3408_v11 = vrot.slane %v3407_v10, 2 }
 0x21b   : > { %v3409_v12 = vadd.f32 %v3408_v11, %v3407_v10 }
 0x21d   : > { %v3410_v13 = vrot.slane %v3409_v12, 1 }
 0x21f   : > { %v3411_v14 = vadd.f32 %v3410_v13, %v3409_v12 }
 0x221   : > { %3412 = vst [vmem:[%s218_s18] sm:$0x1] %v3411_v14 }
 0x222 PF: > { %s15_s15 = sadd.s32 1, %s4569_s15  }
 0x223   : > { %p12_p4 = scmp.ge.s32.totalorder %s15_s15, 6  }
 0x225   :  { %14 = sbr.rel (!%p12_p4) target bundleno = 1 (0x1), region = 77 }

// kernel: vgg19_feature_loss.28
= control target key start
LH: loop header
LB: loop body
LE: loop exit
PB: predicated region body
PF: predicated region fallthrough
CT: control target
= control target key end

     0   :  { %s4637_s15 = smov 0   ;;  %s5037_s0 = inlined_call_operand.vmem [shape: bf16[2,4608], index: 0, kind: input, shape index: {}]   ;;  %s5038_s1 = inlined_call_operand.vmem [shape: bf16[4,4608,128], index: 1, kind: input, shape index: {}]   ;;  %s5039_s2 = inlined_call_operand.vmem [shape: f32[1,512], index: 2, kind: input, shape index: {}]   ;;  %s5040_s3 = inlined_call_operand.vmem [shape: bf16[2,512], index: 3, kind: output, shape index: {0}]   ;;  %s5041_s4 = inlined_call_operand.vmem [shape: f32[1,512], index: 4, kind: output, shape index: {1}]  }
   0x1 LB: > { %s3607_s16 = sadd.s32 4294967295, %s4609_s15   ;;  %p3611_p0 = scmp.ge.s32.totalorder %s4609_s15, 1  ;;  %s4609_s15 = sphi %s4637_s15, %s15_s15  }
   0x2   : > { %p173_p1 = scmp.lt.s32.totalorder %s4609_s15, 5 }
   0x4   : > { %p174_p2 = pnand %p3611_p0, %p173_p1 }
   0x5   : > { %p203_p3 = scmp.lt.s32.totalorder (!%p174_p2), %s3607_s16, 3  ;;  %v808_v0 = vlaneseq (!%p174_p2)  ;;  %v4611_v1 = vmov (!%p174_p2), 1966171168   ;;  %v218_v5 = vld [vmem:[%s5037_s0] sm:$0xff] (!%p174_p2) }
   0x6   : > { %177 = sbr.rel (%p174_p2) target bundleno = 533 (0x215), region = 32  ;;  %v806_v2 = vunpack.c.l.s4 (!%p174_p2), %v4611_v1  ;;  %v804_v30 = vcombine.high (!%p174_p2), %v218_v5, %v218_v5 }
   0x7   : > { %v809_v3 = vshrl.u32 (!%p174_p2), %v808_v0, 7 }
   0x8   : > { %v807_v4 = vunpack.c.0.s8 (!%p174_p2), %v806_v2 }
   0xa   : > { %v4651_v6 = vsub.s32 (!%p174_p2), %v807_v4, %v809_v3  ;;  %v4725_v4 = vld [vmem:[%s5037_s0 + $0x8] sm:$0xff] (!%p174_p2) }
   0xc   : > { %v4660_v8 = vrot.slane (!%p174_p2), %v218_v5, %v4651_v6  ;;  %v4688_v35 = vrot.slane (!%p174_p2), %v804_v30, %v4651_v6 }
   0xd   : > { %s5043_s16 = smov (!%p203_p3, %s3607_s16), 3 }
   0xe   : > { %s4301_s17 = smul.u32 2304, %s5043_s16  ;;  %v819_v11 = vcombine.high %v4660_v8, %v4660_v8  ;;  %v820_v40 = vcombine.high %v4688_v35, %v4688_v35  ;;  %v827_v43 = vrot.slane %v4660_v8, %v4651_v6  ;;  %s210_s7 = scalar_lea.vmem %s5039_s2, %s5043_s16 }
   0xf   : > { %s213_s10 = scalar_lea.vmem %s5040_s3, %s5043_s16  ;;  %s216_s13 = scalar_lea.vmem %s5041_s4, %s5043_s16 }
  0x10   : > { %s4656_s22 = scalar_lea.vmem %s5038_s1, %s4301_s17  ;;  %v841_v14 = vrot.slane %v819_v11, %v4651_v6  ;;  %v848_v46 = vrot.slane %v820_v40, %v4651_v6  ;;  %v849_v48 = vcombine.high %v827_v43, %v827_v43  ;;  %v4734_v11 = vrot.slane %v4725_v4, %v4651_v6 }
  0x11   : > { %v4311_v7 = vld [vmem:[%s4656_s22 + $0x40] sm:$0xff]   ;;  %v4315_v13 = vld [vmem:[%s4656_s22 + $0x48] sm:$0xff]   ;;  %v4319_v19 = vld [vmem:[%s4656_s22 + $0x50] sm:$0xff]  }
  0x12   : > { %v4312_v9 = vld [vmem:[%s4656_s22 + $0xc0] sm:$0xff]   ;;  %3905 = vmatprep.subr.bf16.mxu0 %v4311_v7  ;;  %v4316_v15 = vld [vmem:[%s4656_s22 + $0xc8] sm:$0xff]   ;;  %2820 = vmatprep.mubr.bf16.mxu0 %v841_v14  ;;  %v851_v17 = vcombine.high %v841_v14, %v841_v14  ;;  %v4320_v20 = vld [vmem:[%s4656_s22 + $0xd0] sm:$0xff]   ;;  %v852_v52 = vcombine.high %v848_v46, %v848_v46 }
  0x13   : > { %v4313_v10 = vld [vmem:[%s4656_s22] sm:$0xff]   ;;  %3927 = vmatprep.subr.bf16.mxu1 %v4312_v9  ;;  %v4317_v16 = vld [vmem:[%s4656_s22 + $0x8] sm:$0xff]   ;;  %v4321_v21 = vld [vmem:[%s4656_s22 + $0x10] sm:$0xff]  }
  0x14   : > { %v4314_v12 = vld [vmem:[%s4656_s22 + $0x80] sm:$0xff]   ;;  %3906 = vmatpush3.bf16.msra.mxu0 %v4313_v10  ;;  %v4318_v18 = vld [vmem:[%s4656_s22 + $0x88] sm:$0xff]   ;;  %2860 = vmatprep.mubr.bf16.mxu1 %v851_v17  ;;  %v4322_v22 = vld [vmem:[%s4656_s22 + $0x90] sm:$0xff]  }
  0x15   : > { %3928 = vmatpush3.bf16.msra.mxu1 %v4314_v12  ;;  %3907 = vmatprep.subr.bf16.mxu0 %v4315_v13  ;;  %v4323_v23 = vld [vmem:[%s4656_s22 + $0x58] sm:$0xff]   ;;  %v4327_v27 = vld [vmem:[%s4656_s22 + $0x60] sm:$0xff]   ;;  %v4331_v32 = vld [vmem:[%s4656_s22 + $0x68] sm:$0xff]  }
  0x16   : > { %3929 = vmatprep.subr.bf16.mxu1 %v4316_v15  ;;  %v4324_v24 = vld [vmem:[%s4656_s22 + $0xd8] sm:$0xff]   ;;  %v4328_v28 = vld [vmem:[%s4656_s22 + $0xe0] sm:$0xff]   ;;  %v4332_v33 = vld [vmem:[%s4656_s22 + $0xe8] sm:$0xff]  }
  0x17   : > { %v4325_v25 = vld [vmem:[%s4656_s22 + $0x18] sm:$0xff]   ;;  %v4329_v29 = vld [vmem:[%s4656_s22 + $0x20] sm:$0xff]   ;;  %v4333_v34 = vld [vmem:[%s4656_s22 + $0x28] sm:$0xff]  }
  0x18   : > { %3908 = vmatpush3.bf16.msra.mxu0 %v4317_v16  ;;  %v4326_v26 = vld [vmem:[%s4656_s22 + $0x98] sm:$0xff]   ;;  %v4330_v31 = vld [vmem:[%s4656_s22 + $0xa0] sm:$0xff]   ;;  %v4334_v36 = vld [vmem:[%s4656_s22 + $0xa8] sm:$0xff]   ;;  %v868_v16 = vcombine.high %v4734_v11, %v4734_v11 }
  0x19   : > { %3930 = vmatpush3.bf16.msra.mxu1 %v4318_v18  ;;  %3909 = vmatprep.subr.bf16.mxu0 %v4319_v19  ;;  %v4335_v37 = vld [vmem:[%s4656_s22 + $0x70] sm:$0xff]   ;;  %v4339_v42 = vld [vmem:[%s4656_s22 + $0x78] sm:$0xff]   ;;  %v4344_v49 = vld [vmem:[%s4656_s22 + $0x140] sm:$0xff]   ;;  %v834_v19 = vrot.slane %v4688_v35, %v4651_v6 }
  0x1a   : > { %3931 = vmatprep.subr.bf16.mxu1 %v4320_v20  ;;  %v4336_v38 = vld [vmem:[%s4656_s22 + $0xf0] sm:$0xff]   ;;  %v4340_v44 = vld [vmem:[%s4656_s22 + $0xf8] sm:$0xff]   ;;  %v4345_v50 = vld [vmem:[%s4656_s22 + $0x1c0] sm:$0xff]  }
  0x1b   : > { %v4337_v39 = vld [vmem:[%s4656_s22 + $0x30] sm:$0xff]   ;;  %v4341_v45 = vld [vmem:[%s4656_s22 + $0x38] sm:$0xff]   ;;  %v4346_v51 = vld [vmem:[%s4656_s22 + $0x100] sm:$0xff]  }
  0x1c   : > { %3910 = vmatpush3.bf16.msra.mxu0 %v4321_v21  ;;  %v4338_v41 = vld [vmem:[%s4656_s22 + $0xb0] sm:$0xff]   ;;  %v4342_v47 = vld [vmem:[%s4656_s22 + $0xb8] sm:$0xff]   ;;  %v4347_v53 = vld [vmem:[%s4656_s22 + $0x180] sm:$0xff]  }
  0x1d   : > { %3932 = vmatpush3.bf16.msra.mxu1 %v4322_v22  ;;  %3911 = vmatprep.subr.bf16.mxu0 %v4323_v23  ;;  %v4348_v54 = vld [vmem:[%s4656_s22 + $0x148] sm:$0xff]   ;;  %v4352_v58 = vld [vmem:[%s4656_s22 + $0x150] sm:$0xff]   ;;  %v4356_v62 = vld [vmem:[%s4656_s22 + $0x158] sm:$0xff]   ;;  %v890_v22 = vrot.slane %v868_v16, %v4651_v6 }
  0x1e   : > { %3933 = vmatprep.subr.bf16.mxu1 %v4324_v24  ;;  %v4349_v55 = vld [vmem:[%s4656_s22 + $0x1c8] sm:$0xff]   ;;  %v4353_v59 = vld [vmem:[%s4656_s22 + $0x1d0] sm:$0xff]   ;;  %v4357_v63 = vld [vmem:[%s4656_s22 + $0x1d8] sm:$0xff]   ;;  %v850_v24 = vcombine.high %v834_v19, %v834_v19 }
  0x1f   : > { %v4350_v56 = vld [vmem:[%s4656_s22 + $0x108] sm:$0xff]   ;;  %v4354_v60 = vld [vmem:[%s4656_s22 + $0x110] sm:$0xff]   ;;  %v4358_v0 = vld [vmem:[%s4656_s22 + $0x118] sm:$0xff]  }
  0x20   : > { %3912 = vmatpush3.bf16.msra.mxu0 %v4325_v25  ;;  %v4351_v57 = vld [vmem:[%s4656_s22 + $0x188] sm:$0xff]   ;;  %v4355_v61 = vld [vmem:[%s4656_s22 + $0x190] sm:$0xff]   ;;  %v4359_v1 = vld [vmem:[%s4656_s22 + $0x198] sm:$0xff]  }
  0x21   : > { %3934 = vmatpush3.bf16.msra.mxu1 %v4326_v26  ;;  %3913 = vmatprep.subr.bf16.mxu0 %v4327_v27  ;;  %v4360_v2 = vld [vmem:[%s4656_s22 + $0x160] sm:$0xff]   ;;  %v4364_v8 = vld [vmem:[%s4656_s22 + $0x168] sm:$0xff]   ;;  %v4368_v13 = vld [vmem:[%s4656_s22 + $0x170] sm:$0xff]  }
  0x22   : > { %3935 = vmatprep.subr.bf16.mxu1 %v4328_v28  ;;  %v4361_v3 = vld [vmem:[%s4656_s22 + $0x1e0] sm:$0xff]   ;;  %v4365_v9 = vld [vmem:[%s4656_s22 + $0x1e8] sm:$0xff]   ;;  %v4369_v14 = vld [vmem:[%s4656_s22 + $0x1f0] sm:$0xff]   ;;  %v900_v28 = vcombine.high %v890_v22, %v890_v22 }
  0x23   : > { %v4362_v5 = vld [vmem:[%s4656_s22 + $0x120] sm:$0xff]   ;;  %v4366_v10 = vld [vmem:[%s4656_s22 + $0x128] sm:$0xff]   ;;  %v4370_v15 = vld [vmem:[%s4656_s22 + $0x130] sm:$0xff]  }
  0x24   : > { %3914 = vmatpush3.bf16.msra.mxu0 %v4329_v29  ;;  %v4363_v7 = vld [vmem:[%s4656_s22 + $0x1a0] sm:$0xff]   ;;  %v4367_v12 = vld [vmem:[%s4656_s22 + $0x1a8] sm:$0xff]   ;;  %v4371_v17 = vld [vmem:[%s4656_s22 + $0x1b0] sm:$0xff]  }
  0x25   : > { %3936 = vmatpush3.bf16.msra.mxu1 %v4330_v31  ;;  %3915 = vmatprep.subr.bf16.mxu0 %v4331_v32  ;;  %v4372_v18 = vld [vmem:[%s4656_s22 + $0x178] sm:$0xff]   ;;  %v4376_v25 = vld [vmem:[%s4656_s22 + $0x240] sm:$0xff]   ;;  %v4380_v30 = vld [vmem:[%s4656_s22 + $0x248] sm:$0xff]  }
  0x26   : > { %3937 = vmatprep.subr.bf16.mxu1 %v4332_v33  ;;  %v4373_v20 = vld [vmem:[%s4656_s22 + $0x1f8] sm:$0xff]   ;;  %v4377_v26 = vld [vmem:[%s4656_s22 + $0x2c0] sm:$0xff]   ;;  %v4381_v31 = vld [vmem:[%s4656_s22 + $0x2c8] sm:$0xff]  }
  0x27   : > { %v4374_v21 = vld [vmem:[%s4656_s22 + $0x138] sm:$0xff]   ;;  %v4378_v27 = vld [vmem:[%s4656_s22 + $0x200] sm:$0xff]   ;;  %v4382_v32 = vld [vmem:[%s4656_s22 + $0x208] sm:$0xff]  }
  0x28   : > { %3916 = vmatpush3.bf16.msra.mxu0 %v4333_v34  ;;  %v4375_v23 = vld [vmem:[%s4656_s22 + $0x1b8] sm:$0xff]   ;;  %v4379_v29 = vld [vmem:[%s4656_s22 + $0x280] sm:$0xff]   ;;  %v4383_v33 = vld [vmem:[%s4656_s22 + $0x288] sm:$0xff]  }
  0x29   : > { %3938 = vmatpush3.bf16.msra.mxu1 %v4334_v36  ;;  %3917 = vmatprep.subr.bf16.mxu0 %v4335_v37  ;;  %v4384_v34 = vld [vmem:[%s4656_s22 + $0x250] sm:$0xff]   ;;  %v4390_v40 = vld [vmem:[%s4656_s22 + $0x218] sm:$0xff]  }
  0x2a   : > { %3939 = vmatprep.subr.bf16.mxu1 %v4336_v38  ;;  %v4385_v35 = vld [vmem:[%s4656_s22 + $0x2d0] sm:$0xff]   ;;  %v4388_v38 = vld [vmem:[%s4656_s22 + $0x258] sm:$0xff]  }
  0x2b   : > { %v4386_v36 = vld [vmem:[%s4656_s22 + $0x210] sm:$0xff]   ;;  %v4422_v16 = vld [vmem:[%s4656_s22 + $0x318] sm:$0xff]  }
  0x2c   : > { %3918 = vmatpush3.bf16.msra.mxu0 %v4337_v39  ;;  %v4387_v37 = vld [vmem:[%s4656_s22 + $0x290] sm:$0xff]   ;;  %v4389_v39 = vld [vmem:[%s4656_s22 + $0x2d8] sm:$0xff]  }
  0x2d   : > { %3940 = vmatpush3.bf16.msra.mxu1 %v4338_v41  ;;  %3919 = vmatprep.subr.bf16.mxu0 %v4339_v42  ;;  %v4391_v41 = vld [vmem:[%s4656_s22 + $0x298] sm:$0xff]   ;;  %v4392_v42 = vld [vmem:[%s4656_s22 + $0x260] sm:$0xff]  }
  0x2e   : > { %3941 = vmatprep.subr.bf16.mxu1 %v4340_v44  ;;  %v4394_v44 = vld [vmem:[%s4656_s22 + $0x220] sm:$0xff]  }
  0x30   : > { %3920 = vmatpush3.bf16.msra.mxu0 %v4341_v45  ;;  %v853_v45 = vcombine.high %v4725_v4, %v4725_v4  ;;  %v4411_v4 = vld [vmem:[%s4656_s22 + $0x380] sm:$0xff]  }
  0x31   : > { %3942 = vmatpush3.bf16.msra.mxu1 %v4342_v47  ;;  %3949 = vmatprep.subr.bf16.mxu0 %v4344_v49  ;;  %v4396_v47 = vld [vmem:[%s4656_s22 + $0x268] sm:$0xff]  }
  0x32   : > { %3971 = vmatprep.subr.bf16.mxu1 %v4345_v50  ;;  %v4398_v49 = vld [vmem:[%s4656_s22 + $0x228] sm:$0xff]   ;;  %v4776_v50 = vrot.slane %v853_v45, %v4651_v6  ;;  %v4450_v45 = vld [vmem:[%s4656_s22 + $0x4d0] sm:$0xff]  }
  0x33   : > { %2821 = vmatmul.mubr.bf16.vlgmr.msra.gmra.mrb[0].mxu0 %v827_v43  ;;  %v4393_v43 = vld [vmem:[%s4656_s22 + $0x2e0] sm:$0xff]  }
  0x34   : > { %2861 = vmatmul.mubr.bf16.vlgmr.msra.gmra.mrb[0].mxu1 %v849_v48  ;;  %3950 = vmatpush3.bf16.msra.mxu0 %v4346_v51  ;;  %v4397_v48 = vld [vmem:[%s4656_s22 + $0x2e8] sm:$0xff]  }
  0x35   : > { %3972 = vmatpush3.bf16.msra.mxu1 %v4347_v53  ;;  %2900 = vmatprep.mubr.bf16.mxu0 %v848_v46  ;;  %v4395_v46 = vld [vmem:[%s4656_s22 + $0x2a0] sm:$0xff]   ;;  %v4399_v51 = vld [vmem:[%s4656_s22 + $0x2a8] sm:$0xff]   ;;  %v4401_v53 = vld [vmem:[%s4656_s22 + $0x2f0] sm:$0xff]  }
  0x36   : > { %3951 = vmatprep.subr.bf16.mxu0 %v4348_v54  ;;  %2940 = vmatprep.mubr.bf16.mxu1 %v852_v52  ;;  %v4400_v52 = vld [vmem:[%s4656_s22 + $0x270] sm:$0xff]  }
  0x37   : > { %3973 = vmatprep.subr.bf16.mxu1 %v4349_v55  ;;  %v4402_v54 = vld [vmem:[%s4656_s22 + $0x230] sm:$0xff]   ;;  %v869_v55 = vcombine.high %v4776_v50, %v4776_v50 }
  0x38   : > { %3952 = vmatpush3.bf16.msra.mxu0 %v4350_v56  ;;  %v4403_v56 = vld [vmem:[%s4656_s22 + $0x2b0] sm:$0xff]  }
  0x39   : > { %3974 = vmatpush3.bf16.msra.mxu1 %v4351_v57  ;;  %3953 = vmatprep.subr.bf16.mxu0 %v4352_v58  ;;  %v4404_v57 = vld [vmem:[%s4656_s22 + $0x278] sm:$0xff]   ;;  %v876_v58 = vrot.slane %v4734_v11, %v4651_v6  ;;  %v4417_v11 = vld [vmem:[%s4656_s22 + $0x3d0] sm:$0xff]  }
  0x3a   : > { %3975 = vmatprep.subr.bf16.mxu1 %v4353_v59  ;;  %v4405_v59 = vld [vmem:[%s4656_s22 + $0x2f8] sm:$0xff]  }
  0x3c   : > { %3954 = vmatpush3.bf16.msra.mxu0 %v4354_v60  ;;  %v4406_v60 = vld [vmem:[%s4656_s22 + $0x238] sm:$0xff]  }
  0x3d   : > { %3976 = vmatpush3.bf16.msra.mxu1 %v4355_v61  ;;  %3955 = vmatprep.subr.bf16.mxu0 %v4356_v62  ;;  %v897_v61 = vrot.slane %v869_v55, %v4651_v6  ;;  %v4407_v62 = vld [vmem:[%s4656_s22 + $0x2b8] sm:$0xff]   ;;  %v4460_v55 = vld [vmem:[%s4656_s22 + $0x4a0] sm:$0xff]  }
  0x3e   : > { %3977 = vmatprep.subr.bf16.mxu1 %v4357_v63  ;;  %v898_v63 = vcombine.high %v876_v58, %v876_v58 }
  0x40   : > { %3956 = vmatpush3.bf16.msra.mxu0 %v4358_v0  ;;  %v4408_v0 = vld [vmem:[%s4656_s22 + $0x340] sm:$0xff]  }
  0x41   : > { %3978 = vmatpush3.bf16.msra.mxu1 %v4359_v1  ;;  %3957 = vmatprep.subr.bf16.mxu0 %v4360_v2  ;;  %v4409_v1 = vld [vmem:[%s4656_s22 + $0x3c0] sm:$0xff]  }
  0x42   : > { %3979 = vmatprep.subr.bf16.mxu1 %v4361_v3  ;;  %v4410_v2 = vld [vmem:[%s4656_s22 + $0x300] sm:$0xff]   ;;  %v901_v3 = vcombine.high %v897_v61, %v897_v61 }
  0x44   : > { %3958 = vmatpush3.bf16.msra.mxu0 %v4362_v5  ;;  %v4412_v5 = vld [vmem:[%s4656_s22 + $0x348] sm:$0xff]  }
  0x45   : > { %3980 = vmatpush3.bf16.msra.mxu1 %v4363_v7  ;;  %3959 = vmatprep.subr.bf16.mxu0 %v4364_v8  ;;  %v4413_v7 = vld [vmem:[%s4656_s22 + $0x3c8] sm:$0xff]  }
  0x46   : > { %3981 = vmatprep.subr.bf16.mxu1 %v4365_v9  ;;  %v4414_v8 = vld [vmem:[%s4656_s22 + $0x308] sm:$0xff]  }
  0x47   : > { %v4415_v9 = vld [vmem:[%s4656_s22 + $0x388] sm:$0xff]  }
  0x48   : > { %3960 = vmatpush3.bf16.msra.mxu0 %v4366_v10  ;;  %v4416_v10 = vld [vmem:[%s4656_s22 + $0x350] sm:$0xff]  }
  0x49   : > { %3982 = vmatpush3.bf16.msra.mxu1 %v4367_v12  ;;  %3961 = vmatprep.subr.bf16.mxu0 %v4368_v13  ;;  %v4418_v12 = vld [vmem:[%s4656_s22 + $0x310] sm:$0xff]  }
  0x4a   : > { %3983 = vmatprep.subr.bf16.mxu1 %v4369_v14  ;;  %v4419_v13 = vld [vmem:[%s4656_s22 + $0x390] sm:$0xff]   ;;  %v4420_v14 = vld [vmem:[%s4656_s22 + $0x358] sm:$0xff]  }
  0x4c   : > { %3962 = vmatpush3.bf16.msra.mxu0 %v4370_v15  ;;  %v4421_v15 = vld [vmem:[%s4656_s22 + $0x3d8] sm:$0xff]  }
  0x4d   : > { %3984 = vmatpush3.bf16.msra.mxu1 %v4371_v17  ;;  %3963 = vmatprep.subr.bf16.mxu0 %v4372_v18  ;;  %v4423_v17 = vld [vmem:[%s4656_s22 + $0x398] sm:$0xff]   ;;  %v4424_v18 = vld [vmem:[%s4656_s22 + $0x360] sm:$0xff]  }
  0x4e   : > { %3985 = vmatprep.subr.bf16.mxu1 %v4373_v20  ;;  %v4426_v20 = vld [vmem:[%s4656_s22 + $0x320] sm:$0xff]  }
  0x50   : > { %3964 = vmatpush3.bf16.msra.mxu0 %v4374_v21  ;;  %v4427_v21 = vld [vmem:[%s4656_s22 + $0x3a0] sm:$0xff]  }
  0x51   : > { %3986 = vmatpush3.bf16.msra.mxu1 %v4375_v23  ;;  %3993 = vmatprep.subr.bf16.mxu0 %v4376_v25  ;;  %v4429_v23 = vld [vmem:[%s4656_s22 + $0x3e8] sm:$0xff]  }
  0x52   : > { %4015 = vmatprep.subr.bf16.mxu1 %v4377_v26  ;;  %v4431_v25 = vld [vmem:[%s4656_s22 + $0x3a8] sm:$0xff]   ;;  %v4432_v26 = vld [vmem:[%s4656_s22 + $0x370] sm:$0xff]  }
  0x53   : > { %2901 = vmatmul.mubr.bf16.vlgmr.msra.gmra.mrb[4].mxu0 %v834_v19  ;;  %v4425_v19 = vld [vmem:[%s4656_s22 + $0x3e0] sm:$0xff]  }
  0x54   : > { %2941 = vmatmul.mubr.bf16.vlgmr.msra.gmra.mrb[4].mxu1 %v850_v24  ;;  %3994 = vmatpush3.bf16.msra.mxu0 %v4378_v27  ;;  %v4430_v24 = vld [vmem:[%s4656_s22 + $0x328] sm:$0xff]   ;;  %v4433_v27 = vld [vmem:[%s4656_s22 + $0x3f0] sm:$0xff]  }
  0x55   : > { %4016 = vmatpush3.bf16.msra.mxu1 %v4379_v29  ;;  %2980 = vmatprep.mubr.bf16.mxu0 %v890_v22  ;;  %v4428_v22 = vld [vmem:[%s4656_s22 + $0x368] sm:$0xff]   ;;  %v4435_v29 = vld [vmem:[%s4656_s22 + $0x3b0] sm:$0xff]  }
  0x56   : > { %3995 = vmatprep.subr.bf16.mxu0 %v4380_v30  ;;  %3020 = vmatprep.mubr.bf16.mxu1 %v900_v28  ;;  %v4434_v28 = vld [vmem:[%s4656_s22 + $0x330] sm:$0xff]   ;;  %v4436_v30 = vld [vmem:[%s4656_s22 + $0x378] sm:$0xff]  }
  0x57   : > { %4017 = vmatprep.subr.bf16.mxu1 %v4381_v31  ;;  %v883_v31 = vrot.slane %v4776_v50, %v4651_v6  ;;  %v4455_v50 = vld [vmem:[%s4656_s22 + $0x418] sm:$0xff]  }
  0x58   : > { %3996 = vmatpush3.bf16.msra.mxu0 %v4382_v32  ;;  %v4437_v32 = vld [vmem:[%s4656_s22 + $0x3f8] sm:$0xff]  }
  0x59   : > { %4018 = vmatpush3.bf16.msra.mxu1 %v4383_v33  ;;  %3997 = vmatprep.subr.bf16.mxu0 %v4384_v34  ;;  %v4438_v33 = vld [vmem:[%s4656_s22 + $0x338] sm:$0xff]  }
  0x5a   : > { %4019 = vmatprep.subr.bf16.mxu1 %v4385_v35  ;;  %v4439_v34 = vld [vmem:[%s4656_s22 + $0x3b8] sm:$0xff]   ;;  %v899_v35 = vcombine.high %v883_v31, %v883_v31 }
  0x5c   : > { %3998 = vmatpush3.bf16.msra.mxu0 %v4386_v36  ;;  %v4441_v36 = vld [vmem:[%s4656_s22 + $0x440] sm:$0xff]  }
  0x5d   : > { %4020 = vmatpush3.bf16.msra.mxu1 %v4387_v37  ;;  %3999 = vmatprep.subr.bf16.mxu0 %v4388_v38  ;;  %v4442_v37 = vld [vmem:[%s4656_s22 + $0x4c0] sm:$0xff]  }
  0x5e   : > { %4021 = vmatprep.subr.bf16.mxu1 %v4389_v39  ;;  %v4443_v38 = vld [vmem:[%s4656_s22 + $0x400] sm:$0xff]  }
  0x5f   : > { %v4444_v39 = vld [vmem:[%s4656_s22 + $0x480] sm:$0xff]  }
  0x60   : > { %4000 = vmatpush3.bf16.msra.mxu0 %v4390_v40  ;;  %v4445_v40 = vld [vmem:[%s4656_s22 + $0x448] sm:$0xff]  }
  0x61   : > { %4022 = vmatpush3.bf16.msra.mxu1 %v4391_v41  ;;  %4001 = vmatprep.subr.bf16.mxu0 %v4392_v42  ;;  %v4446_v41 = vld [vmem:[%s4656_s22 + $0x4c8] sm:$0xff]  }
  0x62   : > { %4023 = vmatprep.subr.bf16.mxu1 %v4393_v43  ;;  %v4447_v42 = vld [vmem:[%s4656_s22 + $0x408] sm:$0xff]  }
  0x63   : > { %v4448_v43 = vld [vmem:[%s4656_s22 + $0x488] sm:$0xff]  }
  0x64   : > { %4002 = vmatpush3.bf16.msra.mxu0 %v4394_v44  ;;  %v4449_v44 = vld [vmem:[%s4656_s22 + $0x450] sm:$0xff]  }
  0x65   : > { %4024 = vmatpush3.bf16.msra.mxu1 %v4395_v46  ;;  %4003 = vmatprep.subr.bf16.mxu0 %v4396_v47  ;;  %v4451_v46 = vld [vmem:[%s4656_s22 + $0x410] sm:$0xff]  }
  0x66   : > { %4025 = vmatprep.subr.bf16.mxu1 %v4397_v48  ;;  %v4452_v47 = vld [vmem:[%s4656_s22 + $0x490] sm:$0xff]   ;;  %v4453_v48 = vld [vmem:[%s4656_s22 + $0x458] sm:$0xff]  }
  0x68   : > { %4004 = vmatpush3.bf16.msra.mxu0 %v4398_v49  ;;  %v4454_v49 = vld [vmem:[%s4656_s22 + $0x4d8] sm:$0xff]  }
  0x69   : > { %4026 = vmatpush3.bf16.msra.mxu1 %v4399_v51  ;;  %4005 = vmatprep.subr.bf16.mxu0 %v4400_v52  ;;  %v4456_v51 = vld [vmem:[%s4656_s22 + $0x498] sm:$0xff]   ;;  %v4457_v52 = vld [vmem:[%s4656_s22 + $0x460] sm:$0xff]  }
  0x6a   : > { %4027 = vmatprep.subr.bf16.mxu1 %v4401_v53  ;;  %v4458_v53 = vld [vmem:[%s4656_s22 + $0x4e0] sm:$0xff]  }
  0x6c   : > { %4006 = vmatpush3.bf16.msra.mxu0 %v4402_v54  ;;  %v4459_v54 = vld [vmem:[%s4656_s22 + $0x420] sm:$0xff]  }
  0x6d   : > { %4028 = vmatpush3.bf16.msra.mxu1 %v4403_v56  ;;  %4007 = vmatprep.subr.bf16.mxu0 %v4404_v57  ;;  %v4461_v56 = vld [vmem:[%s4656_s22 + $0x468] sm:$0xff]  }
  0x6e   : > { %4029 = vmatprep.subr.bf16.mxu1 %v4405_v59  ;;  %v4462_v57 = vld [vmem:[%s4656_s22 + $0x4e8] sm:$0xff]  }
  0x6f   : > { %v4464_v59 = vld [vmem:[%s4656_s22 + $0x4a8] sm:$0xff]  }
  0x70   : > { %4008 = vmatpush3.bf16.msra.mxu0 %v4406_v60  ;;  %v4465_v60 = vld [vmem:[%s4656_s22 + $0x470] sm:$0xff]  }
  0x71   : > { %4030 = vmatpush3.bf16.msra.mxu1 %v4407_v62  ;;  %4037 = vmatprep.subr.bf16.mxu0 %v4408_v0  ;;  %v4467_v62 = vld [vmem:[%s4656_s22 + $0x430] sm:$0xff]   ;;  %v4469_v0 = vld [vmem:[%s4656_s22 + $0x478] sm:$0xff]  }
  0x72   : > { %4059 = vmatprep.subr.bf16.mxu1 %v4409_v1  ;;  %v4470_v1 = vld [vmem:[%s4656_s22 + $0x4f8] sm:$0xff]  }
  0x73   : > { %2981 = vmatmul.mubr.bf16.vlgmr.msra.gmra.mrb[8].mxu0 %v876_v58  ;;  %v4463_v58 = vld [vmem:[%s4656_s22 + $0x428] sm:$0xff]  }
  0x74   : > { %3021 = vmatmul.mubr.bf16.vlgmr.msra.gmra.mrb[8].mxu1 %v898_v63  ;;  %4038 = vmatpush3.bf16.msra.mxu0 %v4410_v2  ;;  %v4468_v63 = vld [vmem:[%s4656_s22 + $0x4b0] sm:$0xff]   ;;  %v4471_v2 = vld [vmem:[%s4656_s22 + $0x438] sm:$0xff]  }
  0x75   : > { %4060 = vmatpush3.bf16.msra.mxu1 %v4411_v4  ;;  %3060 = vmatprep.mubr.bf16.mxu0 %v897_v61  ;;  %v4466_v61 = vld [vmem:[%s4656_s22 + $0x4f0] sm:$0xff]  }
  0x76   : > { %4039 = vmatprep.subr.bf16.mxu0 %v4412_v5  ;;  %3100 = vmatprep.mubr.bf16.mxu1 %v901_v3  ;;  %v4472_v3 = vld [vmem:[%s4656_s22 + $0x4b8] sm:$0xff]   ;;  %v220_v4 = vld [vmem:[%s5037_s0 + $0x10] sm:$0xff] }
  0x77   : > { %4061 = vmatprep.subr.bf16.mxu1 %v4413_v7  ;;  %v909_v5 = vrot.slane %v220_v4, %v4651_v6  ;;  %v4473_v7 = vld [vmem:[%s4656_s22 + $0x540] sm:$0xff]  }
  0x78   : > { %4040 = vmatpush3.bf16.msra.mxu0 %v4414_v8  ;;  %v902_v8 = vcombine.high %v220_v4, %v220_v4  ;;  %v4523_v4 = vld [vmem:[%s4656_s22 + $0x6e0] sm:$0xff]  }
  0x79   : > { %4062 = vmatpush3.bf16.msra.mxu1 %v4415_v9  ;;  %4041 = vmatprep.subr.bf16.mxu0 %v4416_v10  ;;  %v4474_v9 = vld [vmem:[%s4656_s22 + $0x5c0] sm:$0xff]   ;;  %v917_v10 = vcombine.high %v909_v5, %v909_v5 }
  0x7a   : > { %4063 = vmatprep.subr.bf16.mxu1 %v4417_v11  ;;  %v925_v11 = vrot.slane %v909_v5, %v4651_v6  ;;  %v4524_v5 = vld [vmem:[%s4656_s22 + $0x620] sm:$0xff]  }
  0x7c   : > { %4042 = vmatpush3.bf16.msra.mxu0 %v4418_v12  ;;  %v4866_v12 = vrot.slane %v902_v8, %v4651_v6  ;;  %v4526_v8 = vld [vmem:[%s4656_s22 + $0x668] sm:$0xff]  }
  0x7d   : > { %4064 = vmatpush3.bf16.msra.mxu1 %v4419_v13  ;;  %4043 = vmatprep.subr.bf16.mxu0 %v4420_v14  ;;  %v4475_v13 = vld [vmem:[%s4656_s22 + $0x500] sm:$0xff]   ;;  %v939_v14 = vrot.slane %v917_v10, %v4651_v6  ;;  %v4528_v10 = vld [vmem:[%s4656_s22 + $0x628] sm:$0xff]  }
  0x7e   : > { %4065 = vmatprep.subr.bf16.mxu1 %v4421_v15  ;;  %v4476_v15 = vld [vmem:[%s4656_s22 + $0x580] sm:$0xff]  }
  0x80   : > { %4044 = vmatpush3.bf16.msra.mxu0 %v4422_v16  ;;  %v918_v16 = vcombine.high %v4866_v12, %v4866_v12 }
  0x81   : > { %4066 = vmatpush3.bf16.msra.mxu1 %v4423_v17  ;;  %4045 = vmatprep.subr.bf16.mxu0 %v4424_v18  ;;  %v947_v17 = vcombine.high %v925_v11, %v925_v11  ;;  %v4477_v18 = vld [vmem:[%s4656_s22 + $0x548] sm:$0xff]  }
  0x82   : > { %4067 = vmatprep.subr.bf16.mxu1 %v4425_v19  ;;  %v949_v19 = vcombine.high %v939_v14, %v939_v14 }
  0x84   : > { %4046 = vmatpush3.bf16.msra.mxu0 %v4426_v20  ;;  %v4478_v20 = vld [vmem:[%s4656_s22 + $0x5c8] sm:$0xff]  }
  0x85   : > { %4068 = vmatpush3.bf16.msra.mxu1 %v4427_v21  ;;  %4047 = vmatprep.subr.bf16.mxu0 %v4428_v22  ;;  %v946_v21 = vrot.slane %v918_v16, %v4651_v6  ;;  %v4479_v22 = vld [vmem:[%s4656_s22 + $0x508] sm:$0xff]   ;;  %v4534_v16 = vld [vmem:[%s4656_s22 + $0x678] sm:$0xff]  }
  0x86   : > { %4069 = vmatprep.subr.bf16.mxu1 %v4429_v23  ;;  %v4480_v23 = vld [vmem:[%s4656_s22 + $0x588] sm:$0xff]  }
  0x88   : > { %4048 = vmatpush3.bf16.msra.mxu0 %v4430_v24  ;;  %v950_v24 = vcombine.high %v946_v21, %v946_v21 }
  0x89   : > { %4070 = vmatpush3.bf16.msra.mxu1 %v4431_v25  ;;  %4049 = vmatprep.subr.bf16.mxu0 %v4432_v26  ;;  %v4481_v25 = vld [vmem:[%s4656_s22 + $0x550] sm:$0xff]  }
  0x8a   : > { %4071 = vmatprep.subr.bf16.mxu1 %v4433_v27  ;;  %v4482_v26 = vld [vmem:[%s4656_s22 + $0x5d0] sm:$0xff]  }
  0x8b   : > { %v4483_v27 = vld [vmem:[%s4656_s22 + $0x510] sm:$0xff]  }
  0x8c   : > { %4050 = vmatpush3.bf16.msra.mxu0 %v4434_v28  ;;  %v4484_v28 = vld [vmem:[%s4656_s22 + $0x590] sm:$0xff]  }
  0x8d   : > { %4072 = vmatpush3.bf16.msra.mxu1 %v4435_v29  ;;  %4051 = vmatprep.subr.bf16.mxu0 %v4436_v30  ;;  %v4485_v29 = vld [vmem:[%s4656_s22 + $0x558] sm:$0xff]  }
  0x8e   : > { %4073 = vmatprep.subr.bf16.mxu1 %v4437_v32  ;;  %v4486_v30 = vld [vmem:[%s4656_s22 + $0x5d8] sm:$0xff]  }
  0x8f   : > { %v4488_v32 = vld [vmem:[%s4656_s22 + $0x598] sm:$0xff]  }
  0x90   : > { %4052 = vmatpush3.bf16.msra.mxu0 %v4438_v33  ;;  %v4489_v33 = vld [vmem:[%s4656_s22 + $0x560] sm:$0xff]  }
  0x91   : > { %4074 = vmatpush3.bf16.msra.mxu1 %v4439_v34  ;;  %4081 = vmatprep.subr.bf16.mxu0 %v4441_v36  ;;  %v4490_v34 = vld [vmem:[%s4656_s22 + $0x5e0] sm:$0xff]  }
  0x92   : > { %4103 = vmatprep.subr.bf16.mxu1 %v4442_v37  ;;  %v4492_v36 = vld [vmem:[%s4656_s22 + $0x5a0] sm:$0xff]   ;;  %v4493_v37 = vld [vmem:[%s4656_s22 + $0x568] sm:$0xff]  }
  0x93   : > { %3061 = vmatmul.mubr.bf16.vlgmr.msra.gmra.mrb[12].mxu0 %v883_v31  ;;  %v4487_v31 = vld [vmem:[%s4656_s22 + $0x518] sm:$0xff]  }
  0x94   : > { %3101 = vmatmul.mubr.bf16.vlgmr.msra.gmra.mrb[12].mxu1 %v899_v35  ;;  %4082 = vmatpush3.bf16.msra.mxu0 %v4443_v38  ;;  %v4491_v35 = vld [vmem:[%s4656_s22 + $0x520] sm:$0xff]   ;;  %v4494_v38 = vld [vmem:[%s4656_s22 + $0x5e8] sm:$0xff]  }
  0x95   : > { %4104 = vmatpush3.bf16.msra.mxu1 %v4444_v39  ;;  %4083 = vmatprep.subr.bf16.mxu0 %v4445_v40  ;;  %v4495_v39 = vld [vmem:[%s4656_s22 + $0x528] sm:$0xff]  }
  0x96   : > { %4105 = vmatprep.subr.bf16.mxu1 %v4446_v41  ;;  %3140 = vmatprep.mubr.bf16.mxu0 %v939_v14  ;;  %v4496_v40 = vld [vmem:[%s4656_s22 + $0x5a8] sm:$0xff]   ;;  %v4497_v41 = vld [vmem:[%s4656_s22 + $0x570] sm:$0xff]  }
  0x97   : > { %3180 = vmatprep.mubr.bf16.mxu1 %v949_v19  ;;  %v4532_v14 = vld [vmem:[%s4656_s22 + $0x630] sm:$0xff]   ;;  %v221_v19 = vld [vmem:[%s5037_s0 + $0x18] sm:$0xff] }
  0x98   : > { %4084 = vmatpush3.bf16.msra.mxu0 %v4447_v42  ;;  %v4498_v42 = vld [vmem:[%s4656_s22 + $0x5f0] sm:$0xff]  }
  0x99   : > { %4106 = vmatpush3.bf16.msra.mxu1 %v4448_v43  ;;  %4085 = vmatprep.subr.bf16.mxu0 %v4449_v44  ;;  %v4499_v43 = vld [vmem:[%s4656_s22 + $0x530] sm:$0xff]  }
  0x9a   : > { %4107 = vmatprep.subr.bf16.mxu1 %v4450_v45  ;;  %v4500_v44 = vld [vmem:[%s4656_s22 + $0x5b0] sm:$0xff]   ;;  %v4501_v45 = vld [vmem:[%s4656_s22 + $0x578] sm:$0xff]  }
  0x9c   : > { %4086 = vmatpush3.bf16.msra.mxu0 %v4451_v46  ;;  %v4502_v46 = vld [vmem:[%s4656_s22 + $0x5f8] sm:$0xff]  }
  0x9d   : > { %4108 = vmatpush3.bf16.msra.mxu1 %v4452_v47  ;;  %4087 = vmatprep.subr.bf16.mxu0 %v4453_v48  ;;  %v4503_v47 = vld [vmem:[%s4656_s22 + $0x538] sm:$0xff]  }
  0x9e   : > { %4109 = vmatprep.subr.bf16.mxu1 %v4454_v49  ;;  %v4504_v48 = vld [vmem:[%s4656_s22 + $0x5b8] sm:$0xff]   ;;  %v932_v49 = vrot.slane %v4866_v12, %v4651_v6  ;;  %v4530_v12 = vld [vmem:[%s4656_s22 + $0x670] sm:$0xff]  }
  0xa0   : > { %4088 = vmatpush3.bf16.msra.mxu0 %v4455_v50  ;;  %v4506_v50 = vld [vmem:[%s4656_s22 + $0x640] sm:$0xff]  }
  0xa1   : > { %4110 = vmatpush3.bf16.msra.mxu1 %v4456_v51  ;;  %4089 = vmatprep.subr.bf16.mxu0 %v4457_v52  ;;  %v4507_v51 = vld [vmem:[%s4656_s22 + $0x6c0] sm:$0xff]  }
  0xa2   : > { %4111 = vmatprep.subr.bf16.mxu1 %v4458_v53  ;;  %v4508_v52 = vld [vmem:[%s4656_s22 + $0x600] sm:$0xff]  }
  0xa3   : > { %v4509_v53 = vld [vmem:[%s4656_s22 + $0x680] sm:$0xff]  }
  0xa4   : > { %4090 = vmatpush3.bf16.msra.mxu0 %v4459_v54  ;;  %v948_v54 = vcombine.high %v932_v49, %v932_v49 }
  0xa5   : > { %4112 = vmatpush3.bf16.msra.mxu1 %v4460_v55  ;;  %4091 = vmatprep.subr.bf16.mxu0 %v4461_v56  ;;  %v4510_v55 = vld [vmem:[%s4656_s22 + $0x648] sm:$0xff]  }
  0xa6   : > { %4113 = vmatprep.subr.bf16.mxu1 %v4462_v57  ;;  %v4511_v56 = vld [vmem:[%s4656_s22 + $0x6c8] sm:$0xff]  }
  0xa7   : > { %v4512_v57 = vld [vmem:[%s4656_s22 + $0x608] sm:$0xff]  }
  0xa8   : > { %4092 = vmatpush3.bf16.msra.mxu0 %v4463_v58  ;;  %v4513_v58 = vld [vmem:[%s4656_s22 + $0x688] sm:$0xff]  }
  0xa9   : > { %4114 = vmatpush3.bf16.msra.mxu1 %v4464_v59  ;;  %4093 = vmatprep.subr.bf16.mxu0 %v4465_v60  ;;  %v4514_v59 = vld [vmem:[%s4656_s22 + $0x650] sm:$0xff]  }
  0xaa   : > { %4115 = vmatprep.subr.bf16.mxu1 %v4466_v61  ;;  %v4515_v60 = vld [vmem:[%s4656_s22 + $0x6d0] sm:$0xff]  }
  0xab   : > { %v4516_v61 = vld [vmem:[%s4656_s22 + $0x610] sm:$0xff]  }
  0xac   : > { %4094 = vmatpush3.bf16.msra.mxu0 %v4467_v62  ;;  %v4517_v62 = vld [vmem:[%s4656_s22 + $0x690] sm:$0xff]  }
  0xad   : > { %4116 = vmatpush3.bf16.msra.mxu1 %v4468_v63  ;;  %4095 = vmatprep.subr.bf16.mxu0 %v4469_v0  ;;  %v4518_v63 = vld [vmem:[%s4656_s22 + $0x658] sm:$0xff]  }
  0xae   : > { %4117 = vmatprep.subr.bf16.mxu1 %v4470_v1  ;;  %v4519_v0 = vld [vmem:[%s4656_s22 + $0x6d8] sm:$0xff]  }
  0xaf   : > { %v4520_v1 = vld [vmem:[%s4656_s22 + $0x618] sm:$0xff]  }
  0xb0   : > { %4096 = vmatpush3.bf16.msra.mxu0 %v4471_v2  ;;  %v4521_v2 = vld [vmem:[%s4656_s22 + $0x698] sm:$0xff]  }
  0xb1   : > { %4118 = vmatpush3.bf16.msra.mxu1 %v4472_v3  ;;  %4125 = vmatprep.subr.bf16.mxu0 %v4473_v7  ;;  %v4522_v3 = vld [vmem:[%s4656_s22 + $0x660] sm:$0xff]  }
  0xb2   : > { %4147 = vmatprep.subr.bf16.mxu1 %v4474_v9  ;;  %v4525_v7 = vld [vmem:[%s4656_s22 + $0x6a0] sm:$0xff]   ;;  %v4527_v9 = vld [vmem:[%s4656_s22 + $0x6e8] sm:$0xff]  }
  0xb3   : > { %3141 = vmatmul.mubr.bf16.vlgmr.msra.gmra.mrb[16].mxu0 %v925_v11  ;;  %v4529_v11 = vld [vmem:[%s4656_s22 + $0x6a8] sm:$0xff]  }
  0xb4   : > { %4126 = vmatpush3.bf16.msra.mxu0 %v4475_v13  ;;  %3181 = vmatmul.mubr.bf16.vlgmr.msra.gmra.mrb[16].mxu1 %v947_v17  ;;  %v4531_v13 = vld [vmem:[%s4656_s22 + $0x6f0] sm:$0xff]   ;;  %v4535_v17 = vld [vmem:[%s4656_s22 + $0x6f8] sm:$0xff]  }
  0xb5   : > { %4127 = vmatprep.subr.bf16.mxu0 %v4477_v18  ;;  %4148 = vmatpush3.bf16.msra.mxu1 %v4476_v15  ;;  %v4533_v15 = vld [vmem:[%s4656_s22 + $0x6b0] sm:$0xff]   ;;  %v4536_v18 = vld [vmem:[%s4656_s22 + $0x638] sm:$0xff]  }
  0xb6   : > { %3220 = vmatprep.mubr.bf16.mxu0 %v946_v21  ;;  %4149 = vmatprep.subr.bf16.mxu1 %v4478_v20  ;;  %v4537_v20 = vld [vmem:[%s4656_s22 + $0x6b8] sm:$0xff]   ;;  %v958_v21 = vrot.slane %v221_v19, %v4651_v6 }
  0xb7   : > { %3260 = vmatprep.mubr.bf16.mxu1 %v950_v24 }
  0xb8   : > { %4128 = vmatpush3.bf16.msra.mxu0 %v4479_v22  ;;  %v951_v22 = vcombine.high %v221_v19, %v221_v19  ;;  %v966_v24 = vcombine.high %v958_v21, %v958_v21  ;;  %v4576_v19 = vld [vmem:[%s4656_s22 + $0x8c8] sm:$0xff]  }
  0xb9   : > { %4129 = vmatprep.subr.bf16.mxu0 %v4481_v25  ;;  %4150 = vmatpush3.bf16.msra.mxu1 %v4480_v23  ;;  %v4538_v23 = vld [vmem:[%s4656_s22 + $0x740] sm:$0xff]   ;;  %v974_v25 = vrot.slane %v958_v21, %v4651_v6  ;;  %v4579_v21 = vld [vmem:[%s4656_s22 + $0x850] sm:$0xff]  }
  0xba   : > { %4151 = vmatprep.subr.bf16.mxu1 %v4482_v26  ;;  %v4539_v26 = vld [vmem:[%s4656_s22 + $0x7c0] sm:$0xff]  }
  0xbc   : > { %4130 = vmatpush3.bf16.msra.mxu0 %v4483_v27  ;;  %v4944_v27 = vrot.slane %v951_v22, %v4651_v6  ;;  %v4578_v22 = vld [vmem:[%s4656_s22 + $0x888] sm:$0xff]  }
  0xbd   : > { %4131 = vmatprep.subr.bf16.mxu0 %v4485_v29  ;;  %4152 = vmatpush3.bf16.msra.mxu1 %v4484_v28  ;;  %v4540_v28 = vld [vmem:[%s4656_s22 + $0x700] sm:$0xff]   ;;  %v988_v29 = vrot.slane %v966_v24, %v4651_v6  ;;  %v4581_v24 = vld [vmem:[%s4656_s22 + $0x810] sm:$0xff]  }
  0xbe   : > { %4153 = vmatprep.subr.bf16.mxu1 %v4486_v30  ;;  %v4541_v30 = vld [vmem:[%s4656_s22 + $0x780] sm:$0xff]  }
  0xc0   : > { %4132 = vmatpush3.bf16.msra.mxu0 %v4487_v31  ;;  %v967_v31 = vcombine.high %v4944_v27, %v4944_v27 }
  0xc1   : > { %4133 = vmatprep.subr.bf16.mxu0 %v4489_v33  ;;  %4154 = vmatpush3.bf16.msra.mxu1 %v4488_v32  ;;  %v996_v32 = vcombine.high %v974_v25, %v974_v25  ;;  %v4542_v33 = vld [vmem:[%s4656_s22 + $0x748] sm:$0xff]  }
  0xc2   : > { %4155 = vmatprep.subr.bf16.mxu1 %v4490_v34  ;;  %v998_v34 = vcombine.high %v988_v29, %v988_v29 }
  0xc4   : > { %4134 = vmatpush3.bf16.msra.mxu0 %v4491_v35  ;;  %v4543_v35 = vld [vmem:[%s4656_s22 + $0x7c8] sm:$0xff]  }
  0xc5   : > { %4135 = vmatprep.subr.bf16.mxu0 %v4493_v37  ;;  %4156 = vmatpush3.bf16.msra.mxu1 %v4492_v36  ;;  %v995_v36 = vrot.slane %v967_v31, %v4651_v6  ;;  %v4544_v37 = vld [vmem:[%s4656_s22 + $0x708] sm:$0xff]   ;;  %v4588_v31 = vld [vmem:[%s4656_s22 + $0x8e0] sm:$0xff]  }
  0xc6   : > { %4157 = vmatprep.subr.bf16.mxu1 %v4494_v38  ;;  %v4545_v38 = vld [vmem:[%s4656_s22 + $0x788] sm:$0xff]  }
  0xc8   : > { %4136 = vmatpush3.bf16.msra.mxu0 %v4495_v39  ;;  %v999_v39 = vcombine.high %v995_v36, %v995_v36 }
  0xc9   : > { %4137 = vmatprep.subr.bf16.mxu0 %v4497_v41  ;;  %4158 = vmatpush3.bf16.msra.mxu1 %v4496_v40  ;;  %v4546_v40 = vld [vmem:[%s4656_s22 + $0x750] sm:$0xff]  }
  0xca   : > { %4159 = vmatprep.subr.bf16.mxu1 %v4498_v42  ;;  %v4547_v41 = vld [vmem:[%s4656_s22 + $0x7d0] sm:$0xff]  }
  0xcb   : > { %v4548_v42 = vld [vmem:[%s4656_s22 + $0x710] sm:$0xff]  }
  0xcc   : > { %4138 = vmatpush3.bf16.msra.mxu0 %v4499_v43  ;;  %v4549_v43 = vld [vmem:[%s4656_s22 + $0x790] sm:$0xff]  }
  0xcd   : > { %4139 = vmatprep.subr.bf16.mxu0 %v4501_v45  ;;  %4160 = vmatpush3.bf16.msra.mxu1 %v4500_v44  ;;  %v4550_v44 = vld [vmem:[%s4656_s22 + $0x758] sm:$0xff]  }
  0xce   : > { %4161 = vmatprep.subr.bf16.mxu1 %v4502_v46  ;;  %v4551_v45 = vld [vmem:[%s4656_s22 + $0x7d8] sm:$0xff]  }
  0xcf   : > { %v4552_v46 = vld [vmem:[%s4656_s22 + $0x718] sm:$0xff]  }
  0xd0   : > { %4140 = vmatpush3.bf16.msra.mxu0 %v4503_v47  ;;  %v4553_v47 = vld [vmem:[%s4656_s22 + $0x798] sm:$0xff]  }
  0xd1   : > { %4169 = vmatprep.subr.bf16.mxu0 %v4506_v50  ;;  %4162 = vmatpush3.bf16.msra.mxu1 %v4504_v48  ;;  %v4554_v48 = vld [vmem:[%s4656_s22 + $0x760] sm:$0xff]  }
  0xd2   : > { %4191 = vmatprep.subr.bf16.mxu1 %v4507_v51  ;;  %v4556_v50 = vld [vmem:[%s4656_s22 + $0x720] sm:$0xff]  }
  0xd3   : > { %3221 = vmatmul.mubr.bf16.vlgmr.msra.gmra.mrb[20].mxu0 %v932_v49  ;;  %v4555_v49 = vld [vmem:[%s4656_s22 + $0x7e0] sm:$0xff]  }
  0xd4   : > { %4170 = vmatpush3.bf16.msra.mxu0 %v4508_v52  ;;  %3261 = vmatmul.mubr.bf16.vlgmr.msra.gmra.mrb[20].mxu1 %v948_v54  ;;  %v4557_v51 = vld [vmem:[%s4656_s22 + $0x7a0] sm:$0xff]  }
  0xd5   : > { %4171 = vmatprep.subr.bf16.mxu0 %v4510_v55  ;;  %4192 = vmatpush3.bf16.msra.mxu1 %v4509_v53  ;;  %v4558_v53 = vld [vmem:[%s4656_s22 + $0x768] sm:$0xff]  }
  0xd6   : > { %4193 = vmatprep.subr.bf16.mxu1 %v4511_v56  ;;  %3300 = vmatprep.mubr.bf16.mxu0 %v988_v29  ;;  %v4559_v56 = vld [vmem:[%s4656_s22 + $0x7e8] sm:$0xff]   ;;  %v4587_v29 = vld [vmem:[%s4656_s22 + $0x860] sm:$0xff]  }
  0xd7   : > { %3340 = vmatprep.mubr.bf16.mxu1 %v998_v34  ;;  %v4591_v34 = vld [vmem:[%s4656_s22 + $0x868] sm:$0xff]  }
  0xd8   : > { %4172 = vmatpush3.bf16.msra.mxu0 %v4512_v57  ;;  %v4560_v57 = vld [vmem:[%s4656_s22 + $0x728] sm:$0xff]  }
  0xd9   : > { %4173 = vmatprep.subr.bf16.mxu0 %v4514_v59  ;;  %4194 = vmatpush3.bf16.msra.mxu1 %v4513_v58 }
  0xda   : > { %4195 = vmatprep.subr.bf16.mxu1 %v4515_v60 }
  0xdc   : > { %4174 = vmatpush3.bf16.msra.mxu0 %v4516_v61 }
  0xdd   : > { %4175 = vmatprep.subr.bf16.mxu0 %v4518_v63  ;;  %4196 = vmatpush3.bf16.msra.mxu1 %v4517_v62 }
  0xde   : > { %4197 = vmatprep.subr.bf16.mxu1 %v4519_v0 }
  0xe0   : > { %4176 = vmatpush3.bf16.msra.mxu0 %v4520_v1  ;;  %v4562_v1 = vld [vmem:[%s4656_s22 + $0x770] sm:$0xff]  }
  0xe1   : > { %4177 = vmatprep.subr.bf16.mxu0 %v4522_v3  ;;  %4198 = vmatpush3.bf16.msra.mxu1 %v4521_v2  ;;  %v4561_v3 = vld [vmem:[%s4656_s22 + $0x7a8] sm:$0xff]  }
  0xe2   : > { %4199 = vmatprep.subr.bf16.mxu1 %v4523_v4  ;;  %v4563_v4 = vld [vmem:[%s4656_s22 + $0x7f0] sm:$0xff]  }
  0xe4   : > { %4178 = vmatpush3.bf16.msra.mxu0 %v4524_v5  ;;  %v4564_v5 = vld [vmem:[%s4656_s22 + $0x730] sm:$0xff]  }
  0xe5   : > { %4179 = vmatprep.subr.bf16.mxu0 %v4526_v8  ;;  %4200 = vmatpush3.bf16.msra.mxu1 %v4525_v7  ;;  %v4566_v7 = vld [vmem:[%s4656_s22 + $0x778] sm:$0xff]   ;;  %v4565_v8 = vld [vmem:[%s4656_s22 + $0x7b0] sm:$0xff]  }
  0xe6   : > { %4201 = vmatprep.subr.bf16.mxu1 %v4527_v9  ;;  %v4567_v9 = vld [vmem:[%s4656_s22 + $0x7f8] sm:$0xff]  }
  0xe8   : > { %4180 = vmatpush3.bf16.msra.mxu0 %v4528_v10  ;;  %v4568_v10 = vld [vmem:[%s4656_s22 + $0x738] sm:$0xff]  }
  0xe9   : > { %4181 = vmatprep.subr.bf16.mxu0 %v4530_v12  ;;  %4202 = vmatpush3.bf16.msra.mxu1 %v4529_v11  ;;  %v981_v11 = vrot.slane %v4944_v27, %v4651_v6  ;;  %v4571_v12 = vld [vmem:[%s4656_s22 + $0x840] sm:$0xff]   ;;  %v4584_v27 = vld [vmem:[%s4656_s22 + $0x8d8] sm:$0xff]  }
  0xea   : > { %4203 = vmatprep.subr.bf16.mxu1 %v4531_v13  ;;  %v4569_v13 = vld [vmem:[%s4656_s22 + $0x7b8] sm:$0xff]  }
  0xec   : > { %4182 = vmatpush3.bf16.msra.mxu0 %v4532_v14  ;;  %v4572_v14 = vld [vmem:[%s4656_s22 + $0x8c0] sm:$0xff]  }
  0xed   : > { %4183 = vmatprep.subr.bf16.mxu0 %v4534_v16  ;;  %4204 = vmatpush3.bf16.msra.mxu1 %v4533_v15  ;;  %v4573_v15 = vld [vmem:[%s4656_s22 + $0x800] sm:$0xff]   ;;  %v997_v16 = vcombine.high %v981_v11, %v981_v11 }
  0xee   : > { %4205 = vmatprep.subr.bf16.mxu1 %v4535_v17  ;;  %v4575_v17 = vld [vmem:[%s4656_s22 + $0x848] sm:$0xff]  }
  0xf0   : > { %4184 = vmatpush3.bf16.msra.mxu0 %v4536_v18  ;;  %v4574_v18 = vld [vmem:[%s4656_s22 + $0x880] sm:$0xff]  }
  0xf1   : > { %4213 = vmatprep.subr.bf16.mxu0 %v4538_v23  ;;  %4206 = vmatpush3.bf16.msra.mxu1 %v4537_v20  ;;  %v4577_v20 = vld [vmem:[%s4656_s22 + $0x808] sm:$0xff]   ;;  %v4580_v23 = vld [vmem:[%s4656_s22 + $0x8d0] sm:$0xff]  }
  0xf2   : > { %4235 = vmatprep.subr.bf16.mxu1 %v4539_v26  ;;  %v4582_v26 = vld [vmem:[%s4656_s22 + $0x890] sm:$0xff]  }
  0xf3   : > { %3301 = vmatmul.mubr.bf16.vlgmr.msra.gmra.mrb[24].mxu0 %v974_v25  ;;  %v4583_v25 = vld [vmem:[%s4656_s22 + $0x858] sm:$0xff]  }
  0xf4   : > { %4214 = vmatpush3.bf16.msra.mxu0 %v4540_v28  ;;  %3341 = vmatmul.mubr.bf16.vlgmr.msra.gmra.mrb[24].mxu1 %v996_v32  ;;  %v4585_v28 = vld [vmem:[%s4656_s22 + $0x818] sm:$0xff]   ;;  %v4589_v32 = vld [vmem:[%s4656_s22 + $0x820] sm:$0xff]  }
  0xf5   : > { %4215 = vmatprep.subr.bf16.mxu0 %v4542_v33  ;;  %4236 = vmatpush3.bf16.msra.mxu1 %v4541_v30  ;;  %v4586_v30 = vld [vmem:[%s4656_s22 + $0x898] sm:$0xff]  }
  0xf6   : > { %3380 = vmatprep.mubr.bf16.mxu0 %v995_v36  ;;  %4237 = vmatprep.subr.bf16.mxu1 %v4543_v35  ;;  %v4590_v35 = vld [vmem:[%s4656_s22 + $0x8a0] sm:$0xff]  }
  0xf7   : > { %3420 = vmatprep.mubr.bf16.mxu1 %v999_v39 }
  0xf8   : > { %4216 = vmatpush3.bf16.msra.mxu0 %v4544_v37 }
  0xf9   : > { %4217 = vmatprep.subr.bf16.mxu0 %v4546_v40  ;;  %4238 = vmatpush3.bf16.msra.mxu1 %v4545_v38  ;;  %v4592_v38 = vld [vmem:[%s4656_s22 + $0x8e8] sm:$0xff]  }
  0xfa   : > { %4239 = vmatprep.subr.bf16.mxu1 %v4547_v41 }
  0xfc   : > { %4218 = vmatpush3.bf16.msra.mxu0 %v4548_v42 }
  0xfd   : > { %4219 = vmatprep.subr.bf16.mxu0 %v4550_v44  ;;  %4240 = vmatpush3.bf16.msra.mxu1 %v4549_v43  ;;  %v4593_v44 = vld [vmem:[%s4656_s22 + $0x828] sm:$0xff]  }
  0xfe   : > { %4241 = vmatprep.subr.bf16.mxu1 %v4551_v45  ;;  %v4594_v45 = vld [vmem:[%s4656_s22 + $0x8a8] sm:$0xff]  }
 0x100   : > { %4220 = vmatpush3.bf16.msra.mxu0 %v4552_v46 }
 0x101   : > { %4221 = vmatprep.subr.bf16.mxu0 %v4554_v48  ;;  %4242 = vmatpush3.bf16.msra.mxu1 %v4553_v47 }
 0x102   : > { %4243 = vmatprep.subr.bf16.mxu1 %v4555_v49  ;;  %v4595_v49 = vld [vmem:[%s4656_s22 + $0x870] sm:$0xff]  }
 0x104   : > { %4222 = vmatpush3.bf16.msra.mxu0 %v4556_v50 }
 0x105   : > { %4223 = vmatprep.subr.bf16.mxu0 %v4558_v53  ;;  %4244 = vmatpush3.bf16.msra.mxu1 %v4557_v51  ;;  %v4596_v51 = vld [vmem:[%s4656_s22 + $0x8f0] sm:$0xff]   ;;  %v4599_v53 = vld [vmem:[%s4656_s22 + $0x878] sm:$0xff]  }
 0x106   : > { %v3921_v52 = vpop.f32.mrb[0].mxu0  ;;  %4245 = vmatprep.subr.bf16.mxu1 %v4559_v56  ;;  %v4601_v56 = vld [vmem:[%s4656_s22 + $0x838] sm:$0xff]  }
 0x107   : > { %v3943_v54 = vpop.f32.mrb[0].mxu1  ;;  %v3922_v55 = vpop.f32.mrb[1].mxu0 }
 0x108   : > { %v3923_v58 = vadd.f32 %v3922_v55, %v3921_v52  ;;  %v3944_v59 = vpop.f32.mrb[1].mxu1  ;;  %v3924_v60 = vpop.f32.mrb[2].mxu0  ;;  %4224 = vmatpush3.bf16.msra.mxu0 %v4560_v57  ;;  %v4597_v52 = vld [vmem:[%s4656_s22 + $0x830] sm:$0xff]   ;;  %v4600_v55 = vld [vmem:[%s4656_s22 + $0x8f8] sm:$0xff]  }
 0x109   : > { %v3945_v61 = vadd.f32 %v3944_v59, %v3943_v54  ;;  %v3946_v62 = vpop.f32.mrb[2].mxu1  ;;  %v3925_v63 = vpop.f32.mrb[3].mxu0  ;;  %4225 = vmatprep.subr.bf16.mxu0 %v4562_v1  ;;  %4246 = vmatpush3.bf16.msra.mxu1 %v4561_v3  ;;  %v4598_v54 = vld [vmem:[%s4656_s22 + $0x8b0] sm:$0xff]  }
 0x10a   : > { %v3947_v0 = vpop.f32.mrb[3].mxu1  ;;  %4247 = vmatprep.subr.bf16.mxu1 %v4563_v4  ;;  %v3613_v57 = vld.sshfl [vmem:[%s5037_s0 + $0x20] sm:$0x33 pattern:$0x75316420] }
 0x10b   : > { %v4972_v2 = vadd.f32 %v3945_v61, %v3923_v58  ;;  %v4602_v58 = vld [vmem:[%s4656_s22 + $0x8b8] sm:$0xff]   ;;  %v1007_v59 = vcombine.high %v3613_v57, %v3613_v57  ;;  %v1014_v60 = vrot.slane %v3613_v57, %v4651_v6 }
 0x10c   : > { %4226 = vmatpush3.bf16.msra.mxu0 %v4564_v5 }
 0x10d   : > { %4227 = vmatprep.subr.bf16.mxu0 %v4566_v7  ;;  %4248 = vmatpush3.bf16.msra.mxu1 %v4565_v8  ;;  %v1021_v61 = vrot.slane %v1007_v59, %v4651_v6  ;;  %v1022_v62 = vcombine.high %v1014_v60, %v1014_v60 }
 0x10e   : > { %4249 = vmatprep.subr.bf16.mxu1 %v4567_v9 }
 0x10f   : > { %v1023_v63 = vcombine.high %v1021_v61, %v1021_v61 }
 0x110   : > { %4228 = vmatpush3.bf16.msra.mxu0 %v4568_v10 }
 0x111   : > { %4257 = vmatprep.subr.bf16.mxu0 %v4571_v12  ;;  %4250 = vmatpush3.bf16.msra.mxu1 %v4569_v13 }
 0x112   : > { %4279 = vmatprep.subr.bf16.mxu1 %v4572_v14 }
 0x113   : > { %3381 = vmatmul.mubr.bf16.vlgmr.msra.gmra.mrb[28].mxu0 %v981_v11 }
 0x114   : > { %4258 = vmatpush3.bf16.msra.mxu0 %v4573_v15  ;;  %3421 = vmatmul.mubr.bf16.vlgmr.msra.gmra.mrb[28].mxu1 %v997_v16 }
 0x115   : > { %4259 = vmatprep.subr.bf16.mxu0 %v4575_v17  ;;  %4280 = vmatpush3.bf16.msra.mxu1 %v4574_v18 }
 0x116   : > { %4281 = vmatprep.subr.bf16.mxu1 %v4576_v19  ;;  %3460 = vmatprep.mubr.bf16.mxu0 %v1021_v61 }
 0x117   : > { %3500 = vmatprep.mubr.bf16.mxu1 %v1023_v63 }
 0x118   : > { %4260 = vmatpush3.bf16.msra.mxu0 %v4577_v20 }
 0x119   : > { %4261 = vmatprep.subr.bf16.mxu0 %v4579_v21  ;;  %4282 = vmatpush3.bf16.msra.mxu1 %v4578_v22 }
 0x11a   : > { %4283 = vmatprep.subr.bf16.mxu1 %v4580_v23 }
 0x11c   : > { %4262 = vmatpush3.bf16.msra.mxu0 %v4581_v24 }
 0x11d   : > { %4263 = vmatprep.subr.bf16.mxu0 %v4583_v25  ;;  %4284 = vmatpush3.bf16.msra.mxu1 %v4582_v26 }
 0x11e   : > { %4285 = vmatprep.subr.bf16.mxu1 %v4584_v27 }
 0x120   : > { %4264 = vmatpush3.bf16.msra.mxu0 %v4585_v28 }
 0x121   : > { %4265 = vmatprep.subr.bf16.mxu0 %v4587_v29  ;;  %4286 = vmatpush3.bf16.msra.mxu1 %v4586_v30 }
 0x122   : > { %4287 = vmatprep.subr.bf16.mxu1 %v4588_v31 }
 0x124   : > { %4266 = vmatpush3.bf16.msra.mxu0 %v4589_v32 }
 0x125   : > { %4267 = vmatprep.subr.bf16.mxu0 %v4591_v34  ;;  %4288 = vmatpush3.bf16.msra.mxu1 %v4590_v35 }
 0x126   : > { %v3965_v33 = vpop.f32.mrb[4].mxu0  ;;  %4289 = vmatprep.subr.bf16.mxu1 %v4592_v38 }
 0x127   : > { %v3987_v36 = vpop.f32.mrb[4].mxu1  ;;  %v3966_v37 = vpop.f32.mrb[5].mxu0 }
 0x128   : > { %v3967_v39 = vadd.f32 %v3966_v37, %v3965_v33  ;;  %v3988_v40 = vpop.f32.mrb[5].mxu1  ;;  %v3968_v41 = vpop.f32.mrb[6].mxu0  ;;  %4268 = vmatpush3.bf16.msra.mxu0 %v4593_v44 }
 0x129   : > { %v3989_v42 = vadd.f32 %v3988_v40, %v3987_v36  ;;  %v3990_v43 = vpop.f32.mrb[6].mxu1  ;;  %v3969_v46 = vpop.f32.mrb[7].mxu0  ;;  %4269 = vmatprep.subr.bf16.mxu0 %v4595_v49  ;;  %4290 = vmatpush3.bf16.msra.mxu1 %v4594_v45 }
 0x12a   : > { %v2903_v47 = vadd.f32 %v3967_v39, %v4972_v2  ;;  %v3991_v48 = vpop.f32.mrb[7].mxu1  ;;  %4291 = vmatprep.subr.bf16.mxu1 %v4596_v51 }
 0x12c   : > { %v2943_v50 = vadd.f32 %v3989_v42, %v2903_v47  ;;  %4270 = vmatpush3.bf16.msra.mxu0 %v4597_v52 }
 0x12d   : > { %4271 = vmatprep.subr.bf16.mxu0 %v4599_v53  ;;  %4292 = vmatpush3.bf16.msra.mxu1 %v4598_v54 }
 0x12e   : > { %4293 = vmatprep.subr.bf16.mxu1 %v4600_v55 }
 0x130   : > { %4272 = vmatpush3.bf16.msra.mxu0 %v4601_v56 }
 0x131   : > { %4294 = vmatpush3.bf16.msra.mxu1 %v4602_v58 }
 0x133   : > { %3461 = vmatmul.mubr.bf16.vlgmr.msra.gmra.mrb[32].mxu0 %v1014_v60 }
 0x134   : > { %3501 = vmatmul.mubr.bf16.vlgmr.msra.gmra.mrb[32].mxu1 %v1022_v62 }
 0x146   : > { %v4009_v0 = vpop.f32.mrb[8].mxu0 }
 0x147   : > { %v4031_v1 = vpop.f32.mrb[8].mxu1  ;;  %v4010_v2 = vpop.f32.mrb[9].mxu0 }
 0x148   : > { %v4011_v3 = vadd.f32 %v4010_v2, %v4009_v0  ;;  %v4032_v4 = vpop.f32.mrb[9].mxu1  ;;  %v4012_v5 = vpop.f32.mrb[10].mxu0 }
 0x149   : > { %v4033_v7 = vadd.f32 %v4032_v4, %v4031_v1  ;;  %v4034_v8 = vpop.f32.mrb[10].mxu1  ;;  %v4013_v9 = vpop.f32.mrb[11].mxu0 }
 0x14a   : > { %v2983_v10 = vadd.f32 %v4011_v3, %v2943_v50  ;;  %v4035_v11 = vpop.f32.mrb[11].mxu1 }
 0x14c   : > { %v3023_v12 = vadd.f32 %v4033_v7, %v2983_v10 }
 0x166   : > { %v4053_v6 = vpop.f32.mrb[12].mxu0 }
 0x167   : > { %v4075_v13 = vpop.f32.mrb[12].mxu1  ;;  %v4054_v14 = vpop.f32.mrb[13].mxu0 }
 0x168   : > { %v4055_v15 = vadd.f32 %v4054_v14, %v4053_v6  ;;  %v4076_v16 = vpop.f32.mrb[13].mxu1  ;;  %v4056_v17 = vpop.f32.mrb[14].mxu0 }
 0x169   : > { %v4077_v18 = vadd.f32 %v4076_v16, %v4075_v13  ;;  %v4078_v19 = vpop.f32.mrb[14].mxu1  ;;  %v4057_v20 = vpop.f32.mrb[15].mxu0 }
 0x16a   : > { %v3063_v21 = vadd.f32 %v4055_v15, %v3023_v12  ;;  %v4079_v22 = vpop.f32.mrb[15].mxu1 }
 0x16c   : > { %v3103_v23 = vadd.f32 %v4077_v18, %v3063_v21  ;;  %v3902_v18 = vld [vmem:[%s210_s7] ss:$0 sm:$0xff] }
 0x186   : > { %v4097_v24 = vpop.f32.mrb[16].mxu0 }
 0x187   : > { %v4098_v25 = vpop.f32.mrb[17].mxu0  ;;  %v4119_v26 = vpop.f32.mrb[16].mxu1 }
 0x188   : > { %v4099_v27 = vadd.f32 %v4098_v25, %v4097_v24  ;;  %v4100_v28 = vpop.f32.mrb[18].mxu0  ;;  %v4120_v29 = vpop.f32.mrb[17].mxu1 }
 0x189   : > { %v4101_v30 = vpop.f32.mrb[19].mxu0  ;;  %v4121_v32 = vadd.f32 %v4120_v29, %v4119_v26  ;;  %v4122_v33 = vpop.f32.mrb[18].mxu1 }
 0x18a   : > { %v3143_v31 = vadd.f32 %v4099_v27, %v3103_v23  ;;  %v4123_v34 = vpop.f32.mrb[19].mxu1 }
 0x18c   : > { %v3183_v35 = vadd.f32 %v4121_v32, %v3143_v31 }
 0x1a6   : > { %v4141_v36 = vpop.f32.mrb[20].mxu0 }
 0x1a7   : > { %v4142_v37 = vpop.f32.mrb[21].mxu0  ;;  %v4163_v38 = vpop.f32.mrb[20].mxu1 }
 0x1a8   : > { %v4143_v39 = vadd.f32 %v4142_v37, %v4141_v36  ;;  %v4144_v40 = vpop.f32.mrb[22].mxu0  ;;  %v4164_v41 = vpop.f32.mrb[21].mxu1 }
 0x1a9   : > { %v4145_v42 = vpop.f32.mrb[23].mxu0  ;;  %v4165_v44 = vadd.f32 %v4164_v41, %v4163_v38  ;;  %v4166_v45 = vpop.f32.mrb[22].mxu1 }
 0x1aa   : > { %v3223_v43 = vadd.f32 %v4143_v39, %v3183_v35  ;;  %v4167_v46 = vpop.f32.mrb[23].mxu1 }
 0x1ac   : > { %v3263_v47 = vadd.f32 %v4165_v44, %v3223_v43 }
 0x1c6   : > { %v4185_v48 = vpop.f32.mrb[24].mxu0 }
 0x1c7   : > { %v4186_v49 = vpop.f32.mrb[25].mxu0  ;;  %v4207_v50 = vpop.f32.mrb[24].mxu1 }
 0x1c8   : > { %v4187_v51 = vadd.f32 %v4186_v49, %v4185_v48  ;;  %v4188_v52 = vpop.f32.mrb[26].mxu0  ;;  %v4208_v53 = vpop.f32.mrb[25].mxu1 }
 0x1c9   : > { %v4189_v54 = vpop.f32.mrb[27].mxu0  ;;  %v4209_v56 = vadd.f32 %v4208_v53, %v4207_v50  ;;  %v4210_v57 = vpop.f32.mrb[26].mxu1 }
 0x1ca   : > { %v3303_v55 = vadd.f32 %v4187_v51, %v3263_v47  ;;  %v4211_v58 = vpop.f32.mrb[27].mxu1 }
 0x1cc   : > { %v3343_v59 = vadd.f32 %v4209_v56, %v3303_v55 }
 0x1e6   : > { %v4229_v60 = vpop.f32.mrb[28].mxu0 }
 0x1e7   : > { %v4230_v61 = vpop.f32.mrb[29].mxu0  ;;  %v4251_v62 = vpop.f32.mrb[28].mxu1 }
 0x1e8   : > { %v4231_v63 = vadd.f32 %v4230_v61, %v4229_v60  ;;  %v4232_v0 = vpop.f32.mrb[30].mxu0  ;;  %v4252_v1 = vpop.f32.mrb[29].mxu1 }
 0x1e9   : > { %v4233_v2 = vpop.f32.mrb[31].mxu0  ;;  %v4253_v4 = vadd.f32 %v4252_v1, %v4251_v62  ;;  %v4254_v5 = vpop.f32.mrb[30].mxu1 }
 0x1ea   : > { %v3383_v3 = vadd.f32 %v4231_v63, %v3343_v59  ;;  %v4255_v7 = vpop.f32.mrb[31].mxu1 }
 0x1ec   : > { %v3423_v8 = vadd.f32 %v4253_v4, %v3383_v3 }
 0x206   : > { %v4273_v9 = vpop.f32.mrb[32].mxu0 }
 0x207   : > { %v4274_v10 = vpop.f32.mrb[33].mxu0  ;;  %v4295_v11 = vpop.f32.mrb[32].mxu1 }
 0x208   : > { %v4275_v12 = vadd.f32 %v4274_v10, %v4273_v9  ;;  %v4276_v6 = vpop.f32.mrb[34].mxu0  ;;  %v4296_v13 = vpop.f32.mrb[33].mxu1 }
 0x209   : > { %v4277_v14 = vpop.f32.mrb[35].mxu0  ;;  %v4297_v16 = vadd.f32 %v4296_v13, %v4295_v11  ;;  %v4298_v17 = vpop.f32.mrb[34].mxu1 }
 0x20a   : > { %v3463_v15 = vadd.f32 %v4275_v12, %v3423_v8  ;;  %v4299_v19 = vpop.f32.mrb[35].mxu1 }
 0x20c   : > { %v3503_v20 = vadd.f32 %v4297_v16, %v3463_v15 }
 0x20e   : > { %v3515_v21 = vadd.f32 %v3902_v18, %v3503_v20  ;;  %v3520_v22 = vrot.slane %v3503_v20, 1 }
 0x210   : > { %v3516_v23 = vmax.f32 %v3515_v21, 0.0  ;;  %v3522_v24 = vsub.f32 %v3503_v20, %v3520_v22 }
 0x212   : > { %v3517_v25 = vpack.c.bf16 %v3516_v23, %v3516_v23  ;;  %v3523_v26 = vmul.f32 %v3522_v24, %v3522_v24 }
 0x214   : > { %3518 = vst [vmem:[%s213_s10] sm:$0x1] %v3517_v25  ;;  %3525 = vst [vmem:[%s216_s13] sm:$0x1] %v3523_v26 }
 0x215 PF: > { %s15_s15 = sadd.s32 1, %s4609_s15  }
 0x216   : > { %p12_p4 = scmp.ge.s32.totalorder %s15_s15, 6  }
 0x218   :  { %14 = sbr.rel (!%p12_p4) target bundleno = 1 (0x1), region = 77 }

// kernel: vgg19_feature_loss.31
= control target key start
LH: loop header
LB: loop body
LE: loop exit
PB: predicated region body
PF: predicated region fallthrough
CT: control target
= control target key end

     0   :  { %10 = vsyncpa [#allocation3], 0  ;;  %s5229_s0 = inlined_call_operand.vmem [shape: bf16[2,4608], index: 0, kind: input, shape index: {}]   ;;  %s5230_s1 = inlined_call_operand.vmem [shape: bf16[4,4608,128], index: 1, kind: input, shape index: {}]   ;;  %s5231_s2 = inlined_call_operand.vmem [shape: f32[1,512], index: 2, kind: input, shape index: {}]   ;;  %s5232_s3 = inlined_call_operand.hbm [shape: bf16[2,512], index: 3, kind: output, shape index: {0}]   ;;  %s5233_s4 = inlined_call_operand.vmem [shape: f32[1,512], index: 4, kind: output, shape index: {1}]  }
   0x1   :  { %12 = vsyncpa [#allocation3 + $0x1], 0  ;;  %s4747_s15 = smov 0   ;;  %s4749_s16 = smov 0  }
   0x2   :  { %s4751_s17 = smov 0   ;;  %s4753_s18 = smov 0  }
   0x3 LB: > { %s4768_s19 = sadd.s32 4294967295, %s4718_s18   ;;  %s3629_s20 = sadd.s32 4294967294, %s4718_s18   ;;  %s4718_s18 = sphi %s4753_s18, %s5239_s18   ;;  %s4714_s17 = sphi %s4751_s17, %s5238_s17   ;;  %s4710_s16 = sphi %s4749_s16, %s5237_s16   ;;  %s4706_s15 = sphi %s4747_s15, %s5236_s15  }
   0x4   : > { %s4772_s21 = sadd.s32 1, %s4718_s18   ;;  %s98_s22 = sadd.s32 1, %s4714_s17 }
   0x5   : > { %s95_s23 = ssub.s32 %s4718_s18, %s4772_s21  ;;  %p108_p0 = scmp.ne.s32.totalorder %s4714_s17, %s4710_s16 }
   0x6   : > { %p96_p1 = scmp.eq.s32.totalorder %s95_s23, 0  ;;  %p109_p2 = scmp.eq.s32.totalorder %s4768_s19, 3 }
   0x7   : > { %p114_p3 = scmp.ne.s32.totalorder %s4710_s16, %s4706_s15  ;;  %p115_p4 = scmp.eq.s32.totalorder %s3629_s20, 3 }
   0x8   : > { %s4783_s24 = scalar_select %p96_p1, %s4714_s17, %s98_s22  }
   0x9   : > { %p4785_p5 = por %p109_p2, %p108_p0  ;;  %p4789_p6 = por %p115_p4, %p114_p3 }
   0xa   : > { %p3632_p7 = scmp.ge.s32.totalorder %s4718_s18, 1  ;;  %p176_p8 = scmp.lt.s32.totalorder %s4718_s18, 5 }
   0xc   : > { %p177_p9 = pnand %p3632_p7, %p176_p8 }
   0xd   : > { %p207_p10 = scmp.lt.s32.totalorder (!%p177_p9), %s4768_s19, 3  ;;  %v809_v0 = vlaneseq (!%p177_p9)  ;;  %v4720_v1 = vmov (!%p177_p9), 1966171168   ;;  %v219_v5 = vld [vmem:[%s5229_s0] sm:$0xff] (!%p177_p9)  ;;  %s200_s29 = sand.u32 (!%p177_p9), 1, %s4710_s16  }
   0xe   : > { %180 = sbr.rel (%p177_p9) target bundleno = 555 (0x22b), region = 32  ;;  %v807_v2 = vunpack.c.l.s4 (!%p177_p9), %v4720_v1  ;;  %v805_v30 = vcombine.high (!%p177_p9), %v219_v5, %v219_v5  ;;  %s3924_s30 = sshll.u32 (!%p177_p9), %s4768_s19, 4 }
   0xf   : > { %v810_v3 = vshrl.u32 (!%p177_p9), %v809_v0, 7  ;;  %s201_s5 = scalar_lea.vmem (!%p177_p9), [#allocation2], %s200_s29  ;;  %s5187_s12 = scalar_lea.hbm (!%p177_p9), %s5232_s3, %s3924_s30 }
  0x10   : > { %v808_v4 = vunpack.c.0.s8 (!%p177_p9), %v807_v2  ;;  %s3543_s6 = sshll.u32 (!%p177_p9), %s201_s5, 4  ;;  %s5189_s6 = int_to_ptr.vmem [resolvable:$true] %s3543_s6 }
  0x11   : > { %s4656_s13 = scalar_lea.vmem (!%p177_p9), %s5189_s6, 16 }
  0x12   : > { %v4803_v6 = vsub.s32 (!%p177_p9), %v808_v4, %v810_v3  ;;  %v4877_v4 = vld [vmem:[%s5229_s0 + $0x8] sm:$0xff] (!%p177_p9)  ;;  %p4657_p11 = scmp.ne.s32.totalorder (!%p177_p9), %s5189_s6, %s4656_s13 }
  0x14   : > { %v4812_v8 = vrot.slane (!%p177_p9), %v219_v5, %v4803_v6  ;;  %v4840_v35 = vrot.slane (!%p177_p9), %v805_v30, %v4803_v6  ;;  %p4658_p12 = pnand (!%p177_p9), %p4657_p11, %p4785_p5 }
  0x15   : > { %s4797_s27 = scalar_select %p207_p10, %s4768_s19, 3 }
  0x16   : > { %v820_v11 = vcombine.high %v4812_v8, %v4812_v8  ;;  %v821_v40 = vcombine.high %v4840_v35, %v4840_v35  ;;  %v828_v43 = vrot.slane %v4812_v8, %v4803_v6  ;;  %s3528_s19 = scalar_lea.sflag [#allocation3], %s200_s29  ;;  %p4659_p13 = pneg %p4658_p12 }
  0x17   : > { %s4323_s28 = smul.u32 2304, %s4797_s27  ;;  %s217_s9 = scalar_lea.vmem %s5233_s4, %s4797_s27 }
  0x18   : > { %v842_v14 = vrot.slane %v820_v11, %v4803_v6  ;;  %v849_v46 = vrot.slane %v821_v40, %v4803_v6  ;;  %v850_v48 = vcombine.high %v828_v43, %v828_v43  ;;  %v4886_v11 = vrot.slane %v4877_v4, %v4803_v6 }
  0x19   : > { %s4808_s7 = scalar_lea.vmem %s5230_s1, %s4323_s28  ;;  %s214_s28 = scalar_lea.vmem %s5231_s2, %s4797_s27 }
  0x1a   : > { %v4364_v7 = vld [vmem:[%s4808_s7 + $0x40] sm:$0xff]   ;;  %v4368_v13 = vld [vmem:[%s4808_s7 + $0x48] sm:$0xff]   ;;  %2821 = vmatprep.mubr.bf16.mxu0 %v842_v14  ;;  %v852_v17 = vcombine.high %v842_v14, %v842_v14  ;;  %v4372_v19 = vld [vmem:[%s4808_s7 + $0x50] sm:$0xff]   ;;  %v853_v52 = vcombine.high %v849_v46, %v849_v46  ;;  %s4721_s27 = smov [#allocation2]  }
  0x1b   : > { %v4365_v9 = vld [vmem:[%s4808_s7 + $0xc0] sm:$0xff]   ;;  %3927 = vmatprep.subr.bf16.mxu0 %v4364_v7  ;;  %v4369_v15 = vld [vmem:[%s4808_s7 + $0xc8] sm:$0xff]   ;;  %v4373_v20 = vld [vmem:[%s4808_s7 + $0xd0] sm:$0xff]   ;;  %s4660_s14 = sshll.u32 %s4721_s27, 4  ;;  %s4661_s14 = int_to_ptr.vmem [resolvable:$false] %s4660_s14 }
  0x1c   : > { %v4366_v10 = vld [vmem:[%s4808_s7] sm:$0xff]   ;;  %3949 = vmatprep.subr.bf16.mxu1 %v4365_v9  ;;  %v4370_v16 = vld [vmem:[%s4808_s7 + $0x8] sm:$0xff]   ;;  %2861 = vmatprep.mubr.bf16.mxu1 %v852_v17  ;;  %v4374_v21 = vld [vmem:[%s4808_s7 + $0x10] sm:$0xff]   ;;  %s4662_s20 = scalar_lea.vmem %s4661_s14, 32  ;;  %p4663_p0 = scmp.lt.s32.totalorder %s5189_s6, %s4661_s14 }
  0x1d   : > { %v4367_v12 = vld [vmem:[%s4808_s7 + $0x80] sm:$0xff]   ;;  %3928 = vmatpush3.bf16.msra.mxu0 %v4366_v10  ;;  %v4371_v18 = vld [vmem:[%s4808_s7 + $0x88] sm:$0xff]   ;;  %v4375_v22 = vld [vmem:[%s4808_s7 + $0x90] sm:$0xff]   ;;  %p4664_p1 = scmp.lt.s32.totalorder %s4662_s20, %s4656_s13 }
  0x1e   : > { %3950 = vmatpush3.bf16.msra.mxu1 %v4367_v12  ;;  %3929 = vmatprep.subr.bf16.mxu0 %v4368_v13  ;;  %v4376_v23 = vld [vmem:[%s4808_s7 + $0x58] sm:$0xff]   ;;  %v4380_v27 = vld [vmem:[%s4808_s7 + $0x60] sm:$0xff]   ;;  %v4384_v32 = vld [vmem:[%s4808_s7 + $0x68] sm:$0xff]  }
  0x1f   : > { %3951 = vmatprep.subr.bf16.mxu1 %v4369_v15  ;;  %v4377_v24 = vld [vmem:[%s4808_s7 + $0xd8] sm:$0xff]   ;;  %v4381_v28 = vld [vmem:[%s4808_s7 + $0xe0] sm:$0xff]   ;;  %v4385_v33 = vld [vmem:[%s4808_s7 + $0xe8] sm:$0xff]   ;;  %p4665_p2 = por %p4664_p1, %p4663_p0 }
  0x20   : > { %v4378_v25 = vld [vmem:[%s4808_s7 + $0x18] sm:$0xff]   ;;  %v4382_v29 = vld [vmem:[%s4808_s7 + $0x20] sm:$0xff]   ;;  %v4386_v34 = vld [vmem:[%s4808_s7 + $0x28] sm:$0xff]  }
  0x21   : > { %3930 = vmatpush3.bf16.msra.mxu0 %v4370_v16  ;;  %v4379_v26 = vld [vmem:[%s4808_s7 + $0x98] sm:$0xff]   ;;  %v4383_v31 = vld [vmem:[%s4808_s7 + $0xa0] sm:$0xff]   ;;  %v4387_v36 = vld [vmem:[%s4808_s7 + $0xa8] sm:$0xff]   ;;  %v869_v16 = vcombine.high %v4886_v11, %v4886_v11  ;;  %p4666_p3 = pnand %p4665_p2, %p4659_p13 }
  0x22   : > { %3952 = vmatpush3.bf16.msra.mxu1 %v4371_v18  ;;  %3931 = vmatprep.subr.bf16.mxu0 %v4372_v19  ;;  %v4388_v37 = vld [vmem:[%s4808_s7 + $0x70] sm:$0xff]   ;;  %v4392_v42 = vld [vmem:[%s4808_s7 + $0x78] sm:$0xff]   ;;  %v4397_v49 = vld [vmem:[%s4808_s7 + $0x140] sm:$0xff]   ;;  %v835_v19 = vrot.slane %v4840_v35, %v4803_v6 }
  0x23   : > { %3953 = vmatprep.subr.bf16.mxu1 %v4373_v20  ;;  %v4389_v38 = vld [vmem:[%s4808_s7 + $0xf0] sm:$0xff]   ;;  %v4393_v44 = vld [vmem:[%s4808_s7 + $0xf8] sm:$0xff]   ;;  %v4398_v50 = vld [vmem:[%s4808_s7 + $0x1c0] sm:$0xff]  }
  0x24   : > { %v4390_v39 = vld [vmem:[%s4808_s7 + $0x30] sm:$0xff]   ;;  %v4394_v45 = vld [vmem:[%s4808_s7 + $0x38] sm:$0xff]   ;;  %v4399_v51 = vld [vmem:[%s4808_s7 + $0x100] sm:$0xff]  }
  0x25   : > { %3932 = vmatpush3.bf16.msra.mxu0 %v4374_v21  ;;  %v4391_v41 = vld [vmem:[%s4808_s7 + $0xb0] sm:$0xff]   ;;  %v4395_v47 = vld [vmem:[%s4808_s7 + $0xb8] sm:$0xff]   ;;  %v4400_v53 = vld [vmem:[%s4808_s7 + $0x180] sm:$0xff]  }
  0x26   : > { %3954 = vmatpush3.bf16.msra.mxu1 %v4375_v22  ;;  %3933 = vmatprep.subr.bf16.mxu0 %v4376_v23  ;;  %v4401_v54 = vld [vmem:[%s4808_s7 + $0x148] sm:$0xff]   ;;  %v4405_v58 = vld [vmem:[%s4808_s7 + $0x150] sm:$0xff]   ;;  %v4409_v62 = vld [vmem:[%s4808_s7 + $0x158] sm:$0xff]   ;;  %v891_v22 = vrot.slane %v869_v16, %v4803_v6 }
  0x27   : > { %3955 = vmatprep.subr.bf16.mxu1 %v4377_v24  ;;  %v4402_v55 = vld [vmem:[%s4808_s7 + $0x1c8] sm:$0xff]   ;;  %v4406_v59 = vld [vmem:[%s4808_s7 + $0x1d0] sm:$0xff]   ;;  %v4410_v63 = vld [vmem:[%s4808_s7 + $0x1d8] sm:$0xff]   ;;  %v851_v24 = vcombine.high %v835_v19, %v835_v19 }
  0x28   : > { %v4403_v56 = vld [vmem:[%s4808_s7 + $0x108] sm:$0xff]   ;;  %v4407_v60 = vld [vmem:[%s4808_s7 + $0x110] sm:$0xff]   ;;  %v4411_v0 = vld [vmem:[%s4808_s7 + $0x118] sm:$0xff]  }
  0x29   : > { %3934 = vmatpush3.bf16.msra.mxu0 %v4378_v25  ;;  %v4404_v57 = vld [vmem:[%s4808_s7 + $0x188] sm:$0xff]   ;;  %v4408_v61 = vld [vmem:[%s4808_s7 + $0x190] sm:$0xff]   ;;  %v4412_v1 = vld [vmem:[%s4808_s7 + $0x198] sm:$0xff]  }
  0x2a   : > { %3956 = vmatpush3.bf16.msra.mxu1 %v4379_v26  ;;  %3935 = vmatprep.subr.bf16.mxu0 %v4380_v27  ;;  %v4413_v2 = vld [vmem:[%s4808_s7 + $0x160] sm:$0xff]   ;;  %v4417_v8 = vld [vmem:[%s4808_s7 + $0x168] sm:$0xff]   ;;  %v4421_v13 = vld [vmem:[%s4808_s7 + $0x170] sm:$0xff]  }
  0x2b   : > { %3957 = vmatprep.subr.bf16.mxu1 %v4381_v28  ;;  %v4414_v3 = vld [vmem:[%s4808_s7 + $0x1e0] sm:$0xff]   ;;  %v4418_v9 = vld [vmem:[%s4808_s7 + $0x1e8] sm:$0xff]   ;;  %v4422_v14 = vld [vmem:[%s4808_s7 + $0x1f0] sm:$0xff]   ;;  %v901_v28 = vcombine.high %v891_v22, %v891_v22 }
  0x2c   : > { %v4415_v5 = vld [vmem:[%s4808_s7 + $0x120] sm:$0xff]   ;;  %v4419_v10 = vld [vmem:[%s4808_s7 + $0x128] sm:$0xff]   ;;  %v4423_v15 = vld [vmem:[%s4808_s7 + $0x130] sm:$0xff]  }
  0x2d   : > { %3936 = vmatpush3.bf16.msra.mxu0 %v4382_v29  ;;  %v4416_v7 = vld [vmem:[%s4808_s7 + $0x1a0] sm:$0xff]   ;;  %v4420_v12 = vld [vmem:[%s4808_s7 + $0x1a8] sm:$0xff]   ;;  %v4424_v17 = vld [vmem:[%s4808_s7 + $0x1b0] sm:$0xff]  }
  0x2e   : > { %3958 = vmatpush3.bf16.msra.mxu1 %v4383_v31  ;;  %3937 = vmatprep.subr.bf16.mxu0 %v4384_v32  ;;  %v4425_v18 = vld [vmem:[%s4808_s7 + $0x178] sm:$0xff]   ;;  %v4429_v25 = vld [vmem:[%s4808_s7 + $0x240] sm:$0xff]   ;;  %v4433_v30 = vld [vmem:[%s4808_s7 + $0x248] sm:$0xff]  }
  0x2f   : > { %3959 = vmatprep.subr.bf16.mxu1 %v4385_v33  ;;  %v4426_v20 = vld [vmem:[%s4808_s7 + $0x1f8] sm:$0xff]   ;;  %v4430_v26 = vld [vmem:[%s4808_s7 + $0x2c0] sm:$0xff]   ;;  %v4434_v31 = vld [vmem:[%s4808_s7 + $0x2c8] sm:$0xff]  }
  0x30   : > { %v4427_v21 = vld [vmem:[%s4808_s7 + $0x138] sm:$0xff]   ;;  %v4431_v27 = vld [vmem:[%s4808_s7 + $0x200] sm:$0xff]   ;;  %v4435_v32 = vld [vmem:[%s4808_s7 + $0x208] sm:$0xff]  }
  0x31   : > { %3938 = vmatpush3.bf16.msra.mxu0 %v4386_v34  ;;  %v4428_v23 = vld [vmem:[%s4808_s7 + $0x1b8] sm:$0xff]   ;;  %v4432_v29 = vld [vmem:[%s4808_s7 + $0x280] sm:$0xff]   ;;  %v4436_v33 = vld [vmem:[%s4808_s7 + $0x288] sm:$0xff]  }
  0x32   : > { %3960 = vmatpush3.bf16.msra.mxu1 %v4387_v36  ;;  %3939 = vmatprep.subr.bf16.mxu0 %v4388_v37  ;;  %v4437_v34 = vld [vmem:[%s4808_s7 + $0x250] sm:$0xff]   ;;  %v4443_v40 = vld [vmem:[%s4808_s7 + $0x218] sm:$0xff]  }
  0x33   : > { %3961 = vmatprep.subr.bf16.mxu1 %v4389_v38  ;;  %v4438_v35 = vld [vmem:[%s4808_s7 + $0x2d0] sm:$0xff]   ;;  %v4441_v38 = vld [vmem:[%s4808_s7 + $0x258] sm:$0xff]  }
  0x34   : > { %v4439_v36 = vld [vmem:[%s4808_s7 + $0x210] sm:$0xff]   ;;  %v4475_v16 = vld [vmem:[%s4808_s7 + $0x318] sm:$0xff]  }
  0x35   : > { %3940 = vmatpush3.bf16.msra.mxu0 %v4390_v39  ;;  %v4440_v37 = vld [vmem:[%s4808_s7 + $0x290] sm:$0xff]   ;;  %v4442_v39 = vld [vmem:[%s4808_s7 + $0x2d8] sm:$0xff]  }
  0x36   : > { %3962 = vmatpush3.bf16.msra.mxu1 %v4391_v41  ;;  %3941 = vmatprep.subr.bf16.mxu0 %v4392_v42  ;;  %v4444_v41 = vld [vmem:[%s4808_s7 + $0x298] sm:$0xff]   ;;  %v4445_v42 = vld [vmem:[%s4808_s7 + $0x260] sm:$0xff]  }
  0x37   : > { %3963 = vmatprep.subr.bf16.mxu1 %v4393_v44  ;;  %v4447_v44 = vld [vmem:[%s4808_s7 + $0x220] sm:$0xff]  }
  0x39   : > { %3942 = vmatpush3.bf16.msra.mxu0 %v4394_v45  ;;  %v854_v45 = vcombine.high %v4877_v4, %v4877_v4  ;;  %v4464_v4 = vld [vmem:[%s4808_s7 + $0x380] sm:$0xff]  }
  0x3a   : > { %3964 = vmatpush3.bf16.msra.mxu1 %v4395_v47  ;;  %3971 = vmatprep.subr.bf16.mxu0 %v4397_v49  ;;  %v4449_v47 = vld [vmem:[%s4808_s7 + $0x268] sm:$0xff]  }
  0x3b   : > { %3993 = vmatprep.subr.bf16.mxu1 %v4398_v50  ;;  %v4451_v49 = vld [vmem:[%s4808_s7 + $0x228] sm:$0xff]   ;;  %v4928_v50 = vrot.slane %v854_v45, %v4803_v6  ;;  %v4503_v45 = vld [vmem:[%s4808_s7 + $0x4d0] sm:$0xff]  }
  0x3c   : > { %2822 = vmatmul.mubr.bf16.vlgmr.msra.gmra.mrb[0].mxu0 %v828_v43  ;;  %v4446_v43 = vld [vmem:[%s4808_s7 + $0x2e0] sm:$0xff]  }
  0x3d   : > { %2862 = vmatmul.mubr.bf16.vlgmr.msra.gmra.mrb[0].mxu1 %v850_v48  ;;  %3972 = vmatpush3.bf16.msra.mxu0 %v4399_v51  ;;  %v4450_v48 = vld [vmem:[%s4808_s7 + $0x2e8] sm:$0xff]  }
  0x3e   : > { %3994 = vmatpush3.bf16.msra.mxu1 %v4400_v53  ;;  %2901 = vmatprep.mubr.bf16.mxu0 %v849_v46  ;;  %v4448_v46 = vld [vmem:[%s4808_s7 + $0x2a0] sm:$0xff]   ;;  %v4452_v51 = vld [vmem:[%s4808_s7 + $0x2a8] sm:$0xff]   ;;  %v4454_v53 = vld [vmem:[%s4808_s7 + $0x2f0] sm:$0xff]  }
  0x3f   : > { %3973 = vmatprep.subr.bf16.mxu0 %v4401_v54  ;;  %2941 = vmatprep.mubr.bf16.mxu1 %v853_v52  ;;  %v4453_v52 = vld [vmem:[%s4808_s7 + $0x270] sm:$0xff]  }
  0x40   : > { %3995 = vmatprep.subr.bf16.mxu1 %v4402_v55  ;;  %v4455_v54 = vld [vmem:[%s4808_s7 + $0x230] sm:$0xff]   ;;  %v870_v55 = vcombine.high %v4928_v50, %v4928_v50 }
  0x41   : > { %3974 = vmatpush3.bf16.msra.mxu0 %v4403_v56  ;;  %v4456_v56 = vld [vmem:[%s4808_s7 + $0x2b0] sm:$0xff]  }
  0x42   : > { %3996 = vmatpush3.bf16.msra.mxu1 %v4404_v57  ;;  %3975 = vmatprep.subr.bf16.mxu0 %v4405_v58  ;;  %v4457_v57 = vld [vmem:[%s4808_s7 + $0x278] sm:$0xff]   ;;  %v877_v58 = vrot.slane %v4886_v11, %v4803_v6  ;;  %v4470_v11 = vld [vmem:[%s4808_s7 + $0x3d0] sm:$0xff]  }
  0x43   : > { %3997 = vmatprep.subr.bf16.mxu1 %v4406_v59  ;;  %v4458_v59 = vld [vmem:[%s4808_s7 + $0x2f8] sm:$0xff]  }
  0x45   : > { %3976 = vmatpush3.bf16.msra.mxu0 %v4407_v60  ;;  %v4459_v60 = vld [vmem:[%s4808_s7 + $0x238] sm:$0xff]  }
  0x46   : > { %3998 = vmatpush3.bf16.msra.mxu1 %v4408_v61  ;;  %3977 = vmatprep.subr.bf16.mxu0 %v4409_v62  ;;  %v898_v61 = vrot.slane %v870_v55, %v4803_v6  ;;  %v4460_v62 = vld [vmem:[%s4808_s7 + $0x2b8] sm:$0xff]   ;;  %v4513_v55 = vld [vmem:[%s4808_s7 + $0x4a0] sm:$0xff]  }
  0x47   : > { %3999 = vmatprep.subr.bf16.mxu1 %v4410_v63  ;;  %v899_v63 = vcombine.high %v877_v58, %v877_v58 }
  0x49   : > { %3978 = vmatpush3.bf16.msra.mxu0 %v4411_v0  ;;  %v4461_v0 = vld [vmem:[%s4808_s7 + $0x340] sm:$0xff]  }
  0x4a   : > { %4000 = vmatpush3.bf16.msra.mxu1 %v4412_v1  ;;  %3979 = vmatprep.subr.bf16.mxu0 %v4413_v2  ;;  %v4462_v1 = vld [vmem:[%s4808_s7 + $0x3c0] sm:$0xff]  }
  0x4b   : > { %4001 = vmatprep.subr.bf16.mxu1 %v4414_v3  ;;  %v4463_v2 = vld [vmem:[%s4808_s7 + $0x300] sm:$0xff]   ;;  %v902_v3 = vcombine.high %v898_v61, %v898_v61 }
  0x4d   : > { %3980 = vmatpush3.bf16.msra.mxu0 %v4415_v5  ;;  %v4465_v5 = vld [vmem:[%s4808_s7 + $0x348] sm:$0xff]  }
  0x4e   : > { %4002 = vmatpush3.bf16.msra.mxu1 %v4416_v7  ;;  %3981 = vmatprep.subr.bf16.mxu0 %v4417_v8  ;;  %v4466_v7 = vld [vmem:[%s4808_s7 + $0x3c8] sm:$0xff]  }
  0x4f   : > { %4003 = vmatprep.subr.bf16.mxu1 %v4418_v9  ;;  %v4467_v8 = vld [vmem:[%s4808_s7 + $0x308] sm:$0xff]  }
  0x50   : > { %v4468_v9 = vld [vmem:[%s4808_s7 + $0x388] sm:$0xff]  }
  0x51   : > { %3982 = vmatpush3.bf16.msra.mxu0 %v4419_v10  ;;  %v4469_v10 = vld [vmem:[%s4808_s7 + $0x350] sm:$0xff]  }
  0x52   : > { %4004 = vmatpush3.bf16.msra.mxu1 %v4420_v12  ;;  %3983 = vmatprep.subr.bf16.mxu0 %v4421_v13  ;;  %v4471_v12 = vld [vmem:[%s4808_s7 + $0x310] sm:$0xff]  }
  0x53   : > { %4005 = vmatprep.subr.bf16.mxu1 %v4422_v14  ;;  %v4472_v13 = vld [vmem:[%s4808_s7 + $0x390] sm:$0xff]   ;;  %v4473_v14 = vld [vmem:[%s4808_s7 + $0x358] sm:$0xff]  }
  0x55   : > { %3984 = vmatpush3.bf16.msra.mxu0 %v4423_v15  ;;  %v4474_v15 = vld [vmem:[%s4808_s7 + $0x3d8] sm:$0xff]  }
  0x56   : > { %4006 = vmatpush3.bf16.msra.mxu1 %v4424_v17  ;;  %3985 = vmatprep.subr.bf16.mxu0 %v4425_v18  ;;  %v4476_v17 = vld [vmem:[%s4808_s7 + $0x398] sm:$0xff]   ;;  %v4477_v18 = vld [vmem:[%s4808_s7 + $0x360] sm:$0xff]  }
  0x57   : > { %4007 = vmatprep.subr.bf16.mxu1 %v4426_v20  ;;  %v4479_v20 = vld [vmem:[%s4808_s7 + $0x320] sm:$0xff]  }
  0x59   : > { %3986 = vmatpush3.bf16.msra.mxu0 %v4427_v21  ;;  %v4480_v21 = vld [vmem:[%s4808_s7 + $0x3a0] sm:$0xff]  }
  0x5a   : > { %4008 = vmatpush3.bf16.msra.mxu1 %v4428_v23  ;;  %4015 = vmatprep.subr.bf16.mxu0 %v4429_v25  ;;  %v4482_v23 = vld [vmem:[%s4808_s7 + $0x3e8] sm:$0xff]  }
  0x5b   : > { %4037 = vmatprep.subr.bf16.mxu1 %v4430_v26  ;;  %v4484_v25 = vld [vmem:[%s4808_s7 + $0x3a8] sm:$0xff]   ;;  %v4485_v26 = vld [vmem:[%s4808_s7 + $0x370] sm:$0xff]  }
  0x5c   : > { %2902 = vmatmul.mubr.bf16.vlgmr.msra.gmra.mrb[4].mxu0 %v835_v19  ;;  %v4478_v19 = vld [vmem:[%s4808_s7 + $0x3e0] sm:$0xff]  }
  0x5d   : > { %2942 = vmatmul.mubr.bf16.vlgmr.msra.gmra.mrb[4].mxu1 %v851_v24  ;;  %4016 = vmatpush3.bf16.msra.mxu0 %v4431_v27  ;;  %v4483_v24 = vld [vmem:[%s4808_s7 + $0x328] sm:$0xff]   ;;  %v4486_v27 = vld [vmem:[%s4808_s7 + $0x3f0] sm:$0xff]  }
  0x5e   : > { %4038 = vmatpush3.bf16.msra.mxu1 %v4432_v29  ;;  %2981 = vmatprep.mubr.bf16.mxu0 %v891_v22  ;;  %v4481_v22 = vld [vmem:[%s4808_s7 + $0x368] sm:$0xff]   ;;  %v4488_v29 = vld [vmem:[%s4808_s7 + $0x3b0] sm:$0xff]  }
  0x5f   : > { %4017 = vmatprep.subr.bf16.mxu0 %v4433_v30  ;;  %3021 = vmatprep.mubr.bf16.mxu1 %v901_v28  ;;  %v4487_v28 = vld [vmem:[%s4808_s7 + $0x330] sm:$0xff]   ;;  %v4489_v30 = vld [vmem:[%s4808_s7 + $0x378] sm:$0xff]  }
  0x60   : > { %4039 = vmatprep.subr.bf16.mxu1 %v4434_v31  ;;  %v884_v31 = vrot.slane %v4928_v50, %v4803_v6  ;;  %v4508_v50 = vld [vmem:[%s4808_s7 + $0x418] sm:$0xff]  }
  0x61   : > { %4018 = vmatpush3.bf16.msra.mxu0 %v4435_v32  ;;  %v4490_v32 = vld [vmem:[%s4808_s7 + $0x3f8] sm:$0xff]  }
  0x62   : > { %4040 = vmatpush3.bf16.msra.mxu1 %v4436_v33  ;;  %4019 = vmatprep.subr.bf16.mxu0 %v4437_v34  ;;  %v4491_v33 = vld [vmem:[%s4808_s7 + $0x338] sm:$0xff]  }
  0x63   : > { %4041 = vmatprep.subr.bf16.mxu1 %v4438_v35  ;;  %v4492_v34 = vld [vmem:[%s4808_s7 + $0x3b8] sm:$0xff]   ;;  %v900_v35 = vcombine.high %v884_v31, %v884_v31 }
  0x65   : > { %4020 = vmatpush3.bf16.msra.mxu0 %v4439_v36  ;;  %v4494_v36 = vld [vmem:[%s4808_s7 + $0x440] sm:$0xff]  }
  0x66   : > { %4042 = vmatpush3.bf16.msra.mxu1 %v4440_v37  ;;  %4021 = vmatprep.subr.bf16.mxu0 %v4441_v38  ;;  %v4495_v37 = vld [vmem:[%s4808_s7 + $0x4c0] sm:$0xff]  }
  0x67   : > { %4043 = vmatprep.subr.bf16.mxu1 %v4442_v39  ;;  %v4496_v38 = vld [vmem:[%s4808_s7 + $0x400] sm:$0xff]  }
  0x68   : > { %v4497_v39 = vld [vmem:[%s4808_s7 + $0x480] sm:$0xff]  }
  0x69   : > { %4022 = vmatpush3.bf16.msra.mxu0 %v4443_v40  ;;  %v4498_v40 = vld [vmem:[%s4808_s7 + $0x448] sm:$0xff]  }
  0x6a   : > { %4044 = vmatpush3.bf16.msra.mxu1 %v4444_v41  ;;  %4023 = vmatprep.subr.bf16.mxu0 %v4445_v42  ;;  %v4499_v41 = vld [vmem:[%s4808_s7 + $0x4c8] sm:$0xff]  }
  0x6b   : > { %4045 = vmatprep.subr.bf16.mxu1 %v4446_v43  ;;  %v4500_v42 = vld [vmem:[%s4808_s7 + $0x408] sm:$0xff]  }
  0x6c   : > { %v4501_v43 = vld [vmem:[%s4808_s7 + $0x488] sm:$0xff]  }
  0x6d   : > { %4024 = vmatpush3.bf16.msra.mxu0 %v4447_v44  ;;  %v4502_v44 = vld [vmem:[%s4808_s7 + $0x450] sm:$0xff]  }
  0x6e   : > { %4046 = vmatpush3.bf16.msra.mxu1 %v4448_v46  ;;  %4025 = vmatprep.subr.bf16.mxu0 %v4449_v47  ;;  %v4504_v46 = vld [vmem:[%s4808_s7 + $0x410] sm:$0xff]  }
  0x6f   : > { %4047 = vmatprep.subr.bf16.mxu1 %v4450_v48  ;;  %v4505_v47 = vld [vmem:[%s4808_s7 + $0x490] sm:$0xff]   ;;  %v4506_v48 = vld [vmem:[%s4808_s7 + $0x458] sm:$0xff]  }
  0x71   : > { %4026 = vmatpush3.bf16.msra.mxu0 %v4451_v49  ;;  %v4507_v49 = vld [vmem:[%s4808_s7 + $0x4d8] sm:$0xff]  }
  0x72   : > { %4048 = vmatpush3.bf16.msra.mxu1 %v4452_v51  ;;  %4027 = vmatprep.subr.bf16.mxu0 %v4453_v52  ;;  %v4509_v51 = vld [vmem:[%s4808_s7 + $0x498] sm:$0xff]   ;;  %v4510_v52 = vld [vmem:[%s4808_s7 + $0x460] sm:$0xff]  }
  0x73   : > { %4049 = vmatprep.subr.bf16.mxu1 %v4454_v53  ;;  %v4511_v53 = vld [vmem:[%s4808_s7 + $0x4e0] sm:$0xff]  }
  0x75   : > { %4028 = vmatpush3.bf16.msra.mxu0 %v4455_v54  ;;  %v4512_v54 = vld [vmem:[%s4808_s7 + $0x420] sm:$0xff]  }
  0x76   : > { %4050 = vmatpush3.bf16.msra.mxu1 %v4456_v56  ;;  %4029 = vmatprep.subr.bf16.mxu0 %v4457_v57  ;;  %v4514_v56 = vld [vmem:[%s4808_s7 + $0x468] sm:$0xff]  }
  0x77   : > { %4051 = vmatprep.subr.bf16.mxu1 %v4458_v59  ;;  %v4515_v57 = vld [vmem:[%s4808_s7 + $0x4e8] sm:$0xff]  }
  0x78   : > { %v4517_v59 = vld [vmem:[%s4808_s7 + $0x4a8] sm:$0xff]  }
  0x79   : > { %4030 = vmatpush3.bf16.msra.mxu0 %v4459_v60  ;;  %v4518_v60 = vld [vmem:[%s4808_s7 + $0x470] sm:$0xff]  }
  0x7a   : > { %4052 = vmatpush3.bf16.msra.mxu1 %v4460_v62  ;;  %4059 = vmatprep.subr.bf16.mxu0 %v4461_v0  ;;  %v4520_v62 = vld [vmem:[%s4808_s7 + $0x430] sm:$0xff]   ;;  %v4522_v0 = vld [vmem:[%s4808_s7 + $0x478] sm:$0xff]  }
  0x7b   : > { %4081 = vmatprep.subr.bf16.mxu1 %v4462_v1  ;;  %v4523_v1 = vld [vmem:[%s4808_s7 + $0x4f8] sm:$0xff]  }
  0x7c   : > { %2982 = vmatmul.mubr.bf16.vlgmr.msra.gmra.mrb[8].mxu0 %v877_v58  ;;  %v4516_v58 = vld [vmem:[%s4808_s7 + $0x428] sm:$0xff]  }
  0x7d   : > { %3022 = vmatmul.mubr.bf16.vlgmr.msra.gmra.mrb[8].mxu1 %v899_v63  ;;  %4060 = vmatpush3.bf16.msra.mxu0 %v4463_v2  ;;  %v4521_v63 = vld [vmem:[%s4808_s7 + $0x4b0] sm:$0xff]   ;;  %v4524_v2 = vld [vmem:[%s4808_s7 + $0x438] sm:$0xff]  }
  0x7e   : > { %4082 = vmatpush3.bf16.msra.mxu1 %v4464_v4  ;;  %3061 = vmatprep.mubr.bf16.mxu0 %v898_v61  ;;  %v4519_v61 = vld [vmem:[%s4808_s7 + $0x4f0] sm:$0xff]  }
  0x7f   : > { %4061 = vmatprep.subr.bf16.mxu0 %v4465_v5  ;;  %3101 = vmatprep.mubr.bf16.mxu1 %v902_v3  ;;  %v4525_v3 = vld [vmem:[%s4808_s7 + $0x4b8] sm:$0xff]   ;;  %v221_v4 = vld [vmem:[%s5229_s0 + $0x10] sm:$0xff] }
  0x80   : > { %4083 = vmatprep.subr.bf16.mxu1 %v4466_v7  ;;  %v910_v5 = vrot.slane %v221_v4, %v4803_v6  ;;  %v4526_v7 = vld [vmem:[%s4808_s7 + $0x540] sm:$0xff]  }
  0x81   : > { %4062 = vmatpush3.bf16.msra.mxu0 %v4467_v8  ;;  %v903_v8 = vcombine.high %v221_v4, %v221_v4  ;;  %v4576_v4 = vld [vmem:[%s4808_s7 + $0x6e0] sm:$0xff]  }
  0x82   : > { %4084 = vmatpush3.bf16.msra.mxu1 %v4468_v9  ;;  %4063 = vmatprep.subr.bf16.mxu0 %v4469_v10  ;;  %v4527_v9 = vld [vmem:[%s4808_s7 + $0x5c0] sm:$0xff]   ;;  %v918_v10 = vcombine.high %v910_v5, %v910_v5 }
  0x83   : > { %4085 = vmatprep.subr.bf16.mxu1 %v4470_v11  ;;  %v926_v11 = vrot.slane %v910_v5, %v4803_v6  ;;  %v4577_v5 = vld [vmem:[%s4808_s7 + $0x620] sm:$0xff]  }
  0x85   : > { %4064 = vmatpush3.bf16.msra.mxu0 %v4471_v12  ;;  %v5018_v12 = vrot.slane %v903_v8, %v4803_v6  ;;  %v4579_v8 = vld [vmem:[%s4808_s7 + $0x668] sm:$0xff]  }
  0x86   : > { %4086 = vmatpush3.bf16.msra.mxu1 %v4472_v13  ;;  %4065 = vmatprep.subr.bf16.mxu0 %v4473_v14  ;;  %v4528_v13 = vld [vmem:[%s4808_s7 + $0x500] sm:$0xff]   ;;  %v940_v14 = vrot.slane %v918_v10, %v4803_v6  ;;  %v4581_v10 = vld [vmem:[%s4808_s7 + $0x628] sm:$0xff]  }
  0x87   : > { %4087 = vmatprep.subr.bf16.mxu1 %v4474_v15  ;;  %v4529_v15 = vld [vmem:[%s4808_s7 + $0x580] sm:$0xff]  }
  0x89   : > { %4066 = vmatpush3.bf16.msra.mxu0 %v4475_v16  ;;  %v919_v16 = vcombine.high %v5018_v12, %v5018_v12 }
  0x8a   : > { %4088 = vmatpush3.bf16.msra.mxu1 %v4476_v17  ;;  %4067 = vmatprep.subr.bf16.mxu0 %v4477_v18  ;;  %v948_v17 = vcombine.high %v926_v11, %v926_v11  ;;  %v4530_v18 = vld [vmem:[%s4808_s7 + $0x548] sm:$0xff]  }
  0x8b   : > { %4089 = vmatprep.subr.bf16.mxu1 %v4478_v19  ;;  %v950_v19 = vcombine.high %v940_v14, %v940_v14 }
  0x8d   : > { %4068 = vmatpush3.bf16.msra.mxu0 %v4479_v20  ;;  %v4531_v20 = vld [vmem:[%s4808_s7 + $0x5c8] sm:$0xff]  }
  0x8e   : > { %4090 = vmatpush3.bf16.msra.mxu1 %v4480_v21  ;;  %4069 = vmatprep.subr.bf16.mxu0 %v4481_v22  ;;  %v947_v21 = vrot.slane %v919_v16, %v4803_v6  ;;  %v4532_v22 = vld [vmem:[%s4808_s7 + $0x508] sm:$0xff]   ;;  %v4587_v16 = vld [vmem:[%s4808_s7 + $0x678] sm:$0xff]  }
  0x8f   : > { %4091 = vmatprep.subr.bf16.mxu1 %v4482_v23  ;;  %v4533_v23 = vld [vmem:[%s4808_s7 + $0x588] sm:$0xff]  }
  0x91   : > { %4070 = vmatpush3.bf16.msra.mxu0 %v4483_v24  ;;  %v951_v24 = vcombine.high %v947_v21, %v947_v21 }
  0x92   : > { %4092 = vmatpush3.bf16.msra.mxu1 %v4484_v25  ;;  %4071 = vmatprep.subr.bf16.mxu0 %v4485_v26  ;;  %v4534_v25 = vld [vmem:[%s4808_s7 + $0x550] sm:$0xff]  }
  0x93   : > { %4093 = vmatprep.subr.bf16.mxu1 %v4486_v27  ;;  %v4535_v26 = vld [vmem:[%s4808_s7 + $0x5d0] sm:$0xff]  }
  0x94   : > { %v4536_v27 = vld [vmem:[%s4808_s7 + $0x510] sm:$0xff]  }
  0x95   : > { %4072 = vmatpush3.bf16.msra.mxu0 %v4487_v28  ;;  %v4537_v28 = vld [vmem:[%s4808_s7 + $0x590] sm:$0xff]  }
  0x96   : > { %4094 = vmatpush3.bf16.msra.mxu1 %v4488_v29  ;;  %4073 = vmatprep.subr.bf16.mxu0 %v4489_v30  ;;  %v4538_v29 = vld [vmem:[%s4808_s7 + $0x558] sm:$0xff]  }
  0x97   : > { %4095 = vmatprep.subr.bf16.mxu1 %v4490_v32  ;;  %v4539_v30 = vld [vmem:[%s4808_s7 + $0x5d8] sm:$0xff]  }
  0x98   : > { %v4541_v32 = vld [vmem:[%s4808_s7 + $0x598] sm:$0xff]  }
  0x99   : > { %4074 = vmatpush3.bf16.msra.mxu0 %v4491_v33  ;;  %v4542_v33 = vld [vmem:[%s4808_s7 + $0x560] sm:$0xff]  }
  0x9a   : > { %4096 = vmatpush3.bf16.msra.mxu1 %v4492_v34  ;;  %4103 = vmatprep.subr.bf16.mxu0 %v4494_v36  ;;  %v4543_v34 = vld [vmem:[%s4808_s7 + $0x5e0] sm:$0xff]  }
  0x9b   : > { %4125 = vmatprep.subr.bf16.mxu1 %v4495_v37  ;;  %v4545_v36 = vld [vmem:[%s4808_s7 + $0x5a0] sm:$0xff]   ;;  %v4546_v37 = vld [vmem:[%s4808_s7 + $0x568] sm:$0xff]  }
  0x9c   : > { %3062 = vmatmul.mubr.bf16.vlgmr.msra.gmra.mrb[12].mxu0 %v884_v31  ;;  %v4540_v31 = vld [vmem:[%s4808_s7 + $0x518] sm:$0xff]  }
  0x9d   : > { %3102 = vmatmul.mubr.bf16.vlgmr.msra.gmra.mrb[12].mxu1 %v900_v35  ;;  %4104 = vmatpush3.bf16.msra.mxu0 %v4496_v38  ;;  %v4544_v35 = vld [vmem:[%s4808_s7 + $0x520] sm:$0xff]   ;;  %v4547_v38 = vld [vmem:[%s4808_s7 + $0x5e8] sm:$0xff]  }
  0x9e   : > { %4126 = vmatpush3.bf16.msra.mxu1 %v4497_v39  ;;  %4105 = vmatprep.subr.bf16.mxu0 %v4498_v40  ;;  %v4548_v39 = vld [vmem:[%s4808_s7 + $0x528] sm:$0xff]  }
  0x9f   : > { %4127 = vmatprep.subr.bf16.mxu1 %v4499_v41  ;;  %3141 = vmatprep.mubr.bf16.mxu0 %v940_v14  ;;  %v4549_v40 = vld [vmem:[%s4808_s7 + $0x5a8] sm:$0xff]   ;;  %v4550_v41 = vld [vmem:[%s4808_s7 + $0x570] sm:$0xff]  }
  0xa0   : > { %3181 = vmatprep.mubr.bf16.mxu1 %v950_v19  ;;  %v4585_v14 = vld [vmem:[%s4808_s7 + $0x630] sm:$0xff]   ;;  %v222_v19 = vld [vmem:[%s5229_s0 + $0x18] sm:$0xff] }
  0xa1   : > { %4106 = vmatpush3.bf16.msra.mxu0 %v4500_v42  ;;  %v4551_v42 = vld [vmem:[%s4808_s7 + $0x5f0] sm:$0xff]  }
  0xa2   : > { %4128 = vmatpush3.bf16.msra.mxu1 %v4501_v43  ;;  %4107 = vmatprep.subr.bf16.mxu0 %v4502_v44  ;;  %v4552_v43 = vld [vmem:[%s4808_s7 + $0x530] sm:$0xff]  }
  0xa3   : > { %4129 = vmatprep.subr.bf16.mxu1 %v4503_v45  ;;  %v4553_v44 = vld [vmem:[%s4808_s7 + $0x5b0] sm:$0xff]   ;;  %v4554_v45 = vld [vmem:[%s4808_s7 + $0x578] sm:$0xff]  }
  0xa5   : > { %4108 = vmatpush3.bf16.msra.mxu0 %v4504_v46  ;;  %v4555_v46 = vld [vmem:[%s4808_s7 + $0x5f8] sm:$0xff]  }
  0xa6   : > { %4130 = vmatpush3.bf16.msra.mxu1 %v4505_v47  ;;  %4109 = vmatprep.subr.bf16.mxu0 %v4506_v48  ;;  %v4556_v47 = vld [vmem:[%s4808_s7 + $0x538] sm:$0xff]  }
  0xa7   : > { %4131 = vmatprep.subr.bf16.mxu1 %v4507_v49  ;;  %v4557_v48 = vld [vmem:[%s4808_s7 + $0x5b8] sm:$0xff]   ;;  %v933_v49 = vrot.slane %v5018_v12, %v4803_v6  ;;  %v4583_v12 = vld [vmem:[%s4808_s7 + $0x670] sm:$0xff]  }
  0xa9   : > { %4110 = vmatpush3.bf16.msra.mxu0 %v4508_v50  ;;  %v4559_v50 = vld [vmem:[%s4808_s7 + $0x640] sm:$0xff]  }
  0xaa   : > { %4132 = vmatpush3.bf16.msra.mxu1 %v4509_v51  ;;  %4111 = vmatprep.subr.bf16.mxu0 %v4510_v52  ;;  %v4560_v51 = vld [vmem:[%s4808_s7 + $0x6c0] sm:$0xff]  }
  0xab   : > { %4133 = vmatprep.subr.bf16.mxu1 %v4511_v53  ;;  %v4561_v52 = vld [vmem:[%s4808_s7 + $0x600] sm:$0xff]  }
  0xac   : > { %v4562_v53 = vld [vmem:[%s4808_s7 + $0x680] sm:$0xff]  }
  0xad   : > { %4112 = vmatpush3.bf16.msra.mxu0 %v4512_v54  ;;  %v949_v54 = vcombine.high %v933_v49, %v933_v49 }
  0xae   : > { %4134 = vmatpush3.bf16.msra.mxu1 %v4513_v55  ;;  %4113 = vmatprep.subr.bf16.mxu0 %v4514_v56  ;;  %v4563_v55 = vld [vmem:[%s4808_s7 + $0x648] sm:$0xff]  }
  0xaf   : > { %4135 = vmatprep.subr.bf16.mxu1 %v4515_v57  ;;  %v4564_v56 = vld [vmem:[%s4808_s7 + $0x6c8] sm:$0xff]  }
  0xb0   : > { %v4565_v57 = vld [vmem:[%s4808_s7 + $0x608] sm:$0xff]  }
  0xb1   : > { %4114 = vmatpush3.bf16.msra.mxu0 %v4516_v58  ;;  %v4566_v58 = vld [vmem:[%s4808_s7 + $0x688] sm:$0xff]  }
  0xb2   : > { %4136 = vmatpush3.bf16.msra.mxu1 %v4517_v59  ;;  %4115 = vmatprep.subr.bf16.mxu0 %v4518_v60  ;;  %v4567_v59 = vld [vmem:[%s4808_s7 + $0x650] sm:$0xff]  }
  0xb3   : > { %4137 = vmatprep.subr.bf16.mxu1 %v4519_v61  ;;  %v4568_v60 = vld [vmem:[%s4808_s7 + $0x6d0] sm:$0xff]  }
  0xb4   : > { %v4569_v61 = vld [vmem:[%s4808_s7 + $0x610] sm:$0xff]  }
  0xb5   : > { %4116 = vmatpush3.bf16.msra.mxu0 %v4520_v62  ;;  %v4570_v62 = vld [vmem:[%s4808_s7 + $0x690] sm:$0xff]  }
  0xb6   : > { %4138 = vmatpush3.bf16.msra.mxu1 %v4521_v63  ;;  %4117 = vmatprep.subr.bf16.mxu0 %v4522_v0  ;;  %v4571_v63 = vld [vmem:[%s4808_s7 + $0x658] sm:$0xff]  }
  0xb7   : > { %4139 = vmatprep.subr.bf16.mxu1 %v4523_v1  ;;  %v4572_v0 = vld [vmem:[%s4808_s7 + $0x6d8] sm:$0xff]  }
  0xb8   : > { %v4573_v1 = vld [vmem:[%s4808_s7 + $0x618] sm:$0xff]  }
  0xb9   : > { %4118 = vmatpush3.bf16.msra.mxu0 %v4524_v2  ;;  %v4574_v2 = vld [vmem:[%s4808_s7 + $0x698] sm:$0xff]  }
  0xba   : > { %4140 = vmatpush3.bf16.msra.mxu1 %v4525_v3  ;;  %4147 = vmatprep.subr.bf16.mxu0 %v4526_v7  ;;  %v4575_v3 = vld [vmem:[%s4808_s7 + $0x660] sm:$0xff]  }
  0xbb   : > { %4169 = vmatprep.subr.bf16.mxu1 %v4527_v9  ;;  %v4578_v7 = vld [vmem:[%s4808_s7 + $0x6a0] sm:$0xff]   ;;  %v4580_v9 = vld [vmem:[%s4808_s7 + $0x6e8] sm:$0xff]  }
  0xbc   : > { %3142 = vmatmul.mubr.bf16.vlgmr.msra.gmra.mrb[16].mxu0 %v926_v11  ;;  %v4582_v11 = vld [vmem:[%s4808_s7 + $0x6a8] sm:$0xff]  }
  0xbd   : > { %4148 = vmatpush3.bf16.msra.mxu0 %v4528_v13  ;;  %3182 = vmatmul.mubr.bf16.vlgmr.msra.gmra.mrb[16].mxu1 %v948_v17  ;;  %v4584_v13 = vld [vmem:[%s4808_s7 + $0x6f0] sm:$0xff]   ;;  %v4588_v17 = vld [vmem:[%s4808_s7 + $0x6f8] sm:$0xff]  }
  0xbe   : > { %4149 = vmatprep.subr.bf16.mxu0 %v4530_v18  ;;  %4170 = vmatpush3.bf16.msra.mxu1 %v4529_v15  ;;  %v4586_v15 = vld [vmem:[%s4808_s7 + $0x6b0] sm:$0xff]   ;;  %v4589_v18 = vld [vmem:[%s4808_s7 + $0x638] sm:$0xff]  }
  0xbf   : > { %3221 = vmatprep.mubr.bf16.mxu0 %v947_v21  ;;  %4171 = vmatprep.subr.bf16.mxu1 %v4531_v20  ;;  %v4590_v20 = vld [vmem:[%s4808_s7 + $0x6b8] sm:$0xff]   ;;  %v959_v21 = vrot.slane %v222_v19, %v4803_v6 }
  0xc0   : > { %3261 = vmatprep.mubr.bf16.mxu1 %v951_v24 }
  0xc1   : > { %4150 = vmatpush3.bf16.msra.mxu0 %v4532_v22  ;;  %v952_v22 = vcombine.high %v222_v19, %v222_v19  ;;  %v967_v24 = vcombine.high %v959_v21, %v959_v21  ;;  %v4629_v19 = vld [vmem:[%s4808_s7 + $0x8c8] sm:$0xff]  }
  0xc2   : > { %4151 = vmatprep.subr.bf16.mxu0 %v4534_v25  ;;  %4172 = vmatpush3.bf16.msra.mxu1 %v4533_v23  ;;  %v4591_v23 = vld [vmem:[%s4808_s7 + $0x740] sm:$0xff]   ;;  %v975_v25 = vrot.slane %v959_v21, %v4803_v6  ;;  %v4632_v21 = vld [vmem:[%s4808_s7 + $0x850] sm:$0xff]  }
  0xc3   : > { %4173 = vmatprep.subr.bf16.mxu1 %v4535_v26  ;;  %v4592_v26 = vld [vmem:[%s4808_s7 + $0x7c0] sm:$0xff]  }
  0xc5   : > { %4152 = vmatpush3.bf16.msra.mxu0 %v4536_v27  ;;  %v5096_v27 = vrot.slane %v952_v22, %v4803_v6  ;;  %v4631_v22 = vld [vmem:[%s4808_s7 + $0x888] sm:$0xff]  }
  0xc6   : > { %4153 = vmatprep.subr.bf16.mxu0 %v4538_v29  ;;  %4174 = vmatpush3.bf16.msra.mxu1 %v4537_v28  ;;  %v4593_v28 = vld [vmem:[%s4808_s7 + $0x700] sm:$0xff]   ;;  %v989_v29 = vrot.slane %v967_v24, %v4803_v6  ;;  %v4634_v24 = vld [vmem:[%s4808_s7 + $0x810] sm:$0xff]  }
  0xc7   : > { %4175 = vmatprep.subr.bf16.mxu1 %v4539_v30  ;;  %v4594_v30 = vld [vmem:[%s4808_s7 + $0x780] sm:$0xff]  }
  0xc9   : > { %4154 = vmatpush3.bf16.msra.mxu0 %v4540_v31  ;;  %v968_v31 = vcombine.high %v5096_v27, %v5096_v27 }
  0xca   : > { %4155 = vmatprep.subr.bf16.mxu0 %v4542_v33  ;;  %4176 = vmatpush3.bf16.msra.mxu1 %v4541_v32  ;;  %v997_v32 = vcombine.high %v975_v25, %v975_v25  ;;  %v4595_v33 = vld [vmem:[%s4808_s7 + $0x748] sm:$0xff]  }
  0xcb   : > { %4177 = vmatprep.subr.bf16.mxu1 %v4543_v34  ;;  %v999_v34 = vcombine.high %v989_v29, %v989_v29 }
  0xcd   : > { %4156 = vmatpush3.bf16.msra.mxu0 %v4544_v35  ;;  %v4596_v35 = vld [vmem:[%s4808_s7 + $0x7c8] sm:$0xff]  }
  0xce   : > { %4157 = vmatprep.subr.bf16.mxu0 %v4546_v37  ;;  %4178 = vmatpush3.bf16.msra.mxu1 %v4545_v36  ;;  %v996_v36 = vrot.slane %v968_v31, %v4803_v6  ;;  %v4597_v37 = vld [vmem:[%s4808_s7 + $0x708] sm:$0xff]   ;;  %v4641_v31 = vld [vmem:[%s4808_s7 + $0x8e0] sm:$0xff]  }
  0xcf   : > { %4179 = vmatprep.subr.bf16.mxu1 %v4547_v38  ;;  %v4598_v38 = vld [vmem:[%s4808_s7 + $0x788] sm:$0xff]  }
  0xd1   : > { %4158 = vmatpush3.bf16.msra.mxu0 %v4548_v39  ;;  %v1000_v39 = vcombine.high %v996_v36, %v996_v36 }
  0xd2   : > { %4159 = vmatprep.subr.bf16.mxu0 %v4550_v41  ;;  %4180 = vmatpush3.bf16.msra.mxu1 %v4549_v40  ;;  %v4599_v40 = vld [vmem:[%s4808_s7 + $0x750] sm:$0xff]  }
  0xd3   : > { %4181 = vmatprep.subr.bf16.mxu1 %v4551_v42  ;;  %v4600_v41 = vld [vmem:[%s4808_s7 + $0x7d0] sm:$0xff]  }
  0xd4   : > { %v4601_v42 = vld [vmem:[%s4808_s7 + $0x710] sm:$0xff]  }
  0xd5   : > { %4160 = vmatpush3.bf16.msra.mxu0 %v4552_v43  ;;  %v4602_v43 = vld [vmem:[%s4808_s7 + $0x790] sm:$0xff]  }
  0xd6   : > { %4161 = vmatprep.subr.bf16.mxu0 %v4554_v45  ;;  %4182 = vmatpush3.bf16.msra.mxu1 %v4553_v44  ;;  %v4603_v44 = vld [vmem:[%s4808_s7 + $0x758] sm:$0xff]  }
  0xd7   : > { %4183 = vmatprep.subr.bf16.mxu1 %v4555_v46  ;;  %v4604_v45 = vld [vmem:[%s4808_s7 + $0x7d8] sm:$0xff]  }
  0xd8   : > { %v4605_v46 = vld [vmem:[%s4808_s7 + $0x718] sm:$0xff]  }
  0xd9   : > { %4162 = vmatpush3.bf16.msra.mxu0 %v4556_v47  ;;  %v4606_v47 = vld [vmem:[%s4808_s7 + $0x798] sm:$0xff]  }
  0xda   : > { %4191 = vmatprep.subr.bf16.mxu0 %v4559_v50  ;;  %4184 = vmatpush3.bf16.msra.mxu1 %v4557_v48  ;;  %v4607_v48 = vld [vmem:[%s4808_s7 + $0x760] sm:$0xff]  }
  0xdb   : > { %4213 = vmatprep.subr.bf16.mxu1 %v4560_v51  ;;  %v4609_v50 = vld [vmem:[%s4808_s7 + $0x720] sm:$0xff]  }
  0xdc   : > { %3222 = vmatmul.mubr.bf16.vlgmr.msra.gmra.mrb[20].mxu0 %v933_v49  ;;  %v4608_v49 = vld [vmem:[%s4808_s7 + $0x7e0] sm:$0xff]  }
  0xdd   : > { %4192 = vmatpush3.bf16.msra.mxu0 %v4561_v52  ;;  %3262 = vmatmul.mubr.bf16.vlgmr.msra.gmra.mrb[20].mxu1 %v949_v54  ;;  %v4610_v51 = vld [vmem:[%s4808_s7 + $0x7a0] sm:$0xff]  }
  0xde   : > { %4193 = vmatprep.subr.bf16.mxu0 %v4563_v55  ;;  %4214 = vmatpush3.bf16.msra.mxu1 %v4562_v53  ;;  %v4611_v53 = vld [vmem:[%s4808_s7 + $0x768] sm:$0xff]  }
  0xdf   : > { %4215 = vmatprep.subr.bf16.mxu1 %v4564_v56  ;;  %3301 = vmatprep.mubr.bf16.mxu0 %v989_v29  ;;  %v4612_v56 = vld [vmem:[%s4808_s7 + $0x7e8] sm:$0xff]   ;;  %v4640_v29 = vld [vmem:[%s4808_s7 + $0x860] sm:$0xff]  }
  0xe0   : > { %3341 = vmatprep.mubr.bf16.mxu1 %v999_v34  ;;  %v4644_v34 = vld [vmem:[%s4808_s7 + $0x868] sm:$0xff]  }
  0xe1   : > { %4194 = vmatpush3.bf16.msra.mxu0 %v4565_v57  ;;  %v4613_v57 = vld [vmem:[%s4808_s7 + $0x728] sm:$0xff]  }
  0xe2   : > { %4195 = vmatprep.subr.bf16.mxu0 %v4567_v59  ;;  %4216 = vmatpush3.bf16.msra.mxu1 %v4566_v58 }
  0xe3   : > { %4217 = vmatprep.subr.bf16.mxu1 %v4568_v60 }
  0xe5   : > { %4196 = vmatpush3.bf16.msra.mxu0 %v4569_v61 }
  0xe6   : > { %4197 = vmatprep.subr.bf16.mxu0 %v4571_v63  ;;  %4218 = vmatpush3.bf16.msra.mxu1 %v4570_v62 }
  0xe7   : > { %4219 = vmatprep.subr.bf16.mxu1 %v4572_v0 }
  0xe9   : > { %4198 = vmatpush3.bf16.msra.mxu0 %v4573_v1  ;;  %v4615_v1 = vld [vmem:[%s4808_s7 + $0x770] sm:$0xff]  }
  0xea   : > { %4199 = vmatprep.subr.bf16.mxu0 %v4575_v3  ;;  %4220 = vmatpush3.bf16.msra.mxu1 %v4574_v2  ;;  %v4614_v3 = vld [vmem:[%s4808_s7 + $0x7a8] sm:$0xff]  }
  0xeb   : > { %4221 = vmatprep.subr.bf16.mxu1 %v4576_v4  ;;  %v4616_v4 = vld [vmem:[%s4808_s7 + $0x7f0] sm:$0xff]  }
  0xed   : > { %4200 = vmatpush3.bf16.msra.mxu0 %v4577_v5  ;;  %v4617_v5 = vld [vmem:[%s4808_s7 + $0x730] sm:$0xff]  }
  0xee   : > { %4201 = vmatprep.subr.bf16.mxu0 %v4579_v8  ;;  %4222 = vmatpush3.bf16.msra.mxu1 %v4578_v7  ;;  %v4619_v7 = vld [vmem:[%s4808_s7 + $0x778] sm:$0xff]   ;;  %v4618_v8 = vld [vmem:[%s4808_s7 + $0x7b0] sm:$0xff]  }
  0xef   : > { %4223 = vmatprep.subr.bf16.mxu1 %v4580_v9  ;;  %v4620_v9 = vld [vmem:[%s4808_s7 + $0x7f8] sm:$0xff]  }
  0xf1   : > { %4202 = vmatpush3.bf16.msra.mxu0 %v4581_v10  ;;  %v4621_v10 = vld [vmem:[%s4808_s7 + $0x738] sm:$0xff]  }
  0xf2   : > { %4203 = vmatprep.subr.bf16.mxu0 %v4583_v12  ;;  %4224 = vmatpush3.bf16.msra.mxu1 %v4582_v11  ;;  %v982_v11 = vrot.slane %v5096_v27, %v4803_v6  ;;  %v4624_v12 = vld [vmem:[%s4808_s7 + $0x840] sm:$0xff]   ;;  %v4637_v27 = vld [vmem:[%s4808_s7 + $0x8d8] sm:$0xff]  }
  0xf3   : > { %4225 = vmatprep.subr.bf16.mxu1 %v4584_v13  ;;  %v4622_v13 = vld [vmem:[%s4808_s7 + $0x7b8] sm:$0xff]  }
  0xf5   : > { %4204 = vmatpush3.bf16.msra.mxu0 %v4585_v14  ;;  %v4625_v14 = vld [vmem:[%s4808_s7 + $0x8c0] sm:$0xff]  }
  0xf6   : > { %4205 = vmatprep.subr.bf16.mxu0 %v4587_v16  ;;  %4226 = vmatpush3.bf16.msra.mxu1 %v4586_v15  ;;  %v4626_v15 = vld [vmem:[%s4808_s7 + $0x800] sm:$0xff]   ;;  %v998_v16 = vcombine.high %v982_v11, %v982_v11 }
  0xf7   : > { %4227 = vmatprep.subr.bf16.mxu1 %v4588_v17  ;;  %v4628_v17 = vld [vmem:[%s4808_s7 + $0x848] sm:$0xff]  }
  0xf9   : > { %4206 = vmatpush3.bf16.msra.mxu0 %v4589_v18  ;;  %v4627_v18 = vld [vmem:[%s4808_s7 + $0x880] sm:$0xff]  }
  0xfa   : > { %4235 = vmatprep.subr.bf16.mxu0 %v4591_v23  ;;  %4228 = vmatpush3.bf16.msra.mxu1 %v4590_v20  ;;  %v4630_v20 = vld [vmem:[%s4808_s7 + $0x808] sm:$0xff]   ;;  %v4633_v23 = vld [vmem:[%s4808_s7 + $0x8d0] sm:$0xff]  }
  0xfb   : > { %4257 = vmatprep.subr.bf16.mxu1 %v4592_v26  ;;  %v4635_v26 = vld [vmem:[%s4808_s7 + $0x890] sm:$0xff]  }
  0xfc   : > { %3302 = vmatmul.mubr.bf16.vlgmr.msra.gmra.mrb[24].mxu0 %v975_v25  ;;  %v4636_v25 = vld [vmem:[%s4808_s7 + $0x858] sm:$0xff]  }
  0xfd   : > { %4236 = vmatpush3.bf16.msra.mxu0 %v4593_v28  ;;  %3342 = vmatmul.mubr.bf16.vlgmr.msra.gmra.mrb[24].mxu1 %v997_v32  ;;  %v4638_v28 = vld [vmem:[%s4808_s7 + $0x818] sm:$0xff]   ;;  %v4642_v32 = vld [vmem:[%s4808_s7 + $0x820] sm:$0xff]  }
  0xfe   : > { %4237 = vmatprep.subr.bf16.mxu0 %v4595_v33  ;;  %4258 = vmatpush3.bf16.msra.mxu1 %v4594_v30  ;;  %v4639_v30 = vld [vmem:[%s4808_s7 + $0x898] sm:$0xff]  }
  0xff   : > { %3381 = vmatprep.mubr.bf16.mxu0 %v996_v36  ;;  %4259 = vmatprep.subr.bf16.mxu1 %v4596_v35  ;;  %v4643_v35 = vld [vmem:[%s4808_s7 + $0x8a0] sm:$0xff]  }
 0x100   : > { %3421 = vmatprep.mubr.bf16.mxu1 %v1000_v39 }
 0x101   : > { %4238 = vmatpush3.bf16.msra.mxu0 %v4597_v37 }
 0x102   : > { %4239 = vmatprep.subr.bf16.mxu0 %v4599_v40  ;;  %4260 = vmatpush3.bf16.msra.mxu1 %v4598_v38  ;;  %v4645_v38 = vld [vmem:[%s4808_s7 + $0x8e8] sm:$0xff]  }
 0x103   : > { %4261 = vmatprep.subr.bf16.mxu1 %v4600_v41 }
 0x105   : > { %4240 = vmatpush3.bf16.msra.mxu0 %v4601_v42 }
 0x106   : > { %4241 = vmatprep.subr.bf16.mxu0 %v4603_v44  ;;  %4262 = vmatpush3.bf16.msra.mxu1 %v4602_v43  ;;  %v4646_v44 = vld [vmem:[%s4808_s7 + $0x828] sm:$0xff]  }
 0x107   : > { %4263 = vmatprep.subr.bf16.mxu1 %v4604_v45  ;;  %v4647_v45 = vld [vmem:[%s4808_s7 + $0x8a8] sm:$0xff]  }
 0x109   : > { %4242 = vmatpush3.bf16.msra.mxu0 %v4605_v46 }
 0x10a   : > { %4243 = vmatprep.subr.bf16.mxu0 %v4607_v48  ;;  %4264 = vmatpush3.bf16.msra.mxu1 %v4606_v47 }
 0x10b   : > { %4265 = vmatprep.subr.bf16.mxu1 %v4608_v49  ;;  %v4648_v49 = vld [vmem:[%s4808_s7 + $0x870] sm:$0xff]  }
 0x10d   : > { %4244 = vmatpush3.bf16.msra.mxu0 %v4609_v50 }
 0x10e   : > { %4245 = vmatprep.subr.bf16.mxu0 %v4611_v53  ;;  %4266 = vmatpush3.bf16.msra.mxu1 %v4610_v51  ;;  %v4649_v51 = vld [vmem:[%s4808_s7 + $0x8f0] sm:$0xff]   ;;  %v4652_v53 = vld [vmem:[%s4808_s7 + $0x878] sm:$0xff]  }
 0x10f   : > { %v3943_v52 = vpop.f32.mrb[0].mxu0  ;;  %4267 = vmatprep.subr.bf16.mxu1 %v4612_v56  ;;  %v4654_v56 = vld [vmem:[%s4808_s7 + $0x838] sm:$0xff]  }
 0x110   : > { %v3965_v54 = vpop.f32.mrb[0].mxu1  ;;  %v3944_v55 = vpop.f32.mrb[1].mxu0 }
 0x111   : > { %v3945_v58 = vadd.f32 %v3944_v55, %v3943_v52  ;;  %v3966_v59 = vpop.f32.mrb[1].mxu1  ;;  %v3946_v60 = vpop.f32.mrb[2].mxu0  ;;  %4246 = vmatpush3.bf16.msra.mxu0 %v4613_v57  ;;  %v4650_v52 = vld [vmem:[%s4808_s7 + $0x830] sm:$0xff]   ;;  %v4653_v55 = vld [vmem:[%s4808_s7 + $0x8f8] sm:$0xff]  }
 0x112   : > { %v3967_v61 = vadd.f32 %v3966_v59, %v3965_v54  ;;  %v3968_v62 = vpop.f32.mrb[2].mxu1  ;;  %v3947_v63 = vpop.f32.mrb[3].mxu0  ;;  %4247 = vmatprep.subr.bf16.mxu0 %v4615_v1  ;;  %4268 = vmatpush3.bf16.msra.mxu1 %v4614_v3  ;;  %v4651_v54 = vld [vmem:[%s4808_s7 + $0x8b0] sm:$0xff]  }
 0x113   : > { %v3969_v0 = vpop.f32.mrb[3].mxu1  ;;  %4269 = vmatprep.subr.bf16.mxu1 %v4616_v4  ;;  %v3634_v57 = vld.sshfl [vmem:[%s5229_s0 + $0x20] sm:$0x33 pattern:$0x75316420] }
 0x114   : > { %v5124_v2 = vadd.f32 %v3967_v61, %v3945_v58  ;;  %v4655_v58 = vld [vmem:[%s4808_s7 + $0x8b8] sm:$0xff]   ;;  %v1008_v59 = vcombine.high %v3634_v57, %v3634_v57  ;;  %v1015_v60 = vrot.slane %v3634_v57, %v4803_v6 }
 0x115   : > { %4248 = vmatpush3.bf16.msra.mxu0 %v4617_v5 }
 0x116   : > { %4249 = vmatprep.subr.bf16.mxu0 %v4619_v7  ;;  %4270 = vmatpush3.bf16.msra.mxu1 %v4618_v8  ;;  %v1022_v61 = vrot.slane %v1008_v59, %v4803_v6  ;;  %v1023_v62 = vcombine.high %v1015_v60, %v1015_v60 }
 0x117   : > { %4271 = vmatprep.subr.bf16.mxu1 %v4620_v9 }
 0x118   : > { %v1024_v63 = vcombine.high %v1022_v61, %v1022_v61 }
 0x119   : > { %4250 = vmatpush3.bf16.msra.mxu0 %v4621_v10 }
 0x11a   : > { %4279 = vmatprep.subr.bf16.mxu0 %v4624_v12  ;;  %4272 = vmatpush3.bf16.msra.mxu1 %v4622_v13 }
 0x11b   : > { %4301 = vmatprep.subr.bf16.mxu1 %v4625_v14 }
 0x11c   : > { %3382 = vmatmul.mubr.bf16.vlgmr.msra.gmra.mrb[28].mxu0 %v982_v11 }
 0x11d   : > { %4280 = vmatpush3.bf16.msra.mxu0 %v4626_v15  ;;  %3422 = vmatmul.mubr.bf16.vlgmr.msra.gmra.mrb[28].mxu1 %v998_v16 }
 0x11e   : > { %4281 = vmatprep.subr.bf16.mxu0 %v4628_v17  ;;  %4302 = vmatpush3.bf16.msra.mxu1 %v4627_v18 }
 0x11f   : > { %4303 = vmatprep.subr.bf16.mxu1 %v4629_v19  ;;  %3461 = vmatprep.mubr.bf16.mxu0 %v1022_v61 }
 0x120   : > { %3501 = vmatprep.mubr.bf16.mxu1 %v1024_v63 }
 0x121   : > { %4282 = vmatpush3.bf16.msra.mxu0 %v4630_v20 }
 0x122   : > { %4283 = vmatprep.subr.bf16.mxu0 %v4632_v21  ;;  %4304 = vmatpush3.bf16.msra.mxu1 %v4631_v22 }
 0x123   : > { %4305 = vmatprep.subr.bf16.mxu1 %v4633_v23 }
 0x125   : > { %4284 = vmatpush3.bf16.msra.mxu0 %v4634_v24 }
 0x126   : > { %4285 = vmatprep.subr.bf16.mxu0 %v4636_v25  ;;  %4306 = vmatpush3.bf16.msra.mxu1 %v4635_v26 }
 0x127   : > { %4307 = vmatprep.subr.bf16.mxu1 %v4637_v27 }
 0x129   : > { %4286 = vmatpush3.bf16.msra.mxu0 %v4638_v28 }
 0x12a   : > { %4287 = vmatprep.subr.bf16.mxu0 %v4640_v29  ;;  %4308 = vmatpush3.bf16.msra.mxu1 %v4639_v30 }
 0x12b   : > { %4309 = vmatprep.subr.bf16.mxu1 %v4641_v31 }
 0x12d   : > { %4288 = vmatpush3.bf16.msra.mxu0 %v4642_v32 }
 0x12e   : > { %4289 = vmatprep.subr.bf16.mxu0 %v4644_v34  ;;  %4310 = vmatpush3.bf16.msra.mxu1 %v4643_v35 }
 0x12f   : > { %v3987_v33 = vpop.f32.mrb[4].mxu0  ;;  %4311 = vmatprep.subr.bf16.mxu1 %v4645_v38 }
 0x130   : > { %v4009_v36 = vpop.f32.mrb[4].mxu1  ;;  %v3988_v37 = vpop.f32.mrb[5].mxu0 }
 0x131   : > { %v3989_v39 = vadd.f32 %v3988_v37, %v3987_v33  ;;  %v4010_v40 = vpop.f32.mrb[5].mxu1  ;;  %v3990_v41 = vpop.f32.mrb[6].mxu0  ;;  %4290 = vmatpush3.bf16.msra.mxu0 %v4646_v44 }
 0x132   : > { %v4011_v42 = vadd.f32 %v4010_v40, %v4009_v36  ;;  %v4012_v43 = vpop.f32.mrb[6].mxu1  ;;  %v3991_v46 = vpop.f32.mrb[7].mxu0  ;;  %4291 = vmatprep.subr.bf16.mxu0 %v4648_v49  ;;  %4312 = vmatpush3.bf16.msra.mxu1 %v4647_v45 }
 0x133   : > { %v2904_v47 = vadd.f32 %v3989_v39, %v5124_v2  ;;  %v4013_v48 = vpop.f32.mrb[7].mxu1  ;;  %4313 = vmatprep.subr.bf16.mxu1 %v4649_v51 }
 0x135   : > { %v2944_v50 = vadd.f32 %v4011_v42, %v2904_v47  ;;  %4292 = vmatpush3.bf16.msra.mxu0 %v4650_v52 }
 0x136   : > { %4293 = vmatprep.subr.bf16.mxu0 %v4652_v53  ;;  %4314 = vmatpush3.bf16.msra.mxu1 %v4651_v54 }
 0x137   : > { %4315 = vmatprep.subr.bf16.mxu1 %v4653_v55 }
 0x139   : > { %4294 = vmatpush3.bf16.msra.mxu0 %v4654_v56 }
 0x13a   : > { %4316 = vmatpush3.bf16.msra.mxu1 %v4655_v58 }
 0x13c   : > { %3462 = vmatmul.mubr.bf16.vlgmr.msra.gmra.mrb[32].mxu0 %v1015_v60 }
 0x13d   : > { %3502 = vmatmul.mubr.bf16.vlgmr.msra.gmra.mrb[32].mxu1 %v1023_v62 }
 0x14f   : > { %v4031_v0 = vpop.f32.mrb[8].mxu0 }
 0x150   : > { %v4053_v1 = vpop.f32.mrb[8].mxu1  ;;  %v4032_v2 = vpop.f32.mrb[9].mxu0 }
 0x151   : > { %v4033_v3 = vadd.f32 %v4032_v2, %v4031_v0  ;;  %v4054_v4 = vpop.f32.mrb[9].mxu1  ;;  %v4034_v5 = vpop.f32.mrb[10].mxu0 }
 0x152   : > { %v4055_v7 = vadd.f32 %v4054_v4, %v4053_v1  ;;  %v4056_v8 = vpop.f32.mrb[10].mxu1  ;;  %v4035_v9 = vpop.f32.mrb[11].mxu0 }
 0x153   : > { %v2984_v10 = vadd.f32 %v4033_v3, %v2944_v50  ;;  %v4057_v11 = vpop.f32.mrb[11].mxu1 }
 0x155   : > { %v3024_v12 = vadd.f32 %v4055_v7, %v2984_v10 }
 0x16f   : > { %v4075_v6 = vpop.f32.mrb[12].mxu0 }
 0x170   : > { %v4097_v13 = vpop.f32.mrb[12].mxu1  ;;  %v4076_v14 = vpop.f32.mrb[13].mxu0 }
 0x171   : > { %v4077_v15 = vadd.f32 %v4076_v14, %v4075_v6  ;;  %v4098_v16 = vpop.f32.mrb[13].mxu1  ;;  %v4078_v17 = vpop.f32.mrb[14].mxu0 }
 0x172   : > { %v4099_v18 = vadd.f32 %v4098_v16, %v4097_v13  ;;  %v4100_v19 = vpop.f32.mrb[14].mxu1  ;;  %v4079_v20 = vpop.f32.mrb[15].mxu0 }
 0x173   : > { %v3064_v21 = vadd.f32 %v4077_v15, %v3024_v12  ;;  %v4101_v22 = vpop.f32.mrb[15].mxu1  ;;  %v3923_v19 = vld [vmem:[%s214_s28] ss:$0 sm:$0xff] }
 0x175   : > { %v3104_v23 = vadd.f32 %v4099_v18, %v3064_v21 }
 0x18f   : > { %v4119_v24 = vpop.f32.mrb[16].mxu0 }
 0x190   : > { %v4120_v25 = vpop.f32.mrb[17].mxu0  ;;  %v4141_v26 = vpop.f32.mrb[16].mxu1 }
 0x191   : > { %v4121_v27 = vadd.f32 %v4120_v25, %v4119_v24  ;;  %v4122_v28 = vpop.f32.mrb[18].mxu0  ;;  %v4142_v29 = vpop.f32.mrb[17].mxu1 }
 0x192   : > { %v4123_v30 = vpop.f32.mrb[19].mxu0  ;;  %v4143_v32 = vadd.f32 %v4142_v29, %v4141_v26  ;;  %v4144_v33 = vpop.f32.mrb[18].mxu1 }
 0x193   : > { %v3144_v31 = vadd.f32 %v4121_v27, %v3104_v23  ;;  %v4145_v34 = vpop.f32.mrb[19].mxu1 }
 0x195   : > { %v3184_v35 = vadd.f32 %v4143_v32, %v3144_v31 }
 0x1af   : > { %v4163_v36 = vpop.f32.mrb[20].mxu0 }
 0x1b0   : > { %v4164_v37 = vpop.f32.mrb[21].mxu0  ;;  %v4185_v38 = vpop.f32.mrb[20].mxu1 }
 0x1b1   : > { %v4165_v39 = vadd.f32 %v4164_v37, %v4163_v36  ;;  %v4166_v40 = vpop.f32.mrb[22].mxu0  ;;  %v4186_v41 = vpop.f32.mrb[21].mxu1 }
 0x1b2   : > { %v4167_v42 = vpop.f32.mrb[23].mxu0  ;;  %v4187_v44 = vadd.f32 %v4186_v41, %v4185_v38  ;;  %v4188_v45 = vpop.f32.mrb[22].mxu1 }
 0x1b3   : > { %v3224_v43 = vadd.f32 %v4165_v39, %v3184_v35  ;;  %v4189_v46 = vpop.f32.mrb[23].mxu1 }
 0x1b5   : > { %v3264_v47 = vadd.f32 %v4187_v44, %v3224_v43 }
 0x1cf   : > { %v4207_v48 = vpop.f32.mrb[24].mxu0 }
 0x1d0   : > { %v4208_v49 = vpop.f32.mrb[25].mxu0  ;;  %v4229_v50 = vpop.f32.mrb[24].mxu1 }
 0x1d1   : > { %v4209_v51 = vadd.f32 %v4208_v49, %v4207_v48  ;;  %v4210_v52 = vpop.f32.mrb[26].mxu0  ;;  %v4230_v53 = vpop.f32.mrb[25].mxu1 }
 0x1d2   : > { %v4211_v54 = vpop.f32.mrb[27].mxu0  ;;  %v4231_v56 = vadd.f32 %v4230_v53, %v4229_v50  ;;  %v4232_v57 = vpop.f32.mrb[26].mxu1 }
 0x1d3   : > { %v3304_v55 = vadd.f32 %v4209_v51, %v3264_v47  ;;  %v4233_v58 = vpop.f32.mrb[27].mxu1 }
 0x1d5   : > { %v3344_v59 = vadd.f32 %v4231_v56, %v3304_v55 }
 0x1ef   : > { %v4251_v60 = vpop.f32.mrb[28].mxu0 }
 0x1f0   : > { %v4252_v61 = vpop.f32.mrb[29].mxu0  ;;  %v4273_v62 = vpop.f32.mrb[28].mxu1 }
 0x1f1   : > { %v4253_v63 = vadd.f32 %v4252_v61, %v4251_v60  ;;  %v4254_v0 = vpop.f32.mrb[30].mxu0  ;;  %v4274_v1 = vpop.f32.mrb[29].mxu1 }
 0x1f2   : > { %v4255_v2 = vpop.f32.mrb[31].mxu0  ;;  %v4275_v4 = vadd.f32 %v4274_v1, %v4273_v62  ;;  %v4276_v5 = vpop.f32.mrb[30].mxu1 }
 0x1f3   : > { %v3384_v3 = vadd.f32 %v4253_v63, %v3344_v59  ;;  %v4277_v7 = vpop.f32.mrb[31].mxu1 }
 0x1f5   : > { %v3424_v8 = vadd.f32 %v4275_v4, %v3384_v3 }
 0x20f   : > { %v4295_v9 = vpop.f32.mrb[32].mxu0 }
 0x210   : > { %v4296_v10 = vpop.f32.mrb[33].mxu0  ;;  %v4317_v11 = vpop.f32.mrb[32].mxu1 }
 0x211   : > { %v4297_v12 = vadd.f32 %v4296_v10, %v4295_v9  ;;  %v4298_v6 = vpop.f32.mrb[34].mxu0  ;;  %v4318_v13 = vpop.f32.mrb[33].mxu1 }
 0x212   : > { %v4299_v14 = vpop.f32.mrb[35].mxu0  ;;  %v4319_v16 = vadd.f32 %v4318_v13, %v4317_v11  ;;  %v4320_v17 = vpop.f32.mrb[34].mxu1 }
 0x213   : > { %v3464_v15 = vadd.f32 %v4297_v12, %v3424_v8  ;;  %v4321_v18 = vpop.f32.mrb[35].mxu1 }
 0x215   : > { %v3504_v20 = vadd.f32 %v4319_v16, %v3464_v15 }
 0x217   : > { %v3521_v21 = vrot.slane %v3504_v20, 1  ;;  %v3516_v22 = vadd.f32 %v3923_v19, %v3504_v20 }
 0x219   : > { %v3523_v23 = vsub.f32 %v3504_v20, %v3521_v21  ;;  %v3517_v24 = vmax.f32 %v3516_v22, 0.0 }
 0x21b   : > { %v3524_v25 = vmul.f32 %v3523_v23, %v3523_v23  ;;  %v3518_v26 = vpack.c.bf16 %v3517_v24, %v3517_v24 }
 0x21d   : > { %3526 = vst [vmem:[%s217_s9] sm:$0x1] %v3524_v25  ;;  %3519 = vst [vmem:[%s201_s5] sm:$0x1] %v3518_v26 }
 0x21e   : > { %4669 = shalt.err (!%p4666_p3)
}
 0x21f   : > { %s4670_s22 = scalar_lea.hbm %s5187_s12, 16  ;;  %s4674_s29 = scalar_lea.hbm %s5232_s3, 64 }
 0x220   : > { %p4671_p4 = scmp.ne.s32.totalorder %s5187_s12, %s4670_s22  ;;  %p4675_p9 = scmp.lt.u32.totalorder %s5187_s12, %s5232_s3 }
 0x221   : > { %p4676_p10 = scmp.lt.u32.totalorder %s4674_s29, %s4670_s22  ;;  %p4678_p12 = scmp.lt.u32.totalorder %s4670_s22, %s5187_s12 }
 0x222   : > { %p4672_p7 = pnand %p4671_p4, %p4785_p5 }
 0x223   : > { %p4677_p11 = por %p4676_p10, %p4675_p9 }
 0x224   : > { %p4673_p8 = pneg %p4672_p7 }
 0x225   : > { %p4679_p13 = por %p4678_p12, %p4677_p11 }
 0x227   : > { %p4680_p0 = pnand %p4679_p13, %p4673_p8 }
 0x229   : > { %4683 = shalt.err (!%p4680_p0)
}
 0x22a   : > { %4324 = dma.vmem_to_hbm [thread:$0]  (%p4785_p5), %s5189_s6, 16, %s5187_s12, %s3528_s19  }
 0x22b PF: > { %p4330_p1 = scmp.ge.s32.totalorder %s4718_s18, 2  ;;  %s3558_s7 = sand.u32 1, %s4706_s15  }
 0x22c   : > { %s3559_s8 = scalar_lea.sflag [#allocation3], %s3558_s7 }
 0x22d   : > { %p4327_p2 = pnand %p4330_p1, %p4789_p6 }
 0x22f   : > { %4701 = dma.done.wait (!%p4327_p2), %s3559_s8, 16  }
 0x230   : > { %4703 = vsyncadd (!%p4327_p2), %s3559_s8, 4294967280  ;;  %p15_p3 = scmp.ge.s32.totalorder %s4772_s21, 6   ;;  %s5236_s15 = smov %s4710_s16 }
 0x231   : > { %s5237_s16 = smov %s4714_s17  ;;  %s5238_s17 = smov %s4783_s24 }
 0x232   : > { %s5239_s18 = smov %s4772_s21  ;;  %17 = sbr.rel (!%p15_p3) target bundleno = 3 (0x3), region = 82 }
 0x239   :  { %3569 = vsyncpa [#allocation3], 1 }
 0x23a   :  { %3571 = vsyncpa [#allocation3 + $0x1], 1 }

</bundles_post_ra>
